<compile_context>
chip_gen: v6e
topology: v6e:2x2x1
jax: 0.10.0
libtpu: 0.0.40
codegen_flags: <defaults>
</compile_context>

<pallas_src>
import functools
import math

import jax
import jax.numpy as jnp
from jax.experimental import pallas as pl
from jax.experimental.pallas import tpu as pltpu

LEAKY_SLOPE = 0.01  # nn.LeakyReLU default negative_slope
TM_MAX = 1024       # lane-tile of the spatial dimension (fits all VMEM budgets in bf16)


def _round_up(x, m):
    return (x + m - 1) // m * m


# ----------------------------------------------------------------------------
# Pallas kernel: fused (Cout, K) @ (K, TM) + bias (+ LeakyReLU), lane-dense out
# ----------------------------------------------------------------------------
def _gemm_bias_act_kernel(w_ref, x_ref, b_ref, o_ref, *, leaky):
    # w: (Cout_pad, K) bf16   x: (K, TM) bf16   b: (Cout_pad, 1) f32
    acc = jnp.dot(w_ref[...], x_ref[...], preferred_element_type=jnp.float32)
    acc = acc + b_ref[...]                       # lane-broadcast of bias
    if leaky:
        acc = jnp.where(acc > 0, acc, LEAKY_SLOPE * acc)
    o_ref[...] = acc


_GEMM_CACHE = {}


def gemm_bias_act(wm, patches_t, b, leaky):
    """out (Cout, M) = wm (Cout, K) @ patches_t (K, M) + b, optional LeakyReLU.

    M (spatial) is the lane dimension; it is tiled with a parallel grid axis.
    Weights and bias are small and stay VMEM-resident across the grid.
    """
    Cout, K = wm.shape
    _, M = patches_t.shape

    Cout_pad = _round_up(Cout, 8)                # sublane-clean MXU lhs / output
    TM = min(TM_MAX, _round_up(M, 128))          # lane-dense tile
    M_pad = _round_up(M, TM)

    if Cout_pad != Cout:
        wm = jnp.pad(wm, ((0, Cout_pad - Cout), (0, 0)))
        b = jnp.pad(b, ((0, Cout_pad - Cout),))
    if M_pad != M:
        patches_t = jnp.pad(patches_t, ((0, 0), (0, M_pad - M)))

    # bf16 MXU operands, f32 accumulation / bias / activation.
    wm_bf = wm.astype(jnp.bfloat16)
    x_bf = patches_t.astype(jnp.bfloat16)
    b2 = b.reshape(Cout_pad, 1).astype(jnp.float32)

    key = (Cout_pad, K, TM, M_pad, bool(leaky))
    fn = _GEMM_CACHE.get(key)
    if fn is None:
        fn = pl.pallas_call(
            functools.partial(_gemm_bias_act_kernel, leaky=bool(leaky)),
            out_shape=jax.ShapeDtypeStruct((Cout_pad, M_pad), jnp.float32),
            grid=(M_pad // TM,),
            in_specs=[
                pl.BlockSpec((Cout_pad, K), lambda m: (0, 0)),   # weights: resident
                pl.BlockSpec((K, TM), lambda m: (0, m)),         # patches: tiled over M
                pl.BlockSpec((Cout_pad, 1), lambda m: (0, 0)),   # bias: resident
            ],
            out_specs=pl.BlockSpec((Cout_pad, TM), lambda m: (0, m)),
            compiler_params=pltpu.CompilerParams(
                dimension_semantics=("parallel",),
                vmem_limit_bytes=32 * 1024 * 1024,
            ),
        )
        _GEMM_CACHE[key] = fn

    y = fn(wm_bf, x_bf, b2)
    return y[:Cout, :M]


# ----------------------------------------------------------------------------
# Conv helpers. Internal activation layout is CBHW = (C, B, H, W): the
# lane-dense GEMM output (Cout, B*Ho*Wo) reshapes directly into it, so there
# are no per-layer transposes. im2col slicing is XLA data-movement glue.
# ----------------------------------------------------------------------------
def conv2d_cbhw(x, w, b, stride=1, pad=0, leaky=False):
    # x: (Cin, B, H, W); w: PyTorch layout (Cout, Cin, KH, KW); b: (Cout,)
    Cout, Cin, KH, KW = w.shape
    _, B, H, Wsp = x.shape
    Ho = (H + 2 * pad - KH) // stride + 1
    Wo = (Wsp + 2 * pad - KW) // stride + 1
    if pad:
        x = jnp.pad(x, ((0, 0), (0, 0), (pad, pad), (pad, pad)))

    if KH == 1 and KW == 1 and stride == 1:
        patches_t = x.reshape(Cin, B * Ho * Wo)          # 1x1 conv: no im2col blowup
    else:
        taps = []
        for kh in range(KH):
            for kw in range(KW):
                taps.append(x[:, :, kh:kh + stride * Ho:stride,
                               kw:kw + stride * Wo:stride])
        # (Cin, KH*KW, B, Ho, Wo) -> (Cin*KH*KW, B*Ho*Wo); k-order matches
        # PyTorch's (Cout, Cin, KH, KW) weight flattening.
        patches_t = jnp.stack(taps, axis=1).reshape(Cin * KH * KW, B * Ho * Wo)

    wm = w.reshape(Cout, Cin * KH * KW)
    y = gemm_bias_act(wm, patches_t, b, leaky)
    return y.reshape(Cout, B, Ho, Wo)


def conv_transpose2d_cbhw(x, w, b, stride, pad, output_padding, leaky=False):
    # x: (Cin, B, H, W); w: PyTorch ConvTranspose2d layout (Cin, Cout, KH, KW)
    Cin, Cout, KH, KW = w.shape
    _, B, H, Wsp = x.shape
    xd = jnp.zeros((Cin, B, (H - 1) * stride + 1, (Wsp - 1) * stride + 1), x.dtype)
    xd = xd.at[:, :, ::stride, ::stride].set(x)          # zero-insertion dilation
    p_lo = KH - 1 - pad
    p_hi = KH - 1 - pad + output_padding
    xp = jnp.pad(xd, ((0, 0), (0, 0), (p_lo, p_hi), (p_lo, p_hi)))
    w_eq = jnp.transpose(jnp.flip(w, axis=(2, 3)), (1, 0, 2, 3))  # (Cout,Cin,KH,KW)
    return conv2d_cbhw(xp, w_eq, b, stride=1, pad=0, leaky=leaky)


def run_seq(spec, layer_params, x):
    for s, p in zip(spec, layer_params):
        if s['type'] == 'conv':
            x = conv2d_cbhw(x, p['w'], p['b'], stride=s['stride'], pad=s['pad'],
                            leaky=s['leaky'])
        else:  # 'convT'
            x = conv_transpose2d_cbhw(x, p['w'], p['b'], stride=s['stride'],
                                      pad=s['pad'], output_padding=s['op'],
                                      leaky=s['leaky'])
    return x


# ----------------------------------------------------------------------------
# Static layer specs (mirror the PyTorch Sequentials; LeakyReLU fused into the
# conv that precedes it). Kept OUTSIDE the params pytree so jit sees arrays only.
# ----------------------------------------------------------------------------
def C(cin, cout, k, pad=0, stride=1, leaky=False):
    return dict(type='conv', cin=cin, cout=cout, k=k, pad=pad,
                stride=stride, leaky=leaky)


def CT(cin, cout, k, stride, pad, op, leaky=False):
    return dict(type='convT', cin=cin, cout=cout, k=k, pad=pad,
                stride=stride, op=op, leaky=leaky)


DOWN_FEATURE = [C(1, 20, 5, pad=2), C(20, 20, 1, leaky=True),
                C(20, 20, 3, pad=1), C(20, 40, 1, leaky=True),
                C(40, 20, 3, pad=1)]
UP_FEATURE = [C(50, 40, 3, pad=1), C(40, 30, 1, leaky=True),
              C(30, 20, 3, pad=1), C(20, 20, 1, leaky=True),
              C(20, 20, 3, pad=1), C(20, 1, 1)]
CONV_X = [C(2, 20, 5, pad=2), C(20, 20, 1, leaky=True),
          C(20, 80, 3, stride=2, pad=1), C(80, 40, 1, leaky=True),
          C(40, 40, 3, pad=1, leaky=True),
          CT(40, 10, 3, stride=2, pad=1, op=1)]
H_H = [C(50, 30, 3, pad=1), C(30, 20, 1, leaky=True), C(20, 20, 3, pad=1)]
RES_BRANCH = [C(50, 50, 3, pad=1, leaky=True), C(50, 50, 1, leaky=True),
              C(50, 50, 3, pad=1)]


class KeyGen:
    def __init__(self, seed=0):
        self._base = jax.random.PRNGKey(seed)
        self._n = 0

    def __call__(self):
        self._n += 1
        return jax.random.fold_in(self._base, self._n)


def make_seq_params(kg, spec):
    layers = []
    for s in spec:
        fan_in = s['cin'] * s['k'] * s['k']
        scale = 1.0 / math.sqrt(fan_in)
        if s['type'] == 'conv':
            w_shape = (s['cout'], s['cin'], s['k'], s['k'])
        else:  # ConvTranspose2d weight layout
            w_shape = (s['cin'], s['cout'], s['k'], s['k'])
        w = jax.random.normal(kg(), w_shape, jnp.float32) * scale
        b = jax.random.normal(kg(), (s['cout'],), jnp.float32) * 0.01
        layers.append(dict(w=w, b=b))                     # arrays only (jit-friendly)
    return layers


def make_forward_rnn_params(seed=0):
    kg = KeyGen(seed)
    return dict(
        extract_feature1=make_seq_params(kg, DOWN_FEATURE),
        up_feature1=make_seq_params(kg, UP_FEATURE),
        conv_x=make_seq_params(kg, CONV_X),
        h_h=make_seq_params(kg, H_H),
        res_part1=dict(conv1=make_seq_params(kg, RES_BRANCH),
                       conv2=make_seq_params(kg, RES_BRANCH),
                       conv3=make_seq_params(kg, RES_BRANCH)),
        res_part2=dict(conv1=make_seq_params(kg, RES_BRANCH),
                       conv2=make_seq_params(kg, RES_BRANCH),
                       conv3=make_seq_params(kg, RES_BRANCH)),
    )


def res_part_apply(p, x):
    x = run_seq(RES_BRANCH, p['conv1'], x) + x
    x = run_seq(RES_BRANCH, p['conv2'], x) + x
    x = run_seq(RES_BRANCH, p['conv3'], x) + x
    return x


# ----------------------------------------------------------------------------
# forward_rnn.forward  (whole pass jitted; python loop unrolls over cs_rate)
# ----------------------------------------------------------------------------
@functools.partial(jax.jit, static_argnames=("block_size", "cs_rate"))
def forward_rnn(params, xt1, meas, mask, h, meas_re, block_size, cs_rate):
    # xt1: (B,1,H,W)  meas: (B,H,W)  mask: (cs_rate,H,W)
    # h:   (B,20,H,W) meas_re: (B,1,H,W)
    B, Hsz, Wsz = meas.shape

    # internal layout: (C, B, H, W)
    ht = jnp.transpose(h, (1, 0, 2, 3))                   # (20,B,H,W)
    xt = jnp.transpose(xt1, (1, 0, 2, 3))                 # (1,B,H,W)
    meas_re_cb = jnp.transpose(meas_re, (1, 0, 2, 3))     # (1,B,H,W)
    meas_re_sq = meas_re[:, 0]                            # (B,H,W)  (B==1 safe)

    # suffix sums of the mask: suffix[j] = sum_{ii>=j} mask[ii]; extra zero row
    # so suffix[cs_rate] == 0 (used at the last timestep).
    suffix = jnp.flip(jnp.cumsum(jnp.flip(mask, axis=0), axis=0), axis=0)
    suffix = jnp.concatenate([suffix, jnp.zeros((1, Hsz, Wsz), mask.dtype)], axis=0)

    frames = [xt1[:, 0]]                                  # list of (B,H,W)
    d1 = jnp.zeros((B, Hsz, Wsz), jnp.float32)

    for i in range(cs_rate - 1):
        # incremental O(1) updates (reference recomputes these sums every step)
        d1 = d1 + mask[i] * frames[i]
        d2 = suffix[i + 2] * meas_re_sq

        xin = jnp.concatenate([meas_re_cb, (meas - d1 - d2)[None]], axis=0)   # (2,B,H,W)
        x1 = run_seq(CONV_X, params['conv_x'], xin)                           # (10,B,H,W)
        x2 = run_seq(DOWN_FEATURE, params['extract_feature1'], xt)            # (20,B,H,W)
        hcat = jnp.concatenate([ht, x1, x2], axis=0)                          # (50,B,H,W)
        hcat = res_part_apply(params['res_part1'], hcat)
        hcat = res_part_apply(params['res_part2'], hcat)
        ht = run_seq(H_H, params['h_h'], hcat)                                # (20,B,H,W)
        xt = run_seq(UP_FEATURE, params['up_feature1'], hcat)                 # (1,B,H,W)
        frames.append(xt[0])

    out = jnp.stack(frames, axis=1)                       # (B,cs_rate,H,W)
    ht_out = jnp.transpose(ht, (1, 0, 2, 3))              # (B,20,H,W)
    return out, ht_out


# ----------------------------------------------------------------------------
if __name__ == "__main__":
    B, BLOCK, CS = 2, 16, 3

    params = make_forward_rnn_params(seed=0)

    key = jax.random.PRNGKey(0)
    k1, k2, k3, k4, k5 = jax.random.split(key, 5)
    xt1 = jax.random.normal(k1, (B, 1, BLOCK, BLOCK), jnp.float32)
    meas = jax.random.normal(k2, (B, BLOCK, BLOCK), jnp.float32)
    mask = (jax.random.uniform(k3, (CS, BLOCK, BLOCK)) > 0.5).astype(jnp.float32)
    h0 = jax.random.normal(k4, (B, 20, BLOCK, BLOCK), jnp.float32)
    meas_re = jax.random.normal(k5, (B, 1, BLOCK, BLOCK), jnp.float32)

    out, ht = forward_rnn(params, xt1, meas, mask, h0, meas_re,
                          block_size=BLOCK, cs_rate=CS)
    out = jax.block_until_ready(out)
    ht = jax.block_until_ready(ht)

    assert out.shape == (B, CS, BLOCK, BLOCK), out.shape
    assert ht.shape == (B, 20, BLOCK, BLOCK), ht.shape
    assert bool(jnp.all(jnp.isfinite(out))) and bool(jnp.all(jnp.isfinite(ht)))
    print("KERNEL_OK")
</pallas_src>

<mosaic_0001>
module attributes {stable_mosaic.version = 11 : i64} {
  func.func @_gemm_bias_act_kernel(%arg0: i32, %arg1: memref<24x50xbf16, #tpu.memory_space<vmem>>, %arg2: memref<50x512xbf16, #tpu.memory_space<vmem>>, %arg3: memref<24x1xf32, #tpu.memory_space<vmem>>, %arg4: memref<24x512xf32, #tpu.memory_space<vmem>>) attributes {dimension_semantics = [#tpu.dimension_semantics<parallel>], iteration_bounds = array<i64: 1>, scalar_prefetch = 0 : i64, scratch_operands = 0 : i64, tpu.core_type = #tpu.core_type<tc>, window_params = [{pipeline_mode = #tpu.pipeline_mode<synchronous>, transform_indices = @transform_0, window_bounds = array<i64: 24, 50>}, {transform_indices = @transform_1, window_bounds = array<i64: 50, 512>}, {pipeline_mode = #tpu.pipeline_mode<synchronous>, transform_indices = @transform_2, window_bounds = array<i64: 24, 1>}, {transform_indices = @transform_3, window_bounds = array<i64: 24, 512>}]} {
    %c0 = arith.constant 0 : index
    %c0_0 = arith.constant 0 : index
    %0 = vector.load %arg1[%c0, %c0_0] : memref<24x50xbf16, #tpu.memory_space<vmem>>, vector<24x50xbf16>
    %c0_1 = arith.constant 0 : index
    %c0_2 = arith.constant 0 : index
    %1 = vector.load %arg2[%c0_1, %c0_2] : memref<50x512xbf16, #tpu.memory_space<vmem>>, vector<50x512xbf16>
    %cst = arith.constant dense<0.000000e+00> : vector<24x512xf32>
    %2 = tpu.matmul %0, %1, %cst {dimension_numbers = #tpu.dot_dimension_numbers<[1], [0], [0], [1], [0, 0, 1, 1], [], []>} : vector<24x50xbf16>, vector<50x512xbf16>, vector<24x512xf32> -> vector<24x512xf32>
    %c0_3 = arith.constant 0 : index
    %c0_4 = arith.constant 0 : index
    %3 = vector.load %arg3[%c0_3, %c0_4] : memref<24x1xf32, #tpu.memory_space<vmem>>, vector<24x1xf32>
    %4 = vector.broadcast %3 : vector<24x1xf32> to vector<24x512xf32>
    %5 = arith.addf %2, %4 : vector<24x512xf32>
    %c0_5 = arith.constant 0 : index
    %c0_6 = arith.constant 0 : index
    %6 = vector.load %arg4[%c0_5, %c0_6] : memref<24x512xf32, #tpu.memory_space<vmem>>, vector<24x512xf32>
    tpu.vector_store %arg4[%c0_5, %c0_6], %5 {strides = array<i32>} : memref<24x512xf32, #tpu.memory_space<vmem>>, vector<24x512xf32>,
    return
  }
  func.func @transform_0(%arg0: i32) -> (i32, i32) {
    %c0_i32 = arith.constant 0 : i32
    %c0_i32_0 = arith.constant 0 : i32
    %c0_i32_1 = arith.constant 0 : i32
    return %c0_i32, %c0_i32_0 : i32, i32
  }
  func.func @transform_1(%arg0: i32) -> (i32, i32) {
    %c0_i32 = arith.constant 0 : i32
    %c0_i32_0 = arith.constant 0 : i32
    return %c0_i32, %arg0 : i32, i32
  }
  func.func @transform_2(%arg0: i32) -> (i32, i32) {
    %c0_i32 = arith.constant 0 : i32
    %c0_i32_0 = arith.constant 0 : i32
    %c0_i32_1 = arith.constant 0 : i32
    return %c0_i32, %c0_i32_0 : i32, i32
  }
  func.func @transform_3(%arg0: i32) -> (i32, i32) {
    %c0_i32 = arith.constant 0 : i32
    %c0_i32_0 = arith.constant 0 : i32
    return %c0_i32, %arg0 : i32, i32
  }
}

module attributes {stable_mosaic.version = 11 : i64} {
  func.func @_gemm_bias_act_kernel(%arg0: i32, %arg1: memref<24x20xbf16, #tpu.memory_space<vmem>>, %arg2: memref<20x512xbf16, #tpu.memory_space<vmem>>, %arg3: memref<24x1xf32, #tpu.memory_space<vmem>>, %arg4: memref<24x512xf32, #tpu.memory_space<vmem>>) attributes {dimension_semantics = [#tpu.dimension_semantics<parallel>], iteration_bounds = array<i64: 1>, scalar_prefetch = 0 : i64, scratch_operands = 0 : i64, tpu.core_type = #tpu.core_type<tc>, window_params = [{pipeline_mode = #tpu.pipeline_mode<synchronous>, transform_indices = @transform_0, window_bounds = array<i64: 24, 20>}, {transform_indices = @transform_1, window_bounds = array<i64: 20, 512>}, {pipeline_mode = #tpu.pipeline_mode<synchronous>, transform_indices = @transform_2, window_bounds = array<i64: 24, 1>}, {transform_indices = @transform_3, window_bounds = array<i64: 24, 512>}]} {
    %c0 = arith.constant 0 : index
    %c0_0 = arith.constant 0 : index
    %0 = vector.load %arg1[%c0, %c0_0] : memref<24x20xbf16, #tpu.memory_space<vmem>>, vector<24x20xbf16>
    %c0_1 = arith.constant 0 : index
    %c0_2 = arith.constant 0 : index
    %1 = vector.load %arg2[%c0_1, %c0_2] : memref<20x512xbf16, #tpu.memory_space<vmem>>, vector<20x512xbf16>
    %cst = arith.constant dense<0.000000e+00> : vector<24x512xf32>
    %2 = tpu.matmul %0, %1, %cst {dimension_numbers = #tpu.dot_dimension_numbers<[1], [0], [0], [1], [0, 0, 1, 1], [], []>} : vector<24x20xbf16>, vector<20x512xbf16>, vector<24x512xf32> -> vector<24x512xf32>
    %c0_3 = arith.constant 0 : index
    %c0_4 = arith.constant 0 : index
    %3 = vector.load %arg3[%c0_3, %c0_4] : memref<24x1xf32, #tpu.memory_space<vmem>>, vector<24x1xf32>
    %4 = vector.broadcast %3 : vector<24x1xf32> to vector<24x512xf32>
    %5 = arith.addf %2, %4 : vector<24x512xf32>
    %cst_5 = arith.constant 0.000000e+00 : f32
    %6 = vector.broadcast %cst_5 : f32 to vector<24x512xf32>
    %7 = arith.cmpf ogt, %5, %6 : vector<24x512xf32>
    %cst_6 = arith.constant 0.00999999977 : f32
    %8 = vector.broadcast %cst_6 : f32 to vector<24x512xf32>
    %9 = arith.mulf %8, %5 : vector<24x512xf32>
    %10 = arith.select %7, %5, %9 : vector<24x512xi1>, vector<24x512xf32>
    %c0_7 = arith.constant 0 : index
    %c0_8 = arith.constant 0 : index
    %11 = vector.load %arg4[%c0_7, %c0_8] : memref<24x512xf32, #tpu.memory_space<vmem>>, vector<24x512xf32>
    tpu.vector_store %arg4[%c0_7, %c0_8], %10 {strides = array<i32>} : memref<24x512xf32, #tpu.memory_space<vmem>>, vector<24x512xf32>,
    return
  }
  func.func @transform_0(%arg0: i32) -> (i32, i32) {
    %c0_i32 = arith.constant 0 : i32
    %c0_i32_0 = arith.constant 0 : i32
    %c0_i32_1 = arith.constant 0 : i32
    return %c0_i32, %c0_i32_0 : i32, i32
  }
  func.func @transform_1(%arg0: i32) -> (i32, i32) {
    %c0_i32 = arith.constant 0 : i32
    %c0_i32_0 = arith.constant 0 : i32
    return %c0_i32, %arg0 : i32, i32
  }
  func.func @transform_2(%arg0: i32) -> (i32, i32) {
    %c0_i32 = arith.constant 0 : i32
    %c0_i32_0 = arith.constant 0 : i32
    %c0_i32_1 = arith.constant 0 : i32
    return %c0_i32, %c0_i32_0 : i32, i32
  }
  func.func @transform_3(%arg0: i32) -> (i32, i32) {
    %c0_i32 = arith.constant 0 : i32
    %c0_i32_0 = arith.constant 0 : i32
    return %c0_i32, %arg0 : i32, i32
  }
}

module attributes {stable_mosaic.version = 11 : i64} {
  func.func @_gemm_bias_act_kernel(%arg0: i32, %arg1: memref<80x180xbf16, #tpu.memory_space<vmem>>, %arg2: memref<180x128xbf16, #tpu.memory_space<vmem>>, %arg3: memref<80x1xf32, #tpu.memory_space<vmem>>, %arg4: memref<80x128xf32, #tpu.memory_space<vmem>>) attributes {dimension_semantics = [#tpu.dimension_semantics<parallel>], iteration_bounds = array<i64: 1>, scalar_prefetch = 0 : i64, scratch_operands = 0 : i64, tpu.core_type = #tpu.core_type<tc>, window_params = [{pipeline_mode = #tpu.pipeline_mode<synchronous>, transform_indices = @transform_0, window_bounds = array<i64: 80, 180>}, {transform_indices = @transform_1, window_bounds = array<i64: 180, 128>}, {pipeline_mode = #tpu.pipeline_mode<synchronous>, transform_indices = @transform_2, window_bounds = array<i64: 80, 1>}, {transform_indices = @transform_3, window_bounds = array<i64: 80, 128>}]} {
    %c0 = arith.constant 0 : index
    %c0_0 = arith.constant 0 : index
    %0 = vector.load %arg1[%c0, %c0_0] : memref<80x180xbf16, #tpu.memory_space<vmem>>, vector<80x180xbf16>
    %c0_1 = arith.constant 0 : index
    %c0_2 = arith.constant 0 : index
    %1 = vector.load %arg2[%c0_1, %c0_2] : memref<180x128xbf16, #tpu.memory_space<vmem>>, vector<180x128xbf16>
    %cst = arith.constant dense<0.000000e+00> : vector<80x128xf32>
    %2 = tpu.matmul %0, %1, %cst {dimension_numbers = #tpu.dot_dimension_numbers<[1], [0], [0], [1], [0, 0, 1, 1], [], []>} : vector<80x180xbf16>, vector<180x128xbf16>, vector<80x128xf32> -> vector<80x128xf32>
    %c0_3 = arith.constant 0 : index
    %c0_4 = arith.constant 0 : index
    %3 = vector.load %arg3[%c0_3, %c0_4] : memref<80x1xf32, #tpu.memory_space<vmem>>, vector<80x1xf32>
    %4 = vector.broadcast %3 : vector<80x1xf32> to vector<80x128xf32>
    %5 = arith.addf %2, %4 : vector<80x128xf32>
    %c0_5 = arith.constant 0 : index
    %c0_6 = arith.constant 0 : index
    %6 = vector.load %arg4[%c0_5, %c0_6] : memref<80x128xf32, #tpu.memory_space<vmem>>, vector<80x128xf32>
    tpu.vector_store %arg4[%c0_5, %c0_6], %5 {strides = array<i32>} : memref<80x128xf32, #tpu.memory_space<vmem>>, vector<80x128xf32>,
    return
  }
  func.func @transform_0(%arg0: i32) -> (i32, i32) {
    %c0_i32 = arith.constant 0 : i32
    %c0_i32_0 = arith.constant 0 : i32
    %c0_i32_1 = arith.constant 0 : i32
    return %c0_i32, %c0_i32_0 : i32, i32
  }
  func.func @transform_1(%arg0: i32) -> (i32, i32) {
    %c0_i32 = arith.constant 0 : i32
    %c0_i32_0 = arith.constant 0 : i32
    return %c0_i32, %arg0 : i32, i32
  }
  func.func @transform_2(%arg0: i32) -> (i32, i32) {
    %c0_i32 = arith.constant 0 : i32
    %c0_i32_0 = arith.constant 0 : i32
    %c0_i32_1 = arith.constant 0 : i32
    return %c0_i32, %c0_i32_0 : i32, i32
  }
  func.func @transform_3(%arg0: i32) -> (i32, i32) {
    %c0_i32 = arith.constant 0 : i32
    %c0_i32_0 = arith.constant 0 : i32
    return %c0_i32, %arg0 : i32, i32
  }
}

module attributes {stable_mosaic.version = 11 : i64} {
  func.func @_gemm_bias_act_kernel(%arg0: i32, %arg1: memref<40x80xbf16, #tpu.memory_space<vmem>>, %arg2: memref<80x128xbf16, #tpu.memory_space<vmem>>, %arg3: memref<40x1xf32, #tpu.memory_space<vmem>>, %arg4: memref<40x128xf32, #tpu.memory_space<vmem>>) attributes {dimension_semantics = [#tpu.dimension_semantics<parallel>], iteration_bounds = array<i64: 1>, scalar_prefetch = 0 : i64, scratch_operands = 0 : i64, tpu.core_type = #tpu.core_type<tc>, window_params = [{pipeline_mode = #tpu.pipeline_mode<synchronous>, transform_indices = @transform_0, window_bounds = array<i64: 40, 80>}, {transform_indices = @transform_1, window_bounds = array<i64: 80, 128>}, {pipeline_mode = #tpu.pipeline_mode<synchronous>, transform_indices = @transform_2, window_bounds = array<i64: 40, 1>}, {transform_indices = @transform_3, window_bounds = array<i64: 40, 128>}]} {
    %c0 = arith.constant 0 : index
    %c0_0 = arith.constant 0 : index
    %0 = vector.load %arg1[%c0, %c0_0] : memref<40x80xbf16, #tpu.memory_space<vmem>>, vector<40x80xbf16>
    %c0_1 = arith.constant 0 : index
    %c0_2 = arith.constant 0 : index
    %1 = vector.load %arg2[%c0_1, %c0_2] : memref<80x128xbf16, #tpu.memory_space<vmem>>, vector<80x128xbf16>
    %cst = arith.constant dense<0.000000e+00> : vector<40x128xf32>
    %2 = tpu.matmul %0, %1, %cst {dimension_numbers = #tpu.dot_dimension_numbers<[1], [0], [0], [1], [0, 0, 1, 1], [], []>} : vector<40x80xbf16>, vector<80x128xbf16>, vector<40x128xf32> -> vector<40x128xf32>
    %c0_3 = arith.constant 0 : index
    %c0_4 = arith.constant 0 : index
    %3 = vector.load %arg3[%c0_3, %c0_4] : memref<40x1xf32, #tpu.memory_space<vmem>>, vector<40x1xf32>
    %4 = vector.broadcast %3 : vector<40x1xf32> to vector<40x128xf32>
    %5 = arith.addf %2, %4 : vector<40x128xf32>
    %cst_5 = arith.constant 0.000000e+00 : f32
    %6 = vector.broadcast %cst_5 : f32 to vector<40x128xf32>
    %7 = arith.cmpf ogt, %5, %6 : vector<40x128xf32>
    %cst_6 = arith.constant 0.00999999977 : f32
    %8 = vector.broadcast %cst_6 : f32 to vector<40x128xf32>
    %9 = arith.mulf %8, %5 : vector<40x128xf32>
    %10 = arith.select %7, %5, %9 : vector<40x128xi1>, vector<40x128xf32>
    %c0_7 = arith.constant 0 : index
    %c0_8 = arith.constant 0 : index
    %11 = vector.load %arg4[%c0_7, %c0_8] : memref<40x128xf32, #tpu.memory_space<vmem>>, vector<40x128xf32>
    tpu.vector_store %arg4[%c0_7, %c0_8], %10 {strides = array<i32>} : memref<40x128xf32, #tpu.memory_space<vmem>>, vector<40x128xf32>,
    return
  }
  func.func @transform_0(%arg0: i32) -> (i32, i32) {
    %c0_i32 = arith.constant 0 : i32
    %c0_i32_0 = arith.constant 0 : i32
    %c0_i32_1 = arith.constant 0 : i32
    return %c0_i32, %c0_i32_0 : i32, i32
  }
  func.func @transform_1(%arg0: i32) -> (i32, i32) {
    %c0_i32 = arith.constant 0 : i32
    %c0_i32_0 = arith.constant 0 : i32
    return %c0_i32, %arg0 : i32, i32
  }
  func.func @transform_2(%arg0: i32) -> (i32, i32) {
    %c0_i32 = arith.constant 0 : i32
    %c0_i32_0 = arith.constant 0 : i32
    %c0_i32_1 = arith.constant 0 : i32
    return %c0_i32, %c0_i32_0 : i32, i32
  }
  func.func @transform_3(%arg0: i32) -> (i32, i32) {
    %c0_i32 = arith.constant 0 : i32
    %c0_i32_0 = arith.constant 0 : i32
    return %c0_i32, %arg0 : i32, i32
  }
}

module attributes {stable_mosaic.version = 11 : i64} {
  func.func @_gemm_bias_act_kernel(%arg0: i32, %arg1: memref<40x360xbf16, #tpu.memory_space<vmem>>, %arg2: memref<360x128xbf16, #tpu.memory_space<vmem>>, %arg3: memref<40x1xf32, #tpu.memory_space<vmem>>, %arg4: memref<40x128xf32, #tpu.memory_space<vmem>>) attributes {dimension_semantics = [#tpu.dimension_semantics<parallel>], iteration_bounds = array<i64: 1>, scalar_prefetch = 0 : i64, scratch_operands = 0 : i64, tpu.core_type = #tpu.core_type<tc>, window_params = [{pipeline_mode = #tpu.pipeline_mode<synchronous>, transform_indices = @transform_0, window_bounds = array<i64: 40, 360>}, {transform_indices = @transform_1, window_bounds = array<i64: 360, 128>}, {pipeline_mode = #tpu.pipeline_mode<synchronous>, transform_indices = @transform_2, window_bounds = array<i64: 40, 1>}, {transform_indices = @transform_3, window_bounds = array<i64: 40, 128>}]} {
    %c0 = arith.constant 0 : index
    %c0_0 = arith.constant 0 : index
    %0 = vector.load %arg1[%c0, %c0_0] : memref<40x360xbf16, #tpu.memory_space<vmem>>, vector<40x360xbf16>
    %c0_1 = arith.constant 0 : index
    %c0_2 = arith.constant 0 : index
    %1 = vector.load %arg2[%c0_1, %c0_2] : memref<360x128xbf16, #tpu.memory_space<vmem>>, vector<360x128xbf16>
    %cst = arith.constant dense<0.000000e+00> : vector<40x128xf32>
    %2 = tpu.matmul %0, %1, %cst {dimension_numbers = #tpu.dot_dimension_numbers<[1], [0], [0], [1], [0, 0, 1, 1], [], []>} : vector<40x360xbf16>, vector<360x128xbf16>, vector<40x128xf32> -> vector<40x128xf32>
    %c0_3 = arith.constant 0 : index
    %c0_4 = arith.constant 0 : index
    %3 = vector.load %arg3[%c0_3, %c0_4] : memref<40x1xf32, #tpu.memory_space<vmem>>, vector<40x1xf32>
    %4 = vector.broadcast %3 : vector<40x1xf32> to vector<40x128xf32>
    %5 = arith.addf %2, %4 : vector<40x128xf32>
    %cst_5 = arith.constant 0.000000e+00 : f32
    %6 = vector.broadcast %cst_5 : f32 to vector<40x128xf32>
    %7 = arith.cmpf ogt, %5, %6 : vector<40x128xf32>
    %cst_6 = arith.constant 0.00999999977 : f32
    %8 = vector.broadcast %cst_6 : f32 to vector<40x128xf32>
    %9 = arith.mulf %8, %5 : vector<40x128xf32>
    %10 = arith.select %7, %5, %9 : vector<40x128xi1>, vector<40x128xf32>
    %c0_7 = arith.constant 0 : index
    %c0_8 = arith.constant 0 : index
    %11 = vector.load %arg4[%c0_7, %c0_8] : memref<40x128xf32, #tpu.memory_space<vmem>>, vector<40x128xf32>
    tpu.vector_store %arg4[%c0_7, %c0_8], %10 {strides = array<i32>} : memref<40x128xf32, #tpu.memory_space<vmem>>, vector<40x128xf32>,
    return
  }
  func.func @transform_0(%arg0: i32) -> (i32, i32) {
    %c0_i32 = arith.constant 0 : i32
    %c0_i32_0 = arith.constant 0 : i32
    %c0_i32_1 = arith.constant 0 : i32
    return %c0_i32, %c0_i32_0 : i32, i32
  }
  func.func @transform_1(%arg0: i32) -> (i32, i32) {
    %c0_i32 = arith.constant 0 : i32
    %c0_i32_0 = arith.constant 0 : i32
    return %c0_i32, %arg0 : i32, i32
  }
  func.func @transform_2(%arg0: i32) -> (i32, i32) {
    %c0_i32 = arith.constant 0 : i32
    %c0_i32_0 = arith.constant 0 : i32
    %c0_i32_1 = arith.constant 0 : i32
    return %c0_i32, %c0_i32_0 : i32, i32
  }
  func.func @transform_3(%arg0: i32) -> (i32, i32) {
    %c0_i32 = arith.constant 0 : i32
    %c0_i32_0 = arith.constant 0 : i32
    return %c0_i32, %arg0 : i32, i32
  }
}

module attributes {stable_mosaic.version = 11 : i64} {
  func.func @_gemm_bias_act_kernel(%arg0: i32, %arg1: memref<16x360xbf16, #tpu.memory_space<vmem>>, %arg2: memref<360x512xbf16, #tpu.memory_space<vmem>>, %arg3: memref<16x1xf32, #tpu.memory_space<vmem>>, %arg4: memref<16x512xf32, #tpu.memory_space<vmem>>) attributes {dimension_semantics = [#tpu.dimension_semantics<parallel>], iteration_bounds = array<i64: 1>, scalar_prefetch = 0 : i64, scratch_operands = 0 : i64, tpu.core_type = #tpu.core_type<tc>, window_params = [{pipeline_mode = #tpu.pipeline_mode<synchronous>, transform_indices = @transform_0, window_bounds = array<i64: 16, 360>}, {transform_indices = @transform_1, window_bounds = array<i64: 360, 512>}, {pipeline_mode = #tpu.pipeline_mode<synchronous>, transform_indices = @transform_2, window_bounds = array<i64: 16, 1>}, {transform_indices = @transform_3, window_bounds = array<i64: 16, 512>}]} {
    %c0 = arith.constant 0 : index
    %c0_0 = arith.constant 0 : index
    %0 = vector.load %arg1[%c0, %c0_0] : memref<16x360xbf16, #tpu.memory_space<vmem>>, vector<16x360xbf16>
    %c0_1 = arith.constant 0 : index
    %c0_2 = arith.constant 0 : index
    %1 = vector.load %arg2[%c0_1, %c0_2] : memref<360x512xbf16, #tpu.memory_space<vmem>>, vector<360x512xbf16>
    %cst = arith.constant dense<0.000000e+00> : vector<16x512xf32>
    %2 = tpu.matmul %0, %1, %cst {dimension_numbers = #tpu.dot_dimension_numbers<[1], [0], [0], [1], [0, 0, 1, 1], [], []>} : vector<16x360xbf16>, vector<360x512xbf16>, vector<16x512xf32> -> vector<16x512xf32>
    %c0_3 = arith.constant 0 : index
    %c0_4 = arith.constant 0 : index
    %3 = vector.load %arg3[%c0_3, %c0_4] : memref<16x1xf32, #tpu.memory_space<vmem>>, vector<16x1xf32>
    %4 = vector.broadcast %3 : vector<16x1xf32> to vector<16x512xf32>
    %5 = arith.addf %2, %4 : vector<16x512xf32>
    %c0_5 = arith.constant 0 : index
    %c0_6 = arith.constant 0 : index
    %6 = vector.load %arg4[%c0_5, %c0_6] : memref<16x512xf32, #tpu.memory_space<vmem>>, vector<16x512xf32>
    tpu.vector_store %arg4[%c0_5, %c0_6], %5 {strides = array<i32>} : memref<16x512xf32, #tpu.memory_space<vmem>>, vector<16x512xf32>,
    return
  }
  func.func @transform_0(%arg0: i32) -> (i32, i32) {
    %c0_i32 = arith.constant 0 : i32
    %c0_i32_0 = arith.constant 0 : i32
    %c0_i32_1 = arith.constant 0 : i32
    return %c0_i32, %c0_i32_0 : i32, i32
  }
  func.func @transform_1(%arg0: i32) -> (i32, i32) {
    %c0_i32 = arith.constant 0 : i32
    %c0_i32_0 = arith.constant 0 : i32
    return %c0_i32, %arg0 : i32, i32
  }
  func.func @transform_2(%arg0: i32) -> (i32, i32) {
    %c0_i32 = arith.constant 0 : i32
    %c0_i32_0 = arith.constant 0 : i32
    %c0_i32_1 = arith.constant 0 : i32
    return %c0_i32, %c0_i32_0 : i32, i32
  }
  func.func @transform_3(%arg0: i32) -> (i32, i32) {
    %c0_i32 = arith.constant 0 : i32
    %c0_i32_0 = arith.constant 0 : i32
    return %c0_i32, %arg0 : i32, i32
  }
}

module attributes {stable_mosaic.version = 11 : i64} {
  func.func @_gemm_bias_act_kernel(%arg0: i32, %arg1: memref<24x25xbf16, #tpu.memory_space<vmem>>, %arg2: memref<25x512xbf16, #tpu.memory_space<vmem>>, %arg3: memref<24x1xf32, #tpu.memory_space<vmem>>, %arg4: memref<24x512xf32, #tpu.memory_space<vmem>>) attributes {dimension_semantics = [#tpu.dimension_semantics<parallel>], iteration_bounds = array<i64: 1>, scalar_prefetch = 0 : i64, scratch_operands = 0 : i64, tpu.core_type = #tpu.core_type<tc>, window_params = [{pipeline_mode = #tpu.pipeline_mode<synchronous>, transform_indices = @transform_0, window_bounds = array<i64: 24, 25>}, {transform_indices = @transform_1, window_bounds = array<i64: 25, 512>}, {pipeline_mode = #tpu.pipeline_mode<synchronous>, transform_indices = @transform_2, window_bounds = array<i64: 24, 1>}, {transform_indices = @transform_3, window_bounds = array<i64: 24, 512>}]} {
    %c0 = arith.constant 0 : index
    %c0_0 = arith.constant 0 : index
    %0 = vector.load %arg1[%c0, %c0_0] : memref<24x25xbf16, #tpu.memory_space<vmem>>, vector<24x25xbf16>
    %c0_1 = arith.constant 0 : index
    %c0_2 = arith.constant 0 : index
    %1 = vector.load %arg2[%c0_1, %c0_2] : memref<25x512xbf16, #tpu.memory_space<vmem>>, vector<25x512xbf16>
    %cst = arith.constant dense<0.000000e+00> : vector<24x512xf32>
    %2 = tpu.matmul %0, %1, %cst {dimension_numbers = #tpu.dot_dimension_numbers<[1], [0], [0], [1], [0, 0, 1, 1], [], []>} : vector<24x25xbf16>, vector<25x512xbf16>, vector<24x512xf32> -> vector<24x512xf32>
    %c0_3 = arith.constant 0 : index
    %c0_4 = arith.constant 0 : index
    %3 = vector.load %arg3[%c0_3, %c0_4] : memref<24x1xf32, #tpu.memory_space<vmem>>, vector<24x1xf32>
    %4 = vector.broadcast %3 : vector<24x1xf32> to vector<24x512xf32>
    %5 = arith.addf %2, %4 : vector<24x512xf32>
    %c0_5 = arith.constant 0 : index
    %c0_6 = arith.constant 0 : index
    %6 = vector.load %arg4[%c0_5, %c0_6] : memref<24x512xf32, #tpu.memory_space<vmem>>, vector<24x512xf32>
    tpu.vector_store %arg4[%c0_5, %c0_6], %5 {strides = array<i32>} : memref<24x512xf32, #tpu.memory_space<vmem>>, vector<24x512xf32>,
    return
  }
  func.func @transform_0(%arg0: i32) -> (i32, i32) {
    %c0_i32 = arith.constant 0 : i32
    %c0_i32_0 = arith.constant 0 : i32
    %c0_i32_1 = arith.constant 0 : i32
    return %c0_i32, %c0_i32_0 : i32, i32
  }
  func.func @transform_1(%arg0: i32) -> (i32, i32) {
    %c0_i32 = arith.constant 0 : i32
    %c0_i32_0 = arith.constant 0 : i32
    return %c0_i32, %arg0 : i32, i32
  }
  func.func @transform_2(%arg0: i32) -> (i32, i32) {
    %c0_i32 = arith.constant 0 : i32
    %c0_i32_0 = arith.constant 0 : i32
    %c0_i32_1 = arith.constant 0 : i32
    return %c0_i32, %c0_i32_0 : i32, i32
  }
  func.func @transform_3(%arg0: i32) -> (i32, i32) {
    %c0_i32 = arith.constant 0 : i32
    %c0_i32_0 = arith.constant 0 : i32
    return %c0_i32, %arg0 : i32, i32
  }
}

module attributes {stable_mosaic.version = 11 : i64} {
  func.func @_gemm_bias_act_kernel(%arg0: i32, %arg1: memref<24x180xbf16, #tpu.memory_space<vmem>>, %arg2: memref<180x512xbf16, #tpu.memory_space<vmem>>, %arg3: memref<24x1xf32, #tpu.memory_space<vmem>>, %arg4: memref<24x512xf32, #tpu.memory_space<vmem>>) attributes {dimension_semantics = [#tpu.dimension_semantics<parallel>], iteration_bounds = array<i64: 1>, scalar_prefetch = 0 : i64, scratch_operands = 0 : i64, tpu.core_type = #tpu.core_type<tc>, window_params = [{pipeline_mode = #tpu.pipeline_mode<synchronous>, transform_indices = @transform_0, window_bounds = array<i64: 24, 180>}, {transform_indices = @transform_1, window_bounds = array<i64: 180, 512>}, {pipeline_mode = #tpu.pipeline_mode<synchronous>, transform_indices = @transform_2, window_bounds = array<i64: 24, 1>}, {transform_indices = @transform_3, window_bounds = array<i64: 24, 512>}]} {
    %c0 = arith.constant 0 : index
    %c0_0 = arith.constant 0 : index
    %0 = vector.load %arg1[%c0, %c0_0] : memref<24x180xbf16, #tpu.memory_space<vmem>>, vector<24x180xbf16>
    %c0_1 = arith.constant 0 : index
    %c0_2 = arith.constant 0 : index
    %1 = vector.load %arg2[%c0_1, %c0_2] : memref<180x512xbf16, #tpu.memory_space<vmem>>, vector<180x512xbf16>
    %cst = arith.constant dense<0.000000e+00> : vector<24x512xf32>
    %2 = tpu.matmul %0, %1, %cst {dimension_numbers = #tpu.dot_dimension_numbers<[1], [0], [0], [1], [0, 0, 1, 1], [], []>} : vector<24x180xbf16>, vector<180x512xbf16>, vector<24x512xf32> -> vector<24x512xf32>
    %c0_3 = arith.constant 0 : index
    %c0_4 = arith.constant 0 : index
    %3 = vector.load %arg3[%c0_3, %c0_4] : memref<24x1xf32, #tpu.memory_space<vmem>>, vector<24x1xf32>
    %4 = vector.broadcast %3 : vector<24x1xf32> to vector<24x512xf32>
    %5 = arith.addf %2, %4 : vector<24x512xf32>
    %c0_5 = arith.constant 0 : index
    %c0_6 = arith.constant 0 : index
    %6 = vector.load %arg4[%c0_5, %c0_6] : memref<24x512xf32, #tpu.memory_space<vmem>>, vector<24x512xf32>
    tpu.vector_store %arg4[%c0_5, %c0_6], %5 {strides = array<i32>} : memref<24x512xf32, #tpu.memory_space<vmem>>, vector<24x512xf32>,
    return
  }
  func.func @transform_0(%arg0: i32) -> (i32, i32) {
    %c0_i32 = arith.constant 0 : i32
    %c0_i32_0 = arith.constant 0 : i32
    %c0_i32_1 = arith.constant 0 : i32
    return %c0_i32, %c0_i32_0 : i32, i32
  }
  func.func @transform_1(%arg0: i32) -> (i32, i32) {
    %c0_i32 = arith.constant 0 : i32
    %c0_i32_0 = arith.constant 0 : i32
    return %c0_i32, %arg0 : i32, i32
  }
  func.func @transform_2(%arg0: i32) -> (i32, i32) {
    %c0_i32 = arith.constant 0 : i32
    %c0_i32_0 = arith.constant 0 : i32
    %c0_i32_1 = arith.constant 0 : i32
    return %c0_i32, %c0_i32_0 : i32, i32
  }
  func.func @transform_3(%arg0: i32) -> (i32, i32) {
    %c0_i32 = arith.constant 0 : i32
    %c0_i32_0 = arith.constant 0 : i32
    return %c0_i32, %arg0 : i32, i32
  }
}

module attributes {stable_mosaic.version = 11 : i64} {
  func.func @_gemm_bias_act_kernel(%arg0: i32, %arg1: memref<40x20xbf16, #tpu.memory_space<vmem>>, %arg2: memref<20x512xbf16, #tpu.memory_space<vmem>>, %arg3: memref<40x1xf32, #tpu.memory_space<vmem>>, %arg4: memref<40x512xf32, #tpu.memory_space<vmem>>) attributes {dimension_semantics = [#tpu.dimension_semantics<parallel>], iteration_bounds = array<i64: 1>, scalar_prefetch = 0 : i64, scratch_operands = 0 : i64, tpu.core_type = #tpu.core_type<tc>, window_params = [{pipeline_mode = #tpu.pipeline_mode<synchronous>, transform_indices = @transform_0, window_bounds = array<i64: 40, 20>}, {transform_indices = @transform_1, window_bounds = array<i64: 20, 512>}, {pipeline_mode = #tpu.pipeline_mode<synchronous>, transform_indices = @transform_2, window_bounds = array<i64: 40, 1>}, {transform_indices = @transform_3, window_bounds = array<i64: 40, 512>}]} {
    %c0 = arith.constant 0 : index
    %c0_0 = arith.constant 0 : index
    %0 = vector.load %arg1[%c0, %c0_0] : memref<40x20xbf16, #tpu.memory_space<vmem>>, vector<40x20xbf16>
    %c0_1 = arith.constant 0 : index
    %c0_2 = arith.constant 0 : index
    %1 = vector.load %arg2[%c0_1, %c0_2] : memref<20x512xbf16, #tpu.memory_space<vmem>>, vector<20x512xbf16>
    %cst = arith.constant dense<0.000000e+00> : vector<40x512xf32>
    %2 = tpu.matmul %0, %1, %cst {dimension_numbers = #tpu.dot_dimension_numbers<[1], [0], [0], [1], [0, 0, 1, 1], [], []>} : vector<40x20xbf16>, vector<20x512xbf16>, vector<40x512xf32> -> vector<40x512xf32>
    %c0_3 = arith.constant 0 : index
    %c0_4 = arith.constant 0 : index
    %3 = vector.load %arg3[%c0_3, %c0_4] : memref<40x1xf32, #tpu.memory_space<vmem>>, vector<40x1xf32>
    %4 = vector.broadcast %3 : vector<40x1xf32> to vector<40x512xf32>
    %5 = arith.addf %2, %4 : vector<40x512xf32>
    %cst_5 = arith.constant 0.000000e+00 : f32
    %6 = vector.broadcast %cst_5 : f32 to vector<40x512xf32>
    %7 = arith.cmpf ogt, %5, %6 : vector<40x512xf32>
    %cst_6 = arith.constant 0.00999999977 : f32
    %8 = vector.broadcast %cst_6 : f32 to vector<40x512xf32>
    %9 = arith.mulf %8, %5 : vector<40x512xf32>
    %10 = arith.select %7, %5, %9 : vector<40x512xi1>, vector<40x512xf32>
    %c0_7 = arith.constant 0 : index
    %c0_8 = arith.constant 0 : index
    %11 = vector.load %arg4[%c0_7, %c0_8] : memref<40x512xf32, #tpu.memory_space<vmem>>, vector<40x512xf32>
    tpu.vector_store %arg4[%c0_7, %c0_8], %10 {strides = array<i32>} : memref<40x512xf32, #tpu.memory_space<vmem>>, vector<40x512xf32>,
    return
  }
  func.func @transform_0(%arg0: i32) -> (i32, i32) {
    %c0_i32 = arith.constant 0 : i32
    %c0_i32_0 = arith.constant 0 : i32
    %c0_i32_1 = arith.constant 0 : i32
    return %c0_i32, %c0_i32_0 : i32, i32
  }
  func.func @transform_1(%arg0: i32) -> (i32, i32) {
    %c0_i32 = arith.constant 0 : i32
    %c0_i32_0 = arith.constant 0 : i32
    return %c0_i32, %arg0 : i32, i32
  }
  func.func @transform_2(%arg0: i32) -> (i32, i32) {
    %c0_i32 = arith.constant 0 : i32
    %c0_i32_0 = arith.constant 0 : i32
    %c0_i32_1 = arith.constant 0 : i32
    return %c0_i32, %c0_i32_0 : i32, i32
  }
  func.func @transform_3(%arg0: i32) -> (i32, i32) {
    %c0_i32 = arith.constant 0 : i32
    %c0_i32_0 = arith.constant 0 : i32
    return %c0_i32, %arg0 : i32, i32
  }
}

module attributes {stable_mosaic.version = 11 : i64} {
  func.func @_gemm_bias_act_kernel(%arg0: i32, %arg1: memref<24x360xbf16, #tpu.memory_space<vmem>>, %arg2: memref<360x512xbf16, #tpu.memory_space<vmem>>, %arg3: memref<24x1xf32, #tpu.memory_space<vmem>>, %arg4: memref<24x512xf32, #tpu.memory_space<vmem>>) attributes {dimension_semantics = [#tpu.dimension_semantics<parallel>], iteration_bounds = array<i64: 1>, scalar_prefetch = 0 : i64, scratch_operands = 0 : i64, tpu.core_type = #tpu.core_type<tc>, window_params = [{pipeline_mode = #tpu.pipeline_mode<synchronous>, transform_indices = @transform_0, window_bounds = array<i64: 24, 360>}, {transform_indices = @transform_1, window_bounds = array<i64: 360, 512>}, {pipeline_mode = #tpu.pipeline_mode<synchronous>, transform_indices = @transform_2, window_bounds = array<i64: 24, 1>}, {transform_indices = @transform_3, window_bounds = array<i64: 24, 512>}]} {
    %c0 = arith.constant 0 : index
    %c0_0 = arith.constant 0 : index
    %0 = vector.load %arg1[%c0, %c0_0] : memref<24x360xbf16, #tpu.memory_space<vmem>>, vector<24x360xbf16>
    %c0_1 = arith.constant 0 : index
    %c0_2 = arith.constant 0 : index
    %1 = vector.load %arg2[%c0_1, %c0_2] : memref<360x512xbf16, #tpu.memory_space<vmem>>, vector<360x512xbf16>
    %cst = arith.constant dense<0.000000e+00> : vector<24x512xf32>
    %2 = tpu.matmul %0, %1, %cst {dimension_numbers = #tpu.dot_dimension_numbers<[1], [0], [0], [1], [0, 0, 1, 1], [], []>} : vector<24x360xbf16>, vector<360x512xbf16>, vector<24x512xf32> -> vector<24x512xf32>
    %c0_3 = arith.constant 0 : index
    %c0_4 = arith.constant 0 : index
    %3 = vector.load %arg3[%c0_3, %c0_4] : memref<24x1xf32, #tpu.memory_space<vmem>>, vector<24x1xf32>
    %4 = vector.broadcast %3 : vector<24x1xf32> to vector<24x512xf32>
    %5 = arith.addf %2, %4 : vector<24x512xf32>
    %c0_5 = arith.constant 0 : index
    %c0_6 = arith.constant 0 : index
    %6 = vector.load %arg4[%c0_5, %c0_6] : memref<24x512xf32, #tpu.memory_space<vmem>>, vector<24x512xf32>
    tpu.vector_store %arg4[%c0_5, %c0_6], %5 {strides = array<i32>} : memref<24x512xf32, #tpu.memory_space<vmem>>, vector<24x512xf32>,
    return
  }
  func.func @transform_0(%arg0: i32) -> (i32, i32) {
    %c0_i32 = arith.constant 0 : i32
    %c0_i32_0 = arith.constant 0 : i32
    %c0_i32_1 = arith.constant 0 : i32
    return %c0_i32, %c0_i32_0 : i32, i32
  }
  func.func @transform_1(%arg0: i32) -> (i32, i32) {
    %c0_i32 = arith.constant 0 : i32
    %c0_i32_0 = arith.constant 0 : i32
    return %c0_i32, %arg0 : i32, i32
  }
  func.func @transform_2(%arg0: i32) -> (i32, i32) {
    %c0_i32 = arith.constant 0 : i32
    %c0_i32_0 = arith.constant 0 : i32
    %c0_i32_1 = arith.constant 0 : i32
    return %c0_i32, %c0_i32_0 : i32, i32
  }
  func.func @transform_3(%arg0: i32) -> (i32, i32) {
    %c0_i32 = arith.constant 0 : i32
    %c0_i32_0 = arith.constant 0 : i32
    return %c0_i32, %arg0 : i32, i32
  }
}

module attributes {stable_mosaic.version = 11 : i64} {
  func.func @_gemm_bias_act_kernel(%arg0: i32, %arg1: memref<56x450xbf16, #tpu.memory_space<vmem>>, %arg2: memref<450x512xbf16, #tpu.memory_space<vmem>>, %arg3: memref<56x1xf32, #tpu.memory_space<vmem>>, %arg4: memref<56x512xf32, #tpu.memory_space<vmem>>) attributes {dimension_semantics = [#tpu.dimension_semantics<parallel>], iteration_bounds = array<i64: 1>, scalar_prefetch = 0 : i64, scratch_operands = 0 : i64, tpu.core_type = #tpu.core_type<tc>, window_params = [{pipeline_mode = #tpu.pipeline_mode<synchronous>, transform_indices = @transform_0, window_bounds = array<i64: 56, 450>}, {transform_indices = @transform_1, window_bounds = array<i64: 450, 512>}, {pipeline_mode = #tpu.pipeline_mode<synchronous>, transform_indices = @transform_2, window_bounds = array<i64: 56, 1>}, {transform_indices = @transform_3, window_bounds = array<i64: 56, 512>}]} {
    %c0 = arith.constant 0 : index
    %c0_0 = arith.constant 0 : index
    %0 = vector.load %arg1[%c0, %c0_0] : memref<56x450xbf16, #tpu.memory_space<vmem>>, vector<56x450xbf16>
    %c0_1 = arith.constant 0 : index
    %c0_2 = arith.constant 0 : index
    %1 = vector.load %arg2[%c0_1, %c0_2] : memref<450x512xbf16, #tpu.memory_space<vmem>>, vector<450x512xbf16>
    %cst = arith.constant dense<0.000000e+00> : vector<56x512xf32>
    %2 = tpu.matmul %0, %1, %cst {dimension_numbers = #tpu.dot_dimension_numbers<[1], [0], [0], [1], [0, 0, 1, 1], [], []>} : vector<56x450xbf16>, vector<450x512xbf16>, vector<56x512xf32> -> vector<56x512xf32>
    %c0_3 = arith.constant 0 : index
    %c0_4 = arith.constant 0 : index
    %3 = vector.load %arg3[%c0_3, %c0_4] : memref<56x1xf32, #tpu.memory_space<vmem>>, vector<56x1xf32>
    %4 = vector.broadcast %3 : vector<56x1xf32> to vector<56x512xf32>
    %5 = arith.addf %2, %4 : vector<56x512xf32>
    %cst_5 = arith.constant 0.000000e+00 : f32
    %6 = vector.broadcast %cst_5 : f32 to vector<56x512xf32>
    %7 = arith.cmpf ogt, %5, %6 : vector<56x512xf32>
    %cst_6 = arith.constant 0.00999999977 : f32
    %8 = vector.broadcast %cst_6 : f32 to vector<56x512xf32>
    %9 = arith.mulf %8, %5 : vector<56x512xf32>
    %10 = arith.select %7, %5, %9 : vector<56x512xi1>, vector<56x512xf32>
    %c0_7 = arith.constant 0 : index
    %c0_8 = arith.constant 0 : index
    %11 = vector.load %arg4[%c0_7, %c0_8] : memref<56x512xf32, #tpu.memory_space<vmem>>, vector<56x512xf32>
    tpu.vector_store %arg4[%c0_7, %c0_8], %10 {strides = array<i32>} : memref<56x512xf32, #tpu.memory_space<vmem>>, vector<56x512xf32>,
    return
  }
  func.func @transform_0(%arg0: i32) -> (i32, i32) {
    %c0_i32 = arith.constant 0 : i32
    %c0_i32_0 = arith.constant 0 : i32
    %c0_i32_1 = arith.constant 0 : i32
    return %c0_i32, %c0_i32_0 : i32, i32
  }
  func.func @transform_1(%arg0: i32) -> (i32, i32) {
    %c0_i32 = arith.constant 0 : i32
    %c0_i32_0 = arith.constant 0 : i32
    return %c0_i32, %arg0 : i32, i32
  }
  func.func @transform_2(%arg0: i32) -> (i32, i32) {
    %c0_i32 = arith.constant 0 : i32
    %c0_i32_0 = arith.constant 0 : i32
    %c0_i32_1 = arith.constant 0 : i32
    return %c0_i32, %c0_i32_0 : i32, i32
  }
  func.func @transform_3(%arg0: i32) -> (i32, i32) {
    %c0_i32 = arith.constant 0 : i32
    %c0_i32_0 = arith.constant 0 : i32
    return %c0_i32, %arg0 : i32, i32
  }
}

module attributes {stable_mosaic.version = 11 : i64} {
  func.func @_gemm_bias_act_kernel(%arg0: i32, %arg1: memref<56x50xbf16, #tpu.memory_space<vmem>>, %arg2: memref<50x512xbf16, #tpu.memory_space<vmem>>, %arg3: memref<56x1xf32, #tpu.memory_space<vmem>>, %arg4: memref<56x512xf32, #tpu.memory_space<vmem>>) attributes {dimension_semantics = [#tpu.dimension_semantics<parallel>], iteration_bounds = array<i64: 1>, scalar_prefetch = 0 : i64, scratch_operands = 0 : i64, tpu.core_type = #tpu.core_type<tc>, window_params = [{pipeline_mode = #tpu.pipeline_mode<synchronous>, transform_indices = @transform_0, window_bounds = array<i64: 56, 50>}, {transform_indices = @transform_1, window_bounds = array<i64: 50, 512>}, {pipeline_mode = #tpu.pipeline_mode<synchronous>, transform_indices = @transform_2, window_bounds = array<i64: 56, 1>}, {transform_indices = @transform_3, window_bounds = array<i64: 56, 512>}]} {
    %c0 = arith.constant 0 : index
    %c0_0 = arith.constant 0 : index
    %0 = vector.load %arg1[%c0, %c0_0] : memref<56x50xbf16, #tpu.memory_space<vmem>>, vector<56x50xbf16>
    %c0_1 = arith.constant 0 : index
    %c0_2 = arith.constant 0 : index
    %1 = vector.load %arg2[%c0_1, %c0_2] : memref<50x512xbf16, #tpu.memory_space<vmem>>, vector<50x512xbf16>
    %cst = arith.constant dense<0.000000e+00> : vector<56x512xf32>
    %2 = tpu.matmul %0, %1, %cst {dimension_numbers = #tpu.dot_dimension_numbers<[1], [0], [0], [1], [0, 0, 1, 1], [], []>} : vector<56x50xbf16>, vector<50x512xbf16>, vector<56x512xf32> -> vector<56x512xf32>
    %c0_3 = arith.constant 0 : index
    %c0_4 = arith.constant 0 : index
    %3 = vector.load %arg3[%c0_3, %c0_4] : memref<56x1xf32, #tpu.memory_space<vmem>>, vector<56x1xf32>
    %4 = vector.broadcast %3 : vector<56x1xf32> to vector<56x512xf32>
    %5 = arith.addf %2, %4 : vector<56x512xf32>
    %cst_5 = arith.constant 0.000000e+00 : f32
    %6 = vector.broadcast %cst_5 : f32 to vector<56x512xf32>
    %7 = arith.cmpf ogt, %5, %6 : vector<56x512xf32>
    %cst_6 = arith.constant 0.00999999977 : f32
    %8 = vector.broadcast %cst_6 : f32 to vector<56x512xf32>
    %9 = arith.mulf %8, %5 : vector<56x512xf32>
    %10 = arith.select %7, %5, %9 : vector<56x512xi1>, vector<56x512xf32>
    %c0_7 = arith.constant 0 : index
    %c0_8 = arith.constant 0 : index
    %11 = vector.load %arg4[%c0_7, %c0_8] : memref<56x512xf32, #tpu.memory_space<vmem>>, vector<56x512xf32>
    tpu.vector_store %arg4[%c0_7, %c0_8], %10 {strides = array<i32>} : memref<56x512xf32, #tpu.memory_space<vmem>>, vector<56x512xf32>,
    return
  }
  func.func @transform_0(%arg0: i32) -> (i32, i32) {
    %c0_i32 = arith.constant 0 : i32
    %c0_i32_0 = arith.constant 0 : i32
    %c0_i32_1 = arith.constant 0 : i32
    return %c0_i32, %c0_i32_0 : i32, i32
  }
  func.func @transform_1(%arg0: i32) -> (i32, i32) {
    %c0_i32 = arith.constant 0 : i32
    %c0_i32_0 = arith.constant 0 : i32
    return %c0_i32, %arg0 : i32, i32
  }
  func.func @transform_2(%arg0: i32) -> (i32, i32) {
    %c0_i32 = arith.constant 0 : i32
    %c0_i32_0 = arith.constant 0 : i32
    %c0_i32_1 = arith.constant 0 : i32
    return %c0_i32, %c0_i32_0 : i32, i32
  }
  func.func @transform_3(%arg0: i32) -> (i32, i32) {
    %c0_i32 = arith.constant 0 : i32
    %c0_i32_0 = arith.constant 0 : i32
    return %c0_i32, %arg0 : i32, i32
  }
}

module attributes {stable_mosaic.version = 11 : i64} {
  func.func @_gemm_bias_act_kernel(%arg0: i32, %arg1: memref<56x450xbf16, #tpu.memory_space<vmem>>, %arg2: memref<450x512xbf16, #tpu.memory_space<vmem>>, %arg3: memref<56x1xf32, #tpu.memory_space<vmem>>, %arg4: memref<56x512xf32, #tpu.memory_space<vmem>>) attributes {dimension_semantics = [#tpu.dimension_semantics<parallel>], iteration_bounds = array<i64: 1>, scalar_prefetch = 0 : i64, scratch_operands = 0 : i64, tpu.core_type = #tpu.core_type<tc>, window_params = [{pipeline_mode = #tpu.pipeline_mode<synchronous>, transform_indices = @transform_0, window_bounds = array<i64: 56, 450>}, {transform_indices = @transform_1, window_bounds = array<i64: 450, 512>}, {pipeline_mode = #tpu.pipeline_mode<synchronous>, transform_indices = @transform_2, window_bounds = array<i64: 56, 1>}, {transform_indices = @transform_3, window_bounds = array<i64: 56, 512>}]} {
    %c0 = arith.constant 0 : index
    %c0_0 = arith.constant 0 : index
    %0 = vector.load %arg1[%c0, %c0_0] : memref<56x450xbf16, #tpu.memory_space<vmem>>, vector<56x450xbf16>
    %c0_1 = arith.constant 0 : index
    %c0_2 = arith.constant 0 : index
    %1 = vector.load %arg2[%c0_1, %c0_2] : memref<450x512xbf16, #tpu.memory_space<vmem>>, vector<450x512xbf16>
    %cst = arith.constant dense<0.000000e+00> : vector<56x512xf32>
    %2 = tpu.matmul %0, %1, %cst {dimension_numbers = #tpu.dot_dimension_numbers<[1], [0], [0], [1], [0, 0, 1, 1], [], []>} : vector<56x450xbf16>, vector<450x512xbf16>, vector<56x512xf32> -> vector<56x512xf32>
    %c0_3 = arith.constant 0 : index
    %c0_4 = arith.constant 0 : index
    %3 = vector.load %arg3[%c0_3, %c0_4] : memref<56x1xf32, #tpu.memory_space<vmem>>, vector<56x1xf32>
    %4 = vector.broadcast %3 : vector<56x1xf32> to vector<56x512xf32>
    %5 = arith.addf %2, %4 : vector<56x512xf32>
    %c0_5 = arith.constant 0 : index
    %c0_6 = arith.constant 0 : index
    %6 = vector.load %arg4[%c0_5, %c0_6] : memref<56x512xf32, #tpu.memory_space<vmem>>, vector<56x512xf32>
    tpu.vector_store %arg4[%c0_5, %c0_6], %5 {strides = array<i32>} : memref<56x512xf32, #tpu.memory_space<vmem>>, vector<56x512xf32>,
    return
  }
  func.func @transform_0(%arg0: i32) -> (i32, i32) {
    %c0_i32 = arith.constant 0 : i32
    %c0_i32_0 = arith.constant 0 : i32
    %c0_i32_1 = arith.constant 0 : i32
    return %c0_i32, %c0_i32_0 : i32, i32
  }
  func.func @transform_1(%arg0: i32) -> (i32, i32) {
    %c0_i32 = arith.constant 0 : i32
    %c0_i32_0 = arith.constant 0 : i32
    return %c0_i32, %arg0 : i32, i32
  }
  func.func @transform_2(%arg0: i32) -> (i32, i32) {
    %c0_i32 = arith.constant 0 : i32
    %c0_i32_0 = arith.constant 0 : i32
    %c0_i32_1 = arith.constant 0 : i32
    return %c0_i32, %c0_i32_0 : i32, i32
  }
  func.func @transform_3(%arg0: i32) -> (i32, i32) {
    %c0_i32 = arith.constant 0 : i32
    %c0_i32_0 = arith.constant 0 : i32
    return %c0_i32, %arg0 : i32, i32
  }
}

module attributes {stable_mosaic.version = 11 : i64} {
  func.func @_gemm_bias_act_kernel(%arg0: i32, %arg1: memref<32x450xbf16, #tpu.memory_space<vmem>>, %arg2: memref<450x512xbf16, #tpu.memory_space<vmem>>, %arg3: memref<32x1xf32, #tpu.memory_space<vmem>>, %arg4: memref<32x512xf32, #tpu.memory_space<vmem>>) attributes {dimension_semantics = [#tpu.dimension_semantics<parallel>], iteration_bounds = array<i64: 1>, scalar_prefetch = 0 : i64, scratch_operands = 0 : i64, tpu.core_type = #tpu.core_type<tc>, window_params = [{pipeline_mode = #tpu.pipeline_mode<synchronous>, transform_indices = @transform_0, window_bounds = array<i64: 32, 450>}, {transform_indices = @transform_1, window_bounds = array<i64: 450, 512>}, {pipeline_mode = #tpu.pipeline_mode<synchronous>, transform_indices = @transform_2, window_bounds = array<i64: 32, 1>}, {transform_indices = @transform_3, window_bounds = array<i64: 32, 512>}]} {
    %c0 = arith.constant 0 : index
    %c0_0 = arith.constant 0 : index
    %0 = vector.load %arg1[%c0, %c0_0] : memref<32x450xbf16, #tpu.memory_space<vmem>>, vector<32x450xbf16>
    %c0_1 = arith.constant 0 : index
    %c0_2 = arith.constant 0 : index
    %1 = vector.load %arg2[%c0_1, %c0_2] : memref<450x512xbf16, #tpu.memory_space<vmem>>, vector<450x512xbf16>
    %cst = arith.constant dense<0.000000e+00> : vector<32x512xf32>
    %2 = tpu.matmul %0, %1, %cst {dimension_numbers = #tpu.dot_dimension_numbers<[1], [0], [0], [1], [0, 0, 1, 1], [], []>} : vector<32x450xbf16>, vector<450x512xbf16>, vector<32x512xf32> -> vector<32x512xf32>
    %c0_3 = arith.constant 0 : index
    %c0_4 = arith.constant 0 : index
    %3 = vector.load %arg3[%c0_3, %c0_4] : memref<32x1xf32, #tpu.memory_space<vmem>>, vector<32x1xf32>
    %4 = vector.broadcast %3 : vector<32x1xf32> to vector<32x512xf32>
    %5 = arith.addf %2, %4 : vector<32x512xf32>
    %c0_5 = arith.constant 0 : index
    %c0_6 = arith.constant 0 : index
    %6 = vector.load %arg4[%c0_5, %c0_6] : memref<32x512xf32, #tpu.memory_space<vmem>>, vector<32x512xf32>
    tpu.vector_store %arg4[%c0_5, %c0_6], %5 {strides = array<i32>} : memref<32x512xf32, #tpu.memory_space<vmem>>, vector<32x512xf32>,
    return
  }
  func.func @transform_0(%arg0: i32) -> (i32, i32) {
    %c0_i32 = arith.constant 0 : i32
    %c0_i32_0 = arith.constant 0 : i32
    %c0_i32_1 = arith.constant 0 : i32
    return %c0_i32, %c0_i32_0 : i32, i32
  }
  func.func @transform_1(%arg0: i32) -> (i32, i32) {
    %c0_i32 = arith.constant 0 : i32
    %c0_i32_0 = arith.constant 0 : i32
    return %c0_i32, %arg0 : i32, i32
  }
  func.func @transform_2(%arg0: i32) -> (i32, i32) {
    %c0_i32 = arith.constant 0 : i32
    %c0_i32_0 = arith.constant 0 : i32
    %c0_i32_1 = arith.constant 0 : i32
    return %c0_i32, %c0_i32_0 : i32, i32
  }
  func.func @transform_3(%arg0: i32) -> (i32, i32) {
    %c0_i32 = arith.constant 0 : i32
    %c0_i32_0 = arith.constant 0 : i32
    return %c0_i32, %arg0 : i32, i32
  }
}

module attributes {stable_mosaic.version = 11 : i64} {
  func.func @_gemm_bias_act_kernel(%arg0: i32, %arg1: memref<24x30xbf16, #tpu.memory_space<vmem>>, %arg2: memref<30x512xbf16, #tpu.memory_space<vmem>>, %arg3: memref<24x1xf32, #tpu.memory_space<vmem>>, %arg4: memref<24x512xf32, #tpu.memory_space<vmem>>) attributes {dimension_semantics = [#tpu.dimension_semantics<parallel>], iteration_bounds = array<i64: 1>, scalar_prefetch = 0 : i64, scratch_operands = 0 : i64, tpu.core_type = #tpu.core_type<tc>, window_params = [{pipeline_mode = #tpu.pipeline_mode<synchronous>, transform_indices = @transform_0, window_bounds = array<i64: 24, 30>}, {transform_indices = @transform_1, window_bounds = array<i64: 30, 512>}, {pipeline_mode = #tpu.pipeline_mode<synchronous>, transform_indices = @transform_2, window_bounds = array<i64: 24, 1>}, {transform_indices = @transform_3, window_bounds = array<i64: 24, 512>}]} {
    %c0 = arith.constant 0 : index
    %c0_0 = arith.constant 0 : index
    %0 = vector.load %arg1[%c0, %c0_0] : memref<24x30xbf16, #tpu.memory_space<vmem>>, vector<24x30xbf16>
    %c0_1 = arith.constant 0 : index
    %c0_2 = arith.constant 0 : index
    %1 = vector.load %arg2[%c0_1, %c0_2] : memref<30x512xbf16, #tpu.memory_space<vmem>>, vector<30x512xbf16>
    %cst = arith.constant dense<0.000000e+00> : vector<24x512xf32>
    %2 = tpu.matmul %0, %1, %cst {dimension_numbers = #tpu.dot_dimension_numbers<[1], [0], [0], [1], [0, 0, 1, 1], [], []>} : vector<24x30xbf16>, vector<30x512xbf16>, vector<24x512xf32> -> vector<24x512xf32>
    %c0_3 = arith.constant 0 : index
    %c0_4 = arith.constant 0 : index
    %3 = vector.load %arg3[%c0_3, %c0_4] : memref<24x1xf32, #tpu.memory_space<vmem>>, vector<24x1xf32>
    %4 = vector.broadcast %3 : vector<24x1xf32> to vector<24x512xf32>
    %5 = arith.addf %2, %4 : vector<24x512xf32>
    %cst_5 = arith.constant 0.000000e+00 : f32
    %6 = vector.broadcast %cst_5 : f32 to vector<24x512xf32>
    %7 = arith.cmpf ogt, %5, %6 : vector<24x512xf32>
    %cst_6 = arith.constant 0.00999999977 : f32
    %8 = vector.broadcast %cst_6 : f32 to vector<24x512xf32>
    %9 = arith.mulf %8, %5 : vector<24x512xf32>
    %10 = arith.select %7, %5, %9 : vector<24x512xi1>, vector<24x512xf32>
    %c0_7 = arith.constant 0 : index
    %c0_8 = arith.constant 0 : index
    %11 = vector.load %arg4[%c0_7, %c0_8] : memref<24x512xf32, #tpu.memory_space<vmem>>, vector<24x512xf32>
    tpu.vector_store %arg4[%c0_7, %c0_8], %10 {strides = array<i32>} : memref<24x512xf32, #tpu.memory_space<vmem>>, vector<24x512xf32>,
    return
  }
  func.func @transform_0(%arg0: i32) -> (i32, i32) {
    %c0_i32 = arith.constant 0 : i32
    %c0_i32_0 = arith.constant 0 : i32
    %c0_i32_1 = arith.constant 0 : i32
    return %c0_i32, %c0_i32_0 : i32, i32
  }
  func.func @transform_1(%arg0: i32) -> (i32, i32) {
    %c0_i32 = arith.constant 0 : i32
    %c0_i32_0 = arith.constant 0 : i32
    return %c0_i32, %arg0 : i32, i32
  }
  func.func @transform_2(%arg0: i32) -> (i32, i32) {
    %c0_i32 = arith.constant 0 : i32
    %c0_i32_0 = arith.constant 0 : i32
    %c0_i32_1 = arith.constant 0 : i32
    return %c0_i32, %c0_i32_0 : i32, i32
  }
  func.func @transform_3(%arg0: i32) -> (i32, i32) {
    %c0_i32 = arith.constant 0 : i32
    %c0_i32_0 = arith.constant 0 : i32
    return %c0_i32, %arg0 : i32, i32
  }
}

module attributes {stable_mosaic.version = 11 : i64} {
  func.func @_gemm_bias_act_kernel(%arg0: i32, %arg1: memref<40x450xbf16, #tpu.memory_space<vmem>>, %arg2: memref<450x512xbf16, #tpu.memory_space<vmem>>, %arg3: memref<40x1xf32, #tpu.memory_space<vmem>>, %arg4: memref<40x512xf32, #tpu.memory_space<vmem>>) attributes {dimension_semantics = [#tpu.dimension_semantics<parallel>], iteration_bounds = array<i64: 1>, scalar_prefetch = 0 : i64, scratch_operands = 0 : i64, tpu.core_type = #tpu.core_type<tc>, window_params = [{pipeline_mode = #tpu.pipeline_mode<synchronous>, transform_indices = @transform_0, window_bounds = array<i64: 40, 450>}, {transform_indices = @transform_1, window_bounds = array<i64: 450, 512>}, {pipeline_mode = #tpu.pipeline_mode<synchronous>, transform_indices = @transform_2, window_bounds = array<i64: 40, 1>}, {transform_indices = @transform_3, window_bounds = array<i64: 40, 512>}]} {
    %c0 = arith.constant 0 : index
    %c0_0 = arith.constant 0 : index
    %0 = vector.load %arg1[%c0, %c0_0] : memref<40x450xbf16, #tpu.memory_space<vmem>>, vector<40x450xbf16>
    %c0_1 = arith.constant 0 : index
    %c0_2 = arith.constant 0 : index
    %1 = vector.load %arg2[%c0_1, %c0_2] : memref<450x512xbf16, #tpu.memory_space<vmem>>, vector<450x512xbf16>
    %cst = arith.constant dense<0.000000e+00> : vector<40x512xf32>
    %2 = tpu.matmul %0, %1, %cst {dimension_numbers = #tpu.dot_dimension_numbers<[1], [0], [0], [1], [0, 0, 1, 1], [], []>} : vector<40x450xbf16>, vector<450x512xbf16>, vector<40x512xf32> -> vector<40x512xf32>
    %c0_3 = arith.constant 0 : index
    %c0_4 = arith.constant 0 : index
    %3 = vector.load %arg3[%c0_3, %c0_4] : memref<40x1xf32, #tpu.memory_space<vmem>>, vector<40x1xf32>
    %4 = vector.broadcast %3 : vector<40x1xf32> to vector<40x512xf32>
    %5 = arith.addf %2, %4 : vector<40x512xf32>
    %c0_5 = arith.constant 0 : index
    %c0_6 = arith.constant 0 : index
    %6 = vector.load %arg4[%c0_5, %c0_6] : memref<40x512xf32, #tpu.memory_space<vmem>>, vector<40x512xf32>
    tpu.vector_store %arg4[%c0_5, %c0_6], %5 {strides = array<i32>} : memref<40x512xf32, #tpu.memory_space<vmem>>, vector<40x512xf32>,
    return
  }
  func.func @transform_0(%arg0: i32) -> (i32, i32) {
    %c0_i32 = arith.constant 0 : i32
    %c0_i32_0 = arith.constant 0 : i32
    %c0_i32_1 = arith.constant 0 : i32
    return %c0_i32, %c0_i32_0 : i32, i32
  }
  func.func @transform_1(%arg0: i32) -> (i32, i32) {
    %c0_i32 = arith.constant 0 : i32
    %c0_i32_0 = arith.constant 0 : i32
    return %c0_i32, %arg0 : i32, i32
  }
  func.func @transform_2(%arg0: i32) -> (i32, i32) {
    %c0_i32 = arith.constant 0 : i32
    %c0_i32_0 = arith.constant 0 : i32
    %c0_i32_1 = arith.constant 0 : i32
    return %c0_i32, %c0_i32_0 : i32, i32
  }
  func.func @transform_3(%arg0: i32) -> (i32, i32) {
    %c0_i32 = arith.constant 0 : i32
    %c0_i32_0 = arith.constant 0 : i32
    return %c0_i32, %arg0 : i32, i32
  }
}

module attributes {stable_mosaic.version = 11 : i64} {
  func.func @_gemm_bias_act_kernel(%arg0: i32, %arg1: memref<32x40xbf16, #tpu.memory_space<vmem>>, %arg2: memref<40x512xbf16, #tpu.memory_space<vmem>>, %arg3: memref<32x1xf32, #tpu.memory_space<vmem>>, %arg4: memref<32x512xf32, #tpu.memory_space<vmem>>) attributes {dimension_semantics = [#tpu.dimension_semantics<parallel>], iteration_bounds = array<i64: 1>, scalar_prefetch = 0 : i64, scratch_operands = 0 : i64, tpu.core_type = #tpu.core_type<tc>, window_params = [{pipeline_mode = #tpu.pipeline_mode<synchronous>, transform_indices = @transform_0, window_bounds = array<i64: 32, 40>}, {transform_indices = @transform_1, window_bounds = array<i64: 40, 512>}, {pipeline_mode = #tpu.pipeline_mode<synchronous>, transform_indices = @transform_2, window_bounds = array<i64: 32, 1>}, {transform_indices = @transform_3, window_bounds = array<i64: 32, 512>}]} {
    %c0 = arith.constant 0 : index
    %c0_0 = arith.constant 0 : index
    %0 = vector.load %arg1[%c0, %c0_0] : memref<32x40xbf16, #tpu.memory_space<vmem>>, vector<32x40xbf16>
    %c0_1 = arith.constant 0 : index
    %c0_2 = arith.constant 0 : index
    %1 = vector.load %arg2[%c0_1, %c0_2] : memref<40x512xbf16, #tpu.memory_space<vmem>>, vector<40x512xbf16>
    %cst = arith.constant dense<0.000000e+00> : vector<32x512xf32>
    %2 = tpu.matmul %0, %1, %cst {dimension_numbers = #tpu.dot_dimension_numbers<[1], [0], [0], [1], [0, 0, 1, 1], [], []>} : vector<32x40xbf16>, vector<40x512xbf16>, vector<32x512xf32> -> vector<32x512xf32>
    %c0_3 = arith.constant 0 : index
    %c0_4 = arith.constant 0 : index
    %3 = vector.load %arg3[%c0_3, %c0_4] : memref<32x1xf32, #tpu.memory_space<vmem>>, vector<32x1xf32>
    %4 = vector.broadcast %3 : vector<32x1xf32> to vector<32x512xf32>
    %5 = arith.addf %2, %4 : vector<32x512xf32>
    %cst_5 = arith.constant 0.000000e+00 : f32
    %6 = vector.broadcast %cst_5 : f32 to vector<32x512xf32>
    %7 = arith.cmpf ogt, %5, %6 : vector<32x512xf32>
    %cst_6 = arith.constant 0.00999999977 : f32
    %8 = vector.broadcast %cst_6 : f32 to vector<32x512xf32>
    %9 = arith.mulf %8, %5 : vector<32x512xf32>
    %10 = arith.select %7, %5, %9 : vector<32x512xi1>, vector<32x512xf32>
    %c0_7 = arith.constant 0 : index
    %c0_8 = arith.constant 0 : index
    %11 = vector.load %arg4[%c0_7, %c0_8] : memref<32x512xf32, #tpu.memory_space<vmem>>, vector<32x512xf32>
    tpu.vector_store %arg4[%c0_7, %c0_8], %10 {strides = array<i32>} : memref<32x512xf32, #tpu.memory_space<vmem>>, vector<32x512xf32>,
    return
  }
  func.func @transform_0(%arg0: i32) -> (i32, i32) {
    %c0_i32 = arith.constant 0 : i32
    %c0_i32_0 = arith.constant 0 : i32
    %c0_i32_1 = arith.constant 0 : i32
    return %c0_i32, %c0_i32_0 : i32, i32
  }
  func.func @transform_1(%arg0: i32) -> (i32, i32) {
    %c0_i32 = arith.constant 0 : i32
    %c0_i32_0 = arith.constant 0 : i32
    return %c0_i32, %arg0 : i32, i32
  }
  func.func @transform_2(%arg0: i32) -> (i32, i32) {
    %c0_i32 = arith.constant 0 : i32
    %c0_i32_0 = arith.constant 0 : i32
    %c0_i32_1 = arith.constant 0 : i32
    return %c0_i32, %c0_i32_0 : i32, i32
  }
  func.func @transform_3(%arg0: i32) -> (i32, i32) {
    %c0_i32 = arith.constant 0 : i32
    %c0_i32_0 = arith.constant 0 : i32
    return %c0_i32, %arg0 : i32, i32
  }
}

module attributes {stable_mosaic.version = 11 : i64} {
  func.func @_gemm_bias_act_kernel(%arg0: i32, %arg1: memref<24x270xbf16, #tpu.memory_space<vmem>>, %arg2: memref<270x512xbf16, #tpu.memory_space<vmem>>, %arg3: memref<24x1xf32, #tpu.memory_space<vmem>>, %arg4: memref<24x512xf32, #tpu.memory_space<vmem>>) attributes {dimension_semantics = [#tpu.dimension_semantics<parallel>], iteration_bounds = array<i64: 1>, scalar_prefetch = 0 : i64, scratch_operands = 0 : i64, tpu.core_type = #tpu.core_type<tc>, window_params = [{pipeline_mode = #tpu.pipeline_mode<synchronous>, transform_indices = @transform_0, window_bounds = array<i64: 24, 270>}, {transform_indices = @transform_1, window_bounds = array<i64: 270, 512>}, {pipeline_mode = #tpu.pipeline_mode<synchronous>, transform_indices = @transform_2, window_bounds = array<i64: 24, 1>}, {transform_indices = @transform_3, window_bounds = array<i64: 24, 512>}]} {
    %c0 = arith.constant 0 : index
    %c0_0 = arith.constant 0 : index
    %0 = vector.load %arg1[%c0, %c0_0] : memref<24x270xbf16, #tpu.memory_space<vmem>>, vector<24x270xbf16>
    %c0_1 = arith.constant 0 : index
    %c0_2 = arith.constant 0 : index
    %1 = vector.load %arg2[%c0_1, %c0_2] : memref<270x512xbf16, #tpu.memory_space<vmem>>, vector<270x512xbf16>
    %cst = arith.constant dense<0.000000e+00> : vector<24x512xf32>
    %2 = tpu.matmul %0, %1, %cst {dimension_numbers = #tpu.dot_dimension_numbers<[1], [0], [0], [1], [0, 0, 1, 1], [], []>} : vector<24x270xbf16>, vector<270x512xbf16>, vector<24x512xf32> -> vector<24x512xf32>
    %c0_3 = arith.constant 0 : index
    %c0_4 = arith.constant 0 : index
    %3 = vector.load %arg3[%c0_3, %c0_4] : memref<24x1xf32, #tpu.memory_space<vmem>>, vector<24x1xf32>
    %4 = vector.broadcast %3 : vector<24x1xf32> to vector<24x512xf32>
    %5 = arith.addf %2, %4 : vector<24x512xf32>
    %c0_5 = arith.constant 0 : index
    %c0_6 = arith.constant 0 : index
    %6 = vector.load %arg4[%c0_5, %c0_6] : memref<24x512xf32, #tpu.memory_space<vmem>>, vector<24x512xf32>
    tpu.vector_store %arg4[%c0_5, %c0_6], %5 {strides = array<i32>} : memref<24x512xf32, #tpu.memory_space<vmem>>, vector<24x512xf32>,
    return
  }
  func.func @transform_0(%arg0: i32) -> (i32, i32) {
    %c0_i32 = arith.constant 0 : i32
    %c0_i32_0 = arith.constant 0 : i32
    %c0_i32_1 = arith.constant 0 : i32
    return %c0_i32, %c0_i32_0 : i32, i32
  }
  func.func @transform_1(%arg0: i32) -> (i32, i32) {
    %c0_i32 = arith.constant 0 : i32
    %c0_i32_0 = arith.constant 0 : i32
    return %c0_i32, %arg0 : i32, i32
  }
  func.func @transform_2(%arg0: i32) -> (i32, i32) {
    %c0_i32 = arith.constant 0 : i32
    %c0_i32_0 = arith.constant 0 : i32
    %c0_i32_1 = arith.constant 0 : i32
    return %c0_i32, %c0_i32_0 : i32, i32
  }
  func.func @transform_3(%arg0: i32) -> (i32, i32) {
    %c0_i32 = arith.constant 0 : i32
    %c0_i32_0 = arith.constant 0 : i32
    return %c0_i32, %arg0 : i32, i32
  }
}

module attributes {stable_mosaic.version = 11 : i64} {
  func.func @_gemm_bias_act_kernel(%arg0: i32, %arg1: memref<8x20xbf16, #tpu.memory_space<vmem>>, %arg2: memref<20x512xbf16, #tpu.memory_space<vmem>>, %arg3: memref<8x1xf32, #tpu.memory_space<vmem>>, %arg4: memref<8x512xf32, #tpu.memory_space<vmem>>) attributes {dimension_semantics = [#tpu.dimension_semantics<parallel>], iteration_bounds = array<i64: 1>, scalar_prefetch = 0 : i64, scratch_operands = 0 : i64, tpu.core_type = #tpu.core_type<tc>, window_params = [{pipeline_mode = #tpu.pipeline_mode<synchronous>, transform_indices = @transform_0, window_bounds = array<i64: 8, 20>}, {transform_indices = @transform_1, window_bounds = array<i64: 20, 512>}, {pipeline_mode = #tpu.pipeline_mode<synchronous>, transform_indices = @transform_2, window_bounds = array<i64: 8, 1>}, {transform_indices = @transform_3, window_bounds = array<i64: 8, 512>}]} {
    %c0 = arith.constant 0 : index
    %c0_0 = arith.constant 0 : index
    %0 = vector.load %arg1[%c0, %c0_0] : memref<8x20xbf16, #tpu.memory_space<vmem>>, vector<8x20xbf16>
    %c0_1 = arith.constant 0 : index
    %c0_2 = arith.constant 0 : index
    %1 = vector.load %arg2[%c0_1, %c0_2] : memref<20x512xbf16, #tpu.memory_space<vmem>>, vector<20x512xbf16>
    %cst = arith.constant dense<0.000000e+00> : vector<8x512xf32>
    %2 = tpu.matmul %0, %1, %cst {dimension_numbers = #tpu.dot_dimension_numbers<[1], [0], [0], [1], [0, 0, 1, 1], [], []>} : vector<8x20xbf16>, vector<20x512xbf16>, vector<8x512xf32> -> vector<8x512xf32>
    %c0_3 = arith.constant 0 : index
    %c0_4 = arith.constant 0 : index
    %3 = vector.load %arg3[%c0_3, %c0_4] : memref<8x1xf32, #tpu.memory_space<vmem>>, vector<8x1xf32>
    %4 = vector.broadcast %3 : vector<8x1xf32> to vector<8x512xf32>
    %5 = arith.addf %2, %4 : vector<8x512xf32>
    %c0_5 = arith.constant 0 : index
    %c0_6 = arith.constant 0 : index
    %6 = vector.load %arg4[%c0_5, %c0_6] : memref<8x512xf32, #tpu.memory_space<vmem>>, vector<8x512xf32>
    tpu.vector_store %arg4[%c0_5, %c0_6], %5 {strides = array<i32>} : memref<8x512xf32, #tpu.memory_space<vmem>>, vector<8x512xf32>,
    return
  }
  func.func @transform_0(%arg0: i32) -> (i32, i32) {
    %c0_i32 = arith.constant 0 : i32
    %c0_i32_0 = arith.constant 0 : i32
    %c0_i32_1 = arith.constant 0 : i32
    return %c0_i32, %c0_i32_0 : i32, i32
  }
  func.func @transform_1(%arg0: i32) -> (i32, i32) {
    %c0_i32 = arith.constant 0 : i32
    %c0_i32_0 = arith.constant 0 : i32
    return %c0_i32, %arg0 : i32, i32
  }
  func.func @transform_2(%arg0: i32) -> (i32, i32) {
    %c0_i32 = arith.constant 0 : i32
    %c0_i32_0 = arith.constant 0 : i32
    %c0_i32_1 = arith.constant 0 : i32
    return %c0_i32, %c0_i32_0 : i32, i32
  }
  func.func @transform_3(%arg0: i32) -> (i32, i32) {
    %c0_i32 = arith.constant 0 : i32
    %c0_i32_0 = arith.constant 0 : i32
    return %c0_i32, %arg0 : i32, i32
  }
}

</mosaic_0001>

<bundles_post_ra>
// kernel: forward_rnn.77
= control target key start
LH: loop header
LB: loop body
LE: loop exit
PB: predicated region body
PF: predicated region fallthrough
CT: control target
= control target key end

     0   :  { %vm87_vm0 = vcmask 1041408   ;;  %v285_v2 = vmov 0   ;;  %vm80_vm1 = vcmask 162816   ;;  %s379_s1 = inlined_call_operand.vmem [shape: bf16[20,512], index: 1, kind: input, shape index: {}]   ;;  %s380_s0 = inlined_call_operand.vmem [shape: bf16[24,20], index: 0, kind: input, shape index: {}]   ;;  %s381_s2 = inlined_call_operand.vmem [shape: f32[24,1], index: 2, kind: input, shape index: {}]   ;;  %s382_s3 = inlined_call_operand.vmem [shape: f32[24,512], index: 3, kind: output, shape index: {}]  }
   0x1   :  { %v22_v0 = vld [vmem:[%s379_s1 + $0x20] sm:$0x33]  ;;  %v23_v1 = vld [vmem:[%s379_s1 + $0x28] sm:$0x33]  ;;  %132 = vmatprep.mubr.bf16.mxu0 %v285_v2  ;;  %183 = vmatprep.mubr.bf16.mxu1 %v285_v2  ;;  %v26_v14 = vld [vmem:[%s381_s2 + $0x10] sm:$0xff] }
   0x2   :  { %v261_v3 = vcombine.high %v22_v0, %v22_v0  ;;  %v263_v4 = vcombine.high %v23_v1, %v23_v1  ;;  %v260_v5 = vcombine.low %v22_v0, %v22_v0  ;;  %v262_v6 = vcombine.low %v23_v1, %v23_v1  ;;  %v277_v7 = vld [vmem:[%s379_s1 + $0x4] ss:$16 sps:$4 sm:$0xff]   ;;  %271 = vset.pattern.permute.xlu0 %v285_v2  ;;  %v279_v8 = vld [vmem:[%s379_s1 + $0xc] ss:$16 sps:$4 sm:$0xff]   ;;  %v281_v11 = vld [vmem:[%s379_s1] ss:$16 sps:$4 sm:$0xff]  }
   0x3   :  { %272 = vset.pattern.permute.xlu1 %v285_v2  ;;  %v282_v12 = vld [vmem:[%s379_s1 + $0x8] ss:$16 sps:$4 sm:$0xff]   ;;  %v24_v13 = vld [vmem:[%s381_s2] sm:$0xff] }
   0x4   :  { %264 = vmatprep.subr.msk.bf16.mxu0 %vm87_vm0, %v261_v3  ;;  %267 = vmatprep.subr.msk.bf16.mxu1 %vm87_vm0, %v263_v4  ;;  %v89_v9 = vsel %vm87_vm0, %v260_v5, 0  ;;  %v95_v10 = vsel %vm87_vm0, %v262_v6, 0  ;;  %v283_v15 = vld [vmem:[%s380_s0] sm:$0xff]   ;;  %v25_v16 = vld [vmem:[%s381_s2 + $0x8] sm:$0xff] }
   0x5   :  { %113 = vmatpush1.bf16.msra.mxu0 %v89_v9  ;;  %164 = vmatpush1.bf16.msra.mxu1 %v95_v10  ;;  %v284_v17 = vld [vmem:[%s380_s0 + $0x8] ss:$0 sps:$4 sm:$0xff]  }
   0x6   :  { %114 = vmatprep.subr.bf16.mxu0 %v277_v7  ;;  %165 = vmatprep.subr.bf16.mxu1 %v279_v8 }
   0x7   :  { %29 = vperm.xlu0 %271, %v24_v13   ;;  %39 = vperm.xlu1 %272, %v26_v14  }
   0x9   :  { %115 = vmatpush1.bf16.msra.mxu0 %v281_v11  ;;  %166 = vmatpush1.bf16.msra.mxu1 %v282_v12 }
   0xb   :  { %34 = vperm.xlu0 %271, %v25_v16  }
   0xc   :  { %265 = vmatmul.mubr.msk.bf16.vlgmr.msra.gmra.mxu0 %vm80_vm1, %v283_v15  ;;  %268 = vmatmul.mubr.msk.bf16.vlgmr.msra.gmra.mxu1 %vm80_vm1, %v283_v15 }
   0xd   :  { %142 = vmatprep.mubr.bf16.mxu0 %v285_v2  ;;  %193 = vmatprep.mubr.bf16.mxu1 %v285_v2 }
  0x14   :  { %266 = vmatmul.mubr.msk.bf16.gmra.mxu0 %vm80_vm1, %v284_v17  ;;  %269 = vmatmul.mubr.msk.bf16.gmra.mxu1 %vm80_vm1, %v284_v17 }
  0x82   :  { %v30_v18 = vpop.permute.xlu0 %29  ;;  %v40_v36 = vpop.permute.xlu1 %39 }
  0x86   :  { %v35_v23 = vpop.permute.xlu0 %34 }
  0xcc   :  { %v134_v19 = vpop.f32.mrf.mxu0  ;;  %v185_v20 = vpop.f32.mrf.mxu1 }
  0xcd   :  { %v135_v21 = vadd.f32 %v134_v19, %v30_v18  ;;  %v186_v22 = vadd.f32 %v185_v20, %v30_v18 }
  0xce   :  { %v136_v24 = vpop.f32.mrf.mxu0  ;;  %v187_v25 = vpop.f32.mrf.mxu1 }
  0xcf   :  { %vm202_vm2 = vcmp.gt.f32.partialorder %v135_v21, 0.0  ;;  %v214_v26 = vmul.f32 0.01, %v135_v21  ;;  %vm204_vm3 = vcmp.gt.f32.partialorder %v186_v22, 0.0  ;;  %v216_v27 = vmul.f32 0.01, %v186_v22 }
  0xd0   :  { %v137_v28 = vadd.f32 %v136_v24, %v30_v18  ;;  %v188_v29 = vadd.f32 %v187_v25, %v30_v18  ;;  %v138_v30 = vpop.f32.mrf.mxu0  ;;  %v189_v31 = vpop.f32.mrf.mxu1 }
  0xd1   :  { %v226_v32 = vsel %vm202_vm2, %v135_v21, %v214_v26  ;;  %v228_v33 = vsel %vm204_vm3, %v186_v22, %v216_v27  ;;  %v139_v34 = vadd.f32 %v138_v30, %v35_v23  ;;  %v190_v35 = vadd.f32 %v189_v31, %v35_v23 }
  0xd2   :  { %238 = vst [vmem:[%s382_s3] sm:$0xff] %v226_v32  ;;  %240 = vst [vmem:[%s382_s3 + $0x10] sm:$0xff] %v228_v33  ;;  %vm203_vm4 = vcmp.gt.f32.partialorder %v137_v28, 0.0  ;;  %v215_v37 = vmul.f32 0.01, %v137_v28  ;;  %vm205_vm5 = vcmp.gt.f32.partialorder %v188_v29, 0.0  ;;  %v140_v39 = vpop.f32.mrf.mxu0  ;;  %v191_v40 = vpop.f32.mrf.mxu1 }
  0xd3   :  { %v217_v38 = vmul.f32 0.01, %v188_v29  ;;  %vm206_vm6 = vcmp.gt.f32.partialorder %v139_v34, 0.0  ;;  %v218_v41 = vmul.f32 0.01, %v139_v34  ;;  %vm208_vm7 = vcmp.gt.f32.partialorder %v190_v35, 0.0 }
  0xd4   :  { %v220_v42 = vmul.f32 0.01, %v190_v35  ;;  %v227_v43 = vsel %vm203_vm4, %v137_v28, %v215_v37  ;;  %v141_v45 = vadd.f32 %v140_v39, %v35_v23  ;;  %v192_v46 = vadd.f32 %v191_v40, %v35_v23  ;;  %v144_v47 = vpop.f32.mrf.mxu0  ;;  %v195_v48 = vpop.f32.mrf.mxu1 }
  0xd5   :  { %v229_v44 = vsel %vm205_vm5, %v188_v29, %v217_v38  ;;  %239 = vst [vmem:[%s382_s3 + $0x8] sm:$0xff] %v227_v43  ;;  %v230_v49 = vsel %vm206_vm6, %v139_v34, %v218_v41  ;;  %v145_v51 = vadd.f32 %v144_v47, %v40_v36  ;;  %v196_v52 = vadd.f32 %v195_v48, %v40_v36 }
  0xd6   :  { %241 = vst [vmem:[%s382_s3 + $0x18] sm:$0xff] %v229_v44  ;;  %v232_v50 = vsel %vm208_vm7, %v190_v35, %v220_v42  ;;  %242 = vst [vmem:[%s382_s3 + $0x20] sm:$0xff] %v230_v49  ;;  %vm207_vm8 = vcmp.gt.f32.partialorder %v141_v45, 0.0  ;;  %v219_v53 = vmul.f32 0.01, %v141_v45  ;;  %vm209_vm9 = vcmp.gt.f32.partialorder %v192_v46, 0.0  ;;  %v146_v55 = vpop.f32.mrf.mxu0  ;;  %v197_v56 = vpop.f32.mrf.mxu1 }
  0xd7   :  { %244 = vst [vmem:[%s382_s3 + $0x30] sm:$0xff] %v232_v50  ;;  %v221_v54 = vmul.f32 0.01, %v192_v46  ;;  %vm210_vm10 = vcmp.gt.f32.partialorder %v145_v51, 0.0  ;;  %v222_v57 = vmul.f32 0.01, %v145_v51  ;;  %v147_v61 = vadd.f32 %v146_v55, %v40_v36 }
  0xd8   :  { %vm212_vm11 = vcmp.gt.f32.partialorder %v196_v52, 0.0  ;;  %v224_v58 = vmul.f32 0.01, %v196_v52  ;;  %v231_v59 = vsel %vm207_vm8, %v141_v45, %v219_v53  ;;  %v198_v62 = vadd.f32 %v197_v56, %v40_v36  ;;  %v148_v63 = vpop.f32.mrf.mxu0  ;;  %v199_v0 = vpop.f32.mrf.mxu1 }
  0xd9   :  { %v233_v60 = vsel %vm209_vm9, %v192_v46, %v221_v54  ;;  %243 = vst [vmem:[%s382_s3 + $0x28] sm:$0xff] %v231_v59  ;;  %v234_v1 = vsel %vm210_vm10, %v145_v51, %v222_v57  ;;  %vm211_vm12 = vcmp.gt.f32.partialorder %v147_v61, 0.0  ;;  %v223_v3 = vmul.f32 0.01, %v147_v61 }
  0xda   :  { %245 = vst [vmem:[%s382_s3 + $0x38] sm:$0xff] %v233_v60  ;;  %v236_v2 = vsel %vm212_vm11, %v196_v52, %v224_v58  ;;  %246 = vst [vmem:[%s382_s3 + $0x40] sm:$0xff] %v234_v1  ;;  %vm213_vm13 = vcmp.gt.f32.partialorder %v198_v62, 0.0  ;;  %v225_v4 = vmul.f32 0.01, %v198_v62  ;;  %v149_v5 = vpop.f32.mrf.mxu0  ;;  %v200_v6 = vpop.f32.mrf.mxu1 }
  0xdb   :  { %248 = vst [vmem:[%s382_s3 + $0x50] sm:$0xff] %v236_v2  ;;  %v235_v7 = vsel %vm211_vm12, %v147_v61, %v223_v3 }
  0xdc   :  { %v237_v8 = vsel %vm213_vm13, %v198_v62, %v225_v4  ;;  %247 = vst [vmem:[%s382_s3 + $0x48] sm:$0xff] %v235_v7 }
  0xdd   :  { %249 = vst [vmem:[%s382_s3 + $0x58] sm:$0xff] %v237_v8 }

// kernel: forward_rnn.76
= control target key start
LH: loop header
LB: loop body
LE: loop exit
PB: predicated region body
PF: predicated region fallthrough
CT: control target
= control target key end

     0   :  { %vm135_vm0 = vcmask 1040384   ;;  %v317_v2 = vmov 0   ;;  %vm128_vm1 = vcmask 408576   ;;  %s435_s1 = inlined_call_operand.vmem [shape: bf16[50,512], index: 1, kind: input, shape index: {}]   ;;  %s436_s0 = inlined_call_operand.vmem [shape: bf16[24,50], index: 0, kind: input, shape index: {}]   ;;  %s437_s2 = inlined_call_operand.vmem [shape: f32[24,1], index: 2, kind: input, shape index: {}]   ;;  %s438_s3 = inlined_call_operand.vmem [shape: f32[24,512], index: 3, kind: output, shape index: {}]  }
   0x1   :  { %v30_v0 = vld [vmem:[%s435_s1 + $0x60] sm:$0x11]  ;;  %v31_v1 = vld [vmem:[%s435_s1 + $0x68] sm:$0x11]  ;;  %180 = vmatprep.mubr.bf16.mxu0 %v317_v2  ;;  %231 = vmatprep.mubr.bf16.mxu1 %v317_v2  ;;  %v34_v20 = vld [vmem:[%s437_s2 + $0x10] sm:$0xff] }
   0x2   :  { %v281_v3 = vcombine.high %v30_v0, %v30_v0  ;;  %v283_v4 = vcombine.high %v31_v1, %v31_v1  ;;  %v280_v5 = vcombine.low %v30_v0, %v30_v0  ;;  %v282_v6 = vcombine.low %v31_v1, %v31_v1  ;;  %v297_v7 = vld [vmem:[%s435_s1 + $0x44] ss:$16 sps:$4 sm:$0xff]   ;;  %291 = vset.pattern.permute.xlu0 %v317_v2  ;;  %v299_v8 = vld [vmem:[%s435_s1 + $0x4c] ss:$16 sps:$4 sm:$0xff]   ;;  %v301_v11 = vld [vmem:[%s435_s1 + $0x40] ss:$16 sps:$4 sm:$0xff]  }
   0x3   :  { %292 = vset.pattern.permute.xlu1 %v317_v2  ;;  %v302_v12 = vld [vmem:[%s435_s1 + $0x48] ss:$16 sps:$4 sm:$0xff]   ;;  %v303_v13 = vld [vmem:[%s435_s1 + $0x24] ss:$16 sps:$4 sm:$0xff]   ;;  %v305_v14 = vld [vmem:[%s435_s1 + $0x2c] ss:$16 sps:$4 sm:$0xff]  }
   0x4   :  { %284 = vmatprep.subr.msk.bf16.mxu0 %vm135_vm0, %v281_v3  ;;  %287 = vmatprep.subr.msk.bf16.mxu1 %vm135_vm0, %v283_v4  ;;  %v137_v9 = vsel %vm135_vm0, %v280_v5, 0  ;;  %v143_v10 = vsel %vm135_vm0, %v282_v6, 0  ;;  %v307_v15 = vld [vmem:[%s435_s1 + $0x20] ss:$16 sps:$4 sm:$0xff]   ;;  %v308_v16 = vld [vmem:[%s435_s1 + $0x28] ss:$16 sps:$4 sm:$0xff]  }
   0x5   :  { %157 = vmatpush1.bf16.msra.mxu0 %v137_v9  ;;  %208 = vmatpush1.bf16.msra.mxu1 %v143_v10  ;;  %v309_v17 = vld [vmem:[%s435_s1 + $0x4] ss:$16 sps:$4 sm:$0xff]   ;;  %v311_v18 = vld [vmem:[%s435_s1 + $0xc] ss:$16 sps:$4 sm:$0xff]   ;;  %v313_v21 = vld [vmem:[%s435_s1] ss:$16 sps:$4 sm:$0xff]  }
   0x6   :  { %158 = vmatprep.subr.bf16.mxu0 %v297_v7  ;;  %209 = vmatprep.subr.bf16.mxu1 %v299_v8  ;;  %v32_v19 = vld [vmem:[%s437_s2] sm:$0xff]  ;;  %v314_v22 = vld [vmem:[%s435_s1 + $0x8] ss:$16 sps:$4 sm:$0xff]  }
   0x7   :  { %37 = vperm.xlu0 %291, %v32_v19   ;;  %v33_v23 = vld [vmem:[%s437_s2 + $0x8] sm:$0xff]  ;;  %47 = vperm.xlu1 %292, %v34_v20   ;;  %v315_v24 = vld [vmem:[%s436_s0] sm:$0xff]  }
   0x8   :  { %v316_v25 = vld [vmem:[%s436_s0 + $0x8] ss:$0 sps:$4 sm:$0xff]  }
   0x9   :  { %159 = vmatpush1.bf16.msra.mxu0 %v301_v11  ;;  %210 = vmatpush1.bf16.msra.mxu1 %v302_v12 }
   0xa   :  { %160 = vmatprep.subr.bf16.mxu0 %v303_v13  ;;  %211 = vmatprep.subr.bf16.mxu1 %v305_v14 }
   0xb   :  { %42 = vperm.xlu0 %291, %v33_v23  }
   0xd   :  { %161 = vmatpush1.bf16.msra.mxu0 %v307_v15  ;;  %212 = vmatpush1.bf16.msra.mxu1 %v308_v16 }
   0xe   :  { %162 = vmatprep.subr.bf16.mxu0 %v309_v17  ;;  %213 = vmatprep.subr.bf16.mxu1 %v311_v18 }
  0x11   :  { %163 = vmatpush1.bf16.msra.mxu0 %v313_v21  ;;  %214 = vmatpush1.bf16.msra.mxu1 %v314_v22 }
  0x14   :  { %285 = vmatmul.mubr.msk.bf16.vlgmr.msra.gmra.mxu0 %vm128_vm1, %v315_v24  ;;  %288 = vmatmul.mubr.msk.bf16.vlgmr.msra.gmra.mxu1 %vm128_vm1, %v315_v24 }
  0x15   :  { %190 = vmatprep.mubr.bf16.mxu0 %v317_v2  ;;  %241 = vmatprep.mubr.bf16.mxu1 %v317_v2 }
  0x1c   :  { %286 = vmatmul.mubr.msk.bf16.gmra.mxu0 %vm128_vm1, %v316_v25  ;;  %289 = vmatmul.mubr.msk.bf16.gmra.mxu1 %vm128_vm1, %v316_v25 }
  0x82   :  { %v38_v26 = vpop.permute.xlu0 %37  ;;  %v48_v40 = vpop.permute.xlu1 %47 }
  0x86   :  { %v43_v31 = vpop.permute.xlu0 %42 }
  0xd4   :  { %v182_v27 = vpop.f32.mrf.mxu0  ;;  %v233_v28 = vpop.f32.mrf.mxu1 }
  0xd5   :  { %v183_v29 = vadd.f32 %v182_v27, %v38_v26  ;;  %v234_v30 = vadd.f32 %v233_v28, %v38_v26 }
  0xd6   :  { %v184_v32 = vpop.f32.mrf.mxu0  ;;  %v235_v33 = vpop.f32.mrf.mxu1 }
  0xd7   :  { %250 = vst [vmem:[%s438_s3] sm:$0xff] %v183_v29  ;;  %252 = vst [vmem:[%s438_s3 + $0x10] sm:$0xff] %v234_v30  ;;  %v185_v34 = vadd.f32 %v184_v32, %v38_v26  ;;  %v236_v35 = vadd.f32 %v235_v33, %v38_v26 }
  0xd8   :  { %v186_v36 = vpop.f32.mrf.mxu0  ;;  %v237_v37 = vpop.f32.mrf.mxu1 }
  0xd9   :  { %251 = vst [vmem:[%s438_s3 + $0x8] sm:$0xff] %v185_v34  ;;  %253 = vst [vmem:[%s438_s3 + $0x18] sm:$0xff] %v236_v35  ;;  %v187_v38 = vadd.f32 %v186_v36, %v43_v31  ;;  %v238_v39 = vadd.f32 %v237_v37, %v43_v31 }
  0xda   :  { %v188_v41 = vpop.f32.mrf.mxu0  ;;  %v239_v42 = vpop.f32.mrf.mxu1 }
  0xdb   :  { %254 = vst [vmem:[%s438_s3 + $0x20] sm:$0xff] %v187_v38  ;;  %256 = vst [vmem:[%s438_s3 + $0x30] sm:$0xff] %v238_v39  ;;  %v189_v43 = vadd.f32 %v188_v41, %v43_v31  ;;  %v240_v44 = vadd.f32 %v239_v42, %v43_v31 }
  0xdc   :  { %v192_v45 = vpop.f32.mrf.mxu0  ;;  %v243_v46 = vpop.f32.mrf.mxu1 }
  0xdd   :  { %255 = vst [vmem:[%s438_s3 + $0x28] sm:$0xff] %v189_v43  ;;  %257 = vst [vmem:[%s438_s3 + $0x38] sm:$0xff] %v240_v44  ;;  %v193_v47 = vadd.f32 %v192_v45, %v48_v40  ;;  %v244_v48 = vadd.f32 %v243_v46, %v48_v40 }
  0xde   :  { %v194_v49 = vpop.f32.mrf.mxu0  ;;  %v245_v50 = vpop.f32.mrf.mxu1 }
  0xdf   :  { %258 = vst [vmem:[%s438_s3 + $0x40] sm:$0xff] %v193_v47  ;;  %260 = vst [vmem:[%s438_s3 + $0x50] sm:$0xff] %v244_v48  ;;  %v195_v51 = vadd.f32 %v194_v49, %v48_v40  ;;  %v246_v52 = vadd.f32 %v245_v50, %v48_v40 }
  0xe0   :  { %v196_v53 = vpop.f32.mrf.mxu0  ;;  %v247_v54 = vpop.f32.mrf.mxu1 }
  0xe1   :  { %259 = vst [vmem:[%s438_s3 + $0x48] sm:$0xff] %v195_v51  ;;  %261 = vst [vmem:[%s438_s3 + $0x58] sm:$0xff] %v246_v52 }
  0xe2   :  { %v197_v55 = vpop.f32.mrf.mxu0  ;;  %v248_v56 = vpop.f32.mrf.mxu1 }

// kernel: forward_rnn.78
= control target key start
LH: loop header
LB: loop body
LE: loop exit
PB: predicated region body
PF: predicated region fallthrough
CT: control target
= control target key end

     0   :  { %v410_v0 = vmov 0   ;;  %vm222_vm0 = vcmask 424960   ;;  %vm238_vm1 = vcmask 1041408   ;;  %s588_s1 = inlined_call_operand.vmem [shape: bf16[180,128], index: 1, kind: input, shape index: {}]   ;;  %s589_s0 = inlined_call_operand.vmem [shape: bf16[80,180], index: 0, kind: input, shape index: {}]   ;;  %s590_s2 = inlined_call_operand.vmem [shape: f32[80,1], index: 2, kind: input, shape index: {}]   ;;  %s591_s3 = inlined_call_operand.vmem [shape: f32[80,128], index: 3, kind: output, shape index: {}]  }
   0x1   :  { %242 = vmatprep.subr.bf16.mxu0 %v410_v0  ;;  %356 = vmatprep.subr.bf16.mxu1 %v410_v0  ;;  %v383_v1 = vld [vmem:[%s588_s1 + $0x38] sm:$0xff]   ;;  %v384_v2 = vld [vmem:[%s588_s1 + $0x30] sm:$0xff]   ;;  %v385_v3 = vld [vmem:[%s588_s1 + $0x28] sm:$0xff]  }
   0x2   :  { %382 = vset.pattern.permute.xlu1 %v410_v0  ;;  %381 = vset.pattern.permute.xlu0 %v410_v0  ;;  %v386_v4 = vld [vmem:[%s588_s1 + $0x20] sm:$0xff]   ;;  %v387_v6 = vld [vmem:[%s588_s1 + $0x18] sm:$0xff]   ;;  %v388_v8 = vld [vmem:[%s588_s1 + $0x10] sm:$0xff]  }
   0x3   :  { %243 = vmatpush1.bf16.msra.mxu0 %v383_v1  ;;  %368 = vmatpush1.bf16.msra.mxu1 %v383_v1  ;;  %v397_v5 = vld [vmem:[%s589_s0 + $0x4] ss:$8 sps:$4 sm:$0xff]   ;;  %v400_v7 = vld [vmem:[%s589_s0 + $0x34] ss:$8 sps:$4 sm:$0xff]   ;;  %v395_v26 = vld [vmem:[%s589_s0] ss:$8 sps:$4 sm:$0xff]  }
   0x4   :  { %244 = vmatprep.subr.bf16.mxu0 %v410_v0  ;;  %357 = vmatprep.subr.bf16.mxu1 %v410_v0  ;;  %v50_v9 = vld [vmem:[%s590_s2 + $0x10] sm:$0xff]  ;;  %v48_v10 = vld [vmem:[%s590_s2] sm:$0xff]  ;;  %v51_v11 = vld [vmem:[%s590_s2 + $0x18] sm:$0xff] }
   0x5   :  { %351 = vmatprep.mubr.msk.bf16.mxu0 %vm222_vm0, %v397_v5  ;;  %354 = vmatprep.mubr.msk.bf16.mxu1 %vm222_vm0, %v400_v7  ;;  %v49_v12 = vld [vmem:[%s590_s2 + $0x8] sm:$0xff]  ;;  %v52_v15 = vld [vmem:[%s590_s2 + $0x20] sm:$0xff]  ;;  %v391_v17 = vld [vmem:[%s588_s1 + $0x58] ss:$0 sps:$4 sm:$0x33]  }
   0x6   :  { %70 = vperm.xlu1 %382, %v50_v9   ;;  %60 = vperm.xlu0 %381, %v48_v10   ;;  %v389_v13 = vld [vmem:[%s588_s1 + $0x8] sm:$0xff]   ;;  %v390_v16 = vld [vmem:[%s588_s1] sm:$0xff]   ;;  %v55_v18 = vld [vmem:[%s590_s2 + $0x38] sm:$0xff]  ;;  %v240_v20 = vsel %vm238_vm1, %v391_v17, 0 }
   0x7   :  { %245 = vmatpush1.bf16.msra.mxu0 %v384_v2  ;;  %369 = vmatpush1.bf16.msra.mxu1 %v384_v2  ;;  %v53_v14 = vld [vmem:[%s590_s2 + $0x28] sm:$0xff]  ;;  %v54_v19 = vld [vmem:[%s590_s2 + $0x30] sm:$0xff]  ;;  %v56_v22 = vld [vmem:[%s590_s2 + $0x40] sm:$0xff] }
   0x8   :  { %246 = vmatprep.subr.bf16.mxu0 %v410_v0  ;;  %358 = vmatprep.subr.bf16.mxu1 %v410_v0  ;;  %v57_v21 = vld [vmem:[%s590_s2 + $0x48] sm:$0xff]  ;;  %v392_v23 = vld [vmem:[%s588_s1 + $0x50] sm:$0xff]   ;;  %v394_v25 = vld [vmem:[%s588_s1 + $0x40] sm:$0xff]  }
   0x9   :  { %v393_v24 = vld [vmem:[%s588_s1 + $0x48] sm:$0xff]   ;;  %v398_v27 = vld [vmem:[%s589_s0 + $0x30] ss:$8 sps:$4 sm:$0xff]   ;;  %v401_v28 = vld [vmem:[%s589_s0 + $0x14] ss:$8 sps:$4 sm:$0xff]  }
   0xa   :  { %75 = vperm.xlu1 %382, %v51_v11   ;;  %65 = vperm.xlu0 %381, %v49_v12   ;;  %v403_v29 = vld [vmem:[%s589_s0 + $0x44] ss:$8 sps:$4 sm:$0xff]   ;;  %v405_v30 = vld [vmem:[%s589_s0 + $0x10] ss:$8 sps:$4 sm:$0xff]   ;;  %v406_v31 = vld [vmem:[%s589_s0 + $0x40] ss:$8 sps:$4 sm:$0xff]  }
   0xb   :  { %247 = vmatpush1.bf16.msra.mxu0 %v385_v3  ;;  %370 = vmatpush1.bf16.msra.mxu1 %v385_v3  ;;  %v407_v32 = vld [vmem:[%s589_s0 + $0x24] ss:$8 sps:$4 sm:$0xff]   ;;  %v409_v33 = vld [vmem:[%s589_s0 + $0x20] ss:$8 sps:$4 sm:$0xff]  }
   0xc   :  { %248 = vmatprep.subr.bf16.mxu0 %v410_v0  ;;  %359 = vmatprep.subr.bf16.mxu1 %v410_v0 }
   0xe   :  { %85 = vperm.xlu1 %382, %v53_v14   ;;  %80 = vperm.xlu0 %381, %v52_v15  }
   0xf   :  { %249 = vmatpush1.bf16.msra.mxu0 %v386_v4  ;;  %371 = vmatpush1.bf16.msra.mxu1 %v386_v4 }
  0x10   :  { %250 = vmatprep.subr.bf16.mxu0 %v410_v0  ;;  %360 = vmatprep.subr.bf16.mxu1 %v410_v0 }
  0x12   :  { %95 = vperm.xlu1 %382, %v55_v18   ;;  %90 = vperm.xlu0 %381, %v54_v19  }
  0x13   :  { %251 = vmatpush1.bf16.msra.mxu0 %v387_v6  ;;  %372 = vmatpush1.bf16.msra.mxu1 %v387_v6 }
  0x14   :  { %252 = vmatprep.subr.bf16.mxu0 %v410_v0  ;;  %361 = vmatprep.subr.bf16.mxu1 %v410_v0 }
  0x16   :  { %105 = vperm.xlu1 %382, %v57_v21   ;;  %100 = vperm.xlu0 %381, %v56_v22  }
  0x17   :  { %253 = vmatpush1.bf16.msra.mxu0 %v388_v8  ;;  %373 = vmatpush1.bf16.msra.mxu1 %v388_v8 }
  0x18   :  { %254 = vmatprep.subr.bf16.mxu0 %v410_v0  ;;  %362 = vmatprep.subr.bf16.mxu1 %v410_v0 }
  0x1b   :  { %255 = vmatpush1.bf16.msra.mxu0 %v389_v13  ;;  %374 = vmatpush1.bf16.msra.mxu1 %v389_v13 }
  0x1c   :  { %256 = vmatprep.subr.bf16.mxu0 %v410_v0  ;;  %363 = vmatprep.subr.bf16.mxu1 %v410_v0 }
  0x1f   :  { %257 = vmatpush1.bf16.msra.mxu0 %v390_v16  ;;  %375 = vmatpush1.bf16.msra.mxu1 %v390_v16 }
  0x20   :  { %266 = vmatprep.subr.bf16.mxu0 %v410_v0  ;;  %364 = vmatprep.subr.bf16.mxu1 %v410_v0 }
  0x23   :  { %267 = vmatpush2.bf16.msra.mxu0 %v240_v20  ;;  %376 = vmatpush2.bf16.msra.mxu1 %v240_v20 }
  0x24   :  { %268 = vmatprep.subr.bf16.mxu0 %v410_v0  ;;  %365 = vmatprep.subr.bf16.mxu1 %v410_v0 }
  0x27   :  { %269 = vmatpush2.bf16.msra.mxu0 %v392_v23  ;;  %377 = vmatpush2.bf16.msra.mxu1 %v392_v23 }
  0x28   :  { %270 = vmatprep.subr.bf16.mxu0 %v410_v0  ;;  %366 = vmatprep.subr.bf16.mxu1 %v410_v0 }
  0x2b   :  { %271 = vmatpush2.bf16.msra.mxu0 %v393_v24  ;;  %378 = vmatpush2.bf16.msra.mxu1 %v393_v24 }
  0x2c   :  { %272 = vmatprep.subr.bf16.mxu0 %v410_v0  ;;  %367 = vmatprep.subr.bf16.mxu1 %v410_v0 }
  0x2f   :  { %273 = vmatpush2.bf16.msra.mxu0 %v394_v25  ;;  %379 = vmatpush2.bf16.msra.mxu1 %v394_v25 }
  0x32   :  { %275 = vmatmul.mubr.bf16.vlgmr.msra.gmra.mxu0 %v395_v26  ;;  %299 = vmatmul.mubr.bf16.vlgmr.msra.gmra.mxu1 %v398_v27 }
  0x33   :  { %352 = vmatprep.mubr.msk.bf16.mxu0 %vm222_vm0, %v401_v28  ;;  %355 = vmatprep.mubr.msk.bf16.mxu1 %vm222_vm0, %v403_v29 }
  0x3a   :  { %283 = vmatmul.mubr.bf16.gmra.mxu0 %v405_v30  ;;  %307 = vmatmul.mubr.bf16.gmra.mxu1 %v406_v31 }
  0x3b   :  { %353 = vmatprep.mubr.msk.bf16.mxu0 %vm222_vm0, %v407_v32 }
  0x42   :  { %291 = vmatmul.mubr.bf16.gmra.mxu0 %v409_v33 }
  0x81   :  { %v61_v34 = vpop.permute.xlu0 %60  ;;  %v71_v35 = vpop.permute.xlu1 %70 }
  0x85   :  { %v66_v36 = vpop.permute.xlu0 %65  ;;  %v76_v37 = vpop.permute.xlu1 %75 }
  0x89   :  { %v81_v38 = vpop.permute.xlu0 %80  ;;  %v86_v39 = vpop.permute.xlu1 %85 }
  0x8d   :  { %v91_v40 = vpop.permute.xlu0 %90  ;;  %v96_v47 = vpop.permute.xlu1 %95 }
  0x91   :  { %v101_v54 = vpop.permute.xlu0 %100  ;;  %v106_v61 = vpop.permute.xlu1 %105 }
  0xf2   :  { %v276_v41 = vpop.f32.mrf.mxu0  ;;  %v300_v42 = vpop.f32.mrf.mxu1 }
  0xf3   :  { %v277_v43 = vadd.f32 %v276_v41, %v61_v34  ;;  %v301_v44 = vadd.f32 %v300_v42, %v91_v40 }
  0xf4   :  { %v278_v45 = vpop.f32.mrf.mxu0  ;;  %v302_v46 = vpop.f32.mrf.mxu1 }
  0xf5   :  { %315 = vst [vmem:[%s591_s3] sm:$0xff] %v277_v43  ;;  %321 = vst [vmem:[%s591_s3 + $0x30] sm:$0xff] %v301_v44 }
  0xf6   :  { %v279_v48 = vpop.f32.mrf.mxu0  ;;  %v303_v49 = vpop.f32.mrf.mxu1 }
  0xf7   :  { %v280_v50 = vadd.f32 %v279_v48, %v66_v36  ;;  %v304_v51 = vadd.f32 %v303_v49, %v96_v47 }
  0xf8   :  { %v281_v52 = vpop.f32.mrf.mxu0  ;;  %v305_v53 = vpop.f32.mrf.mxu1 }
  0xf9   :  { %316 = vst [vmem:[%s591_s3 + $0x8] sm:$0xff] %v280_v50  ;;  %322 = vst [vmem:[%s591_s3 + $0x38] sm:$0xff] %v304_v51 }
  0xfa   :  { %v284_v55 = vpop.f32.mrf.mxu0  ;;  %v308_v56 = vpop.f32.mrf.mxu1 }
  0xfb   :  { %v285_v57 = vadd.f32 %v284_v55, %v71_v35  ;;  %v309_v58 = vadd.f32 %v308_v56, %v101_v54 }
  0xfc   :  { %v286_v59 = vpop.f32.mrf.mxu0  ;;  %v310_v60 = vpop.f32.mrf.mxu1 }
  0xfd   :  { %317 = vst [vmem:[%s591_s3 + $0x10] sm:$0xff] %v285_v57  ;;  %323 = vst [vmem:[%s591_s3 + $0x40] sm:$0xff] %v309_v58 }
  0xfe   :  { %v287_v62 = vpop.f32.mrf.mxu0  ;;  %v311_v63 = vpop.f32.mrf.mxu1 }
  0xff   :  { %v288_v0 = vadd.f32 %v287_v62, %v76_v37  ;;  %v312_v1 = vadd.f32 %v311_v63, %v106_v61 }
 0x100   :  { %v289_v2 = vpop.f32.mrf.mxu0  ;;  %v313_v3 = vpop.f32.mrf.mxu1 }
 0x101   :  { %318 = vst [vmem:[%s591_s3 + $0x18] sm:$0xff] %v288_v0  ;;  %324 = vst [vmem:[%s591_s3 + $0x48] sm:$0xff] %v312_v1 }
 0x102   :  { %v292_v4 = vpop.f32.mrf.mxu0 }
 0x103   :  { %v293_v5 = vadd.f32 %v292_v4, %v81_v38 }
 0x104   :  { %v294_v6 = vpop.f32.mrf.mxu0 }
 0x105   :  { %319 = vst [vmem:[%s591_s3 + $0x20] sm:$0xff] %v293_v5 }
 0x106   :  { %v295_v7 = vpop.f32.mrf.mxu0 }
 0x107   :  { %v296_v8 = vadd.f32 %v295_v7, %v86_v39 }
 0x108   :  { %v297_v9 = vpop.f32.mrf.mxu0 }
 0x109   :  { %320 = vst [vmem:[%s591_s3 + $0x28] sm:$0xff] %v296_v8 }

// kernel: forward_rnn.79
= control target key start
LH: loop header
LB: loop body
LE: loop exit
PB: predicated region body
PF: predicated region fallthrough
CT: control target
= control target key end

     0   :  { %v257_v0 = vmov 0.0   ;;  %vm258_vm0 = vmmov 0   ;;  %v259_v3 = vmov 0   ;;  %vm103_vm1 = vcmask 654336   ;;  %s337_s1 = inlined_call_operand.vmem [shape: bf16[80,128], index: 1, kind: input, shape index: {}]   ;;  %s338_s0 = inlined_call_operand.vmem [shape: bf16[40,80], index: 0, kind: input, shape index: {}]   ;;  %s339_s2 = inlined_call_operand.vmem [shape: f32[40,1], index: 2, kind: input, shape index: {}]   ;;  %s340_s3 = inlined_call_operand.vmem [shape: f32[40,128], index: 3, kind: output, shape index: {}]  }
   0x1   :  { %212 = vmatprep.subr.bf16.mxu0 %v257_v0  ;;  %234 = vmatprep.subr.bf16.mxu1 %v257_v0  ;;  %v249_v1 = vld [vmem:[%s337_s1 + $0x20] sm:$0xff]   ;;  %v250_v2 = vld [vmem:[%s337_s1 + $0x18] sm:$0xff]   ;;  %v251_v4 = vld [vmem:[%s337_s1 + $0x10] sm:$0xff]  }
   0x2   :  { %222 = vmatprep.mubr.msk.bf16.mxu0 %vm258_vm0, %v257_v0  ;;  %226 = vmatprep.mubr.msk.bf16.mxu1 %vm258_vm0, %v257_v0  ;;  %v30_v5 = vld [vmem:[%s339_s2] sm:$0xff]  ;;  %v32_v6 = vld [vmem:[%s339_s2 + $0x10] sm:$0xff]  ;;  %v31_v7 = vld [vmem:[%s339_s2 + $0x8] sm:$0xff] }
   0x3   :  { %213 = vmatpush3.bf16.msra.mxu0 %v249_v1  ;;  %239 = vmatpush3.bf16.msra.mxu1 %v249_v1  ;;  %v252_v8 = vld [vmem:[%s337_s1 + $0x8] sm:$0xff]   ;;  %v33_v9 = vld [vmem:[%s339_s2 + $0x18] sm:$0xff]  ;;  %v34_v10 = vld [vmem:[%s339_s2 + $0x20] sm:$0xff] }
   0x4   :  { %214 = vmatprep.subr.bf16.mxu0 %v257_v0  ;;  %235 = vmatprep.subr.bf16.mxu1 %v257_v0  ;;  %v253_v11 = vld [vmem:[%s337_s1] sm:$0xff]   ;;  %v255_v13 = vld [vmem:[%s338_s0 + $0x8] sm:$0xff]   ;;  %v256_v14 = vld [vmem:[%s338_s0 + $0x10] ss:$0 sps:$4 sm:$0xff]  }
   0x5   :  { %247 = vset.pattern.permute.xlu0 %v259_v3  ;;  %248 = vset.pattern.permute.xlu1 %v259_v3  ;;  %v254_v12 = vld [vmem:[%s338_s0] sm:$0xff]  }
   0x6   :  { %37 = vperm.xlu0 %247, %v30_v5   ;;  %47 = vperm.xlu1 %248, %v32_v6  }
   0x7   :  { %215 = vmatpush3.bf16.msra.mxu0 %v250_v2  ;;  %240 = vmatpush3.bf16.msra.mxu1 %v250_v2 }
   0x8   :  { %216 = vmatprep.subr.bf16.mxu0 %v257_v0  ;;  %236 = vmatprep.subr.bf16.mxu1 %v257_v0 }
   0xa   :  { %42 = vperm.xlu0 %247, %v31_v7   ;;  %52 = vperm.xlu1 %248, %v33_v9  }
   0xb   :  { %217 = vmatpush3.bf16.msra.mxu0 %v251_v4  ;;  %241 = vmatpush3.bf16.msra.mxu1 %v251_v4 }
   0xc   :  { %218 = vmatprep.subr.bf16.mxu0 %v257_v0  ;;  %237 = vmatprep.subr.bf16.mxu1 %v257_v0 }
   0xe   :  { %57 = vperm.xlu0 %247, %v34_v10  }
   0xf   :  { %219 = vmatpush3.bf16.msra.mxu0 %v252_v8  ;;  %242 = vmatpush3.bf16.msra.mxu1 %v252_v8 }
  0x10   :  { %220 = vmatprep.subr.bf16.mxu0 %v257_v0  ;;  %238 = vmatprep.subr.bf16.mxu1 %v257_v0 }
  0x13   :  { %221 = vmatpush3.bf16.msra.mxu0 %v253_v11  ;;  %243 = vmatpush3.bf16.msra.mxu1 %v253_v11 }
  0x16   :  { %223 = vmatmul.mubr.msk.bf16.vlgmr.msra.gmra.mxu0 %vm103_vm1, %v254_v12  ;;  %227 = vmatmul.mubr.msk.bf16.vlgmr.msra.gmra.mxu1 %vm103_vm1, %v255_v13 }
  0x17   :  { %230 = vmatprep.mubr.msk.bf16.mxu1 %vm258_vm0, %v257_v0 }
  0x1e   :  { %231 = vmatmul.mubr.msk.bf16.gmra.mxu1 %vm103_vm1, %v256_v14 }
  0x81   :  { %v38_v15 = vpop.permute.xlu0 %37  ;;  %v48_v16 = vpop.permute.xlu1 %47 }
  0x85   :  { %v43_v19 = vpop.permute.xlu0 %42  ;;  %v53_v22 = vpop.permute.xlu1 %52 }
  0x89   :  { %v58_v37 = vpop.permute.xlu0 %57 }
  0xd6   :  { %v147_v17 = vpop.f32.mrf.mxu0  ;;  %v155_v18 = vpop.f32.mrf.mxu1 }
  0xd7   :  { %v148_v20 = vadd.f32 %v147_v17, %v38_v15  ;;  %v156_v21 = vadd.f32 %v155_v18, %v48_v16 }
  0xd8   :  { %v224_v23 = vpop.f32.mrf.mxu0  ;;  %v228_v24 = vpop.f32.mrf.mxu1 }
  0xd9   :  { %vm169_vm2 = vcmp.gt.f32.partialorder %v148_v20, 0.0  ;;  %v174_v25 = vmul.f32 0.01, %v148_v20  ;;  %vm171_vm3 = vcmp.gt.f32.partialorder %v156_v21, 0.0  ;;  %v176_v26 = vmul.f32 0.01, %v156_v21 }
  0xda   :  { %v150_v27 = vpop.f32.mrf.mxu0  ;;  %v158_v28 = vpop.f32.mrf.mxu1 }
  0xdb   :  { %v179_v29 = vsel %vm169_vm2, %v148_v20, %v174_v25  ;;  %v181_v30 = vsel %vm171_vm3, %v156_v21, %v176_v26  ;;  %v151_v31 = vadd.f32 %v150_v27, %v43_v19  ;;  %v159_v32 = vadd.f32 %v158_v28, %v53_v22 }
  0xdc   :  { %184 = vst [vmem:[%s340_s3] sm:$0xff] %v179_v29  ;;  %186 = vst [vmem:[%s340_s3 + $0x10] sm:$0xff] %v181_v30  ;;  %v225_v33 = vpop.f32.mrf.mxu0  ;;  %v229_v34 = vpop.f32.mrf.mxu1 }
  0xdd   :  { %vm170_vm4 = vcmp.gt.f32.partialorder %v151_v31, 0.0  ;;  %v175_v35 = vmul.f32 0.01, %v151_v31  ;;  %vm172_vm5 = vcmp.gt.f32.partialorder %v159_v32, 0.0  ;;  %v177_v36 = vmul.f32 0.01, %v159_v32 }
  0xde   :  { %v163_v38 = vpop.f32.mrf.mxu1 }
  0xdf   :  { %v180_v39 = vsel %vm170_vm4, %v151_v31, %v175_v35  ;;  %v182_v40 = vsel %vm172_vm5, %v159_v32, %v177_v36  ;;  %v164_v41 = vadd.f32 %v163_v38, %v58_v37 }
  0xe0   :  { %185 = vst [vmem:[%s340_s3 + $0x8] sm:$0xff] %v180_v39  ;;  %187 = vst [vmem:[%s340_s3 + $0x18] sm:$0xff] %v182_v40  ;;  %v232_v42 = vpop.f32.mrf.mxu1 }
  0xe1   :  { %vm173_vm6 = vcmp.gt.f32.partialorder %v164_v41, 0.0  ;;  %v178_v43 = vmul.f32 0.01, %v164_v41 }
  0xe2   :  { %v166_v44 = vpop.f32.mrf.mxu1 }
  0xe3   :  { %v183_v45 = vsel %vm173_vm6, %v164_v41, %v178_v43 }
  0xe4   :  { %188 = vst [vmem:[%s340_s3 + $0x20] sm:$0xff] %v183_v45  ;;  %v233_v46 = vpop.f32.mrf.mxu1 }

// kernel: forward_rnn.80
= control target key start
LH: loop header
LB: loop body
LE: loop exit
PB: predicated region body
PF: predicated region fallthrough
CT: control target
= control target key end

     0   :  { %v569_v1 = vmov 0.0   ;;  %vm570_vm0 = vmmov 0   ;;  %v571_v3 = vmov 0   ;;  %vm285_vm1 = vcmask 1043456   ;;  %s731_s1 = inlined_call_operand.vmem [shape: bf16[360,128], index: 1, kind: input, shape index: {}]   ;;  %s732_s0 = inlined_call_operand.vmem [shape: bf16[40,360], index: 0, kind: input, shape index: {}]   ;;  %s733_s2 = inlined_call_operand.vmem [shape: f32[40,1], index: 2, kind: input, shape index: {}]   ;;  %s734_s3 = inlined_call_operand.vmem [shape: f32[40,128], index: 3, kind: output, shape index: {}]  }
   0x1   :  { %v535_v0 = vld [vmem:[%s731_s1 + $0x78] sm:$0xff]   ;;  %504 = vmatprep.subr.bf16.mxu1 %v569_v1  ;;  %518 = vmatprep.mubr.msk.bf16.mxu1 %vm570_vm0, %v569_v1  ;;  %v537_v4 = vld [vmem:[%s731_s1 + $0x70] sm:$0xff]   ;;  %v540_v7 = vld [vmem:[%s731_s1 + $0x68] sm:$0xff]   ;;  %vm275_vm2 = vcmask 850944  }
   0x2   :  { %v536_v2 = vld [vmem:[%s731_s1 + $0x38] sm:$0xff]   ;;  %533 = vset.pattern.permute.xlu0 %v571_v3  ;;  %534 = vset.pattern.permute.xlu1 %v571_v3  ;;  %v538_v5 = vld [vmem:[%s731_s1 + $0x30] sm:$0xff]   ;;  %v541_v9 = vld [vmem:[%s731_s1 + $0x28] sm:$0xff]  }
   0x3   :  { %460 = vmatprep.subr.bf16.mxu0 %v535_v0  ;;  %v539_v6 = vld [vmem:[%s731_s1 + $0xb0] ss:$0 sps:$4 sm:$0xff]   ;;  %v542_v10 = vld [vmem:[%s731_s1 + $0xa8] sm:$0xff]   ;;  %v543_v11 = vld [vmem:[%s731_s1 + $0x60] sm:$0xff]  }
   0x4   :  { %461 = vmatpush3.bf16.msra.mxu0 %v536_v2  ;;  %v287_v8 = vsel %vm285_vm1, %v539_v6, 0  ;;  %v544_v12 = vld [vmem:[%s731_s1 + $0x20] sm:$0xff]   ;;  %v546_v14 = vld [vmem:[%s731_s1 + $0x58] sm:$0xff]   ;;  %v549_v17 = vld [vmem:[%s731_s1 + $0x50] sm:$0xff]  }
   0x5   :  { %462 = vmatprep.subr.bf16.mxu0 %v537_v4  ;;  %505 = vmatpush3.bf16.msra.mxu1 %v287_v8  ;;  %v545_v13 = vld [vmem:[%s731_s1 + $0xa0] sm:$0xff]   ;;  %v547_v15 = vld [vmem:[%s731_s1 + $0x18] sm:$0xff]   ;;  %v550_v18 = vld [vmem:[%s731_s1 + $0x10] sm:$0xff]  }
   0x6   :  { %506 = vmatprep.subr.bf16.mxu1 %v569_v1  ;;  %v548_v16 = vld [vmem:[%s731_s1 + $0x98] sm:$0xff]   ;;  %v551_v19 = vld [vmem:[%s731_s1 + $0x90] sm:$0xff]   ;;  %v552_v20 = vld [vmem:[%s731_s1 + $0x48] sm:$0xff]  }
   0x7   :  { %v553_v21 = vld [vmem:[%s731_s1 + $0x8] sm:$0xff]   ;;  %v560_v23 = vld [vmem:[%s732_s0 + $0x4] ss:$12 sps:$4 sm:$0xff]   ;;  %v73_v33 = vld [vmem:[%s733_s2 + $0x18] sm:$0xff] }
   0x8   :  { %463 = vmatpush3.bf16.msra.mxu0 %v538_v5  ;;  %v554_v22 = vld [vmem:[%s731_s1 + $0x88] sm:$0xff]   ;;  %v555_v24 = vld [vmem:[%s731_s1 + $0x40] sm:$0xff]   ;;  %321 = vmatprep.mubr.bf16.mxu0 %v560_v23  ;;  %v72_v28 = vld [vmem:[%s733_s2 + $0x10] sm:$0xff] }
   0x9   :  { %464 = vmatprep.subr.bf16.mxu0 %v540_v7  ;;  %507 = vmatpush3.bf16.msra.mxu1 %v542_v10  ;;  %v556_v25 = vld [vmem:[%s731_s1] sm:$0xff]   ;;  %v561_v30 = vld [vmem:[%s732_s0 + $0x8] ss:$12 sps:$4 sm:$0xff]   ;;  %v568_v40 = vld [vmem:[%s732_s0 + $0x38] ss:$0 sps:$4 sm:$0xff]  }
   0xa   :  { %508 = vmatprep.subr.bf16.mxu1 %v569_v1  ;;  %v557_v26 = vld [vmem:[%s731_s1 + $0x80] sm:$0xff]   ;;  %v71_v31 = vld [vmem:[%s733_s2 + $0x8] sm:$0xff]  ;;  %87 = vperm.xlu1 %534, %v72_v28   ;;  %v23_v35 = vld [vmem:[%s732_s0 + $0x30] sm:$0xff] }
   0xb   :  { %v70_v27 = vld [vmem:[%s733_s2] sm:$0xff]  ;;  %v562_v32 = vld [vmem:[%s732_s0 + $0x1c] ss:$12 sps:$4 sm:$0xff]   ;;  %v432_v38 = vcombine.high %v23_v35, %v23_v35  ;;  %v431_v39 = vcombine.low %v23_v35, %v23_v35 }
   0xc   :  { %465 = vmatpush3.bf16.msra.mxu0 %v541_v9  ;;  %77 = vperm.xlu0 %533, %v70_v27   ;;  %v558_v29 = vld [vmem:[%s732_s0] ss:$12 sps:$4 sm:$0xff]   ;;  %v564_v36 = vld [vmem:[%s732_s0 + $0x18] ss:$12 sps:$4 sm:$0xff]  }
   0xd   :  { %466 = vmatprep.subr.bf16.mxu0 %v543_v11  ;;  %509 = vmatpush3.bf16.msra.mxu1 %v545_v13  ;;  %v74_v34 = vld [vmem:[%s733_s2 + $0x20] sm:$0xff] }
   0xe   :  { %510 = vmatprep.subr.bf16.mxu1 %v569_v1  ;;  %92 = vperm.xlu1 %534, %v73_v33   ;;  %v565_v37 = vld [vmem:[%s732_s0 + $0x20] ss:$12 sps:$4 sm:$0xff]  }
  0x10   :  { %467 = vmatpush3.bf16.msra.mxu0 %v544_v12  ;;  %82 = vperm.xlu0 %533, %v71_v31  }
  0x11   :  { %468 = vmatprep.subr.bf16.mxu0 %v546_v14  ;;  %511 = vmatpush3.bf16.msra.mxu1 %v548_v16 }
  0x12   :  { %512 = vmatprep.subr.bf16.mxu1 %v569_v1 }
  0x14   :  { %469 = vmatpush3.bf16.msra.mxu0 %v547_v15  ;;  %97 = vperm.xlu0 %533, %v74_v34  }
  0x15   :  { %470 = vmatprep.subr.bf16.mxu0 %v549_v17  ;;  %513 = vmatpush3.bf16.msra.mxu1 %v551_v19 }
  0x16   :  { %514 = vmatprep.subr.bf16.mxu1 %v569_v1 }
  0x18   :  { %471 = vmatpush3.bf16.msra.mxu0 %v550_v18 }
  0x19   :  { %472 = vmatprep.subr.bf16.mxu0 %v552_v20  ;;  %515 = vmatpush3.bf16.msra.mxu1 %v554_v22 }
  0x1a   :  { %516 = vmatprep.subr.bf16.mxu1 %v569_v1 }
  0x1c   :  { %473 = vmatpush3.bf16.msra.mxu0 %v553_v21 }
  0x1d   :  { %474 = vmatprep.subr.bf16.mxu0 %v555_v24  ;;  %517 = vmatpush3.bf16.msra.mxu1 %v557_v26 }
  0x20   :  { %475 = vmatpush3.bf16.msra.mxu0 %v556_v25  ;;  %519 = vmatmul.mubr.msk.bf16.vlgmr.msra.gmra.mxu1 %vm275_vm2, %v561_v30 }
  0x21   :  { %522 = vmatprep.mubr.msk.bf16.mxu1 %vm570_vm0, %v569_v1 }
  0x23   :  { %322 = vmatmul.mubr.bf16.vlgmr.msra.gmra.mxu0 %v558_v29 }
  0x24   :  { %329 = vmatprep.mubr.bf16.mxu0 %v562_v32 }
  0x28   :  { %523 = vmatmul.mubr.msk.bf16.gmra.mxu1 %vm275_vm2, %v565_v37 }
  0x29   :  { %526 = vmatprep.mubr.msk.bf16.mxu1 %vm570_vm0, %v569_v1 }
  0x2b   :  { %330 = vmatmul.mubr.bf16.gmra.mxu0 %v564_v36 }
  0x2c   :  { %337 = vmatprep.mubr.bf16.mxu0 %v432_v38 }
  0x30   :  { %527 = vmatmul.mubr.msk.bf16.gmra.mxu1 %vm275_vm2, %v568_v40 }
  0x33   :  { %338 = vmatmul.mubr.bf16.gmra.mxu0 %v431_v39 }
  0x85   :  { %v88_v55 = vpop.permute.xlu1 %87 }
  0x87   :  { %v78_v41 = vpop.permute.xlu0 %77 }
  0x89   :  { %v93_v5 = vpop.permute.xlu1 %92 }
  0x8b   :  { %v83_v50 = vpop.permute.xlu0 %82 }
  0x8f   :  { %v98_v18 = vpop.permute.xlu0 %97 }
  0xe0   :  { %v379_v43 = vpop.f32.mrf.mxu1 }
  0xe2   :  { %v520_v45 = vpop.f32.mrf.mxu1 }
  0xe3   :  { %v476_v42 = vpop.f32.mrf.mxu0 }
  0xe4   :  { %v382_v48 = vpop.f32.mrf.mxu1 }
  0xe5   :  { %v477_v44 = vpop.f32.mrf.mxu0 }
  0xe6   :  { %v478_v46 = vadd.f32 %v477_v44, %v476_v42  ;;  %v521_v52 = vpop.f32.mrf.mxu1 }
  0xe7   :  { %v479_v47 = vpop.f32.mrf.mxu0 }
  0xe8   :  { %v324_v49 = vadd.f32 %v478_v46, %v78_v41  ;;  %v387_v57 = vpop.f32.mrf.mxu1 }
  0xe9   :  { %v480_v51 = vpop.f32.mrf.mxu0 }
  0xea   :  { %v380_v53 = vadd.f32 %v379_v43, %v324_v49  ;;  %v481_v54 = vadd.f32 %v480_v51, %v479_v47  ;;  %v524_v61 = vpop.f32.mrf.mxu1 }
  0xeb   :  { %v482_v56 = vpop.f32.mrf.mxu0 }
  0xec   :  { %vm401_vm3 = vcmp.gt.f32.partialorder %v380_v53, 0.0  ;;  %v406_v58 = vmul.f32 0.01, %v380_v53  ;;  %v327_v59 = vadd.f32 %v481_v54, %v83_v50  ;;  %v390_v2 = vpop.f32.mrf.mxu1 }
  0xed   :  { %v483_v60 = vpop.f32.mrf.mxu0 }
  0xee   :  { %v411_v62 = vsel %vm401_vm3, %v380_v53, %v406_v58  ;;  %v383_v63 = vadd.f32 %v382_v48, %v327_v59  ;;  %v484_v0 = vadd.f32 %v483_v60, %v482_v56  ;;  %v525_v7 = vpop.f32.mrf.mxu1 }
  0xef   :  { %416 = vst [vmem:[%s734_s3] sm:$0xff] %v411_v62  ;;  %v485_v1 = vpop.f32.mrf.mxu0 }
  0xf0   :  { %vm402_vm4 = vcmp.gt.f32.partialorder %v383_v63, 0.0  ;;  %v407_v3 = vmul.f32 0.01, %v383_v63  ;;  %v332_v4 = vadd.f32 %v484_v0, %v88_v55  ;;  %v395_v12 = vpop.f32.mrf.mxu1 }
  0xf1   :  { %v486_v6 = vpop.f32.mrf.mxu0 }
  0xf2   :  { %v412_v8 = vsel %vm402_vm4, %v383_v63, %v407_v3  ;;  %v388_v9 = vadd.f32 %v387_v57, %v332_v4  ;;  %v487_v10 = vadd.f32 %v486_v6, %v485_v1  ;;  %v528_v16 = vpop.f32.mrf.mxu1 }
  0xf3   :  { %417 = vst [vmem:[%s734_s3 + $0x8] sm:$0xff] %v412_v8  ;;  %v488_v11 = vpop.f32.mrf.mxu0 }
  0xf4   :  { %vm403_vm5 = vcmp.gt.f32.partialorder %v388_v9, 0.0  ;;  %v408_v13 = vmul.f32 0.01, %v388_v9  ;;  %v335_v14 = vadd.f32 %v487_v10, %v93_v5  ;;  %v398_v22 = vpop.f32.mrf.mxu1 }
  0xf5   :  { %v489_v15 = vpop.f32.mrf.mxu0 }
  0xf6   :  { %v413_v17 = vsel %vm403_vm5, %v388_v9, %v408_v13  ;;  %v391_v19 = vadd.f32 %v390_v2, %v335_v14  ;;  %v490_v20 = vadd.f32 %v489_v15, %v488_v11  ;;  %v529_v26 = vpop.f32.mrf.mxu1 }
  0xf7   :  { %418 = vst [vmem:[%s734_s3 + $0x10] sm:$0xff] %v413_v17  ;;  %v491_v21 = vpop.f32.mrf.mxu0 }
  0xf8   :  { %vm404_vm6 = vcmp.gt.f32.partialorder %v391_v19, 0.0  ;;  %v409_v23 = vmul.f32 0.01, %v391_v19  ;;  %v340_v24 = vadd.f32 %v490_v20, %v98_v18 }
  0xf9   :  { %v492_v25 = vpop.f32.mrf.mxu0 }
  0xfa   :  { %v414_v27 = vsel %vm404_vm6, %v391_v19, %v409_v23  ;;  %v396_v28 = vadd.f32 %v395_v12, %v340_v24 }
  0xfb   :  { %419 = vst [vmem:[%s734_s3 + $0x18] sm:$0xff] %v414_v27 }
  0xfc   :  { %vm405_vm7 = vcmp.gt.f32.partialorder %v396_v28, 0.0  ;;  %v410_v29 = vmul.f32 0.01, %v396_v28 }
  0xfe   :  { %v415_v30 = vsel %vm405_vm7, %v396_v28, %v410_v29 }
  0xff   :  { %420 = vst [vmem:[%s734_s3 + $0x20] sm:$0xff] %v415_v30 }

// kernel: forward_rnn.81
= control target key start
LH: loop header
LB: loop body
LE: loop exit
PB: predicated region body
PF: predicated region fallthrough
CT: control target
= control target key end

     0   :  { %v1028_v1 = vmov 0   ;;  %vm590_vm0 = vcmask 1043456   ;;  %vm586_vm1 = vcmask 850944   ;;  %s1375_s1 = inlined_call_operand.vmem [shape: bf16[360,512], index: 1, kind: input, shape index: {}]   ;;  %s1376_s0 = inlined_call_operand.vmem [shape: bf16[16,360], index: 0, kind: input, shape index: {}]   ;;  %s1377_s2 = inlined_call_operand.vmem [shape: f32[16,1], index: 2, kind: input, shape index: {}]   ;;  %s1378_s3 = inlined_call_operand.vmem [shape: f32[16,512], index: 3, kind: output, shape index: {}]  }
   0x1   :  { %v888_v0 = vld [vmem:[%s1375_s1 + $0xe4] ss:$16 sps:$4 sm:$0xff]   ;;  %678 = vmatprep.mubr.bf16.mxu1 %v1028_v1  ;;  %887 = vset.pattern.permute.xlu0 %v1028_v1  ;;  %v891_v3 = vld [vmem:[%s1375_s1 + $0xe0] ss:$16 sps:$4 sm:$0xff]   ;;  %v934_v32 = vld [vmem:[%s1375_s1 + $0xec] ss:$16 sps:$4 sm:$0xff]  }
   0x2   :  { %v107_v2 = vld [vmem:[%s1375_s1 + $0x2c0] sm:$0xff]  ;;  %603 = vmatprep.subr.bf16.mxu0 %v888_v0  ;;  %v1146_v34 = vld [vmem:[%s1376_s0 + $0x8] ss:$12 sps:$4 sm:$0xff]   ;;  %v940_v37 = vld [vmem:[%s1375_s1 + $0xcc] ss:$16 sps:$4 sm:$0xff]  }
   0x3   :  { %v879_v4 = vcombine.high %v107_v2, %v107_v2  ;;  %v878_v5 = vcombine.low %v107_v2, %v107_v2  ;;  %v893_v6 = vld [vmem:[%s1375_s1 + $0xc4] ss:$16 sps:$4 sm:$0xff]   ;;  %604 = vmatpush1.bf16.msra.mxu0 %v891_v3  ;;  %v897_v8 = vld [vmem:[%s1375_s1 + $0xc0] ss:$16 sps:$4 sm:$0xff]   ;;  %v932_v36 = vld [vmem:[%s1375_s1 + $0xe8] ss:$16 sps:$4 sm:$0xff]  }
   0x4   :  { %v895_v7 = vld [vmem:[%s1375_s1 + $0x2a4] ss:$16 sps:$4 sm:$0xff]   ;;  %605 = vmatprep.subr.bf16.mxu0 %v893_v6  ;;  %v898_v10 = vld [vmem:[%s1375_s1 + $0x2a0] ss:$16 sps:$4 sm:$0xff]   ;;  %v938_v40 = vld [vmem:[%s1375_s1 + $0xc8] ss:$16 sps:$4 sm:$0xff]  }
   0x5   :  { %882 = vmatprep.subr.msk.bf16.mxu1 %vm590_vm0, %v879_v4  ;;  %v592_v9 = vsel %vm590_vm0, %v878_v5, 0  ;;  %v899_v11 = vld [vmem:[%s1375_s1 + $0xa4] ss:$16 sps:$4 sm:$0xff]   ;;  %v903_v13 = vld [vmem:[%s1375_s1 + $0xa0] ss:$16 sps:$4 sm:$0xff]   ;;  %v108_v3 = vld [vmem:[%s1375_s1 + $0x2c8] sm:$0xff] }
   0x6   :  { %649 = vmatpush1.bf16.msra.mxu1 %v592_v9  ;;  %v901_v12 = vld [vmem:[%s1375_s1 + $0x284] ss:$16 sps:$4 sm:$0xff]   ;;  %v904_v15 = vld [vmem:[%s1375_s1 + $0x280] ss:$16 sps:$4 sm:$0xff]   ;;  %v946_v41 = vld [vmem:[%s1375_s1 + $0xac] ss:$16 sps:$4 sm:$0xff]   ;;  %v881_v6 = vcombine.high %v108_v3, %v108_v3 }
   0x7   :  { %650 = vmatprep.subr.bf16.mxu1 %v895_v7  ;;  %606 = vmatpush1.bf16.msra.mxu0 %v897_v8  ;;  %v905_v14 = vld [vmem:[%s1375_s1 + $0x84] ss:$16 sps:$4 sm:$0xff]   ;;  %v909_v17 = vld [vmem:[%s1375_s1 + $0x80] ss:$16 sps:$4 sm:$0xff]   ;;  %v944_v44 = vld [vmem:[%s1375_s1 + $0xa8] ss:$16 sps:$4 sm:$0xff]   ;;  %v880_v7 = vcombine.low %v108_v3, %v108_v3 }
   0x8   :  { %607 = vmatprep.subr.bf16.mxu0 %v899_v11  ;;  %v907_v16 = vld [vmem:[%s1375_s1 + $0x264] ss:$16 sps:$4 sm:$0xff]   ;;  %v910_v19 = vld [vmem:[%s1375_s1 + $0x260] ss:$16 sps:$4 sm:$0xff]   ;;  %v952_v45 = vld [vmem:[%s1375_s1 + $0x8c] ss:$16 sps:$4 sm:$0xff]  }
   0x9   :  { %v911_v18 = vld [vmem:[%s1375_s1 + $0x64] ss:$16 sps:$4 sm:$0xff]   ;;  %v915_v21 = vld [vmem:[%s1375_s1 + $0x60] ss:$16 sps:$4 sm:$0xff]   ;;  %v950_v48 = vld [vmem:[%s1375_s1 + $0x88] ss:$16 sps:$4 sm:$0xff]  }
   0xa   :  { %651 = vmatpush1.bf16.msra.mxu1 %v898_v10  ;;  %v913_v20 = vld [vmem:[%s1375_s1 + $0x244] ss:$16 sps:$4 sm:$0xff]   ;;  %v916_v23 = vld [vmem:[%s1375_s1 + $0x240] ss:$16 sps:$4 sm:$0xff]   ;;  %v958_v49 = vld [vmem:[%s1375_s1 + $0x6c] ss:$16 sps:$4 sm:$0xff]  }
   0xb   :  { %652 = vmatprep.subr.bf16.mxu1 %v901_v12  ;;  %608 = vmatpush1.bf16.msra.mxu0 %v903_v13  ;;  %v917_v22 = vld [vmem:[%s1375_s1 + $0x44] ss:$16 sps:$4 sm:$0xff]   ;;  %v921_v25 = vld [vmem:[%s1375_s1 + $0x40] ss:$16 sps:$4 sm:$0xff]   ;;  %v956_v53 = vld [vmem:[%s1375_s1 + $0x68] ss:$16 sps:$4 sm:$0xff]  }
   0xc   :  { %609 = vmatprep.subr.bf16.mxu0 %v905_v14  ;;  %v919_v24 = vld [vmem:[%s1375_s1 + $0x224] ss:$16 sps:$4 sm:$0xff]   ;;  %v922_v27 = vld [vmem:[%s1375_s1 + $0x220] ss:$16 sps:$4 sm:$0xff]   ;;  %v964_v54 = vld [vmem:[%s1375_s1 + $0x4c] ss:$16 sps:$4 sm:$0xff]  }
   0xd   :  { %v923_v26 = vld [vmem:[%s1375_s1 + $0x24] ss:$16 sps:$4 sm:$0xff]   ;;  %v927_v29 = vld [vmem:[%s1375_s1 + $0x20] ss:$16 sps:$4 sm:$0xff]   ;;  %v962_v57 = vld [vmem:[%s1375_s1 + $0x48] ss:$16 sps:$4 sm:$0xff]  }
   0xe   :  { %653 = vmatpush1.bf16.msra.mxu1 %v904_v15  ;;  %v925_v28 = vld [vmem:[%s1375_s1 + $0x204] ss:$16 sps:$4 sm:$0xff]   ;;  %v928_v31 = vld [vmem:[%s1375_s1 + $0x200] ss:$16 sps:$4 sm:$0xff]   ;;  %v970_v58 = vld [vmem:[%s1375_s1 + $0x2c] ss:$16 sps:$4 sm:$0xff]  }
   0xf   :  { %654 = vmatprep.subr.bf16.mxu1 %v907_v16  ;;  %610 = vmatpush1.bf16.msra.mxu0 %v909_v17  ;;  %v929_v30 = vld [vmem:[%s1375_s1 + $0x4] ss:$16 sps:$4 sm:$0xff]   ;;  %v935_v33 = vld [vmem:[%s1375_s1] ss:$16 sps:$4 sm:$0xff]   ;;  %v968_v61 = vld [vmem:[%s1375_s1 + $0x28] ss:$16 sps:$4 sm:$0xff]  }
  0x10   :  { %611 = vmatprep.subr.bf16.mxu0 %v911_v18  ;;  %v936_v35 = vld [vmem:[%s1375_s1 + $0x1e4] ss:$16 sps:$4 sm:$0xff]   ;;  %v941_v38 = vld [vmem:[%s1375_s1 + $0x1e0] ss:$16 sps:$4 sm:$0xff]   ;;  %v976_v62 = vld [vmem:[%s1375_s1 + $0xc] ss:$16 sps:$4 sm:$0xff]  }
  0x11   :  { %v942_v39 = vld [vmem:[%s1375_s1 + $0x1c4] ss:$16 sps:$4 sm:$0xff]   ;;  %v947_v42 = vld [vmem:[%s1375_s1 + $0x1c0] ss:$16 sps:$4 sm:$0xff]   ;;  %v974_v2 = vld [vmem:[%s1375_s1 + $0x8] ss:$16 sps:$4 sm:$0xff]  }
  0x12   :  { %655 = vmatpush1.bf16.msra.mxu1 %v910_v19  ;;  %v948_v43 = vld [vmem:[%s1375_s1 + $0x1a4] ss:$16 sps:$4 sm:$0xff]   ;;  %v953_v46 = vld [vmem:[%s1375_s1 + $0x1a0] ss:$16 sps:$4 sm:$0xff]   ;;  %v982_v4 = vld [vmem:[%s1375_s1 + $0x1ec] ss:$16 sps:$4 sm:$0xff]  }
  0x13   :  { %656 = vmatprep.subr.bf16.mxu1 %v913_v20  ;;  %612 = vmatpush1.bf16.msra.mxu0 %v915_v21  ;;  %v954_v47 = vld [vmem:[%s1375_s1 + $0x184] ss:$16 sps:$4 sm:$0xff]   ;;  %v959_v50 = vld [vmem:[%s1375_s1 + $0x180] ss:$16 sps:$4 sm:$0xff]   ;;  %v980_v8 = vld [vmem:[%s1375_s1 + $0x1e8] ss:$16 sps:$4 sm:$0xff]  }
  0x14   :  { %613 = vmatprep.subr.bf16.mxu0 %v917_v22  ;;  %v986_v51 = vld [vmem:[%s1376_s0 + $0x4] ss:$12 sps:$4 sm:$0xff]   ;;  %v1261_v10 = vld [vmem:[%s1376_s0] ss:$12 sps:$4 sm:$0xff]   ;;  %v598_v12 = vsel %vm590_vm0, %v880_v7, 0 }
  0x15   :  { %v960_v52 = vld [vmem:[%s1375_s1 + $0x164] ss:$16 sps:$4 sm:$0xff]   ;;  %635 = vmatprep.mubr.bf16.mxu0 %v986_v51  ;;  %v965_v55 = vld [vmem:[%s1375_s1 + $0x160] ss:$16 sps:$4 sm:$0xff]   ;;  %v989_v11 = vld [vmem:[%s1375_s1 + $0x1cc] ss:$16 sps:$4 sm:$0xff]  }
  0x16   :  { %657 = vmatpush1.bf16.msra.mxu1 %v916_v23  ;;  %v966_v56 = vld [vmem:[%s1375_s1 + $0x144] ss:$16 sps:$4 sm:$0xff]   ;;  %v971_v59 = vld [vmem:[%s1375_s1 + $0x140] ss:$16 sps:$4 sm:$0xff]   ;;  %v997_v13 = vld [vmem:[%s1375_s1 + $0x2ac] ss:$16 sps:$4 sm:$0xff]  }
  0x17   :  { %658 = vmatprep.subr.bf16.mxu1 %v919_v24  ;;  %614 = vmatpush1.bf16.msra.mxu0 %v921_v25  ;;  %v972_v60 = vld [vmem:[%s1375_s1 + $0x124] ss:$16 sps:$4 sm:$0xff]   ;;  %v977_v63 = vld [vmem:[%s1375_s1 + $0x120] ss:$16 sps:$4 sm:$0xff]   ;;  %v987_v14 = vld [vmem:[%s1375_s1 + $0x1c8] ss:$16 sps:$4 sm:$0xff]  }
  0x18   :  { %615 = vmatprep.subr.bf16.mxu0 %v923_v26  ;;  %v978_v0 = vld [vmem:[%s1375_s1 + $0x104] ss:$16 sps:$4 sm:$0xff]   ;;  %v983_v5 = vld [vmem:[%s1375_s1 + $0x100] ss:$16 sps:$4 sm:$0xff]   ;;  %v110_v15 = vld [vmem:[%s1377_s2 + $0x8] sm:$0xff] }
  0x19   :  { %v109_v9 = vld [vmem:[%s1377_s2] sm:$0xff]  ;;  %v994_v16 = vld [vmem:[%s1375_s1 + $0x1ac] ss:$16 sps:$4 sm:$0xff]   ;;  %v995_v17 = vld [vmem:[%s1375_s1 + $0x2a8] ss:$16 sps:$4 sm:$0xff]  }
  0x1a   :  { %659 = vmatpush1.bf16.msra.mxu1 %v922_v27  ;;  %113 = vperm.xlu0 %887, %v109_v9   ;;  %v1003_v18 = vld [vmem:[%s1375_s1 + $0x28c] ss:$16 sps:$4 sm:$0xff]   ;;  %v992_v19 = vld [vmem:[%s1375_s1 + $0x1a8] ss:$16 sps:$4 sm:$0xff]  }
  0x1b   :  { %660 = vmatprep.subr.bf16.mxu1 %v925_v28  ;;  %616 = vmatpush1.bf16.msra.mxu0 %v927_v29  ;;  %v1000_v20 = vld [vmem:[%s1375_s1 + $0x18c] ss:$16 sps:$4 sm:$0xff]   ;;  %v998_v22 = vld [vmem:[%s1375_s1 + $0x188] ss:$16 sps:$4 sm:$0xff]  }
  0x1c   :  { %617 = vmatprep.subr.bf16.mxu0 %v929_v30  ;;  %v1009_v21 = vld [vmem:[%s1375_s1 + $0x26c] ss:$16 sps:$4 sm:$0xff]   ;;  %v1007_v24 = vld [vmem:[%s1375_s1 + $0x268] ss:$16 sps:$4 sm:$0xff]  }
  0x1d   :  { %v1006_v23 = vld [vmem:[%s1375_s1 + $0x16c] ss:$16 sps:$4 sm:$0xff]   ;;  %v1004_v26 = vld [vmem:[%s1375_s1 + $0x168] ss:$16 sps:$4 sm:$0xff]  }
  0x1e   :  { %661 = vmatpush1.bf16.msra.mxu1 %v928_v31  ;;  %118 = vperm.xlu0 %887, %v110_v15   ;;  %v1015_v25 = vld [vmem:[%s1375_s1 + $0x24c] ss:$16 sps:$4 sm:$0xff]   ;;  %v1013_v28 = vld [vmem:[%s1375_s1 + $0x248] ss:$16 sps:$4 sm:$0xff]  }
  0x1f   :  { %689 = vmatprep.subr.bf16.mxu1 %v934_v32  ;;  %618 = vmatpush1.bf16.msra.mxu0 %v935_v33  ;;  %v1012_v27 = vld [vmem:[%s1375_s1 + $0x14c] ss:$16 sps:$4 sm:$0xff]   ;;  %v1010_v30 = vld [vmem:[%s1375_s1 + $0x148] ss:$16 sps:$4 sm:$0xff]  }
  0x20   :  { %619 = vmatprep.subr.bf16.mxu0 %v936_v35  ;;  %v1021_v29 = vld [vmem:[%s1375_s1 + $0x22c] ss:$16 sps:$4 sm:$0xff]   ;;  %v1019_v32 = vld [vmem:[%s1375_s1 + $0x228] ss:$16 sps:$4 sm:$0xff]  }
  0x21   :  { %883 = vmatmul.mubr.msk.bf16.vlgmr.msra.gmra.mxu1 %vm586_vm1, %v1146_v34  ;;  %v1018_v31 = vld [vmem:[%s1375_s1 + $0x12c] ss:$16 sps:$4 sm:$0xff]   ;;  %v1016_v35 = vld [vmem:[%s1375_s1 + $0x128] ss:$16 sps:$4 sm:$0xff]  }
  0x22   :  { %690 = vmatpush1.bf16.msra.mxu1 %v932_v36  ;;  %721 = vmatprep.mubr.bf16.mxu1 %v986_v51  ;;  %v1027_v33 = vld [vmem:[%s1375_s1 + $0x20c] ss:$16 sps:$4 sm:$0xff]  }
  0x23   :  { %691 = vmatprep.subr.bf16.mxu1 %v940_v37  ;;  %620 = vmatpush2.bf16.msra.mxu0 %v941_v38  ;;  %v1024_v36 = vld [vmem:[%s1375_s1 + $0x10c] ss:$16 sps:$4 sm:$0xff]   ;;  %v1025_v37 = vld [vmem:[%s1375_s1 + $0x208] ss:$16 sps:$4 sm:$0xff]  }
  0x24   :  { %621 = vmatprep.subr.bf16.mxu0 %v942_v39  ;;  %v1022_v38 = vld [vmem:[%s1375_s1 + $0x108] ss:$16 sps:$4 sm:$0xff]  }
  0x26   :  { %692 = vmatpush1.bf16.msra.mxu1 %v938_v40 }
  0x27   :  { %693 = vmatprep.subr.bf16.mxu1 %v946_v41  ;;  %622 = vmatpush2.bf16.msra.mxu0 %v947_v42 }
  0x28   :  { %623 = vmatprep.subr.bf16.mxu0 %v948_v43 }
  0x2a   :  { %694 = vmatpush1.bf16.msra.mxu1 %v944_v44 }
  0x2b   :  { %695 = vmatprep.subr.bf16.mxu1 %v952_v45  ;;  %624 = vmatpush2.bf16.msra.mxu0 %v953_v46 }
  0x2c   :  { %625 = vmatprep.subr.bf16.mxu0 %v954_v47 }
  0x2e   :  { %696 = vmatpush1.bf16.msra.mxu1 %v950_v48 }
  0x2f   :  { %697 = vmatprep.subr.bf16.mxu1 %v958_v49  ;;  %626 = vmatpush2.bf16.msra.mxu0 %v959_v50 }
  0x30   :  { %627 = vmatprep.subr.bf16.mxu0 %v960_v52 }
  0x32   :  { %698 = vmatpush1.bf16.msra.mxu1 %v956_v53 }
  0x33   :  { %699 = vmatprep.subr.bf16.mxu1 %v964_v54  ;;  %628 = vmatpush2.bf16.msra.mxu0 %v965_v55 }
  0x34   :  { %629 = vmatprep.subr.bf16.mxu0 %v966_v56 }
  0x36   :  { %700 = vmatpush1.bf16.msra.mxu1 %v962_v57 }
  0x37   :  { %701 = vmatprep.subr.bf16.mxu1 %v970_v58  ;;  %630 = vmatpush2.bf16.msra.mxu0 %v971_v59 }
  0x38   :  { %631 = vmatprep.subr.bf16.mxu0 %v972_v60 }
  0x3a   :  { %702 = vmatpush1.bf16.msra.mxu1 %v968_v61 }
  0x3b   :  { %703 = vmatprep.subr.bf16.mxu1 %v976_v62  ;;  %632 = vmatpush2.bf16.msra.mxu0 %v977_v63 }
  0x3c   :  { %633 = vmatprep.subr.bf16.mxu0 %v978_v0 }
  0x3e   :  { %704 = vmatpush1.bf16.msra.mxu1 %v974_v2 }
  0x3f   :  { %705 = vmatprep.subr.bf16.mxu1 %v982_v4  ;;  %634 = vmatpush2.bf16.msra.mxu0 %v983_v5 }
  0x40   :  { %884 = vmatprep.subr.msk.bf16.mxu0 %vm590_vm0, %v881_v6 }
  0x42   :  { %706 = vmatpush2.bf16.msra.mxu1 %v980_v8  ;;  %636 = vmatmul.mubr.bf16.vlgmr.msra.gmra.mxu0 %v1261_v10 }
  0x43   :  { %707 = vmatprep.subr.bf16.mxu1 %v989_v11  ;;  %735 = vmatpush1.bf16.msra.mxu0 %v598_v12 }
  0x44   :  { %764 = vmatprep.mubr.bf16.mxu0 %v1028_v1  ;;  %736 = vmatprep.subr.bf16.mxu0 %v997_v13  ;;  %v1001_v1 = vld [vmem:[%s1375_s1 + $0x288] ss:$16 sps:$4 sm:$0xff]  }
  0x46   :  { %708 = vmatpush2.bf16.msra.mxu1 %v987_v14 }
  0x47   :  { %709 = vmatprep.subr.bf16.mxu1 %v994_v16  ;;  %737 = vmatpush1.bf16.msra.mxu0 %v995_v17 }
  0x48   :  { %738 = vmatprep.subr.bf16.mxu0 %v1003_v18 }
  0x4a   :  { %710 = vmatpush2.bf16.msra.mxu1 %v992_v19 }
  0x4b   :  { %711 = vmatprep.subr.bf16.mxu1 %v1000_v20  ;;  %739 = vmatpush1.bf16.msra.mxu0 %v1001_v1 }
  0x4c   :  { %740 = vmatprep.subr.bf16.mxu0 %v1009_v21 }
  0x4e   :  { %712 = vmatpush2.bf16.msra.mxu1 %v998_v22 }
  0x4f   :  { %713 = vmatprep.subr.bf16.mxu1 %v1006_v23  ;;  %741 = vmatpush1.bf16.msra.mxu0 %v1007_v24 }
  0x50   :  { %742 = vmatprep.subr.bf16.mxu0 %v1015_v25 }
  0x52   :  { %714 = vmatpush2.bf16.msra.mxu1 %v1004_v26 }
  0x53   :  { %715 = vmatprep.subr.bf16.mxu1 %v1012_v27  ;;  %743 = vmatpush1.bf16.msra.mxu0 %v1013_v28 }
  0x54   :  { %744 = vmatprep.subr.bf16.mxu0 %v1021_v29 }
  0x56   :  { %716 = vmatpush2.bf16.msra.mxu1 %v1010_v30 }
  0x57   :  { %717 = vmatprep.subr.bf16.mxu1 %v1018_v31  ;;  %745 = vmatpush1.bf16.msra.mxu0 %v1019_v32 }
  0x58   :  { %746 = vmatprep.subr.bf16.mxu0 %v1027_v33 }
  0x5a   :  { %718 = vmatpush2.bf16.msra.mxu1 %v1016_v35 }
  0x5b   :  { %719 = vmatprep.subr.bf16.mxu1 %v1024_v36  ;;  %747 = vmatpush1.bf16.msra.mxu0 %v1025_v37 }
  0x5e   :  { %720 = vmatpush2.bf16.msra.mxu1 %v1022_v38  ;;  %885 = vmatmul.mubr.msk.bf16.vlgmr.msra.gmra.mxu0 %vm586_vm1, %v1146_v34 }
  0x61   :  { %722 = vmatmul.mubr.bf16.vlgmr.msra.gmra.mxu1 %v1261_v10 }
  0x95   :  { %v114_v40 = vpop.permute.xlu0 %113 }
  0x99   :  { %v119_v45 = vpop.permute.xlu0 %118 }
  0xe1   :  { %v680_v39 = vpop.f32.mrf.mxu1 }
  0xe3   :  { %v682_v41 = vpop.f32.mrf.mxu1 }
  0xe5   :  { %v684_v48 = vpop.f32.mrf.mxu1 }
  0xe7   :  { %v686_v54 = vpop.f32.mrf.mxu1 }
 0x102   :  { %v637_v42 = vpop.f32.mrf.mxu0 }
 0x103   :  { %v638_v43 = vadd.f32 %v637_v42, %v114_v40 }
 0x104   :  { %v639_v44 = vpop.f32.mrf.mxu0 }
 0x105   :  { %v681_v46 = vadd.f32 %v680_v39, %v638_v43  ;;  %v640_v47 = vadd.f32 %v639_v44, %v114_v40 }
 0x106   :  { %v641_v49 = vpop.f32.mrf.mxu0 }
 0x107   :  { %775 = vst [vmem:[%s1378_s3] sm:$0xff] %v681_v46  ;;  %v683_v50 = vadd.f32 %v682_v41, %v640_v47  ;;  %v642_v51 = vadd.f32 %v641_v49, %v119_v45 }
 0x108   :  { %v643_v34 = vpop.f32.mrf.mxu0 }
 0x109   :  { %776 = vst [vmem:[%s1378_s3 + $0x8] sm:$0xff] %v683_v50  ;;  %v685_v52 = vadd.f32 %v684_v48, %v642_v51  ;;  %v644_v53 = vadd.f32 %v643_v34, %v119_v45 }
 0x10b   :  { %779 = vst [vmem:[%s1378_s3 + $0x20] sm:$0xff] %v685_v52  ;;  %v687_v55 = vadd.f32 %v686_v54, %v644_v53 }
 0x10d   :  { %780 = vst [vmem:[%s1378_s3 + $0x28] sm:$0xff] %v687_v55 }
 0x11e   :  { %v766_v56 = vpop.f32.mrf.mxu0 }
 0x120   :  { %v768_v58 = vpop.f32.mrf.mxu0 }
 0x121   :  { %v723_v57 = vpop.f32.mrf.mxu1 }
 0x122   :  { %v724_v59 = vadd.f32 %v723_v57, %v114_v40  ;;  %v770_v0 = vpop.f32.mrf.mxu0 }
 0x123   :  { %v725_v60 = vpop.f32.mrf.mxu1 }
 0x124   :  { %v767_v61 = vadd.f32 %v766_v56, %v724_v59  ;;  %v726_v62 = vadd.f32 %v725_v60, %v114_v40  ;;  %v772_v7 = vpop.f32.mrf.mxu0 }
 0x125   :  { %v727_v63 = vpop.f32.mrf.mxu1 }
 0x126   :  { %777 = vst [vmem:[%s1378_s3 + $0x10] sm:$0xff] %v767_v61  ;;  %v769_v2 = vadd.f32 %v768_v58, %v726_v62  ;;  %v728_v3 = vadd.f32 %v727_v63, %v119_v45 }
 0x127   :  { %v729_v4 = vpop.f32.mrf.mxu1 }
 0x128   :  { %778 = vst [vmem:[%s1378_s3 + $0x18] sm:$0xff] %v769_v2  ;;  %v771_v5 = vadd.f32 %v770_v0, %v728_v3  ;;  %v730_v6 = vadd.f32 %v729_v4, %v119_v45 }
 0x12a   :  { %781 = vst [vmem:[%s1378_s3 + $0x30] sm:$0xff] %v771_v5  ;;  %v773_v8 = vadd.f32 %v772_v7, %v730_v6 }
 0x12c   :  { %782 = vst [vmem:[%s1378_s3 + $0x38] sm:$0xff] %v773_v8 }

// kernel: forward_rnn.82
= control target key start
LH: loop header
LB: loop body
LE: loop exit
PB: predicated region body
PF: predicated region fallthrough
CT: control target
= control target key end

     0   :  { %vm95_vm0 = vcmask 1043456   ;;  %vm96_vm1 = vcmask 1044480   ;;  %v261_v1 = vmov 0   ;;  %v262_v2 = vmov 65535   ;;  %s358_s1 = inlined_call_operand.vmem [shape: bf16[25,512], index: 1, kind: input, shape index: {}]   ;;  %s359_s0 = inlined_call_operand.vmem [shape: bf16[24,25], index: 0, kind: input, shape index: {}]   ;;  %s360_s2 = inlined_call_operand.vmem [shape: f32[24,1], index: 2, kind: input, shape index: {}]   ;;  %s361_s3 = inlined_call_operand.vmem [shape: f32[24,512], index: 3, kind: output, shape index: {}]  }
   0x1   :  { %v247_v0 = vld [vmem:[%s358_s1 + $0x24] ss:$16 sps:$4 sm:$0x1f]   ;;  %143 = vmatprep.mubr.bf16.mxu0 %v261_v1  ;;  %194 = vmatprep.mubr.bf16.mxu1 %v261_v1  ;;  %v97_v3 = vsel %vm95_vm0, 4294967295, %v262_v2  ;;  %v255_v11 = vld [vmem:[%s358_s1 + $0xc] ss:$16 sps:$4 sm:$0xff]  }
   0x2   :  { %245 = vset.pattern.permute.xlu0 %v261_v1  ;;  %246 = vset.pattern.permute.xlu1 %v261_v1  ;;  %v98_v4 = vsel %vm96_vm1, %v97_v3, 0  ;;  %v249_v5 = vld [vmem:[%s358_s1 + $0x2c] ss:$16 sps:$4 sm:$0x1f]   ;;  %v253_v10 = vld [vmem:[%s358_s1 + $0x4] ss:$16 sps:$4 sm:$0xff]  }
   0x3   :  { %v103_v6 = vand.u32 %v247_v0, %v98_v4  ;;  %v251_v7 = vld [vmem:[%s358_s1 + $0x20] ss:$16 sps:$4 sm:$0x1f]   ;;  %v252_v8 = vld [vmem:[%s358_s1 + $0x28] ss:$16 sps:$4 sm:$0x1f]   ;;  %v109_v9 = vand.u32 %v249_v5, %v98_v4 }
   0x4   :  { %v100_v12 = vand.u32 %v251_v7, %v98_v4  ;;  %v106_v13 = vand.u32 %v252_v8, %v98_v4  ;;  %v257_v14 = vld [vmem:[%s358_s1] ss:$16 sps:$4 sm:$0xff]   ;;  %v258_v15 = vld [vmem:[%s358_s1 + $0x8] ss:$16 sps:$4 sm:$0xff]   ;;  %vm88_vm2 = vcmask 203776  }
   0x5   :  { %123 = vmatprep.subr.bf16.mxu0 %v103_v6  ;;  %174 = vmatprep.subr.bf16.mxu1 %v109_v9  ;;  %v26_v16 = vld [vmem:[%s360_s2] sm:$0xff]  ;;  %v28_v17 = vld [vmem:[%s360_s2 + $0x10] sm:$0xff]  ;;  %v27_v19 = vld [vmem:[%s360_s2 + $0x8] sm:$0xff] }
   0x6   :  { %124 = vmatpush1.bf16.msra.mxu0 %v100_v12  ;;  %175 = vmatpush1.bf16.msra.mxu1 %v106_v13  ;;  %v259_v18 = vld [vmem:[%s359_s0] sm:$0xff]   ;;  %v260_v20 = vld [vmem:[%s359_s0 + $0x8] ss:$0 sps:$4 sm:$0xff]  }
   0x7   :  { %125 = vmatprep.subr.bf16.mxu0 %v253_v10  ;;  %176 = vmatprep.subr.bf16.mxu1 %v255_v11 }
   0x8   :  { %31 = vperm.xlu0 %245, %v26_v16   ;;  %41 = vperm.xlu1 %246, %v28_v17  }
   0xa   :  { %126 = vmatpush1.bf16.msra.mxu0 %v257_v14  ;;  %177 = vmatpush1.bf16.msra.mxu1 %v258_v15 }
   0xc   :  { %36 = vperm.xlu0 %245, %v27_v19  }
   0xd   :  { %239 = vmatmul.mubr.msk.bf16.vlgmr.msra.gmra.mxu0 %vm88_vm2, %v259_v18  ;;  %241 = vmatmul.mubr.msk.bf16.vlgmr.msra.gmra.mxu1 %vm88_vm2, %v259_v18 }
   0xe   :  { %153 = vmatprep.mubr.bf16.mxu0 %v261_v1  ;;  %204 = vmatprep.mubr.bf16.mxu1 %v261_v1 }
  0x15   :  { %240 = vmatmul.mubr.msk.bf16.gmra.mxu0 %vm88_vm2, %v260_v20  ;;  %242 = vmatmul.mubr.msk.bf16.gmra.mxu1 %vm88_vm2, %v260_v20 }
  0x83   :  { %v32_v21 = vpop.permute.xlu0 %31  ;;  %v42_v35 = vpop.permute.xlu1 %41 }
  0x87   :  { %v37_v26 = vpop.permute.xlu0 %36 }
  0xcd   :  { %v145_v22 = vpop.f32.mrf.mxu0  ;;  %v196_v23 = vpop.f32.mrf.mxu1 }
  0xce   :  { %v146_v24 = vadd.f32 %v145_v22, %v32_v21  ;;  %v197_v25 = vadd.f32 %v196_v23, %v32_v21 }
  0xcf   :  { %v147_v27 = vpop.f32.mrf.mxu0  ;;  %v198_v28 = vpop.f32.mrf.mxu1 }
  0xd0   :  { %213 = vst [vmem:[%s361_s3] sm:$0xff] %v146_v24  ;;  %215 = vst [vmem:[%s361_s3 + $0x10] sm:$0xff] %v197_v25  ;;  %v148_v29 = vadd.f32 %v147_v27, %v32_v21  ;;  %v199_v30 = vadd.f32 %v198_v28, %v32_v21 }
  0xd1   :  { %v149_v31 = vpop.f32.mrf.mxu0  ;;  %v200_v32 = vpop.f32.mrf.mxu1 }
  0xd2   :  { %214 = vst [vmem:[%s361_s3 + $0x8] sm:$0xff] %v148_v29  ;;  %216 = vst [vmem:[%s361_s3 + $0x18] sm:$0xff] %v199_v30  ;;  %v150_v33 = vadd.f32 %v149_v31, %v37_v26  ;;  %v201_v34 = vadd.f32 %v200_v32, %v37_v26 }
  0xd3   :  { %v151_v36 = vpop.f32.mrf.mxu0  ;;  %v202_v37 = vpop.f32.mrf.mxu1 }
  0xd4   :  { %217 = vst [vmem:[%s361_s3 + $0x20] sm:$0xff] %v150_v33  ;;  %219 = vst [vmem:[%s361_s3 + $0x30] sm:$0xff] %v201_v34  ;;  %v152_v38 = vadd.f32 %v151_v36, %v37_v26  ;;  %v203_v39 = vadd.f32 %v202_v37, %v37_v26 }
  0xd5   :  { %v155_v40 = vpop.f32.mrf.mxu0  ;;  %v206_v41 = vpop.f32.mrf.mxu1 }
  0xd6   :  { %218 = vst [vmem:[%s361_s3 + $0x28] sm:$0xff] %v152_v38  ;;  %220 = vst [vmem:[%s361_s3 + $0x38] sm:$0xff] %v203_v39  ;;  %v156_v42 = vadd.f32 %v155_v40, %v42_v35  ;;  %v207_v43 = vadd.f32 %v206_v41, %v42_v35 }
  0xd7   :  { %v157_v44 = vpop.f32.mrf.mxu0  ;;  %v208_v45 = vpop.f32.mrf.mxu1 }
  0xd8   :  { %221 = vst [vmem:[%s361_s3 + $0x40] sm:$0xff] %v156_v42  ;;  %223 = vst [vmem:[%s361_s3 + $0x50] sm:$0xff] %v207_v43  ;;  %v158_v46 = vadd.f32 %v157_v44, %v42_v35  ;;  %v209_v47 = vadd.f32 %v208_v45, %v42_v35 }
  0xd9   :  { %v159_v48 = vpop.f32.mrf.mxu0  ;;  %v210_v49 = vpop.f32.mrf.mxu1 }
  0xda   :  { %222 = vst [vmem:[%s361_s3 + $0x48] sm:$0xff] %v158_v46  ;;  %224 = vst [vmem:[%s361_s3 + $0x58] sm:$0xff] %v209_v47 }
  0xdb   :  { %v160_v50 = vpop.f32.mrf.mxu0  ;;  %v211_v51 = vpop.f32.mrf.mxu1 }

// kernel: forward_rnn.84
= control target key start
LH: loop header
LB: loop body
LE: loop exit
PB: predicated region body
PF: predicated region fallthrough
CT: control target
= control target key end

     0   :  { %v601_v1 = vmov 0   ;;  %vm334_vm0 = vcmask 1041408   ;;  %vm327_vm1 = vcmask 424960   ;;  %s818_s1 = inlined_call_operand.vmem [shape: bf16[180,512], index: 1, kind: input, shape index: {}]   ;;  %s819_s0 = inlined_call_operand.vmem [shape: bf16[24,180], index: 0, kind: input, shape index: {}]   ;;  %s820_s2 = inlined_call_operand.vmem [shape: f32[24,1], index: 2, kind: input, shape index: {}]   ;;  %s821_s3 = inlined_call_operand.vmem [shape: f32[24,512], index: 3, kind: output, shape index: {}]  }
   0x1   :  { %v526_v0 = vld [vmem:[%s818_s1 + $0xe4] ss:$16 sps:$4 sm:$0xff]   ;;  %524 = vset.pattern.permute.xlu0 %v601_v1  ;;  %525 = vset.pattern.permute.xlu1 %v601_v1  ;;  %v528_v2 = vld [vmem:[%s818_s1 + $0xec] ss:$16 sps:$4 sm:$0xff]   ;;  %v530_v3 = vld [vmem:[%s818_s1 + $0xe0] ss:$16 sps:$4 sm:$0xff]  }
   0x2   :  { %347 = vmatprep.subr.bf16.mxu0 %v526_v0  ;;  %v531_v4 = vld [vmem:[%s818_s1 + $0xe8] ss:$16 sps:$4 sm:$0xff]   ;;  %398 = vmatprep.subr.bf16.mxu1 %v528_v2  ;;  %v532_v5 = vld [vmem:[%s818_s1 + $0xc4] ss:$16 sps:$4 sm:$0xff]   ;;  %v534_v6 = vld [vmem:[%s818_s1 + $0xcc] ss:$16 sps:$4 sm:$0xff]  }
   0x3   :  { %348 = vmatpush1.bf16.msra.mxu0 %v530_v3  ;;  %399 = vmatpush1.bf16.msra.mxu1 %v531_v4  ;;  %v536_v7 = vld [vmem:[%s818_s1 + $0xc0] ss:$16 sps:$4 sm:$0xff]   ;;  %v537_v8 = vld [vmem:[%s818_s1 + $0xc8] ss:$16 sps:$4 sm:$0xff]   ;;  %v538_v9 = vld [vmem:[%s818_s1 + $0xa4] ss:$16 sps:$4 sm:$0xff]  }
   0x4   :  { %349 = vmatprep.subr.bf16.mxu0 %v532_v5  ;;  %400 = vmatprep.subr.bf16.mxu1 %v534_v6  ;;  %v540_v10 = vld [vmem:[%s818_s1 + $0xac] ss:$16 sps:$4 sm:$0xff]   ;;  %v542_v11 = vld [vmem:[%s818_s1 + $0xa0] ss:$16 sps:$4 sm:$0xff]   ;;  %v543_v12 = vld [vmem:[%s818_s1 + $0xa8] ss:$16 sps:$4 sm:$0xff]  }
   0x5   :  { %v544_v13 = vld [vmem:[%s818_s1 + $0x84] ss:$16 sps:$4 sm:$0xff]   ;;  %v546_v14 = vld [vmem:[%s818_s1 + $0x8c] ss:$16 sps:$4 sm:$0xff]   ;;  %v548_v15 = vld [vmem:[%s818_s1 + $0x80] ss:$16 sps:$4 sm:$0xff]  }
   0x6   :  { %v549_v16 = vld [vmem:[%s818_s1 + $0x88] ss:$16 sps:$4 sm:$0xff]   ;;  %v550_v17 = vld [vmem:[%s818_s1 + $0x64] ss:$16 sps:$4 sm:$0xff]   ;;  %v552_v18 = vld [vmem:[%s818_s1 + $0x6c] ss:$16 sps:$4 sm:$0xff]  }
   0x7   :  { %350 = vmatpush1.bf16.msra.mxu0 %v536_v7  ;;  %401 = vmatpush1.bf16.msra.mxu1 %v537_v8  ;;  %v554_v19 = vld [vmem:[%s818_s1 + $0x60] ss:$16 sps:$4 sm:$0xff]   ;;  %v555_v20 = vld [vmem:[%s818_s1 + $0x68] ss:$16 sps:$4 sm:$0xff]   ;;  %v556_v21 = vld [vmem:[%s818_s1 + $0x44] ss:$16 sps:$4 sm:$0xff]  }
   0x8   :  { %351 = vmatprep.subr.bf16.mxu0 %v538_v9  ;;  %402 = vmatprep.subr.bf16.mxu1 %v540_v10  ;;  %v558_v22 = vld [vmem:[%s818_s1 + $0x4c] ss:$16 sps:$4 sm:$0xff]   ;;  %v560_v23 = vld [vmem:[%s818_s1 + $0x40] ss:$16 sps:$4 sm:$0xff]   ;;  %v561_v24 = vld [vmem:[%s818_s1 + $0x48] ss:$16 sps:$4 sm:$0xff]  }
   0x9   :  { %v562_v25 = vld [vmem:[%s818_s1 + $0x24] ss:$16 sps:$4 sm:$0xff]   ;;  %v564_v26 = vld [vmem:[%s818_s1 + $0x2c] ss:$16 sps:$4 sm:$0xff]   ;;  %v566_v27 = vld [vmem:[%s818_s1 + $0x20] ss:$16 sps:$4 sm:$0xff]  }
   0xa   :  { %v567_v28 = vld [vmem:[%s818_s1 + $0x28] ss:$16 sps:$4 sm:$0xff]   ;;  %v568_v29 = vld [vmem:[%s818_s1 + $0x4] ss:$16 sps:$4 sm:$0xff]   ;;  %v570_v30 = vld [vmem:[%s818_s1 + $0xc] ss:$16 sps:$4 sm:$0xff]  }
   0xb   :  { %352 = vmatpush1.bf16.msra.mxu0 %v542_v11  ;;  %403 = vmatpush1.bf16.msra.mxu1 %v543_v12  ;;  %v62_v31 = vld [vmem:[%s818_s1 + $0x160] sm:$0x33]  ;;  %v63_v32 = vld [vmem:[%s818_s1 + $0x168] sm:$0x33]  ;;  %v66_v41 = vld [vmem:[%s820_s2 + $0x10] sm:$0xff] }
   0xc   :  { %353 = vmatprep.subr.bf16.mxu0 %v544_v13  ;;  %404 = vmatprep.subr.bf16.mxu1 %v546_v14  ;;  %v572_v33 = vld [vmem:[%s818_s1] ss:$16 sps:$4 sm:$0xff]   ;;  %v573_v34 = vld [vmem:[%s818_s1 + $0x8] ss:$16 sps:$4 sm:$0xff]   ;;  %v514_v35 = vcombine.high %v62_v31, %v62_v31  ;;  %v516_v36 = vcombine.high %v63_v32, %v63_v32  ;;  %v513_v37 = vcombine.low %v62_v31, %v62_v31  ;;  %v598_v39 = vld [vmem:[%s819_s0 + $0x4] ss:$8 sps:$4 sm:$0xff]  }
   0xd   :  { %v515_v38 = vcombine.low %v63_v32, %v63_v32  ;;  %v64_v40 = vld [vmem:[%s820_s2] sm:$0xff]  ;;  %v580_v45 = vld [vmem:[%s818_s1 + $0x14c] ss:$16 sps:$4 sm:$0xff]   ;;  %518 = vmatprep.mubr.msk.bf16.mxu0 %vm327_vm1, %v598_v39  ;;  %521 = vmatprep.mubr.msk.bf16.mxu1 %vm327_vm1, %v598_v39  ;;  %v583_v47 = vld [vmem:[%s818_s1 + $0x148] ss:$16 sps:$4 sm:$0xff]  }
   0xe   :  { %v336_v42 = vsel %vm334_vm0, %v513_v37, 0  ;;  %v578_v44 = vld [vmem:[%s818_s1 + $0x144] ss:$16 sps:$4 sm:$0xff]   ;;  %69 = vperm.xlu0 %524, %v64_v40   ;;  %79 = vperm.xlu1 %525, %v66_v41   ;;  %v582_v46 = vld [vmem:[%s818_s1 + $0x140] ss:$16 sps:$4 sm:$0xff]   ;;  %v65_v48 = vld [vmem:[%s820_s2 + $0x8] sm:$0xff] }
   0xf   :  { %354 = vmatpush1.bf16.msra.mxu0 %v548_v15  ;;  %405 = vmatpush1.bf16.msra.mxu1 %v549_v16  ;;  %v342_v43 = vsel %vm334_vm0, %v515_v38, 0  ;;  %v584_v49 = vld [vmem:[%s818_s1 + $0x124] ss:$16 sps:$4 sm:$0xff]   ;;  %v586_v50 = vld [vmem:[%s818_s1 + $0x12c] ss:$16 sps:$4 sm:$0xff]  }
  0x10   :  { %355 = vmatprep.subr.bf16.mxu0 %v550_v17  ;;  %406 = vmatprep.subr.bf16.mxu1 %v552_v18  ;;  %v588_v51 = vld [vmem:[%s818_s1 + $0x120] ss:$16 sps:$4 sm:$0xff]   ;;  %v589_v52 = vld [vmem:[%s818_s1 + $0x128] ss:$16 sps:$4 sm:$0xff]   ;;  %v590_v53 = vld [vmem:[%s818_s1 + $0x104] ss:$16 sps:$4 sm:$0xff]  }
  0x11   :  { %v592_v54 = vld [vmem:[%s818_s1 + $0x10c] ss:$16 sps:$4 sm:$0xff]   ;;  %v594_v55 = vld [vmem:[%s818_s1 + $0x100] ss:$16 sps:$4 sm:$0xff]   ;;  %v595_v56 = vld [vmem:[%s818_s1 + $0x108] ss:$16 sps:$4 sm:$0xff]  }
  0x12   :  { %74 = vperm.xlu0 %524, %v65_v48   ;;  %v17_v57 = vld [vmem:[%s819_s0 + $0x10] sm:$0xff]  ;;  %v596_v58 = vld [vmem:[%s819_s0] ss:$8 sps:$4 sm:$0xff]  }
  0x13   :  { %356 = vmatpush1.bf16.msra.mxu0 %v554_v19  ;;  %407 = vmatpush1.bf16.msra.mxu1 %v555_v20  ;;  %v468_v59 = vcombine.high %v17_v57, %v17_v57  ;;  %v467_v60 = vcombine.low %v17_v57, %v17_v57 }
  0x14   :  { %357 = vmatprep.subr.bf16.mxu0 %v556_v21  ;;  %408 = vmatprep.subr.bf16.mxu1 %v558_v22 }
  0x17   :  { %358 = vmatpush1.bf16.msra.mxu0 %v560_v23  ;;  %409 = vmatpush1.bf16.msra.mxu1 %v561_v24 }
  0x18   :  { %359 = vmatprep.subr.bf16.mxu0 %v562_v25  ;;  %410 = vmatprep.subr.bf16.mxu1 %v564_v26 }
  0x1b   :  { %360 = vmatpush1.bf16.msra.mxu0 %v566_v27  ;;  %411 = vmatpush1.bf16.msra.mxu1 %v567_v28 }
  0x1c   :  { %361 = vmatprep.subr.bf16.mxu0 %v568_v29  ;;  %412 = vmatprep.subr.bf16.mxu1 %v570_v30 }
  0x1f   :  { %362 = vmatpush1.bf16.msra.mxu0 %v572_v33  ;;  %413 = vmatpush1.bf16.msra.mxu1 %v573_v34 }
  0x20   :  { %517 = vmatprep.subr.msk.bf16.mxu0 %vm334_vm0, %v514_v35  ;;  %520 = vmatprep.subr.msk.bf16.mxu1 %vm334_vm0, %v516_v36 }
  0x23   :  { %372 = vmatpush2.bf16.msra.mxu0 %v336_v42  ;;  %423 = vmatpush2.bf16.msra.mxu1 %v342_v43 }
  0x24   :  { %373 = vmatprep.subr.bf16.mxu0 %v578_v44  ;;  %424 = vmatprep.subr.bf16.mxu1 %v580_v45 }
  0x27   :  { %374 = vmatpush2.bf16.msra.mxu0 %v582_v46  ;;  %425 = vmatpush2.bf16.msra.mxu1 %v583_v47 }
  0x28   :  { %375 = vmatprep.subr.bf16.mxu0 %v584_v49  ;;  %426 = vmatprep.subr.bf16.mxu1 %v586_v50 }
  0x2b   :  { %376 = vmatpush2.bf16.msra.mxu0 %v588_v51  ;;  %427 = vmatpush2.bf16.msra.mxu1 %v589_v52 }
  0x2c   :  { %377 = vmatprep.subr.bf16.mxu0 %v590_v53  ;;  %428 = vmatprep.subr.bf16.mxu1 %v592_v54 }
  0x2f   :  { %378 = vmatpush2.bf16.msra.mxu0 %v594_v55  ;;  %429 = vmatpush2.bf16.msra.mxu1 %v595_v56 }
  0x32   :  { %380 = vmatmul.mubr.bf16.vlgmr.msra.gmra.mxu0 %v596_v58  ;;  %431 = vmatmul.mubr.bf16.vlgmr.msra.gmra.mxu1 %v596_v58 }
  0x33   :  { %519 = vmatprep.mubr.msk.bf16.mxu0 %vm327_vm1, %v468_v59  ;;  %522 = vmatprep.mubr.msk.bf16.mxu1 %vm327_vm1, %v468_v59 }
  0x3a   :  { %390 = vmatmul.mubr.bf16.gmra.mxu0 %v467_v60  ;;  %441 = vmatmul.mubr.bf16.gmra.mxu1 %v467_v60 }
  0x89   :  { %v70_v61 = vpop.permute.xlu0 %69  ;;  %v80_v11 = vpop.permute.xlu1 %79 }
  0x8d   :  { %v75_v2 = vpop.permute.xlu0 %74 }
  0xf2   :  { %v381_v62 = vpop.f32.mrf.mxu0  ;;  %v432_v63 = vpop.f32.mrf.mxu1 }
  0xf3   :  { %v382_v0 = vadd.f32 %v381_v62, %v70_v61  ;;  %v433_v1 = vadd.f32 %v432_v63, %v70_v61 }
  0xf4   :  { %v383_v3 = vpop.f32.mrf.mxu0  ;;  %v434_v4 = vpop.f32.mrf.mxu1 }
  0xf5   :  { %449 = vst [vmem:[%s821_s3] sm:$0xff] %v382_v0  ;;  %451 = vst [vmem:[%s821_s3 + $0x10] sm:$0xff] %v433_v1  ;;  %v384_v5 = vadd.f32 %v383_v3, %v70_v61  ;;  %v435_v6 = vadd.f32 %v434_v4, %v70_v61 }
  0xf6   :  { %v385_v7 = vpop.f32.mrf.mxu0  ;;  %v436_v8 = vpop.f32.mrf.mxu1 }
  0xf7   :  { %450 = vst [vmem:[%s821_s3 + $0x8] sm:$0xff] %v384_v5  ;;  %452 = vst [vmem:[%s821_s3 + $0x18] sm:$0xff] %v435_v6  ;;  %v386_v9 = vadd.f32 %v385_v7, %v75_v2  ;;  %v437_v10 = vadd.f32 %v436_v8, %v75_v2 }
  0xf8   :  { %v387_v12 = vpop.f32.mrf.mxu0  ;;  %v438_v13 = vpop.f32.mrf.mxu1 }
  0xf9   :  { %453 = vst [vmem:[%s821_s3 + $0x20] sm:$0xff] %v386_v9  ;;  %455 = vst [vmem:[%s821_s3 + $0x30] sm:$0xff] %v437_v10  ;;  %v388_v14 = vadd.f32 %v387_v12, %v75_v2  ;;  %v439_v15 = vadd.f32 %v438_v13, %v75_v2 }
  0xfa   :  { %v391_v16 = vpop.f32.mrf.mxu0  ;;  %v442_v17 = vpop.f32.mrf.mxu1 }
  0xfb   :  { %454 = vst [vmem:[%s821_s3 + $0x28] sm:$0xff] %v388_v14  ;;  %456 = vst [vmem:[%s821_s3 + $0x38] sm:$0xff] %v439_v15  ;;  %v392_v18 = vadd.f32 %v391_v16, %v80_v11  ;;  %v443_v19 = vadd.f32 %v442_v17, %v80_v11 }
  0xfc   :  { %v393_v20 = vpop.f32.mrf.mxu0  ;;  %v444_v21 = vpop.f32.mrf.mxu1 }
  0xfd   :  { %457 = vst [vmem:[%s821_s3 + $0x40] sm:$0xff] %v392_v18  ;;  %459 = vst [vmem:[%s821_s3 + $0x50] sm:$0xff] %v443_v19  ;;  %v394_v22 = vadd.f32 %v393_v20, %v80_v11  ;;  %v445_v23 = vadd.f32 %v444_v21, %v80_v11 }
  0xfe   :  { %v395_v24 = vpop.f32.mrf.mxu0  ;;  %v446_v25 = vpop.f32.mrf.mxu1 }
  0xff   :  { %458 = vst [vmem:[%s821_s3 + $0x48] sm:$0xff] %v394_v22  ;;  %460 = vst [vmem:[%s821_s3 + $0x58] sm:$0xff] %v445_v23 }
 0x100   :  { %v396_v26 = vpop.f32.mrf.mxu0  ;;  %v447_v27 = vpop.f32.mrf.mxu1 }

// kernel: forward_rnn.85
= control target key start
LH: loop header
LB: loop body
LE: loop exit
PB: predicated region body
PF: predicated region fallthrough
CT: control target
= control target key end

     0   :  { %vm109_vm0 = vcmask 1041408   ;;  %v363_v2 = vmov 0   ;;  %vm99_vm1 = vcmask 162816   ;;  %s496_s1 = inlined_call_operand.vmem [shape: bf16[20,512], index: 1, kind: input, shape index: {}]   ;;  %s497_s0 = inlined_call_operand.vmem [shape: bf16[40,20], index: 0, kind: input, shape index: {}]   ;;  %s498_s2 = inlined_call_operand.vmem [shape: f32[40,1], index: 2, kind: input, shape index: {}]   ;;  %s499_s3 = inlined_call_operand.vmem [shape: f32[40,512], index: 3, kind: output, shape index: {}]  }
   0x1   :  { %v24_v0 = vld [vmem:[%s496_s1 + $0x20] sm:$0x33]  ;;  %v25_v1 = vld [vmem:[%s496_s1 + $0x28] sm:$0x33]  ;;  %154 = vmatprep.mubr.bf16.mxu0 %v363_v2  ;;  %215 = vmatprep.mubr.bf16.mxu1 %v363_v2  ;;  %v28_v15 = vld [vmem:[%s498_s2 + $0x10] sm:$0xff] }
   0x2   :  { %v336_v3 = vcombine.high %v24_v0, %v24_v0  ;;  %v338_v4 = vcombine.high %v25_v1, %v25_v1  ;;  %v335_v5 = vcombine.low %v24_v0, %v24_v0  ;;  %v337_v6 = vcombine.low %v25_v1, %v25_v1  ;;  %v354_v7 = vld [vmem:[%s496_s1 + $0x4] ss:$16 sps:$4 sm:$0xff]   ;;  %348 = vset.pattern.permute.xlu0 %v363_v2  ;;  %v356_v8 = vld [vmem:[%s496_s1 + $0xc] ss:$16 sps:$4 sm:$0xff]   ;;  %v358_v11 = vld [vmem:[%s496_s1] ss:$16 sps:$4 sm:$0xff]  }
   0x3   :  { %349 = vset.pattern.permute.xlu1 %v363_v2  ;;  %v359_v12 = vld [vmem:[%s496_s1 + $0x8] ss:$16 sps:$4 sm:$0xff]   ;;  %v26_v13 = vld [vmem:[%s498_s2] sm:$0xff]  ;;  %v362_v20 = vld [vmem:[%s497_s0 + $0x10] ss:$0 sps:$4 sm:$0xff]  }
   0x4   :  { %339 = vmatprep.subr.msk.bf16.mxu0 %vm109_vm0, %v336_v3  ;;  %343 = vmatprep.subr.msk.bf16.mxu1 %vm109_vm0, %v338_v4  ;;  %v111_v9 = vsel %vm109_vm0, %v335_v5, 0  ;;  %v117_v10 = vsel %vm109_vm0, %v337_v6, 0  ;;  %v360_v14 = vld [vmem:[%s497_s0] sm:$0xff]   ;;  %v27_v16 = vld [vmem:[%s498_s2 + $0x8] sm:$0xff]  ;;  %v29_v17 = vld [vmem:[%s498_s2 + $0x18] sm:$0xff] }
   0x5   :  { %135 = vmatpush1.bf16.msra.mxu0 %v111_v9  ;;  %196 = vmatpush1.bf16.msra.mxu1 %v117_v10  ;;  %v30_v18 = vld [vmem:[%s498_s2 + $0x20] sm:$0xff]  ;;  %v361_v19 = vld [vmem:[%s497_s0 + $0x8] sm:$0xff]  }
   0x6   :  { %136 = vmatprep.subr.bf16.mxu0 %v354_v7  ;;  %197 = vmatprep.subr.bf16.mxu1 %v356_v8 }
   0x7   :  { %33 = vperm.xlu0 %348, %v26_v13   ;;  %43 = vperm.xlu1 %349, %v28_v15  }
   0x9   :  { %137 = vmatpush1.bf16.msra.mxu0 %v358_v11  ;;  %198 = vmatpush1.bf16.msra.mxu1 %v359_v12 }
   0xb   :  { %38 = vperm.xlu0 %348, %v27_v16   ;;  %48 = vperm.xlu1 %349, %v29_v17  }
   0xc   :  { %340 = vmatmul.mubr.msk.bf16.vlgmr.msra.gmra.mxu0 %vm99_vm1, %v360_v14  ;;  %344 = vmatmul.mubr.msk.bf16.vlgmr.msra.gmra.mxu1 %vm99_vm1, %v360_v14 }
   0xd   :  { %164 = vmatprep.mubr.bf16.mxu0 %v363_v2  ;;  %225 = vmatprep.mubr.bf16.mxu1 %v363_v2 }
   0xf   :  { %53 = vperm.xlu0 %348, %v30_v18  }
  0x14   :  { %341 = vmatmul.mubr.msk.bf16.gmra.mxu0 %vm99_vm1, %v361_v19  ;;  %345 = vmatmul.mubr.msk.bf16.gmra.mxu1 %vm99_vm1, %v361_v19 }
  0x15   :  { %174 = vmatprep.mubr.bf16.mxu0 %v363_v2  ;;  %235 = vmatprep.mubr.bf16.mxu1 %v363_v2 }
  0x1c   :  { %342 = vmatmul.mubr.msk.bf16.gmra.mxu0 %vm99_vm1, %v362_v20  ;;  %346 = vmatmul.mubr.msk.bf16.gmra.mxu1 %vm99_vm1, %v362_v20 }
  0x82   :  { %v34_v21 = vpop.permute.xlu0 %33  ;;  %v44_v31 = vpop.permute.xlu1 %43 }
  0x86   :  { %v39_v26 = vpop.permute.xlu0 %38  ;;  %v49_v56 = vpop.permute.xlu1 %48 }
  0x8a   :  { %v54_v13 = vpop.permute.xlu0 %53 }
  0xcc   :  { %v156_v22 = vpop.f32.mrf.mxu0  ;;  %v217_v23 = vpop.f32.mrf.mxu1 }
  0xcd   :  { %v157_v24 = vadd.f32 %v156_v22, %v34_v21  ;;  %v218_v25 = vadd.f32 %v217_v23, %v34_v21 }
  0xce   :  { %v158_v27 = vpop.f32.mrf.mxu0  ;;  %v219_v28 = vpop.f32.mrf.mxu1 }
  0xcf   :  { %vm244_vm2 = vcmp.gt.f32.partialorder %v157_v24, 0.0  ;;  %v264_v29 = vmul.f32 0.01, %v157_v24  ;;  %vm246_vm3 = vcmp.gt.f32.partialorder %v218_v25, 0.0  ;;  %v266_v30 = vmul.f32 0.01, %v218_v25 }
  0xd0   :  { %v159_v32 = vadd.f32 %v158_v27, %v34_v21  ;;  %v220_v33 = vadd.f32 %v219_v28, %v34_v21  ;;  %v160_v34 = vpop.f32.mrf.mxu0  ;;  %v221_v35 = vpop.f32.mrf.mxu1 }
  0xd1   :  { %v284_v36 = vsel %vm244_vm2, %v157_v24, %v264_v29  ;;  %v286_v37 = vsel %vm246_vm3, %v218_v25, %v266_v30  ;;  %v161_v38 = vadd.f32 %v160_v34, %v39_v26  ;;  %v222_v39 = vadd.f32 %v221_v35, %v39_v26 }
  0xd2   :  { %304 = vst [vmem:[%s499_s3] sm:$0xff] %v284_v36  ;;  %306 = vst [vmem:[%s499_s3 + $0x10] sm:$0xff] %v286_v37  ;;  %vm245_vm4 = vcmp.gt.f32.partialorder %v159_v32, 0.0  ;;  %v265_v40 = vmul.f32 0.01, %v159_v32  ;;  %vm247_vm5 = vcmp.gt.f32.partialorder %v220_v33, 0.0  ;;  %v162_v42 = vpop.f32.mrf.mxu0  ;;  %v223_v43 = vpop.f32.mrf.mxu1 }
  0xd3   :  { %v267_v41 = vmul.f32 0.01, %v220_v33  ;;  %vm248_vm6 = vcmp.gt.f32.partialorder %v161_v38, 0.0  ;;  %v268_v44 = vmul.f32 0.01, %v161_v38  ;;  %vm250_vm7 = vcmp.gt.f32.partialorder %v222_v39, 0.0 }
  0xd4   :  { %v270_v45 = vmul.f32 0.01, %v222_v39  ;;  %v285_v46 = vsel %vm245_vm4, %v159_v32, %v265_v40  ;;  %v163_v48 = vadd.f32 %v162_v42, %v39_v26  ;;  %v224_v49 = vadd.f32 %v223_v43, %v39_v26  ;;  %v166_v50 = vpop.f32.mrf.mxu0  ;;  %v227_v51 = vpop.f32.mrf.mxu1 }
  0xd5   :  { %v287_v47 = vsel %vm247_vm5, %v220_v33, %v267_v41  ;;  %305 = vst [vmem:[%s499_s3 + $0x8] sm:$0xff] %v285_v46  ;;  %v288_v52 = vsel %vm248_vm6, %v161_v38, %v268_v44  ;;  %v167_v54 = vadd.f32 %v166_v50, %v44_v31  ;;  %v228_v55 = vadd.f32 %v227_v51, %v44_v31 }
  0xd6   :  { %307 = vst [vmem:[%s499_s3 + $0x18] sm:$0xff] %v287_v47  ;;  %v290_v53 = vsel %vm250_vm7, %v222_v39, %v270_v45  ;;  %308 = vst [vmem:[%s499_s3 + $0x20] sm:$0xff] %v288_v52  ;;  %vm249_vm8 = vcmp.gt.f32.partialorder %v163_v48, 0.0  ;;  %v269_v57 = vmul.f32 0.01, %v163_v48  ;;  %vm251_vm9 = vcmp.gt.f32.partialorder %v224_v49, 0.0  ;;  %v168_v59 = vpop.f32.mrf.mxu0  ;;  %v229_v60 = vpop.f32.mrf.mxu1 }
  0xd7   :  { %310 = vst [vmem:[%s499_s3 + $0x30] sm:$0xff] %v290_v53  ;;  %v271_v58 = vmul.f32 0.01, %v224_v49  ;;  %vm252_vm10 = vcmp.gt.f32.partialorder %v167_v54, 0.0  ;;  %v272_v61 = vmul.f32 0.01, %v167_v54  ;;  %v169_v1 = vadd.f32 %v168_v59, %v44_v31 }
  0xd8   :  { %vm254_vm11 = vcmp.gt.f32.partialorder %v228_v55, 0.0  ;;  %v274_v62 = vmul.f32 0.01, %v228_v55  ;;  %v289_v63 = vsel %vm249_vm8, %v163_v48, %v269_v57  ;;  %v230_v2 = vadd.f32 %v229_v60, %v44_v31  ;;  %v170_v3 = vpop.f32.mrf.mxu0  ;;  %v231_v4 = vpop.f32.mrf.mxu1 }
  0xd9   :  { %v291_v0 = vsel %vm251_vm9, %v224_v49, %v271_v58  ;;  %309 = vst [vmem:[%s499_s3 + $0x28] sm:$0xff] %v289_v63  ;;  %v292_v5 = vsel %vm252_vm10, %v167_v54, %v272_v61  ;;  %v171_v7 = vadd.f32 %v170_v3, %v49_v56  ;;  %v232_v8 = vadd.f32 %v231_v4, %v49_v56 }
  0xda   :  { %311 = vst [vmem:[%s499_s3 + $0x38] sm:$0xff] %v291_v0  ;;  %v294_v6 = vsel %vm254_vm11, %v228_v55, %v274_v62  ;;  %312 = vst [vmem:[%s499_s3 + $0x40] sm:$0xff] %v292_v5  ;;  %vm253_vm12 = vcmp.gt.f32.partialorder %v169_v1, 0.0  ;;  %v273_v9 = vmul.f32 0.01, %v169_v1  ;;  %vm255_vm13 = vcmp.gt.f32.partialorder %v230_v2, 0.0  ;;  %v172_v11 = vpop.f32.mrf.mxu0  ;;  %v233_v12 = vpop.f32.mrf.mxu1 }
  0xdb   :  { %314 = vst [vmem:[%s499_s3 + $0x50] sm:$0xff] %v294_v6  ;;  %v275_v10 = vmul.f32 0.01, %v230_v2  ;;  %vm256_vm14 = vcmp.gt.f32.partialorder %v171_v7, 0.0  ;;  %v276_v14 = vmul.f32 0.01, %v171_v7  ;;  %v173_v18 = vadd.f32 %v172_v11, %v49_v56 }
  0xdc   :  { %vm258_vm15 = vcmp.gt.f32.partialorder %v232_v8, 0.0  ;;  %v278_v15 = vmul.f32 0.01, %v232_v8  ;;  %v293_v16 = vsel %vm253_vm12, %v169_v1, %v273_v9  ;;  %v234_v19 = vadd.f32 %v233_v12, %v49_v56  ;;  %v176_v20 = vpop.f32.mrf.mxu0  ;;  %v237_v21 = vpop.f32.mrf.mxu1 }
  0xdd   :  { %v295_v17 = vsel %vm255_vm13, %v230_v2, %v275_v10  ;;  %313 = vst [vmem:[%s499_s3 + $0x48] sm:$0xff] %v293_v16  ;;  %v296_v22 = vsel %vm256_vm14, %v171_v7, %v276_v14  ;;  %v177_v24 = vadd.f32 %v176_v20, %v54_v13  ;;  %v238_v25 = vadd.f32 %v237_v21, %v54_v13 }
  0xde   :  { %315 = vst [vmem:[%s499_s3 + $0x58] sm:$0xff] %v295_v17  ;;  %v298_v23 = vsel %vm258_vm15, %v232_v8, %v278_v15  ;;  %316 = vst [vmem:[%s499_s3 + $0x60] sm:$0xff] %v296_v22  ;;  %vm257_vm0 = vcmp.gt.f32.partialorder %v173_v18, 0.0  ;;  %v277_v26 = vmul.f32 0.01, %v173_v18  ;;  %vm259_vm1 = vcmp.gt.f32.partialorder %v234_v19, 0.0  ;;  %v178_v28 = vpop.f32.mrf.mxu0  ;;  %v239_v29 = vpop.f32.mrf.mxu1 }
  0xdf   :  { %318 = vst [vmem:[%s499_s3 + $0x70] sm:$0xff] %v298_v23  ;;  %v279_v27 = vmul.f32 0.01, %v234_v19  ;;  %vm260_vm2 = vcmp.gt.f32.partialorder %v177_v24, 0.0  ;;  %v280_v30 = vmul.f32 0.01, %v177_v24  ;;  %v179_v34 = vadd.f32 %v178_v28, %v54_v13 }
  0xe0   :  { %vm262_vm3 = vcmp.gt.f32.partialorder %v238_v25, 0.0  ;;  %v282_v31 = vmul.f32 0.01, %v238_v25  ;;  %v297_v32 = vsel %vm257_vm0, %v173_v18, %v277_v26  ;;  %v240_v35 = vadd.f32 %v239_v29, %v54_v13  ;;  %v180_v36 = vpop.f32.mrf.mxu0  ;;  %v241_v37 = vpop.f32.mrf.mxu1 }
  0xe1   :  { %v299_v33 = vsel %vm259_vm1, %v234_v19, %v279_v27  ;;  %317 = vst [vmem:[%s499_s3 + $0x68] sm:$0xff] %v297_v32  ;;  %v300_v38 = vsel %vm260_vm2, %v177_v24, %v280_v30  ;;  %vm261_vm4 = vcmp.gt.f32.partialorder %v179_v34, 0.0  ;;  %v281_v40 = vmul.f32 0.01, %v179_v34 }
  0xe2   :  { %319 = vst [vmem:[%s499_s3 + $0x78] sm:$0xff] %v299_v33  ;;  %v302_v39 = vsel %vm262_vm3, %v238_v25, %v282_v31  ;;  %320 = vst [vmem:[%s499_s3 + $0x80] sm:$0xff] %v300_v38  ;;  %vm263_vm5 = vcmp.gt.f32.partialorder %v240_v35, 0.0  ;;  %v283_v41 = vmul.f32 0.01, %v240_v35  ;;  %v181_v42 = vpop.f32.mrf.mxu0  ;;  %v242_v43 = vpop.f32.mrf.mxu1 }
  0xe3   :  { %322 = vst [vmem:[%s499_s3 + $0x90] sm:$0xff] %v302_v39  ;;  %v301_v44 = vsel %vm261_vm4, %v179_v34, %v281_v40 }
  0xe4   :  { %v303_v45 = vsel %vm263_vm5, %v240_v35, %v283_v41  ;;  %321 = vst [vmem:[%s499_s3 + $0x88] sm:$0xff] %v301_v44 }
  0xe5   :  { %323 = vst [vmem:[%s499_s3 + $0x98] sm:$0xff] %v303_v45 }

// kernel: forward_rnn.86
= control target key start
LH: loop header
LB: loop body
LE: loop exit
PB: predicated region body
PF: predicated region fallthrough
CT: control target
= control target key end

     0   :  { %v1094_v1 = vmov 0   ;;  %vm611_vm0 = vcmask 1043456   ;;  %vm604_vm1 = vcmask 850944   ;;  %s1475_s1 = inlined_call_operand.vmem [shape: bf16[360,512], index: 1, kind: input, shape index: {}]   ;;  %s1476_s0 = inlined_call_operand.vmem [shape: bf16[24,360], index: 0, kind: input, shape index: {}]   ;;  %s1477_s2 = inlined_call_operand.vmem [shape: f32[24,1], index: 2, kind: input, shape index: {}]   ;;  %s1478_s3 = inlined_call_operand.vmem [shape: f32[24,512], index: 3, kind: output, shape index: {}]  }
   0x1   :  { %v951_v0 = vld [vmem:[%s1475_s1 + $0xe4] ss:$16 sps:$4 sm:$0xff]   ;;  %707 = vmatprep.mubr.bf16.mxu1 %v1094_v1  ;;  %949 = vset.pattern.permute.xlu0 %v1094_v1  ;;  %v954_v3 = vld [vmem:[%s1475_s1 + $0xe0] ss:$16 sps:$4 sm:$0xff]   ;;  %v997_v32 = vld [vmem:[%s1475_s1 + $0xec] ss:$16 sps:$4 sm:$0xff]  }
   0x2   :  { %v109_v2 = vld [vmem:[%s1475_s1 + $0x2c0] sm:$0xff]  ;;  %950 = vset.pattern.permute.xlu1 %v1094_v1  ;;  %624 = vmatprep.subr.bf16.mxu0 %v951_v0  ;;  %v1213_v34 = vld [vmem:[%s1476_s0 + $0x8] ss:$12 sps:$4 sm:$0xff]   ;;  %v1003_v37 = vld [vmem:[%s1475_s1 + $0xcc] ss:$16 sps:$4 sm:$0xff]  }
   0x3   :  { %v939_v4 = vcombine.high %v109_v2, %v109_v2  ;;  %v938_v5 = vcombine.low %v109_v2, %v109_v2  ;;  %v956_v6 = vld [vmem:[%s1475_s1 + $0xc4] ss:$16 sps:$4 sm:$0xff]   ;;  %625 = vmatpush1.bf16.msra.mxu0 %v954_v3  ;;  %v960_v8 = vld [vmem:[%s1475_s1 + $0xc0] ss:$16 sps:$4 sm:$0xff]   ;;  %v995_v36 = vld [vmem:[%s1475_s1 + $0xe8] ss:$16 sps:$4 sm:$0xff]  }
   0x4   :  { %v958_v7 = vld [vmem:[%s1475_s1 + $0x2a4] ss:$16 sps:$4 sm:$0xff]   ;;  %626 = vmatprep.subr.bf16.mxu0 %v956_v6  ;;  %v961_v10 = vld [vmem:[%s1475_s1 + $0x2a0] ss:$16 sps:$4 sm:$0xff]   ;;  %v1001_v40 = vld [vmem:[%s1475_s1 + $0xc8] ss:$16 sps:$4 sm:$0xff]  }
   0x5   :  { %942 = vmatprep.subr.msk.bf16.mxu1 %vm611_vm0, %v939_v4  ;;  %v613_v9 = vsel %vm611_vm0, %v938_v5, 0  ;;  %v962_v11 = vld [vmem:[%s1475_s1 + $0xa4] ss:$16 sps:$4 sm:$0xff]   ;;  %v966_v13 = vld [vmem:[%s1475_s1 + $0xa0] ss:$16 sps:$4 sm:$0xff]   ;;  %v110_v4 = vld [vmem:[%s1475_s1 + $0x2c8] sm:$0xff] }
   0x6   :  { %678 = vmatpush1.bf16.msra.mxu1 %v613_v9  ;;  %v964_v12 = vld [vmem:[%s1475_s1 + $0x284] ss:$16 sps:$4 sm:$0xff]   ;;  %v967_v15 = vld [vmem:[%s1475_s1 + $0x280] ss:$16 sps:$4 sm:$0xff]   ;;  %v1009_v41 = vld [vmem:[%s1475_s1 + $0xac] ss:$16 sps:$4 sm:$0xff]  }
   0x7   :  { %679 = vmatprep.subr.bf16.mxu1 %v958_v7  ;;  %627 = vmatpush1.bf16.msra.mxu0 %v960_v8  ;;  %v968_v14 = vld [vmem:[%s1475_s1 + $0x84] ss:$16 sps:$4 sm:$0xff]   ;;  %v972_v17 = vld [vmem:[%s1475_s1 + $0x80] ss:$16 sps:$4 sm:$0xff]   ;;  %v1007_v44 = vld [vmem:[%s1475_s1 + $0xa8] ss:$16 sps:$4 sm:$0xff]   ;;  %v941_v7 = vcombine.high %v110_v4, %v110_v4  ;;  %v940_v8 = vcombine.low %v110_v4, %v110_v4 }
   0x8   :  { %628 = vmatprep.subr.bf16.mxu0 %v962_v11  ;;  %v970_v16 = vld [vmem:[%s1475_s1 + $0x264] ss:$16 sps:$4 sm:$0xff]   ;;  %v973_v19 = vld [vmem:[%s1475_s1 + $0x260] ss:$16 sps:$4 sm:$0xff]   ;;  %v1015_v45 = vld [vmem:[%s1475_s1 + $0x8c] ss:$16 sps:$4 sm:$0xff]  }
   0x9   :  { %v974_v18 = vld [vmem:[%s1475_s1 + $0x64] ss:$16 sps:$4 sm:$0xff]   ;;  %v978_v21 = vld [vmem:[%s1475_s1 + $0x60] ss:$16 sps:$4 sm:$0xff]   ;;  %v1013_v48 = vld [vmem:[%s1475_s1 + $0x88] ss:$16 sps:$4 sm:$0xff]  }
   0xa   :  { %680 = vmatpush1.bf16.msra.mxu1 %v961_v10  ;;  %v976_v20 = vld [vmem:[%s1475_s1 + $0x244] ss:$16 sps:$4 sm:$0xff]   ;;  %v979_v23 = vld [vmem:[%s1475_s1 + $0x240] ss:$16 sps:$4 sm:$0xff]   ;;  %v1021_v49 = vld [vmem:[%s1475_s1 + $0x6c] ss:$16 sps:$4 sm:$0xff]  }
   0xb   :  { %681 = vmatprep.subr.bf16.mxu1 %v964_v12  ;;  %629 = vmatpush1.bf16.msra.mxu0 %v966_v13  ;;  %v980_v22 = vld [vmem:[%s1475_s1 + $0x44] ss:$16 sps:$4 sm:$0xff]   ;;  %v984_v25 = vld [vmem:[%s1475_s1 + $0x40] ss:$16 sps:$4 sm:$0xff]   ;;  %v1019_v53 = vld [vmem:[%s1475_s1 + $0x68] ss:$16 sps:$4 sm:$0xff]  }
   0xc   :  { %630 = vmatprep.subr.bf16.mxu0 %v968_v14  ;;  %v982_v24 = vld [vmem:[%s1475_s1 + $0x224] ss:$16 sps:$4 sm:$0xff]   ;;  %v985_v27 = vld [vmem:[%s1475_s1 + $0x220] ss:$16 sps:$4 sm:$0xff]   ;;  %v1027_v54 = vld [vmem:[%s1475_s1 + $0x4c] ss:$16 sps:$4 sm:$0xff]  }
   0xd   :  { %v986_v26 = vld [vmem:[%s1475_s1 + $0x24] ss:$16 sps:$4 sm:$0xff]   ;;  %v990_v29 = vld [vmem:[%s1475_s1 + $0x20] ss:$16 sps:$4 sm:$0xff]   ;;  %v1025_v57 = vld [vmem:[%s1475_s1 + $0x48] ss:$16 sps:$4 sm:$0xff]  }
   0xe   :  { %682 = vmatpush1.bf16.msra.mxu1 %v967_v15  ;;  %v988_v28 = vld [vmem:[%s1475_s1 + $0x204] ss:$16 sps:$4 sm:$0xff]   ;;  %v991_v31 = vld [vmem:[%s1475_s1 + $0x200] ss:$16 sps:$4 sm:$0xff]   ;;  %v1033_v58 = vld [vmem:[%s1475_s1 + $0x2c] ss:$16 sps:$4 sm:$0xff]  }
   0xf   :  { %683 = vmatprep.subr.bf16.mxu1 %v970_v16  ;;  %631 = vmatpush1.bf16.msra.mxu0 %v972_v17  ;;  %v992_v30 = vld [vmem:[%s1475_s1 + $0x4] ss:$16 sps:$4 sm:$0xff]   ;;  %v998_v33 = vld [vmem:[%s1475_s1] ss:$16 sps:$4 sm:$0xff]   ;;  %v1031_v61 = vld [vmem:[%s1475_s1 + $0x28] ss:$16 sps:$4 sm:$0xff]  }
  0x10   :  { %632 = vmatprep.subr.bf16.mxu0 %v974_v18  ;;  %v999_v35 = vld [vmem:[%s1475_s1 + $0x1e4] ss:$16 sps:$4 sm:$0xff]   ;;  %v1004_v38 = vld [vmem:[%s1475_s1 + $0x1e0] ss:$16 sps:$4 sm:$0xff]   ;;  %v1039_v62 = vld [vmem:[%s1475_s1 + $0xc] ss:$16 sps:$4 sm:$0xff]  }
  0x11   :  { %v1005_v39 = vld [vmem:[%s1475_s1 + $0x1c4] ss:$16 sps:$4 sm:$0xff]   ;;  %v1010_v42 = vld [vmem:[%s1475_s1 + $0x1c0] ss:$16 sps:$4 sm:$0xff]   ;;  %v1037_v0 = vld [vmem:[%s1475_s1 + $0x8] ss:$16 sps:$4 sm:$0xff]  }
  0x12   :  { %684 = vmatpush1.bf16.msra.mxu1 %v973_v19  ;;  %v1011_v43 = vld [vmem:[%s1475_s1 + $0x1a4] ss:$16 sps:$4 sm:$0xff]   ;;  %v1016_v46 = vld [vmem:[%s1475_s1 + $0x1a0] ss:$16 sps:$4 sm:$0xff]   ;;  %v1045_v5 = vld [vmem:[%s1475_s1 + $0x1ec] ss:$16 sps:$4 sm:$0xff]  }
  0x13   :  { %685 = vmatprep.subr.bf16.mxu1 %v976_v20  ;;  %633 = vmatpush1.bf16.msra.mxu0 %v978_v21  ;;  %v1017_v47 = vld [vmem:[%s1475_s1 + $0x184] ss:$16 sps:$4 sm:$0xff]   ;;  %v1022_v50 = vld [vmem:[%s1475_s1 + $0x180] ss:$16 sps:$4 sm:$0xff]   ;;  %v19_v9 = vld [vmem:[%s1476_s0 + $0x18] sm:$0xff]  ;;  %v619_v16 = vsel %vm611_vm0, %v940_v8, 0 }
  0x14   :  { %634 = vmatprep.subr.bf16.mxu0 %v980_v22  ;;  %v1049_v51 = vld [vmem:[%s1476_s0 + $0x4] ss:$12 sps:$4 sm:$0xff]   ;;  %v1305_v63 = vld [vmem:[%s1476_s0 + $0x20] ss:$0 sps:$4 sm:$0xff]   ;;  %v1043_v10 = vld [vmem:[%s1475_s1 + $0x1e8] ss:$16 sps:$4 sm:$0xff]   ;;  %v1344_v14 = vcombine.high %v19_v9, %v19_v9 }
  0x15   :  { %v1023_v52 = vld [vmem:[%s1475_s1 + $0x164] ss:$16 sps:$4 sm:$0xff]   ;;  %656 = vmatprep.mubr.bf16.mxu0 %v1049_v51  ;;  %v1028_v55 = vld [vmem:[%s1475_s1 + $0x160] ss:$16 sps:$4 sm:$0xff]   ;;  %v1052_v12 = vld [vmem:[%s1475_s1 + $0x1cc] ss:$16 sps:$4 sm:$0xff]  }
  0x16   :  { %686 = vmatpush1.bf16.msra.mxu1 %v979_v23  ;;  %v1029_v56 = vld [vmem:[%s1475_s1 + $0x144] ss:$16 sps:$4 sm:$0xff]   ;;  %v1034_v59 = vld [vmem:[%s1475_s1 + $0x140] ss:$16 sps:$4 sm:$0xff]   ;;  %v1060_v17 = vld [vmem:[%s1475_s1 + $0x2ac] ss:$16 sps:$4 sm:$0xff]  }
  0x17   :  { %687 = vmatprep.subr.bf16.mxu1 %v982_v24  ;;  %635 = vmatpush1.bf16.msra.mxu0 %v984_v25  ;;  %v1035_v60 = vld [vmem:[%s1475_s1 + $0x124] ss:$16 sps:$4 sm:$0xff]   ;;  %v1040_v2 = vld [vmem:[%s1475_s1 + $0x120] ss:$16 sps:$4 sm:$0xff]   ;;  %v1050_v18 = vld [vmem:[%s1475_s1 + $0x1c8] ss:$16 sps:$4 sm:$0xff]   ;;  %v847_v25 = vcombine.low %v19_v9, %v19_v9 }
  0x18   :  { %636 = vmatprep.subr.bf16.mxu0 %v986_v26  ;;  %v1041_v3 = vld [vmem:[%s1475_s1 + $0x104] ss:$16 sps:$4 sm:$0xff]   ;;  %v1046_v6 = vld [vmem:[%s1475_s1 + $0x100] ss:$16 sps:$4 sm:$0xff]   ;;  %v112_v19 = vld [vmem:[%s1477_s2 + $0x8] sm:$0xff] }
  0x19   :  { %v1336_v11 = vld [vmem:[%s1476_s0] ss:$12 sps:$4 sm:$0xff]   ;;  %v113_v15 = vld [vmem:[%s1477_s2 + $0x10] sm:$0xff]  ;;  %v1058_v21 = vld [vmem:[%s1475_s1 + $0x2a8] ss:$16 sps:$4 sm:$0xff]  }
  0x1a   :  { %688 = vmatpush1.bf16.msra.mxu1 %v985_v27  ;;  %v111_v13 = vld [vmem:[%s1477_s2] sm:$0xff]  ;;  %126 = vperm.xlu1 %950, %v113_v15   ;;  %v1057_v20 = vld [vmem:[%s1475_s1 + $0x1ac] ss:$16 sps:$4 sm:$0xff]   ;;  %v1055_v23 = vld [vmem:[%s1475_s1 + $0x1a8] ss:$16 sps:$4 sm:$0xff]  }
  0x1b   :  { %689 = vmatprep.subr.bf16.mxu1 %v988_v28  ;;  %637 = vmatpush1.bf16.msra.mxu0 %v990_v29  ;;  %v1066_v22 = vld [vmem:[%s1475_s1 + $0x28c] ss:$16 sps:$4 sm:$0xff]   ;;  %v1064_v26 = vld [vmem:[%s1475_s1 + $0x288] ss:$16 sps:$4 sm:$0xff]  }
  0x1c   :  { %638 = vmatprep.subr.bf16.mxu0 %v992_v30  ;;  %116 = vperm.xlu0 %949, %v111_v13   ;;  %v1063_v24 = vld [vmem:[%s1475_s1 + $0x18c] ss:$16 sps:$4 sm:$0xff]   ;;  %v1061_v28 = vld [vmem:[%s1475_s1 + $0x188] ss:$16 sps:$4 sm:$0xff]  }
  0x1d   :  { %v1072_v27 = vld [vmem:[%s1475_s1 + $0x26c] ss:$16 sps:$4 sm:$0xff]   ;;  %v1070_v30 = vld [vmem:[%s1475_s1 + $0x268] ss:$16 sps:$4 sm:$0xff]  }
  0x1e   :  { %690 = vmatpush1.bf16.msra.mxu1 %v991_v31  ;;  %v1069_v29 = vld [vmem:[%s1475_s1 + $0x16c] ss:$16 sps:$4 sm:$0xff]  }
  0x1f   :  { %726 = vmatprep.subr.bf16.mxu1 %v997_v32  ;;  %639 = vmatpush1.bf16.msra.mxu0 %v998_v33  ;;  %v1081_v31 = vld [vmem:[%s1475_s1 + $0x24c] ss:$16 sps:$4 sm:$0xff]   ;;  %v1067_v32 = vld [vmem:[%s1475_s1 + $0x168] ss:$16 sps:$4 sm:$0xff]  }
  0x20   :  { %640 = vmatprep.subr.bf16.mxu0 %v999_v35  ;;  %121 = vperm.xlu0 %949, %v112_v19   ;;  %v1078_v33 = vld [vmem:[%s1475_s1 + $0x14c] ss:$16 sps:$4 sm:$0xff]   ;;  %v1079_v35 = vld [vmem:[%s1475_s1 + $0x248] ss:$16 sps:$4 sm:$0xff]  }
  0x21   :  { %943 = vmatmul.mubr.msk.bf16.vlgmr.msra.gmra.mxu1 %vm604_vm1, %v1213_v34 }
  0x22   :  { %727 = vmatpush1.bf16.msra.mxu1 %v995_v36  ;;  %717 = vmatprep.mubr.bf16.mxu1 %v1094_v1  ;;  %v1087_v36 = vld [vmem:[%s1475_s1 + $0x22c] ss:$16 sps:$4 sm:$0xff]  }
  0x23   :  { %728 = vmatprep.subr.bf16.mxu1 %v1003_v37  ;;  %641 = vmatpush2.bf16.msra.mxu0 %v1004_v38  ;;  %v1076_v37 = vld [vmem:[%s1475_s1 + $0x148] ss:$16 sps:$4 sm:$0xff]   ;;  %v1084_v38 = vld [vmem:[%s1475_s1 + $0x12c] ss:$16 sps:$4 sm:$0xff]  }
  0x24   :  { %642 = vmatprep.subr.bf16.mxu0 %v1005_v39  ;;  %v1085_v39 = vld [vmem:[%s1475_s1 + $0x228] ss:$16 sps:$4 sm:$0xff]  }
  0x26   :  { %729 = vmatpush1.bf16.msra.mxu1 %v1001_v40  ;;  %v1093_v40 = vld [vmem:[%s1475_s1 + $0x20c] ss:$16 sps:$4 sm:$0xff]  }
  0x27   :  { %730 = vmatprep.subr.bf16.mxu1 %v1009_v41  ;;  %643 = vmatpush2.bf16.msra.mxu0 %v1010_v42  ;;  %v1082_v41 = vld [vmem:[%s1475_s1 + $0x128] ss:$16 sps:$4 sm:$0xff]   ;;  %v1090_v42 = vld [vmem:[%s1475_s1 + $0x10c] ss:$16 sps:$4 sm:$0xff]  }
  0x28   :  { %644 = vmatprep.subr.bf16.mxu0 %v1011_v43  ;;  %v1091_v43 = vld [vmem:[%s1475_s1 + $0x208] ss:$16 sps:$4 sm:$0xff]  }
  0x29   :  { %944 = vmatmul.mubr.msk.bf16.gmra.mxu1 %vm604_vm1, %v1305_v63 }
  0x2a   :  { %731 = vmatpush1.bf16.msra.mxu1 %v1007_v44  ;;  %758 = vmatprep.mubr.bf16.mxu1 %v1049_v51  ;;  %v1088_v44 = vld [vmem:[%s1475_s1 + $0x108] ss:$16 sps:$4 sm:$0xff]  }
  0x2b   :  { %732 = vmatprep.subr.bf16.mxu1 %v1015_v45  ;;  %645 = vmatpush2.bf16.msra.mxu0 %v1016_v46 }
  0x2c   :  { %646 = vmatprep.subr.bf16.mxu0 %v1017_v47 }
  0x2e   :  { %733 = vmatpush1.bf16.msra.mxu1 %v1013_v48 }
  0x2f   :  { %734 = vmatprep.subr.bf16.mxu1 %v1021_v49  ;;  %647 = vmatpush2.bf16.msra.mxu0 %v1022_v50 }
  0x30   :  { %648 = vmatprep.subr.bf16.mxu0 %v1023_v52 }
  0x32   :  { %735 = vmatpush1.bf16.msra.mxu1 %v1019_v53 }
  0x33   :  { %736 = vmatprep.subr.bf16.mxu1 %v1027_v54  ;;  %649 = vmatpush2.bf16.msra.mxu0 %v1028_v55 }
  0x34   :  { %650 = vmatprep.subr.bf16.mxu0 %v1029_v56 }
  0x36   :  { %737 = vmatpush1.bf16.msra.mxu1 %v1025_v57 }
  0x37   :  { %738 = vmatprep.subr.bf16.mxu1 %v1033_v58  ;;  %651 = vmatpush2.bf16.msra.mxu0 %v1034_v59 }
  0x38   :  { %652 = vmatprep.subr.bf16.mxu0 %v1035_v60 }
  0x3a   :  { %739 = vmatpush1.bf16.msra.mxu1 %v1031_v61 }
  0x3b   :  { %740 = vmatprep.subr.bf16.mxu1 %v1039_v62  ;;  %653 = vmatpush2.bf16.msra.mxu0 %v1040_v2 }
  0x3c   :  { %654 = vmatprep.subr.bf16.mxu0 %v1041_v3 }
  0x3e   :  { %741 = vmatpush1.bf16.msra.mxu1 %v1037_v0 }
  0x3f   :  { %742 = vmatprep.subr.bf16.mxu1 %v1045_v5  ;;  %655 = vmatpush2.bf16.msra.mxu0 %v1046_v6 }
  0x40   :  { %945 = vmatprep.subr.msk.bf16.mxu0 %vm611_vm0, %v941_v7 }
  0x42   :  { %743 = vmatpush2.bf16.msra.mxu1 %v1043_v10  ;;  %657 = vmatmul.mubr.bf16.vlgmr.msra.gmra.mxu0 %v1336_v11 }
  0x43   :  { %744 = vmatprep.subr.bf16.mxu1 %v1052_v12  ;;  %780 = vmatpush1.bf16.msra.mxu0 %v619_v16 }
  0x44   :  { %666 = vmatprep.mubr.bf16.mxu0 %v1344_v14  ;;  %781 = vmatprep.subr.bf16.mxu0 %v1060_v17 }
  0x46   :  { %745 = vmatpush2.bf16.msra.mxu1 %v1050_v18 }
  0x47   :  { %746 = vmatprep.subr.bf16.mxu1 %v1057_v20  ;;  %782 = vmatpush1.bf16.msra.mxu0 %v1058_v21 }
  0x48   :  { %783 = vmatprep.subr.bf16.mxu0 %v1066_v22 }
  0x4a   :  { %747 = vmatpush2.bf16.msra.mxu1 %v1055_v23  ;;  %667 = vmatmul.mubr.bf16.gmra.mxu0 %v847_v25 }
  0x4b   :  { %748 = vmatprep.subr.bf16.mxu1 %v1063_v24  ;;  %784 = vmatpush1.bf16.msra.mxu0 %v1064_v26 }
  0x4c   :  { %809 = vmatprep.mubr.bf16.mxu0 %v1094_v1  ;;  %785 = vmatprep.subr.bf16.mxu0 %v1072_v27 }
  0x4e   :  { %749 = vmatpush2.bf16.msra.mxu1 %v1061_v28 }
  0x4f   :  { %750 = vmatprep.subr.bf16.mxu1 %v1069_v29  ;;  %786 = vmatpush1.bf16.msra.mxu0 %v1070_v30 }
  0x50   :  { %787 = vmatprep.subr.bf16.mxu0 %v1081_v31 }
  0x52   :  { %751 = vmatpush2.bf16.msra.mxu1 %v1067_v32 }
  0x53   :  { %752 = vmatprep.subr.bf16.mxu1 %v1078_v33  ;;  %788 = vmatpush1.bf16.msra.mxu0 %v1079_v35 }
  0x54   :  { %789 = vmatprep.subr.bf16.mxu0 %v1087_v36 }
  0x56   :  { %753 = vmatpush2.bf16.msra.mxu1 %v1076_v37 }
  0x57   :  { %754 = vmatprep.subr.bf16.mxu1 %v1084_v38  ;;  %790 = vmatpush1.bf16.msra.mxu0 %v1085_v39 }
  0x58   :  { %791 = vmatprep.subr.bf16.mxu0 %v1093_v40 }
  0x5a   :  { %755 = vmatpush2.bf16.msra.mxu1 %v1082_v41 }
  0x5b   :  { %756 = vmatprep.subr.bf16.mxu1 %v1090_v42  ;;  %792 = vmatpush1.bf16.msra.mxu0 %v1091_v43 }
  0x5e   :  { %757 = vmatpush2.bf16.msra.mxu1 %v1088_v44  ;;  %946 = vmatmul.mubr.msk.bf16.vlgmr.msra.gmra.mxu0 %vm604_vm1, %v1213_v34 }
  0x5f   :  { %819 = vmatprep.mubr.bf16.mxu0 %v1094_v1 }
  0x61   :  { %759 = vmatmul.mubr.bf16.vlgmr.msra.gmra.mxu1 %v1336_v11 }
  0x62   :  { %768 = vmatprep.mubr.bf16.mxu1 %v1344_v14 }
  0x66   :  { %947 = vmatmul.mubr.msk.bf16.gmra.mxu0 %vm604_vm1, %v1305_v63 }
  0x69   :  { %769 = vmatmul.mubr.bf16.gmra.mxu1 %v847_v25 }
  0x95   :  { %v127_v62 = vpop.permute.xlu1 %126 }
  0x97   :  { %v117_v52 = vpop.permute.xlu0 %116 }
  0x9b   :  { %v122_v55 = vpop.permute.xlu0 %121 }
  0xe1   :  { %v709_v45 = vpop.f32.mrf.mxu1 }
  0xe3   :  { %v711_v46 = vpop.f32.mrf.mxu1 }
  0xe5   :  { %v713_v47 = vpop.f32.mrf.mxu1 }
  0xe7   :  { %v715_v48 = vpop.f32.mrf.mxu1 }
  0xe9   :  { %v719_v49 = vpop.f32.mrf.mxu1 }
  0xeb   :  { %v721_v50 = vpop.f32.mrf.mxu1 }
  0xed   :  { %v723_v51 = vpop.f32.mrf.mxu1 }
  0xef   :  { %v724_v53 = vpop.f32.mrf.mxu1 }
 0x102   :  { %v658_v34 = vpop.f32.mrf.mxu0 }
 0x103   :  { %v659_v54 = vadd.f32 %v658_v34, %v117_v52 }
 0x104   :  { %v660_v1 = vpop.f32.mrf.mxu0 }
 0x105   :  { %v710_v56 = vadd.f32 %v709_v45, %v659_v54  ;;  %v661_v57 = vadd.f32 %v660_v1, %v117_v52 }
 0x106   :  { %v662_v58 = vpop.f32.mrf.mxu0 }
 0x107   :  { %828 = vst [vmem:[%s1478_s3] sm:$0xff] %v710_v56  ;;  %v712_v59 = vadd.f32 %v711_v46, %v661_v57  ;;  %v663_v60 = vadd.f32 %v662_v58, %v122_v55 }
 0x108   :  { %v664_v61 = vpop.f32.mrf.mxu0 }
 0x109   :  { %829 = vst [vmem:[%s1478_s3 + $0x8] sm:$0xff] %v712_v59  ;;  %v714_v63 = vadd.f32 %v713_v47, %v663_v60  ;;  %v665_v0 = vadd.f32 %v664_v61, %v122_v55 }
 0x10a   :  { %v668_v2 = vpop.f32.mrf.mxu0 }
 0x10b   :  { %832 = vst [vmem:[%s1478_s3 + $0x20] sm:$0xff] %v714_v63  ;;  %v716_v3 = vadd.f32 %v715_v48, %v665_v0  ;;  %v669_v4 = vadd.f32 %v668_v2, %v127_v62 }
 0x10c   :  { %v670_v5 = vpop.f32.mrf.mxu0 }
 0x10d   :  { %833 = vst [vmem:[%s1478_s3 + $0x28] sm:$0xff] %v716_v3  ;;  %v671_v6 = vadd.f32 %v670_v5, %v127_v62  ;;  %v720_v7 = vadd.f32 %v719_v49, %v669_v4 }
 0x10e   :  { %v672_v8 = vpop.f32.mrf.mxu0 }
 0x10f   :  { %v722_v9 = vadd.f32 %v721_v50, %v671_v6  ;;  %836 = vst [vmem:[%s1478_s3 + $0x40] sm:$0xff] %v720_v7 }
 0x110   :  { %v673_v10 = vpop.f32.mrf.mxu0 }
 0x111   :  { %837 = vst [vmem:[%s1478_s3 + $0x48] sm:$0xff] %v722_v9 }
 0x11e   :  { %v811_v11 = vpop.f32.mrf.mxu0 }
 0x120   :  { %v813_v13 = vpop.f32.mrf.mxu0 }
 0x121   :  { %v760_v12 = vpop.f32.mrf.mxu1 }
 0x122   :  { %v761_v14 = vadd.f32 %v760_v12, %v117_v52  ;;  %v815_v16 = vpop.f32.mrf.mxu0 }
 0x123   :  { %v762_v15 = vpop.f32.mrf.mxu1 }
 0x124   :  { %v812_v17 = vadd.f32 %v811_v11, %v761_v14  ;;  %v763_v18 = vadd.f32 %v762_v15, %v117_v52  ;;  %v817_v20 = vpop.f32.mrf.mxu0 }
 0x125   :  { %v764_v19 = vpop.f32.mrf.mxu1 }
 0x126   :  { %830 = vst [vmem:[%s1478_s3 + $0x10] sm:$0xff] %v812_v17  ;;  %v814_v21 = vadd.f32 %v813_v13, %v763_v18  ;;  %v765_v22 = vadd.f32 %v764_v19, %v122_v55  ;;  %v821_v24 = vpop.f32.mrf.mxu0 }
 0x127   :  { %v766_v23 = vpop.f32.mrf.mxu1 }
 0x128   :  { %831 = vst [vmem:[%s1478_s3 + $0x18] sm:$0xff] %v814_v21  ;;  %v816_v25 = vadd.f32 %v815_v16, %v765_v22  ;;  %v767_v26 = vadd.f32 %v766_v23, %v122_v55  ;;  %v823_v28 = vpop.f32.mrf.mxu0 }
 0x129   :  { %v770_v27 = vpop.f32.mrf.mxu1 }
 0x12a   :  { %834 = vst [vmem:[%s1478_s3 + $0x30] sm:$0xff] %v816_v25  ;;  %v818_v29 = vadd.f32 %v817_v20, %v767_v26  ;;  %v771_v30 = vadd.f32 %v770_v27, %v127_v62  ;;  %v825_v32 = vpop.f32.mrf.mxu0 }
 0x12b   :  { %v772_v31 = vpop.f32.mrf.mxu1 }
 0x12c   :  { %835 = vst [vmem:[%s1478_s3 + $0x38] sm:$0xff] %v818_v29  ;;  %v822_v33 = vadd.f32 %v821_v24, %v771_v30  ;;  %v773_v35 = vadd.f32 %v772_v31, %v127_v62  ;;  %v826_v37 = vpop.f32.mrf.mxu0 }
 0x12d   :  { %v774_v36 = vpop.f32.mrf.mxu1 }
 0x12e   :  { %838 = vst [vmem:[%s1478_s3 + $0x50] sm:$0xff] %v822_v33  ;;  %v824_v38 = vadd.f32 %v823_v28, %v773_v35 }
 0x12f   :  { %v775_v39 = vpop.f32.mrf.mxu1 }
 0x130   :  { %839 = vst [vmem:[%s1478_s3 + $0x58] sm:$0xff] %v824_v38 }

// kernel: forward_rnn.87
= control target key start
LH: loop header
LB: loop body
LE: loop exit
PB: predicated region body
PF: predicated region fallthrough
CT: control target
= control target key end

     0   :  { %v1590_v2 = vmov 0   ;;  %vm838_vm0 = vcmask 1040384   ;;  %vm825_vm1 = vcmask 539648   ;;  %s2221_s1 = inlined_call_operand.vmem [shape: bf16[450,512], index: 1, kind: input, shape index: {}]   ;;  %s2222_s0 = inlined_call_operand.vmem [shape: bf16[56,450], index: 0, kind: input, shape index: {}]   ;;  %s2223_s2 = inlined_call_operand.vmem [shape: f32[56,1], index: 2, kind: input, shape index: {}]   ;;  %s2224_s3 = inlined_call_operand.vmem [shape: f32[56,512], index: 3, kind: output, shape index: {}]  }
   0x1   :  { %v1396_v0 = vld [vmem:[%s2221_s1 + $0xe4] ss:$16 sps:$4 sm:$0xff]   ;;  %1394 = vset.pattern.permute.xlu0 %v1590_v2  ;;  %1395 = vset.pattern.permute.xlu1 %v1590_v2  ;;  %v1400_v3 = vld [vmem:[%s2221_s1 + $0xe0] ss:$16 sps:$4 sm:$0xff]   ;;  %v1727_v41 = vld [vmem:[%s2222_s0 + $0xc] ss:$16 sps:$4 sm:$0xff]  }
   0x2   :  { %v1398_v1 = vld [vmem:[%s2221_s1 + $0x2e4] ss:$16 sps:$4 sm:$0xff]   ;;  %851 = vmatprep.subr.bf16.mxu0 %v1396_v0  ;;  %v1401_v4 = vld [vmem:[%s2221_s1 + $0x2e0] ss:$16 sps:$4 sm:$0xff]   ;;  %1384 = vmatprep.mubr.msk.bf16.mxu1 %vm825_vm1, %v1727_v41  ;;  %v1480_v58 = vld [vmem:[%s2221_s1 + $0xec] ss:$16 sps:$4 sm:$0xff]  }
   0x3   :  { %922 = vmatprep.subr.bf16.mxu1 %v1398_v1  ;;  %v1402_v5 = vld [vmem:[%s2221_s1 + $0xc4] ss:$16 sps:$4 sm:$0xff]   ;;  %852 = vmatpush1.bf16.msra.mxu0 %v1400_v3  ;;  %v1406_v7 = vld [vmem:[%s2221_s1 + $0xc0] ss:$16 sps:$4 sm:$0xff]   ;;  %v1788_v59 = vld [vmem:[%s2222_s0 + $0x8] ss:$16 sps:$4 sm:$0xff]  }
   0x4   :  { %923 = vmatpush1.bf16.msra.mxu1 %v1401_v4  ;;  %v1404_v6 = vld [vmem:[%s2221_s1 + $0x2c4] ss:$16 sps:$4 sm:$0xff]   ;;  %853 = vmatprep.subr.bf16.mxu0 %v1402_v5  ;;  %v1407_v8 = vld [vmem:[%s2221_s1 + $0x2c0] ss:$16 sps:$4 sm:$0xff]   ;;  %v1478_v60 = vld [vmem:[%s2221_s1 + $0xe8] ss:$16 sps:$4 sm:$0xff]  }
   0x5   :  { %924 = vmatprep.subr.bf16.mxu1 %v1404_v6  ;;  %v1408_v9 = vld [vmem:[%s2221_s1 + $0xa4] ss:$16 sps:$4 sm:$0xff]   ;;  %v1412_v11 = vld [vmem:[%s2221_s1 + $0xa0] ss:$16 sps:$4 sm:$0xff]   ;;  %v1486_v63 = vld [vmem:[%s2221_s1 + $0xcc] ss:$16 sps:$4 sm:$0xff]  }
   0x6   :  { %v1410_v10 = vld [vmem:[%s2221_s1 + $0x2a4] ss:$16 sps:$4 sm:$0xff]   ;;  %v1413_v12 = vld [vmem:[%s2221_s1 + $0x2a0] ss:$16 sps:$4 sm:$0xff]   ;;  %v1484_v0 = vld [vmem:[%s2221_s1 + $0xc8] ss:$16 sps:$4 sm:$0xff]  }
   0x7   :  { %854 = vmatpush1.bf16.msra.mxu0 %v1406_v7  ;;  %v1414_v13 = vld [vmem:[%s2221_s1 + $0x84] ss:$16 sps:$4 sm:$0xff]   ;;  %v1418_v15 = vld [vmem:[%s2221_s1 + $0x80] ss:$16 sps:$4 sm:$0xff]   ;;  %v1492_v3 = vld [vmem:[%s2221_s1 + $0xac] ss:$16 sps:$4 sm:$0xff]  }
   0x8   :  { %925 = vmatpush1.bf16.msra.mxu1 %v1407_v8  ;;  %855 = vmatprep.subr.bf16.mxu0 %v1408_v9  ;;  %v1416_v14 = vld [vmem:[%s2221_s1 + $0x284] ss:$16 sps:$4 sm:$0xff]   ;;  %v1419_v16 = vld [vmem:[%s2221_s1 + $0x280] ss:$16 sps:$4 sm:$0xff]   ;;  %v1490_v4 = vld [vmem:[%s2221_s1 + $0xa8] ss:$16 sps:$4 sm:$0xff]  }
   0x9   :  { %926 = vmatprep.subr.bf16.mxu1 %v1410_v10  ;;  %v1420_v17 = vld [vmem:[%s2221_s1 + $0x64] ss:$16 sps:$4 sm:$0xff]   ;;  %v1424_v19 = vld [vmem:[%s2221_s1 + $0x60] ss:$16 sps:$4 sm:$0xff]   ;;  %v1824_v6 = vld [vmem:[%s2222_s0 + $0x2c] ss:$16 sps:$4 sm:$0xff]  }
   0xa   :  { %v1422_v18 = vld [vmem:[%s2221_s1 + $0x264] ss:$16 sps:$4 sm:$0xff]   ;;  %v1425_v20 = vld [vmem:[%s2221_s1 + $0x260] ss:$16 sps:$4 sm:$0xff]   ;;  %v1829_v7 = vld [vmem:[%s2222_s0 + $0x28] ss:$16 sps:$4 sm:$0xff]  }
   0xb   :  { %856 = vmatpush1.bf16.msra.mxu0 %v1412_v11  ;;  %v1426_v21 = vld [vmem:[%s2221_s1 + $0x44] ss:$16 sps:$4 sm:$0xff]   ;;  %v1430_v23 = vld [vmem:[%s2221_s1 + $0x40] ss:$16 sps:$4 sm:$0xff]   ;;  %v1499_v8 = vld [vmem:[%s2221_s1 + $0x8c] ss:$16 sps:$4 sm:$0xff]  }
   0xc   :  { %927 = vmatpush1.bf16.msra.mxu1 %v1413_v12  ;;  %857 = vmatprep.subr.bf16.mxu0 %v1414_v13  ;;  %v1428_v22 = vld [vmem:[%s2221_s1 + $0x244] ss:$16 sps:$4 sm:$0xff]   ;;  %v1431_v24 = vld [vmem:[%s2221_s1 + $0x240] ss:$16 sps:$4 sm:$0xff]   ;;  %v1502_v9 = vld [vmem:[%s2221_s1 + $0x2ec] ss:$16 sps:$4 sm:$0xff]  }
   0xd   :  { %928 = vmatprep.subr.bf16.mxu1 %v1416_v14  ;;  %v1432_v25 = vld [vmem:[%s2221_s1 + $0x24] ss:$16 sps:$4 sm:$0xff]   ;;  %v1436_v27 = vld [vmem:[%s2221_s1 + $0x20] ss:$16 sps:$4 sm:$0xff]   ;;  %v1497_v11 = vld [vmem:[%s2221_s1 + $0x88] ss:$16 sps:$4 sm:$0xff]  }
   0xe   :  { %v1434_v26 = vld [vmem:[%s2221_s1 + $0x224] ss:$16 sps:$4 sm:$0xff]   ;;  %v1437_v28 = vld [vmem:[%s2221_s1 + $0x220] ss:$16 sps:$4 sm:$0xff]   ;;  %v1500_v12 = vld [vmem:[%s2221_s1 + $0x2e8] ss:$16 sps:$4 sm:$0xff]  }
   0xf   :  { %858 = vmatpush1.bf16.msra.mxu0 %v1418_v15  ;;  %v1438_v29 = vld [vmem:[%s2221_s1 + $0x4] ss:$16 sps:$4 sm:$0xff]   ;;  %v1442_v32 = vld [vmem:[%s2221_s1] ss:$16 sps:$4 sm:$0xff]   ;;  %v1505_v13 = vld [vmem:[%s2221_s1 + $0x6c] ss:$16 sps:$4 sm:$0xff]  }
  0x10   :  { %929 = vmatpush1.bf16.msra.mxu1 %v1419_v16  ;;  %859 = vmatprep.subr.bf16.mxu0 %v1420_v17  ;;  %v1440_v30 = vld [vmem:[%s2221_s1 + $0x204] ss:$16 sps:$4 sm:$0xff]   ;;  %v1443_v33 = vld [vmem:[%s2221_s1 + $0x200] ss:$16 sps:$4 sm:$0xff]   ;;  %v1508_v14 = vld [vmem:[%s2221_s1 + $0x2cc] ss:$16 sps:$4 sm:$0xff]  }
  0x11   :  { %930 = vmatprep.subr.bf16.mxu1 %v1422_v18  ;;  %v141_v31 = vld [vmem:[%s2221_s1 + $0x380] sm:$0x11]  ;;  %v1503_v15 = vld [vmem:[%s2221_s1 + $0x68] ss:$16 sps:$4 sm:$0xff]   ;;  %v1872_v18 = vld [vmem:[%s2222_s0 + $0x4c] ss:$16 sps:$4 sm:$0xff]  }
  0x12   :  { %v1444_v34 = vld [vmem:[%s2221_s1 + $0x1e4] ss:$16 sps:$4 sm:$0xff]   ;;  %v1380_v35 = vcombine.high %v141_v31, %v141_v31  ;;  %v1379_v36 = vcombine.low %v141_v31, %v141_v31  ;;  %v1447_v37 = vld [vmem:[%s2221_s1 + $0x1e0] ss:$16 sps:$4 sm:$0xff]   ;;  %v1506_v16 = vld [vmem:[%s2221_s1 + $0x2c8] ss:$16 sps:$4 sm:$0xff]  }
  0x13   :  { %860 = vmatpush1.bf16.msra.mxu0 %v1424_v19  ;;  %v1449_v39 = vld [vmem:[%s2221_s1 + $0x1c4] ss:$16 sps:$4 sm:$0xff]   ;;  %v1453_v42 = vld [vmem:[%s2221_s1 + $0x1c0] ss:$16 sps:$4 sm:$0xff]   ;;  %v1877_v19 = vld [vmem:[%s2222_s0 + $0x48] ss:$16 sps:$4 sm:$0xff]  }
  0x14   :  { %931 = vmatpush1.bf16.msra.mxu1 %v1425_v20  ;;  %861 = vmatprep.subr.bf16.mxu0 %v1426_v21  ;;  %v840_v38 = vsel %vm838_vm0, %v1379_v36, 0  ;;  %v1451_v40 = vld [vmem:[%s2221_s1 + $0x364] ss:$16 sps:$4 sm:$0xff]   ;;  %v1454_v43 = vld [vmem:[%s2221_s1 + $0x360] ss:$16 sps:$4 sm:$0xff]  }
  0x15   :  { %932 = vmatprep.subr.bf16.mxu1 %v1428_v22  ;;  %v1455_v44 = vld [vmem:[%s2221_s1 + $0x1a4] ss:$16 sps:$4 sm:$0xff]   ;;  %v1459_v46 = vld [vmem:[%s2221_s1 + $0x1a0] ss:$16 sps:$4 sm:$0xff]   ;;  %v1511_v20 = vld [vmem:[%s2221_s1 + $0x4c] ss:$16 sps:$4 sm:$0xff]  }
  0x16   :  { %v1457_v45 = vld [vmem:[%s2221_s1 + $0x344] ss:$16 sps:$4 sm:$0xff]   ;;  %v1460_v47 = vld [vmem:[%s2221_s1 + $0x340] ss:$16 sps:$4 sm:$0xff]   ;;  %v1514_v21 = vld [vmem:[%s2221_s1 + $0x2ac] ss:$16 sps:$4 sm:$0xff]  }
  0x17   :  { %862 = vmatpush1.bf16.msra.mxu0 %v1430_v23  ;;  %v1461_v48 = vld [vmem:[%s2221_s1 + $0x184] ss:$16 sps:$4 sm:$0xff]   ;;  %v1465_v50 = vld [vmem:[%s2221_s1 + $0x180] ss:$16 sps:$4 sm:$0xff]   ;;  %v1509_v23 = vld [vmem:[%s2221_s1 + $0x48] ss:$16 sps:$4 sm:$0xff]  }
  0x18   :  { %933 = vmatpush1.bf16.msra.mxu1 %v1431_v24  ;;  %863 = vmatprep.subr.bf16.mxu0 %v1432_v25  ;;  %v1463_v49 = vld [vmem:[%s2221_s1 + $0x324] ss:$16 sps:$4 sm:$0xff]   ;;  %v1466_v51 = vld [vmem:[%s2221_s1 + $0x320] ss:$16 sps:$4 sm:$0xff]   ;;  %v1512_v24 = vld [vmem:[%s2221_s1 + $0x2a8] ss:$16 sps:$4 sm:$0xff]  }
  0x19   :  { %934 = vmatprep.subr.bf16.mxu1 %v1434_v26  ;;  %v1764_v52 = vld [vmem:[%s2222_s0 + $0x4] ss:$16 sps:$4 sm:$0xff]   ;;  %v1471_v55 = vld [vmem:[%s2221_s1 + $0x160] ss:$16 sps:$4 sm:$0xff]   ;;  %v1517_v25 = vld [vmem:[%s2221_s1 + $0x2c] ss:$16 sps:$4 sm:$0xff]  }
  0x1a   :  { %v1467_v53 = vld [vmem:[%s2221_s1 + $0x164] ss:$16 sps:$4 sm:$0xff]   ;;  %883 = vmatprep.mubr.bf16.mxu0 %v1764_v52  ;;  %v1472_v56 = vld [vmem:[%s2221_s1 + $0x300] ss:$16 sps:$4 sm:$0xff]   ;;  %v1520_v26 = vld [vmem:[%s2221_s1 + $0x28c] ss:$16 sps:$4 sm:$0xff]  }
  0x1b   :  { %864 = vmatpush1.bf16.msra.mxu0 %v1436_v27  ;;  %v1469_v54 = vld [vmem:[%s2221_s1 + $0x304] ss:$16 sps:$4 sm:$0xff]   ;;  %v1481_v61 = vld [vmem:[%s2221_s1 + $0x140] ss:$16 sps:$4 sm:$0xff]   ;;  %v1523_v31 = vld [vmem:[%s2221_s1 + $0xc] ss:$16 sps:$4 sm:$0xff]  }
  0x1c   :  { %935 = vmatpush1.bf16.msra.mxu1 %v1437_v28  ;;  %865 = vmatprep.subr.bf16.mxu0 %v1438_v29  ;;  %v1476_v57 = vld [vmem:[%s2221_s1 + $0x144] ss:$16 sps:$4 sm:$0xff]   ;;  %v1487_v1 = vld [vmem:[%s2221_s1 + $0x120] ss:$16 sps:$4 sm:$0xff]   ;;  %v1515_v28 = vld [vmem:[%s2221_s1 + $0x28] ss:$16 sps:$4 sm:$0xff]  }
  0x1d   :  { %936 = vmatprep.subr.bf16.mxu1 %v1440_v30  ;;  %v1482_v62 = vld [vmem:[%s2221_s1 + $0x124] ss:$16 sps:$4 sm:$0xff]   ;;  %v1493_v5 = vld [vmem:[%s2221_s1 + $0x100] ss:$16 sps:$4 sm:$0xff]   ;;  %v1518_v29 = vld [vmem:[%s2221_s1 + $0x288] ss:$16 sps:$4 sm:$0xff]  }
  0x1e   :  { %v1488_v2 = vld [vmem:[%s2221_s1 + $0x104] ss:$16 sps:$4 sm:$0xff]   ;;  %v1840_v10 = vld [vmem:[%s2222_s0] ss:$16 sps:$4 sm:$0xff]   ;;  %v28_v30 = vld [vmem:[%s2222_s0 + $0x68] sm:$0xff] }
  0x1f   :  { %866 = vmatpush1.bf16.msra.mxu0 %v1442_v32  ;;  %v1866_v17 = vld [vmem:[%s2222_s0 + $0x24] ss:$16 sps:$4 sm:$0xff]   ;;  %v1891_v22 = vld [vmem:[%s2222_s0 + $0x20] ss:$16 sps:$4 sm:$0xff]   ;;  %v1924_v32 = vcombine.high %v28_v30, %v28_v30  ;;  %v1524_v36 = vld [vmem:[%s2221_s1 + $0x268] ss:$16 sps:$4 sm:$0xff]  }
  0x20   :  { %937 = vmatpush1.bf16.msra.mxu1 %v1443_v33  ;;  %867 = vmatprep.subr.bf16.mxu0 %v1444_v34  ;;  %v1909_v27 = vld [vmem:[%s2222_s0 + $0x44] ss:$16 sps:$4 sm:$0xff]   ;;  %v1526_v33 = vld [vmem:[%s2221_s1 + $0x26c] ss:$16 sps:$4 sm:$0xff]   ;;  %v1929_v34 = vcombine.low %v28_v30, %v28_v30 }
  0x21   :  { %1383 = vmatprep.subr.msk.bf16.mxu1 %vm838_vm0, %v1380_v35  ;;  %v1521_v35 = vld [vmem:[%s2221_s1 + $0x8] ss:$16 sps:$4 sm:$0xff]  }
  0x23   :  { %868 = vmatpush2.bf16.msra.mxu0 %v1447_v37  ;;  %v1943_v37 = vld [vmem:[%s2222_s0 + $0x40] ss:$16 sps:$4 sm:$0xff]  }
  0x24   :  { %945 = vmatpush2.bf16.msra.mxu1 %v840_v38  ;;  %869 = vmatprep.subr.bf16.mxu0 %v1449_v39  ;;  %v27_v38 = vld [vmem:[%s2222_s0 + $0x60] sm:$0xff]  ;;  %v1535_v39 = vld [vmem:[%s2221_s1 + $0x1ec] ss:$16 sps:$4 sm:$0xff]  }
  0x25   :  { %946 = vmatprep.subr.bf16.mxu1 %v1451_v40  ;;  %v1538_v40 = vld [vmem:[%s2221_s1 + $0x24c] ss:$16 sps:$4 sm:$0xff]  }
  0x27   :  { %870 = vmatpush2.bf16.msra.mxu0 %v1453_v42  ;;  %v1955_v42 = vcombine.high %v27_v38, %v27_v38 }
  0x28   :  { %947 = vmatpush2.bf16.msra.mxu1 %v1454_v43  ;;  %871 = vmatprep.subr.bf16.mxu0 %v1455_v44  ;;  %v1533_v43 = vld [vmem:[%s2221_s1 + $0x1e8] ss:$16 sps:$4 sm:$0xff]  }
  0x29   :  { %948 = vmatprep.subr.bf16.mxu1 %v1457_v45  ;;  %v1536_v44 = vld [vmem:[%s2221_s1 + $0x248] ss:$16 sps:$4 sm:$0xff]   ;;  %v143_v45 = vld [vmem:[%s2223_s2] sm:$0xff] }
  0x2a   :  { %152 = vperm.xlu0 %1394, %v143_v45  }
  0x2b   :  { %872 = vmatpush2.bf16.msra.mxu0 %v1459_v46  ;;  %v145_v46 = vld [vmem:[%s2223_s2 + $0x10] sm:$0xff] }
  0x2c   :  { %949 = vmatpush2.bf16.msra.mxu1 %v1460_v47  ;;  %873 = vmatprep.subr.bf16.mxu0 %v1461_v48  ;;  %v1541_v47 = vld [vmem:[%s2221_s1 + $0x1cc] ss:$16 sps:$4 sm:$0xff]  }
  0x2d   :  { %950 = vmatprep.subr.bf16.mxu1 %v1463_v49  ;;  %v1544_v48 = vld [vmem:[%s2221_s1 + $0x22c] ss:$16 sps:$4 sm:$0xff]   ;;  %v1978_v49 = vcombine.low %v27_v38, %v27_v38  ;;  %162 = vperm.xlu1 %1395, %v145_v46  }
  0x2f   :  { %874 = vmatpush2.bf16.msra.mxu0 %v1465_v50  ;;  %v144_v50 = vld [vmem:[%s2223_s2 + $0x8] sm:$0xff] }
  0x30   :  { %951 = vmatpush2.bf16.msra.mxu1 %v1466_v51  ;;  %875 = vmatprep.subr.bf16.mxu0 %v1467_v53  ;;  %v1539_v51 = vld [vmem:[%s2221_s1 + $0x1c8] ss:$16 sps:$4 sm:$0xff]  }
  0x31   :  { %952 = vmatprep.subr.bf16.mxu1 %v1469_v54  ;;  %v146_v53 = vld [vmem:[%s2223_s2 + $0x18] sm:$0xff]  ;;  %157 = vperm.xlu0 %1394, %v144_v50  }
  0x32   :  { %v1553_v54 = vld [vmem:[%s2221_s1 + $0x1ac] ss:$16 sps:$4 sm:$0xff]   ;;  %167 = vperm.xlu1 %1395, %v146_v53  }
  0x33   :  { %876 = vmatpush2.bf16.msra.mxu0 %v1471_v55  ;;  %v1556_v55 = vld [vmem:[%s2221_s1 + $0x20c] ss:$16 sps:$4 sm:$0xff]  }
  0x34   :  { %953 = vmatpush2.bf16.msra.mxu1 %v1472_v56  ;;  %877 = vmatprep.subr.bf16.mxu0 %v1476_v57  ;;  %v142_v56 = vld [vmem:[%s2221_s1 + $0x388] sm:$0x11]  ;;  %v147_v57 = vld [vmem:[%s2223_s2 + $0x20] sm:$0xff] }
  0x35   :  { %993 = vmatprep.subr.bf16.mxu1 %v1480_v58  ;;  %v1551_v58 = vld [vmem:[%s2221_s1 + $0x1a8] ss:$16 sps:$4 sm:$0xff]   ;;  %172 = vperm.xlu0 %1394, %v147_v57  }
  0x37   :  { %955 = vmatmul.mubr.bf16.vlgmr.msra.gmra.mxu1 %v1788_v59  ;;  %878 = vmatpush2.bf16.msra.mxu0 %v1481_v61  ;;  %v148_v61 = vld [vmem:[%s2223_s2 + $0x28] sm:$0xff] }
  0x38   :  { %994 = vmatpush1.bf16.msra.mxu1 %v1478_v60  ;;  %879 = vmatprep.subr.bf16.mxu0 %v1482_v62  ;;  %v1554_v60 = vld [vmem:[%s2221_s1 + $0x208] ss:$16 sps:$4 sm:$0xff]   ;;  %v1559_v62 = vld [vmem:[%s2221_s1 + $0x18c] ss:$16 sps:$4 sm:$0xff]  }
  0x39   :  { %995 = vmatprep.subr.bf16.mxu1 %v1486_v63  ;;  %1385 = vmatprep.mubr.msk.bf16.mxu1 %vm825_vm1, %v1824_v6  ;;  %v1382_v63 = vcombine.high %v142_v56, %v142_v56 }
  0x3a   :  { %177 = vperm.xlu1 %1395, %v148_v61  }
  0x3b   :  { %880 = vmatpush2.bf16.msra.mxu0 %v1487_v1  ;;  %v149_v1 = vld [vmem:[%s2223_s2 + $0x30] sm:$0xff] }
  0x3c   :  { %996 = vmatpush1.bf16.msra.mxu1 %v1484_v0  ;;  %881 = vmatprep.subr.bf16.mxu0 %v1488_v2  ;;  %v1381_v0 = vcombine.low %v142_v56, %v142_v56  ;;  %v1557_v2 = vld [vmem:[%s2221_s1 + $0x188] ss:$16 sps:$4 sm:$0xff]  }
  0x3d   :  { %997 = vmatprep.subr.bf16.mxu1 %v1492_v3  ;;  %182 = vperm.xlu0 %1394, %v149_v1  }
  0x3e   :  { %v846_v3 = vsel %vm838_vm0, %v1381_v0, 0 }
  0x3f   :  { %965 = vmatmul.mubr.bf16.gmra.mxu1 %v1829_v7  ;;  %882 = vmatpush2.bf16.msra.mxu0 %v1493_v5  ;;  %v1562_v5 = vld [vmem:[%s2221_s1 + $0x168] ss:$16 sps:$4 sm:$0xff]  }
  0x40   :  { %998 = vmatpush1.bf16.msra.mxu1 %v1490_v4  ;;  %1064 = vmatprep.subr.bf16.mxu0 %v1502_v9  ;;  %v1567_v4 = vld [vmem:[%s2221_s1 + $0x36c] ss:$16 sps:$4 sm:$0xff]  }
  0x41   :  { %999 = vmatprep.subr.bf16.mxu1 %v1499_v8  ;;  %1386 = vmatprep.mubr.msk.bf16.mxu1 %vm825_vm1, %v1872_v18  ;;  %v1565_v8 = vld [vmem:[%s2221_s1 + $0x368] ss:$16 sps:$4 sm:$0xff]   ;;  %v1574_v9 = vld [vmem:[%s2221_s1 + $0x14c] ss:$16 sps:$4 sm:$0xff]  }
  0x42   :  { %884 = vmatmul.mubr.bf16.vlgmr.msra.gmra.mxu0 %v1840_v10 }
  0x43   :  { %1065 = vmatpush1.bf16.msra.mxu0 %v1500_v12  ;;  %893 = vmatprep.mubr.bf16.mxu0 %v1866_v17  ;;  %v1572_v12 = vld [vmem:[%s2221_s1 + $0x148] ss:$16 sps:$4 sm:$0xff]  }
  0x44   :  { %1000 = vmatpush1.bf16.msra.mxu1 %v1497_v11  ;;  %1066 = vmatprep.subr.bf16.mxu0 %v1508_v14  ;;  %v1577_v11 = vld [vmem:[%s2221_s1 + $0x34c] ss:$16 sps:$4 sm:$0xff]  }
  0x45   :  { %1001 = vmatprep.subr.bf16.mxu1 %v1505_v13  ;;  %v1575_v13 = vld [vmem:[%s2221_s1 + $0x348] ss:$16 sps:$4 sm:$0xff]   ;;  %v1580_v14 = vld [vmem:[%s2221_s1 + $0x12c] ss:$16 sps:$4 sm:$0xff]  }
  0x47   :  { %975 = vmatmul.mubr.bf16.gmra.mxu1 %v1877_v19  ;;  %1067 = vmatpush1.bf16.msra.mxu0 %v1506_v16  ;;  %v1578_v16 = vld [vmem:[%s2221_s1 + $0x128] ss:$16 sps:$4 sm:$0xff]  }
  0x48   :  { %1002 = vmatpush1.bf16.msra.mxu1 %v1503_v15  ;;  %1068 = vmatprep.subr.bf16.mxu0 %v1514_v21  ;;  %v1583_v15 = vld [vmem:[%s2221_s1 + $0x32c] ss:$16 sps:$4 sm:$0xff]  }
  0x49   :  { %1003 = vmatprep.subr.bf16.mxu1 %v1511_v20  ;;  %1387 = vmatprep.mubr.msk.bf16.mxu1 %vm825_vm1, %v1924_v32  ;;  %v1581_v20 = vld [vmem:[%s2221_s1 + $0x328] ss:$16 sps:$4 sm:$0xff]   ;;  %v1586_v21 = vld [vmem:[%s2221_s1 + $0x10c] ss:$16 sps:$4 sm:$0xff]  }
  0x4a   :  { %894 = vmatmul.mubr.bf16.gmra.mxu0 %v1891_v22 }
  0x4b   :  { %1069 = vmatpush1.bf16.msra.mxu0 %v1512_v24  ;;  %903 = vmatprep.mubr.bf16.mxu0 %v1909_v27  ;;  %v1584_v24 = vld [vmem:[%s2221_s1 + $0x108] ss:$16 sps:$4 sm:$0xff]  }
  0x4c   :  { %1004 = vmatpush1.bf16.msra.mxu1 %v1509_v23  ;;  %1070 = vmatprep.subr.bf16.mxu0 %v1520_v26  ;;  %v1589_v23 = vld [vmem:[%s2221_s1 + $0x30c] ss:$16 sps:$4 sm:$0xff]  }
  0x4d   :  { %1005 = vmatprep.subr.bf16.mxu1 %v1517_v25  ;;  %v1587_v25 = vld [vmem:[%s2221_s1 + $0x308] ss:$16 sps:$4 sm:$0xff]  }
  0x4f   :  { %985 = vmatmul.mubr.bf16.gmra.mxu1 %v1929_v34  ;;  %1071 = vmatpush1.bf16.msra.mxu0 %v1518_v29 }
  0x50   :  { %1006 = vmatpush1.bf16.msra.mxu1 %v1515_v28  ;;  %1072 = vmatprep.subr.bf16.mxu0 %v1526_v33 }
  0x51   :  { %1007 = vmatprep.subr.bf16.mxu1 %v1523_v31  ;;  %1025 = vmatprep.mubr.bf16.mxu1 %v1764_v52  ;;  %v1542_v52 = vld [vmem:[%s2221_s1 + $0x228] ss:$16 sps:$4 sm:$0xff]  }
  0x52   :  { %904 = vmatmul.mubr.bf16.gmra.mxu0 %v1943_v37 }
  0x53   :  { %1073 = vmatpush1.bf16.msra.mxu0 %v1524_v36  ;;  %913 = vmatprep.mubr.bf16.mxu0 %v1955_v42 }
  0x54   :  { %1008 = vmatpush1.bf16.msra.mxu1 %v1521_v35  ;;  %1074 = vmatprep.subr.bf16.mxu0 %v1538_v40 }
  0x55   :  { %1009 = vmatprep.subr.bf16.mxu1 %v1535_v39 }
  0x57   :  { %1075 = vmatpush1.bf16.msra.mxu0 %v1536_v44 }
  0x58   :  { %1010 = vmatpush2.bf16.msra.mxu1 %v1533_v43  ;;  %1076 = vmatprep.subr.bf16.mxu0 %v1544_v48 }
  0x59   :  { %1011 = vmatprep.subr.bf16.mxu1 %v1541_v47 }
  0x5a   :  { %914 = vmatmul.mubr.bf16.gmra.mxu0 %v1978_v49 }
  0x5b   :  { %1077 = vmatpush1.bf16.msra.mxu0 %v1542_v52  ;;  %1389 = vmatprep.mubr.msk.bf16.mxu0 %vm825_vm1, %v1727_v41  ;;  %v1564_v41 = vld [vmem:[%s2221_s1 + $0x16c] ss:$16 sps:$4 sm:$0xff]  }
  0x5c   :  { %1012 = vmatpush2.bf16.msra.mxu1 %v1539_v51  ;;  %1078 = vmatprep.subr.bf16.mxu0 %v1556_v55 }
  0x5d   :  { %1013 = vmatprep.subr.bf16.mxu1 %v1553_v54 }
  0x5f   :  { %1079 = vmatpush1.bf16.msra.mxu0 %v1554_v60 }
  0x60   :  { %1014 = vmatpush2.bf16.msra.mxu1 %v1551_v58  ;;  %1388 = vmatprep.subr.msk.bf16.mxu0 %vm838_vm0, %v1382_v63 }
  0x61   :  { %1015 = vmatprep.subr.bf16.mxu1 %v1559_v62 }
  0x63   :  { %1087 = vmatpush2.bf16.msra.mxu0 %v846_v3 }
  0x64   :  { %1016 = vmatpush2.bf16.msra.mxu1 %v1557_v2  ;;  %1088 = vmatprep.subr.bf16.mxu0 %v1567_v4 }
  0x65   :  { %1017 = vmatprep.subr.bf16.mxu1 %v1564_v41 }
  0x67   :  { %1089 = vmatpush2.bf16.msra.mxu0 %v1565_v8 }
  0x68   :  { %1018 = vmatpush2.bf16.msra.mxu1 %v1562_v5  ;;  %1090 = vmatprep.subr.bf16.mxu0 %v1577_v11 }
  0x69   :  { %1019 = vmatprep.subr.bf16.mxu1 %v1574_v9 }
  0x6b   :  { %1091 = vmatpush2.bf16.msra.mxu0 %v1575_v13 }
  0x6c   :  { %1020 = vmatpush2.bf16.msra.mxu1 %v1572_v12  ;;  %1092 = vmatprep.subr.bf16.mxu0 %v1583_v15 }
  0x6d   :  { %1021 = vmatprep.subr.bf16.mxu1 %v1580_v14 }
  0x6f   :  { %1093 = vmatpush2.bf16.msra.mxu0 %v1581_v20 }
  0x70   :  { %1022 = vmatpush2.bf16.msra.mxu1 %v1578_v16  ;;  %1094 = vmatprep.subr.bf16.mxu0 %v1589_v23 }
  0x71   :  { %1023 = vmatprep.subr.bf16.mxu1 %v1586_v21 }
  0x73   :  { %1095 = vmatpush2.bf16.msra.mxu0 %v1587_v25 }
  0x74   :  { %1024 = vmatpush2.bf16.msra.mxu1 %v1584_v24 }
  0x76   :  { %1097 = vmatmul.mubr.bf16.vlgmr.msra.gmra.mxu0 %v1788_v59 }
  0x77   :  { %1026 = vmatmul.mubr.bf16.vlgmr.msra.gmra.mxu1 %v1840_v10  ;;  %1390 = vmatprep.mubr.msk.bf16.mxu0 %vm825_vm1, %v1824_v6 }
  0x78   :  { %1035 = vmatprep.mubr.bf16.mxu1 %v1866_v17 }
  0x7e   :  { %1107 = vmatmul.mubr.bf16.gmra.mxu0 %v1829_v7 }
  0x7f   :  { %1036 = vmatmul.mubr.bf16.gmra.mxu1 %v1891_v22  ;;  %1391 = vmatprep.mubr.msk.bf16.mxu0 %vm825_vm1, %v1872_v18 }
  0x80   :  { %1045 = vmatprep.mubr.bf16.mxu1 %v1909_v27 }
  0x86   :  { %1117 = vmatmul.mubr.bf16.gmra.mxu0 %v1877_v19 }
  0x87   :  { %1046 = vmatmul.mubr.bf16.gmra.mxu1 %v1943_v37  ;;  %1392 = vmatprep.mubr.msk.bf16.mxu0 %vm825_vm1, %v1924_v32 }
  0x88   :  { %1055 = vmatprep.mubr.bf16.mxu1 %v1955_v42 }
  0x8e   :  { %1127 = vmatmul.mubr.bf16.gmra.mxu0 %v1929_v34 }
  0x8f   :  { %1056 = vmatmul.mubr.bf16.gmra.mxu1 %v1978_v49 }
  0xa5   :  { %v2092_v17 = vpop.permute.xlu0 %152 }
  0xa8   :  { %v2098_v33 = vpop.permute.xlu1 %162 }
  0xac   :  { %v2095_v28 = vpop.permute.xlu0 %157 }
  0xad   :  { %v2108_v51 = vpop.permute.xlu1 %167 }
  0xb0   :  { %v2118_v1 = vpop.permute.xlu0 %172 }
  0xb5   :  { %v2131_v24 = vpop.permute.xlu1 %177 }
  0xf7   :  { %v956_v59 = vpop.f32.mrf.mxu1 }
  0xf9   :  { %v958_v6 = vpop.f32.mrf.mxu1 }
  0xfb   :  { %v960_v7 = vpop.f32.mrf.mxu1 }
  0xfd   :  { %v962_v10 = vpop.f32.mrf.mxu1 }
  0xff   :  { %v966_v18 = vpop.f32.mrf.mxu1 }
 0x101   :  { %v968_v22 = vpop.f32.mrf.mxu1 }
 0x102   :  { %v885_v26 = vpop.f32.mrf.mxu0 }
 0x103   :  { %v970_v27 = vpop.f32.mrf.mxu1  ;;  %v886_v19 = vadd.f32 %v885_v26, %v2092_v17 }
 0x104   :  { %v887_v29 = vpop.f32.mrf.mxu0 }
 0x105   :  { %v972_v30 = vpop.f32.mrf.mxu1  ;;  %v957_v31 = vadd.f32 %v956_v59, %v886_v19  ;;  %v888_v32 = vadd.f32 %v887_v29, %v2092_v17  ;;  %v2141_v19 = vpop.permute.xlu0 %182 }
 0x106   :  { %v889_v34 = vpop.f32.mrf.mxu0 }
 0x107   :  { %v976_v35 = vpop.f32.mrf.mxu1  ;;  %vm1135_vm2 = vcmp.gt.f32.partialorder %v957_v31, 0.0  ;;  %v1163_v36 = vmul.f32 0.01, %v957_v31  ;;  %v959_v37 = vadd.f32 %v958_v6, %v888_v32  ;;  %v890_v38 = vadd.f32 %v889_v34, %v2095_v28 }
 0x108   :  { %v891_v39 = vpop.f32.mrf.mxu0 }
 0x109   :  { %v978_v40 = vpop.f32.mrf.mxu1  ;;  %v1191_v42 = vsel %vm1135_vm2, %v957_v31, %v1163_v36  ;;  %vm1136_vm3 = vcmp.gt.f32.partialorder %v959_v37, 0.0  ;;  %v1164_v43 = vmul.f32 0.01, %v959_v37  ;;  %v961_v44 = vadd.f32 %v960_v7, %v890_v38 }
 0x10a   :  { %1219 = vst [vmem:[%s2224_s3] sm:$0xff] %v1191_v42  ;;  %v892_v45 = vadd.f32 %v891_v39, %v2095_v28  ;;  %v895_v46 = vpop.f32.mrf.mxu0 }
 0x10b   :  { %v2105_v47 = vpop.f32.mrf.mxu1  ;;  %v1192_v48 = vsel %vm1136_vm3, %v959_v37, %v1164_v43  ;;  %vm1139_vm4 = vcmp.gt.f32.partialorder %v961_v44, 0.0  ;;  %v1167_v49 = vmul.f32 0.01, %v961_v44  ;;  %v896_v50 = vadd.f32 %v895_v46, %v2098_v33 }
 0x10c   :  { %1220 = vst [vmem:[%s2224_s3 + $0x8] sm:$0xff] %v1192_v48  ;;  %v963_v52 = vadd.f32 %v962_v10, %v892_v45  ;;  %v897_v53 = vpop.f32.mrf.mxu0 }
 0x10d   :  { %v982_v54 = vpop.f32.mrf.mxu1  ;;  %v1195_v55 = vsel %vm1139_vm4, %v961_v44, %v1167_v49  ;;  %v898_v56 = vadd.f32 %v897_v53, %v2098_v33  ;;  %v967_v57 = vadd.f32 %v966_v18, %v896_v50 }
 0x10e   :  { %1223 = vst [vmem:[%s2224_s3 + $0x20] sm:$0xff] %v1195_v55  ;;  %vm1140_vm5 = vcmp.gt.f32.partialorder %v963_v52, 0.0  ;;  %v1168_v58 = vmul.f32 0.01, %v963_v52  ;;  %v899_v60 = vpop.f32.mrf.mxu0 }
 0x10f   :  { %v986_v61 = vpop.f32.mrf.mxu1  ;;  %vm1143_vm6 = vcmp.gt.f32.partialorder %v967_v57, 0.0  ;;  %v1171_v62 = vmul.f32 0.01, %v967_v57  ;;  %v969_v63 = vadd.f32 %v968_v22, %v898_v56  ;;  %v900_v0 = vadd.f32 %v899_v60, %v2108_v51 }
 0x110   :  { %v1196_v2 = vsel %vm1140_vm5, %v963_v52, %v1168_v58  ;;  %v901_v3 = vpop.f32.mrf.mxu0 }
 0x111   :  { %v988_v41 = vpop.f32.mrf.mxu1  ;;  %1224 = vst [vmem:[%s2224_s3 + $0x28] sm:$0xff] %v1196_v2  ;;  %v1199_v4 = vsel %vm1143_vm6, %v967_v57, %v1171_v62  ;;  %vm1144_vm7 = vcmp.gt.f32.partialorder %v969_v63, 0.0  ;;  %v1172_v5 = vmul.f32 0.01, %v969_v63  ;;  %v902_v8 = vadd.f32 %v901_v3, %v2108_v51 }
 0x112   :  { %1227 = vst [vmem:[%s2224_s3 + $0x40] sm:$0xff] %v1199_v4  ;;  %v971_v9 = vadd.f32 %v970_v27, %v900_v0  ;;  %v905_v11 = vpop.f32.mrf.mxu0 }
 0x113   :  { %v990_v12 = vpop.f32.mrf.mxu1  ;;  %v1200_v13 = vsel %vm1144_vm7, %v969_v63, %v1172_v5  ;;  %v973_v14 = vadd.f32 %v972_v30, %v902_v8  ;;  %v906_v15 = vadd.f32 %v905_v11, %v2118_v1 }
 0x114   :  { %1228 = vst [vmem:[%s2224_s3 + $0x48] sm:$0xff] %v1200_v13  ;;  %vm1147_vm8 = vcmp.gt.f32.partialorder %v971_v9, 0.0  ;;  %v1175_v16 = vmul.f32 0.01, %v971_v9  ;;  %v907_v20 = vpop.f32.mrf.mxu0 }
 0x115   :  { %v991_v21 = vpop.f32.mrf.mxu1  ;;  %vm1148_vm9 = vcmp.gt.f32.partialorder %v973_v14, 0.0  ;;  %v1176_v23 = vmul.f32 0.01, %v973_v14  ;;  %v908_v25 = vadd.f32 %v907_v20, %v2118_v1  ;;  %v977_v59 = vadd.f32 %v976_v35, %v906_v15 }
 0x116   :  { %v1203_v6 = vsel %vm1147_vm8, %v971_v9, %v1175_v16  ;;  %v909_v7 = vpop.f32.mrf.mxu0 }
 0x117   :  { %1231 = vst [vmem:[%s2224_s3 + $0x60] sm:$0xff] %v1203_v6  ;;  %v1204_v10 = vsel %vm1148_vm9, %v973_v14, %v1176_v23  ;;  %v979_v18 = vadd.f32 %v978_v40, %v908_v25  ;;  %vm1151_vm10 = vcmp.gt.f32.partialorder %v977_v59, 0.0  ;;  %v1179_v22 = vmul.f32 0.01, %v977_v59 }
 0x118   :  { %1232 = vst [vmem:[%s2224_s3 + $0x68] sm:$0xff] %v1204_v10  ;;  %v911_v26 = vpop.f32.mrf.mxu0  ;;  %v910_v27 = vadd.f32 %v909_v7, %v2131_v24 }
 0x119   :  { %vm1152_vm11 = vcmp.gt.f32.partialorder %v979_v18, 0.0  ;;  %v1180_v29 = vmul.f32 0.01, %v979_v18  ;;  %v1207_v30 = vsel %vm1151_vm10, %v977_v59, %v1179_v22  ;;  %v912_v31 = vadd.f32 %v911_v26, %v2131_v24 }
 0x11a   :  { %1235 = vst [vmem:[%s2224_s3 + $0x80] sm:$0xff] %v1207_v30  ;;  %v981_v32 = vadd.f32 %v2105_v47, %v910_v27  ;;  %v915_v34 = vpop.f32.mrf.mxu0 }
 0x11b   :  { %v1208_v35 = vsel %vm1152_vm11, %v979_v18, %v1180_v29  ;;  %v983_v36 = vadd.f32 %v982_v54, %v912_v31  ;;  %v916_v37 = vadd.f32 %v915_v34, %v2141_v19 }
 0x11c   :  { %1236 = vst [vmem:[%s2224_s3 + $0x88] sm:$0xff] %v1208_v35  ;;  %vm1155_vm12 = vcmp.gt.f32.partialorder %v981_v32, 0.0  ;;  %v1183_v38 = vmul.f32 0.01, %v981_v32  ;;  %v917_v39 = vpop.f32.mrf.mxu0 }
 0x11d   :  { %vm1156_vm13 = vcmp.gt.f32.partialorder %v983_v36, 0.0  ;;  %v1184_v40 = vmul.f32 0.01, %v983_v36  ;;  %v987_v42 = vadd.f32 %v986_v61, %v916_v37  ;;  %v918_v43 = vadd.f32 %v917_v39, %v2141_v19 }
 0x11e   :  { %v1211_v44 = vsel %vm1155_vm12, %v981_v32, %v1183_v38  ;;  %v919_v45 = vpop.f32.mrf.mxu0 }
 0x11f   :  { %1239 = vst [vmem:[%s2224_s3 + $0xa0] sm:$0xff] %v1211_v44  ;;  %v1212_v46 = vsel %vm1156_vm13, %v983_v36, %v1184_v40  ;;  %vm1159_vm14 = vcmp.gt.f32.partialorder %v987_v42, 0.0  ;;  %v1187_v47 = vmul.f32 0.01, %v987_v42  ;;  %v989_v48 = vadd.f32 %v988_v41, %v918_v43 }
 0x120   :  { %1240 = vst [vmem:[%s2224_s3 + $0xa8] sm:$0xff] %v1212_v46  ;;  %v920_v49 = vpop.f32.mrf.mxu0 }
 0x121   :  { %v1215_v50 = vsel %vm1159_vm14, %v987_v42, %v1187_v47  ;;  %vm1160_vm15 = vcmp.gt.f32.partialorder %v989_v48, 0.0  ;;  %v1188_v52 = vmul.f32 0.01, %v989_v48 }
 0x122   :  { %1243 = vst [vmem:[%s2224_s3 + $0xc0] sm:$0xff] %v1215_v50 }
 0x123   :  { %v1216_v53 = vsel %vm1160_vm15, %v989_v48, %v1188_v52 }
 0x124   :  { %1244 = vst [vmem:[%s2224_s3 + $0xc8] sm:$0xff] %v1216_v53 }
 0x136   :  { %v1098_v55 = vpop.f32.mrf.mxu0 }
 0x137   :  { %v1027_v54 = vpop.f32.mrf.mxu1 }
 0x138   :  { %v1028_v56 = vadd.f32 %v1027_v54, %v2092_v17  ;;  %v1100_v58 = vpop.f32.mrf.mxu0 }
 0x139   :  { %v1029_v57 = vpop.f32.mrf.mxu1 }
 0x13a   :  { %v1099_v60 = vadd.f32 %v1098_v55, %v1028_v56  ;;  %v1030_v61 = vadd.f32 %v1029_v57, %v2092_v17  ;;  %v1102_v63 = vpop.f32.mrf.mxu0 }
 0x13b   :  { %v1031_v62 = vpop.f32.mrf.mxu1 }
 0x13c   :  { %vm1137_vm0 = vcmp.gt.f32.partialorder %v1099_v60, 0.0  ;;  %v1165_v0 = vmul.f32 0.01, %v1099_v60  ;;  %v1101_v2 = vadd.f32 %v1100_v58, %v1030_v61  ;;  %v1032_v3 = vadd.f32 %v1031_v62, %v2095_v28  ;;  %v1104_v4 = vpop.f32.mrf.mxu0 }
 0x13d   :  { %v1033_v41 = vpop.f32.mrf.mxu1 }
 0x13e   :  { %v1193_v5 = vsel %vm1137_vm0, %v1099_v60, %v1165_v0  ;;  %vm1138_vm1 = vcmp.gt.f32.partialorder %v1101_v2, 0.0  ;;  %v1166_v8 = vmul.f32 0.01, %v1101_v2  ;;  %v1103_v9 = vadd.f32 %v1102_v63, %v1032_v3  ;;  %v1108_v12 = vpop.f32.mrf.mxu0 }
 0x13f   :  { %1221 = vst [vmem:[%s2224_s3 + $0x10] sm:$0xff] %v1193_v5  ;;  %v1034_v11 = vadd.f32 %v1033_v41, %v2095_v28  ;;  %v1037_v17 = vpop.f32.mrf.mxu1 }
 0x140   :  { %v1194_v13 = vsel %vm1138_vm1, %v1101_v2, %v1166_v8  ;;  %vm1141_vm2 = vcmp.gt.f32.partialorder %v1103_v9, 0.0  ;;  %v1169_v14 = vmul.f32 0.01, %v1103_v9  ;;  %v1038_v15 = vadd.f32 %v1037_v17, %v2098_v33  ;;  %v1110_v21 = vpop.f32.mrf.mxu0 }
 0x141   :  { %1222 = vst [vmem:[%s2224_s3 + $0x18] sm:$0xff] %v1194_v13  ;;  %v1105_v16 = vadd.f32 %v1104_v4, %v1034_v11  ;;  %v1039_v20 = vpop.f32.mrf.mxu1 }
 0x142   :  { %v1197_v23 = vsel %vm1141_vm2, %v1103_v9, %v1169_v14  ;;  %v1109_v25 = vadd.f32 %v1108_v12, %v1038_v15  ;;  %v1040_v59 = vadd.f32 %v1039_v20, %v2098_v33  ;;  %v1112_v7 = vpop.f32.mrf.mxu0 }
 0x143   :  { %1225 = vst [vmem:[%s2224_s3 + $0x30] sm:$0xff] %v1197_v23  ;;  %vm1142_vm3 = vcmp.gt.f32.partialorder %v1105_v16, 0.0  ;;  %v1170_v28 = vmul.f32 0.01, %v1105_v16  ;;  %v1041_v6 = vpop.f32.mrf.mxu1 }
 0x144   :  { %vm1145_vm4 = vcmp.gt.f32.partialorder %v1109_v25, 0.0  ;;  %v1173_v10 = vmul.f32 0.01, %v1109_v25  ;;  %v1111_v18 = vadd.f32 %v1110_v21, %v1040_v59  ;;  %v1042_v22 = vadd.f32 %v1041_v6, %v2108_v51  ;;  %v1114_v29 = vpop.f32.mrf.mxu0 }
 0x145   :  { %v1198_v26 = vsel %vm1142_vm3, %v1105_v16, %v1170_v28  ;;  %v1043_v27 = vpop.f32.mrf.mxu1 }
 0x146   :  { %1226 = vst [vmem:[%s2224_s3 + $0x38] sm:$0xff] %v1198_v26  ;;  %v1201_v33 = vsel %vm1145_vm4, %v1109_v25, %v1173_v10  ;;  %vm1146_vm5 = vcmp.gt.f32.partialorder %v1111_v18, 0.0  ;;  %v1174_v30 = vmul.f32 0.01, %v1111_v18  ;;  %v1113_v31 = vadd.f32 %v1112_v7, %v1042_v22  ;;  %v1118_v35 = vpop.f32.mrf.mxu0 }
 0x147   :  { %1229 = vst [vmem:[%s2224_s3 + $0x50] sm:$0xff] %v1201_v33  ;;  %v1044_v32 = vadd.f32 %v1043_v27, %v2108_v51  ;;  %v1047_v34 = vpop.f32.mrf.mxu1 }
 0x148   :  { %v1202_v36 = vsel %vm1146_vm5, %v1111_v18, %v1174_v30  ;;  %vm1149_vm6 = vcmp.gt.f32.partialorder %v1113_v31, 0.0  ;;  %v1177_v37 = vmul.f32 0.01, %v1113_v31  ;;  %v1048_v38 = vadd.f32 %v1047_v34, %v2118_v1  ;;  %v1120_v42 = vpop.f32.mrf.mxu0 }
 0x149   :  { %1230 = vst [vmem:[%s2224_s3 + $0x58] sm:$0xff] %v1202_v36  ;;  %v1115_v39 = vadd.f32 %v1114_v29, %v1044_v32  ;;  %v1049_v40 = vpop.f32.mrf.mxu1 }
 0x14a   :  { %v1205_v43 = vsel %vm1149_vm6, %v1113_v31, %v1177_v37  ;;  %v1119_v44 = vadd.f32 %v1118_v35, %v1048_v38  ;;  %v1050_v45 = vadd.f32 %v1049_v40, %v2118_v1  ;;  %v1122_v47 = vpop.f32.mrf.mxu0 }
 0x14b   :  { %1233 = vst [vmem:[%s2224_s3 + $0x70] sm:$0xff] %v1205_v43  ;;  %vm1150_vm7 = vcmp.gt.f32.partialorder %v1115_v39, 0.0  ;;  %v1178_v51 = vmul.f32 0.01, %v1115_v39  ;;  %v1051_v46 = vpop.f32.mrf.mxu1 }
 0x14c   :  { %vm1153_vm8 = vcmp.gt.f32.partialorder %v1119_v44, 0.0  ;;  %v1181_v48 = vmul.f32 0.01, %v1119_v44  ;;  %v1121_v49 = vadd.f32 %v1120_v42, %v1050_v45  ;;  %v1052_v50 = vadd.f32 %v1051_v46, %v2131_v24  ;;  %v1124_v54 = vpop.f32.mrf.mxu0 }
 0x14d   :  { %v1206_v52 = vsel %vm1150_vm7, %v1115_v39, %v1178_v51  ;;  %v1053_v53 = vpop.f32.mrf.mxu1 }
 0x14e   :  { %1234 = vst [vmem:[%s2224_s3 + $0x78] sm:$0xff] %v1206_v52  ;;  %v1209_v1 = vsel %vm1153_vm8, %v1119_v44, %v1181_v48  ;;  %vm1154_vm9 = vcmp.gt.f32.partialorder %v1121_v49, 0.0  ;;  %v1182_v55 = vmul.f32 0.01, %v1121_v49  ;;  %v1123_v56 = vadd.f32 %v1122_v47, %v1052_v50  ;;  %v1128_v60 = vpop.f32.mrf.mxu0 }
 0x14f   :  { %1237 = vst [vmem:[%s2224_s3 + $0x90] sm:$0xff] %v1209_v1  ;;  %v1054_v57 = vadd.f32 %v1053_v53, %v2131_v24  ;;  %v1057_v58 = vpop.f32.mrf.mxu1 }
 0x150   :  { %v1210_v61 = vsel %vm1154_vm9, %v1121_v49, %v1182_v55  ;;  %vm1157_vm10 = vcmp.gt.f32.partialorder %v1123_v56, 0.0  ;;  %v1185_v62 = vmul.f32 0.01, %v1123_v56  ;;  %v1058_v63 = vadd.f32 %v1057_v58, %v2141_v19  ;;  %v1130_v3 = vpop.f32.mrf.mxu0 }
 0x151   :  { %1238 = vst [vmem:[%s2224_s3 + $0x98] sm:$0xff] %v1210_v61  ;;  %v1125_v0 = vadd.f32 %v1124_v54, %v1054_v57  ;;  %v1059_v2 = vpop.f32.mrf.mxu1 }
 0x152   :  { %v1213_v41 = vsel %vm1157_vm10, %v1123_v56, %v1185_v62  ;;  %v1129_v4 = vadd.f32 %v1128_v60, %v1058_v63  ;;  %v1060_v5 = vadd.f32 %v1059_v2, %v2141_v19  ;;  %v1132_v9 = vpop.f32.mrf.mxu0 }
 0x153   :  { %1241 = vst [vmem:[%s2224_s3 + $0xb0] sm:$0xff] %v1213_v41  ;;  %vm1158_vm11 = vcmp.gt.f32.partialorder %v1125_v0, 0.0  ;;  %v1186_v24 = vmul.f32 0.01, %v1125_v0  ;;  %v1061_v8 = vpop.f32.mrf.mxu1 }
 0x154   :  { %vm1161_vm12 = vcmp.gt.f32.partialorder %v1129_v4, 0.0  ;;  %v1189_v11 = vmul.f32 0.01, %v1129_v4  ;;  %v1131_v17 = vadd.f32 %v1130_v3, %v1060_v5  ;;  %v1133_v14 = vpop.f32.mrf.mxu0 }
 0x155   :  { %v1214_v12 = vsel %vm1158_vm11, %v1125_v0, %v1186_v24  ;;  %v1062_v13 = vpop.f32.mrf.mxu1 }
 0x156   :  { %1242 = vst [vmem:[%s2224_s3 + $0xb8] sm:$0xff] %v1214_v12  ;;  %v1217_v15 = vsel %vm1161_vm12, %v1129_v4, %v1189_v11  ;;  %vm1162_vm13 = vcmp.gt.f32.partialorder %v1131_v17, 0.0  ;;  %v1190_v19 = vmul.f32 0.01, %v1131_v17 }
 0x157   :  { %1245 = vst [vmem:[%s2224_s3 + $0xd0] sm:$0xff] %v1217_v15 }
 0x158   :  { %v1218_v16 = vsel %vm1162_vm13, %v1131_v17, %v1190_v19 }
 0x159   :  { %1246 = vst [vmem:[%s2224_s3 + $0xd8] sm:$0xff] %v1218_v16 }

// kernel: forward_rnn.88
= control target key start
LH: loop header
LB: loop body
LE: loop exit
PB: predicated region body
PF: predicated region fallthrough
CT: control target
= control target key end

     0   :  { %vm179_vm0 = vcmask 1040384   ;;  %v509_v2 = vmov 0   ;;  %vm166_vm1 = vcmask 408576   ;;  %s711_s1 = inlined_call_operand.vmem [shape: bf16[50,512], index: 1, kind: input, shape index: {}]   ;;  %s712_s0 = inlined_call_operand.vmem [shape: bf16[56,50], index: 0, kind: input, shape index: {}]   ;;  %s713_s2 = inlined_call_operand.vmem [shape: f32[56,1], index: 2, kind: input, shape index: {}]   ;;  %s714_s3 = inlined_call_operand.vmem [shape: f32[56,512], index: 3, kind: output, shape index: {}]  }
   0x1   :  { %v34_v0 = vld [vmem:[%s711_s1 + $0x60] sm:$0x11]  ;;  %v35_v1 = vld [vmem:[%s711_s1 + $0x68] sm:$0x11]  ;;  %224 = vmatprep.mubr.bf16.mxu0 %v509_v2  ;;  %295 = vmatprep.mubr.bf16.mxu1 %v509_v2  ;;  %v38_v22 = vld [vmem:[%s713_s2 + $0x10] sm:$0xff] }
   0x2   :  { %v467_v3 = vcombine.high %v34_v0, %v34_v0  ;;  %v469_v4 = vcombine.high %v35_v1, %v35_v1  ;;  %v466_v5 = vcombine.low %v34_v0, %v34_v0  ;;  %v468_v6 = vcombine.low %v35_v1, %v35_v1  ;;  %v487_v7 = vld [vmem:[%s711_s1 + $0x44] ss:$16 sps:$4 sm:$0xff]   ;;  %481 = vset.pattern.permute.xlu0 %v509_v2  ;;  %v489_v8 = vld [vmem:[%s711_s1 + $0x4c] ss:$16 sps:$4 sm:$0xff]   ;;  %v491_v11 = vld [vmem:[%s711_s1 + $0x40] ss:$16 sps:$4 sm:$0xff]  }
   0x3   :  { %482 = vset.pattern.permute.xlu1 %v509_v2  ;;  %v492_v12 = vld [vmem:[%s711_s1 + $0x48] ss:$16 sps:$4 sm:$0xff]   ;;  %v493_v13 = vld [vmem:[%s711_s1 + $0x24] ss:$16 sps:$4 sm:$0xff]   ;;  %v495_v14 = vld [vmem:[%s711_s1 + $0x2c] ss:$16 sps:$4 sm:$0xff]  }
   0x4   :  { %470 = vmatprep.subr.msk.bf16.mxu0 %vm179_vm0, %v467_v3  ;;  %475 = vmatprep.subr.msk.bf16.mxu1 %vm179_vm0, %v469_v4  ;;  %v181_v9 = vsel %vm179_vm0, %v466_v5, 0  ;;  %v187_v10 = vsel %vm179_vm0, %v468_v6, 0  ;;  %v497_v15 = vld [vmem:[%s711_s1 + $0x20] ss:$16 sps:$4 sm:$0xff]   ;;  %v498_v16 = vld [vmem:[%s711_s1 + $0x28] ss:$16 sps:$4 sm:$0xff]  }
   0x5   :  { %201 = vmatpush1.bf16.msra.mxu0 %v181_v9  ;;  %272 = vmatpush1.bf16.msra.mxu1 %v187_v10  ;;  %v499_v17 = vld [vmem:[%s711_s1 + $0x4] ss:$16 sps:$4 sm:$0xff]   ;;  %v501_v18 = vld [vmem:[%s711_s1 + $0xc] ss:$16 sps:$4 sm:$0xff]   ;;  %v503_v19 = vld [vmem:[%s711_s1] ss:$16 sps:$4 sm:$0xff]  }
   0x6   :  { %202 = vmatprep.subr.bf16.mxu0 %v487_v7  ;;  %273 = vmatprep.subr.bf16.mxu1 %v489_v8  ;;  %v504_v20 = vld [vmem:[%s711_s1 + $0x8] ss:$16 sps:$4 sm:$0xff]   ;;  %v36_v21 = vld [vmem:[%s713_s2] sm:$0xff]  ;;  %v42_v29 = vld [vmem:[%s713_s2 + $0x30] sm:$0xff] }
   0x7   :  { %45 = vperm.xlu0 %481, %v36_v21   ;;  %55 = vperm.xlu1 %482, %v38_v22   ;;  %v505_v23 = vld [vmem:[%s712_s0] sm:$0xff]   ;;  %v37_v24 = vld [vmem:[%s713_s2 + $0x8] sm:$0xff]  ;;  %v39_v25 = vld [vmem:[%s713_s2 + $0x18] sm:$0xff] }
   0x8   :  { %v40_v26 = vld [vmem:[%s713_s2 + $0x20] sm:$0xff]  ;;  %v41_v27 = vld [vmem:[%s713_s2 + $0x28] sm:$0xff]  ;;  %v507_v30 = vld [vmem:[%s712_s0 + $0x10] sm:$0xff]  }
   0x9   :  { %203 = vmatpush1.bf16.msra.mxu0 %v491_v11  ;;  %274 = vmatpush1.bf16.msra.mxu1 %v492_v12  ;;  %v506_v28 = vld [vmem:[%s712_s0 + $0x8] sm:$0xff]   ;;  %v508_v31 = vld [vmem:[%s712_s0 + $0x18] ss:$0 sps:$4 sm:$0xff]  }
   0xa   :  { %204 = vmatprep.subr.bf16.mxu0 %v493_v13  ;;  %275 = vmatprep.subr.bf16.mxu1 %v495_v14 }
   0xb   :  { %50 = vperm.xlu0 %481, %v37_v24   ;;  %60 = vperm.xlu1 %482, %v39_v25  }
   0xd   :  { %205 = vmatpush1.bf16.msra.mxu0 %v497_v15  ;;  %276 = vmatpush1.bf16.msra.mxu1 %v498_v16 }
   0xe   :  { %206 = vmatprep.subr.bf16.mxu0 %v499_v17  ;;  %277 = vmatprep.subr.bf16.mxu1 %v501_v18 }
   0xf   :  { %65 = vperm.xlu0 %481, %v40_v26   ;;  %70 = vperm.xlu1 %482, %v41_v27  }
  0x11   :  { %207 = vmatpush1.bf16.msra.mxu0 %v503_v19  ;;  %278 = vmatpush1.bf16.msra.mxu1 %v504_v20 }
  0x13   :  { %75 = vperm.xlu0 %481, %v42_v29  }
  0x14   :  { %471 = vmatmul.mubr.msk.bf16.vlgmr.msra.gmra.mxu0 %vm166_vm1, %v505_v23  ;;  %476 = vmatmul.mubr.msk.bf16.vlgmr.msra.gmra.mxu1 %vm166_vm1, %v505_v23 }
  0x15   :  { %234 = vmatprep.mubr.bf16.mxu0 %v509_v2  ;;  %305 = vmatprep.mubr.bf16.mxu1 %v509_v2 }
  0x1c   :  { %472 = vmatmul.mubr.msk.bf16.gmra.mxu0 %vm166_vm1, %v506_v28  ;;  %477 = vmatmul.mubr.msk.bf16.gmra.mxu1 %vm166_vm1, %v506_v28 }
  0x1d   :  { %244 = vmatprep.mubr.bf16.mxu0 %v509_v2  ;;  %315 = vmatprep.mubr.bf16.mxu1 %v509_v2 }
  0x24   :  { %473 = vmatmul.mubr.msk.bf16.gmra.mxu0 %vm166_vm1, %v507_v30  ;;  %478 = vmatmul.mubr.msk.bf16.gmra.mxu1 %vm166_vm1, %v507_v30 }
  0x25   :  { %254 = vmatprep.mubr.bf16.mxu0 %v509_v2  ;;  %325 = vmatprep.mubr.bf16.mxu1 %v509_v2 }
  0x2c   :  { %474 = vmatmul.mubr.msk.bf16.gmra.mxu0 %vm166_vm1, %v508_v31  ;;  %479 = vmatmul.mubr.msk.bf16.gmra.mxu1 %vm166_vm1, %v508_v31 }
  0x82   :  { %v46_v32 = vpop.permute.xlu0 %45  ;;  %v56_v42 = vpop.permute.xlu1 %55 }
  0x86   :  { %v51_v37 = vpop.permute.xlu0 %50  ;;  %v61_v3 = vpop.permute.xlu1 %60 }
  0x8a   :  { %v66_v24 = vpop.permute.xlu0 %65 }
  0xd4   :  { %v226_v33 = vpop.f32.mrf.mxu0  ;;  %v297_v34 = vpop.f32.mrf.mxu1 }
  0xd5   :  { %v227_v35 = vadd.f32 %v226_v33, %v46_v32  ;;  %v298_v36 = vadd.f32 %v297_v34, %v46_v32 }
  0xd6   :  { %v228_v38 = vpop.f32.mrf.mxu0  ;;  %v299_v39 = vpop.f32.mrf.mxu1 }
  0xd7   :  { %vm334_vm2 = vcmp.gt.f32.partialorder %v227_v35, 0.0  ;;  %v362_v40 = vmul.f32 0.01, %v227_v35  ;;  %vm336_vm3 = vcmp.gt.f32.partialorder %v298_v36, 0.0  ;;  %v364_v41 = vmul.f32 0.01, %v298_v36 }
  0xd8   :  { %v229_v43 = vadd.f32 %v228_v38, %v46_v32  ;;  %v300_v44 = vadd.f32 %v299_v39, %v46_v32  ;;  %v230_v45 = vpop.f32.mrf.mxu0  ;;  %v301_v46 = vpop.f32.mrf.mxu1 }
  0xd9   :  { %v390_v47 = vsel %vm334_vm2, %v227_v35, %v362_v40  ;;  %v392_v48 = vsel %vm336_vm3, %v298_v36, %v364_v41  ;;  %v231_v49 = vadd.f32 %v230_v45, %v51_v37  ;;  %v302_v50 = vadd.f32 %v301_v46, %v51_v37 }
  0xda   :  { %418 = vst [vmem:[%s714_s3] sm:$0xff] %v390_v47  ;;  %420 = vst [vmem:[%s714_s3 + $0x10] sm:$0xff] %v392_v48  ;;  %vm335_vm4 = vcmp.gt.f32.partialorder %v229_v43, 0.0  ;;  %v363_v51 = vmul.f32 0.01, %v229_v43  ;;  %vm337_vm5 = vcmp.gt.f32.partialorder %v300_v44, 0.0  ;;  %v232_v53 = vpop.f32.mrf.mxu0  ;;  %v303_v54 = vpop.f32.mrf.mxu1 }
  0xdb   :  { %v365_v52 = vmul.f32 0.01, %v300_v44  ;;  %vm338_vm6 = vcmp.gt.f32.partialorder %v231_v49, 0.0  ;;  %v366_v55 = vmul.f32 0.01, %v231_v49  ;;  %vm340_vm7 = vcmp.gt.f32.partialorder %v302_v50, 0.0 }
  0xdc   :  { %v368_v56 = vmul.f32 0.01, %v302_v50  ;;  %v391_v57 = vsel %vm335_vm4, %v229_v43, %v363_v51  ;;  %v233_v59 = vadd.f32 %v232_v53, %v51_v37  ;;  %v304_v60 = vadd.f32 %v303_v54, %v51_v37  ;;  %v236_v61 = vpop.f32.mrf.mxu0  ;;  %v307_v62 = vpop.f32.mrf.mxu1 }
  0xdd   :  { %v393_v58 = vsel %vm337_vm5, %v300_v44, %v365_v52  ;;  %419 = vst [vmem:[%s714_s3 + $0x8] sm:$0xff] %v391_v57  ;;  %v394_v63 = vsel %vm338_vm6, %v231_v49, %v366_v55  ;;  %v237_v1 = vadd.f32 %v236_v61, %v56_v42  ;;  %v308_v2 = vadd.f32 %v307_v62, %v56_v42  ;;  %v71_v43 = vpop.permute.xlu1 %70 }
  0xde   :  { %421 = vst [vmem:[%s714_s3 + $0x18] sm:$0xff] %v393_v58  ;;  %v396_v0 = vsel %vm340_vm7, %v302_v50, %v368_v56  ;;  %422 = vst [vmem:[%s714_s3 + $0x20] sm:$0xff] %v394_v63  ;;  %vm339_vm8 = vcmp.gt.f32.partialorder %v233_v59, 0.0  ;;  %v367_v4 = vmul.f32 0.01, %v233_v59  ;;  %vm341_vm9 = vcmp.gt.f32.partialorder %v304_v60, 0.0  ;;  %v238_v6 = vpop.f32.mrf.mxu0  ;;  %v309_v7 = vpop.f32.mrf.mxu1 }
  0xdf   :  { %424 = vst [vmem:[%s714_s3 + $0x30] sm:$0xff] %v396_v0  ;;  %v369_v5 = vmul.f32 0.01, %v304_v60  ;;  %vm342_vm10 = vcmp.gt.f32.partialorder %v237_v1, 0.0  ;;  %v370_v8 = vmul.f32 0.01, %v237_v1  ;;  %v239_v12 = vadd.f32 %v238_v6, %v56_v42  ;;  %v76_v58 = vpop.permute.xlu0 %75 }
  0xe0   :  { %vm344_vm11 = vcmp.gt.f32.partialorder %v308_v2, 0.0  ;;  %v372_v9 = vmul.f32 0.01, %v308_v2  ;;  %v395_v10 = vsel %vm339_vm8, %v233_v59, %v367_v4  ;;  %v310_v13 = vadd.f32 %v309_v7, %v56_v42  ;;  %v240_v14 = vpop.f32.mrf.mxu0  ;;  %v311_v15 = vpop.f32.mrf.mxu1 }
  0xe1   :  { %v397_v11 = vsel %vm341_vm9, %v304_v60, %v369_v5  ;;  %423 = vst [vmem:[%s714_s3 + $0x28] sm:$0xff] %v395_v10  ;;  %v398_v16 = vsel %vm342_vm10, %v237_v1, %v370_v8  ;;  %v241_v18 = vadd.f32 %v240_v14, %v61_v3  ;;  %v312_v19 = vadd.f32 %v311_v15, %v61_v3 }
  0xe2   :  { %425 = vst [vmem:[%s714_s3 + $0x38] sm:$0xff] %v397_v11  ;;  %v400_v17 = vsel %vm344_vm11, %v308_v2, %v372_v9  ;;  %426 = vst [vmem:[%s714_s3 + $0x40] sm:$0xff] %v398_v16  ;;  %vm343_vm12 = vcmp.gt.f32.partialorder %v239_v12, 0.0  ;;  %v371_v20 = vmul.f32 0.01, %v239_v12  ;;  %vm345_vm13 = vcmp.gt.f32.partialorder %v310_v13, 0.0  ;;  %v242_v22 = vpop.f32.mrf.mxu0  ;;  %v313_v23 = vpop.f32.mrf.mxu1 }
  0xe3   :  { %428 = vst [vmem:[%s714_s3 + $0x50] sm:$0xff] %v400_v17  ;;  %v373_v21 = vmul.f32 0.01, %v310_v13  ;;  %vm346_vm14 = vcmp.gt.f32.partialorder %v241_v18, 0.0  ;;  %v374_v25 = vmul.f32 0.01, %v241_v18  ;;  %v243_v29 = vadd.f32 %v242_v22, %v61_v3 }
  0xe4   :  { %vm348_vm15 = vcmp.gt.f32.partialorder %v312_v19, 0.0  ;;  %v376_v26 = vmul.f32 0.01, %v312_v19  ;;  %v399_v27 = vsel %vm343_vm12, %v239_v12, %v371_v20  ;;  %v314_v30 = vadd.f32 %v313_v23, %v61_v3  ;;  %v246_v31 = vpop.f32.mrf.mxu0  ;;  %v317_v32 = vpop.f32.mrf.mxu1 }
  0xe5   :  { %v401_v28 = vsel %vm345_vm13, %v310_v13, %v373_v21  ;;  %427 = vst [vmem:[%s714_s3 + $0x48] sm:$0xff] %v399_v27  ;;  %v402_v33 = vsel %vm346_vm14, %v241_v18, %v374_v25  ;;  %v247_v35 = vadd.f32 %v246_v31, %v66_v24  ;;  %v318_v36 = vadd.f32 %v317_v32, %v66_v24 }
  0xe6   :  { %429 = vst [vmem:[%s714_s3 + $0x58] sm:$0xff] %v401_v28  ;;  %v404_v34 = vsel %vm348_vm15, %v312_v19, %v376_v26  ;;  %430 = vst [vmem:[%s714_s3 + $0x60] sm:$0xff] %v402_v33  ;;  %vm347_vm0 = vcmp.gt.f32.partialorder %v243_v29, 0.0  ;;  %v375_v37 = vmul.f32 0.01, %v243_v29  ;;  %vm349_vm1 = vcmp.gt.f32.partialorder %v314_v30, 0.0  ;;  %v248_v39 = vpop.f32.mrf.mxu0  ;;  %v319_v40 = vpop.f32.mrf.mxu1 }
  0xe7   :  { %432 = vst [vmem:[%s714_s3 + $0x70] sm:$0xff] %v404_v34  ;;  %v377_v38 = vmul.f32 0.01, %v314_v30  ;;  %vm350_vm2 = vcmp.gt.f32.partialorder %v247_v35, 0.0  ;;  %v378_v41 = vmul.f32 0.01, %v247_v35  ;;  %v249_v46 = vadd.f32 %v248_v39, %v66_v24 }
  0xe8   :  { %vm352_vm3 = vcmp.gt.f32.partialorder %v318_v36, 0.0  ;;  %v380_v42 = vmul.f32 0.01, %v318_v36  ;;  %v403_v44 = vsel %vm347_vm0, %v243_v29, %v375_v37  ;;  %v320_v47 = vadd.f32 %v319_v40, %v66_v24  ;;  %v250_v48 = vpop.f32.mrf.mxu0  ;;  %v321_v49 = vpop.f32.mrf.mxu1 }
  0xe9   :  { %v405_v45 = vsel %vm349_vm1, %v314_v30, %v377_v38  ;;  %431 = vst [vmem:[%s714_s3 + $0x68] sm:$0xff] %v403_v44  ;;  %v406_v50 = vsel %vm350_vm2, %v247_v35, %v378_v41  ;;  %v251_v52 = vadd.f32 %v250_v48, %v71_v43  ;;  %v322_v53 = vadd.f32 %v321_v49, %v71_v43 }
  0xea   :  { %433 = vst [vmem:[%s714_s3 + $0x78] sm:$0xff] %v405_v45  ;;  %v408_v51 = vsel %vm352_vm3, %v318_v36, %v380_v42  ;;  %434 = vst [vmem:[%s714_s3 + $0x80] sm:$0xff] %v406_v50  ;;  %vm351_vm4 = vcmp.gt.f32.partialorder %v249_v46, 0.0  ;;  %v379_v54 = vmul.f32 0.01, %v249_v46  ;;  %vm353_vm5 = vcmp.gt.f32.partialorder %v320_v47, 0.0  ;;  %v252_v56 = vpop.f32.mrf.mxu0  ;;  %v323_v57 = vpop.f32.mrf.mxu1 }
  0xeb   :  { %436 = vst [vmem:[%s714_s3 + $0x90] sm:$0xff] %v408_v51  ;;  %v381_v55 = vmul.f32 0.01, %v320_v47  ;;  %vm354_vm6 = vcmp.gt.f32.partialorder %v251_v52, 0.0  ;;  %v382_v59 = vmul.f32 0.01, %v251_v52  ;;  %v253_v63 = vadd.f32 %v252_v56, %v71_v43 }
  0xec   :  { %vm356_vm7 = vcmp.gt.f32.partialorder %v322_v53, 0.0  ;;  %v384_v60 = vmul.f32 0.01, %v322_v53  ;;  %v407_v61 = vsel %vm351_vm4, %v249_v46, %v379_v54  ;;  %v324_v0 = vadd.f32 %v323_v57, %v71_v43  ;;  %v256_v1 = vpop.f32.mrf.mxu0  ;;  %v327_v2 = vpop.f32.mrf.mxu1 }
  0xed   :  { %v409_v62 = vsel %vm353_vm5, %v320_v47, %v381_v55  ;;  %435 = vst [vmem:[%s714_s3 + $0x88] sm:$0xff] %v407_v61  ;;  %v410_v3 = vsel %vm354_vm6, %v251_v52, %v382_v59  ;;  %v257_v5 = vadd.f32 %v256_v1, %v76_v58  ;;  %v328_v6 = vadd.f32 %v327_v2, %v76_v58 }
  0xee   :  { %437 = vst [vmem:[%s714_s3 + $0x98] sm:$0xff] %v409_v62  ;;  %v412_v4 = vsel %vm356_vm7, %v322_v53, %v384_v60  ;;  %438 = vst [vmem:[%s714_s3 + $0xa0] sm:$0xff] %v410_v3  ;;  %vm355_vm8 = vcmp.gt.f32.partialorder %v253_v63, 0.0  ;;  %v383_v7 = vmul.f32 0.01, %v253_v63  ;;  %vm357_vm9 = vcmp.gt.f32.partialorder %v324_v0, 0.0  ;;  %v258_v9 = vpop.f32.mrf.mxu0  ;;  %v329_v10 = vpop.f32.mrf.mxu1 }
  0xef   :  { %440 = vst [vmem:[%s714_s3 + $0xb0] sm:$0xff] %v412_v4  ;;  %v385_v8 = vmul.f32 0.01, %v324_v0  ;;  %vm358_vm10 = vcmp.gt.f32.partialorder %v257_v5, 0.0  ;;  %v386_v11 = vmul.f32 0.01, %v257_v5  ;;  %v259_v15 = vadd.f32 %v258_v9, %v76_v58 }
  0xf0   :  { %vm360_vm11 = vcmp.gt.f32.partialorder %v328_v6, 0.0  ;;  %v388_v12 = vmul.f32 0.01, %v328_v6  ;;  %v411_v13 = vsel %vm355_vm8, %v253_v63, %v383_v7  ;;  %v330_v16 = vadd.f32 %v329_v10, %v76_v58  ;;  %v260_v17 = vpop.f32.mrf.mxu0  ;;  %v331_v18 = vpop.f32.mrf.mxu1 }
  0xf1   :  { %v413_v14 = vsel %vm357_vm9, %v324_v0, %v385_v8  ;;  %439 = vst [vmem:[%s714_s3 + $0xa8] sm:$0xff] %v411_v13  ;;  %v414_v19 = vsel %vm358_vm10, %v257_v5, %v386_v11  ;;  %vm359_vm12 = vcmp.gt.f32.partialorder %v259_v15, 0.0  ;;  %v387_v21 = vmul.f32 0.01, %v259_v15 }
  0xf2   :  { %441 = vst [vmem:[%s714_s3 + $0xb8] sm:$0xff] %v413_v14  ;;  %v416_v20 = vsel %vm360_vm11, %v328_v6, %v388_v12  ;;  %442 = vst [vmem:[%s714_s3 + $0xc0] sm:$0xff] %v414_v19  ;;  %vm361_vm13 = vcmp.gt.f32.partialorder %v330_v16, 0.0  ;;  %v389_v22 = vmul.f32 0.01, %v330_v16  ;;  %v261_v23 = vpop.f32.mrf.mxu0  ;;  %v332_v24 = vpop.f32.mrf.mxu1 }
  0xf3   :  { %444 = vst [vmem:[%s714_s3 + $0xd0] sm:$0xff] %v416_v20  ;;  %v415_v25 = vsel %vm359_vm12, %v259_v15, %v387_v21 }
  0xf4   :  { %v417_v26 = vsel %vm361_vm13, %v330_v16, %v389_v22  ;;  %443 = vst [vmem:[%s714_s3 + $0xc8] sm:$0xff] %v415_v25 }
  0xf5   :  { %445 = vst [vmem:[%s714_s3 + $0xd8] sm:$0xff] %v417_v26 }

// kernel: forward_rnn.89
= control target key start
LH: loop header
LB: loop body
LE: loop exit
PB: predicated region body
PF: predicated region fallthrough
CT: control target
= control target key end

     0   :  { %v1506_v2 = vmov 0   ;;  %vm838_vm0 = vcmask 1040384   ;;  %vm825_vm1 = vcmask 539648   ;;  %s2134_s1 = inlined_call_operand.vmem [shape: bf16[450,512], index: 1, kind: input, shape index: {}]   ;;  %s2135_s0 = inlined_call_operand.vmem [shape: bf16[56,450], index: 0, kind: input, shape index: {}]   ;;  %s2136_s2 = inlined_call_operand.vmem [shape: f32[56,1], index: 2, kind: input, shape index: {}]   ;;  %s2137_s3 = inlined_call_operand.vmem [shape: f32[56,512], index: 3, kind: output, shape index: {}]  }
   0x1   :  { %v1312_v0 = vld [vmem:[%s2134_s1 + $0xe4] ss:$16 sps:$4 sm:$0xff]   ;;  %1310 = vset.pattern.permute.xlu0 %v1506_v2  ;;  %1311 = vset.pattern.permute.xlu1 %v1506_v2  ;;  %v1316_v3 = vld [vmem:[%s2134_s1 + $0xe0] ss:$16 sps:$4 sm:$0xff]   ;;  %v1643_v41 = vld [vmem:[%s2135_s0 + $0xc] ss:$16 sps:$4 sm:$0xff]  }
   0x2   :  { %v1314_v1 = vld [vmem:[%s2134_s1 + $0x2e4] ss:$16 sps:$4 sm:$0xff]   ;;  %851 = vmatprep.subr.bf16.mxu0 %v1312_v0  ;;  %v1317_v4 = vld [vmem:[%s2134_s1 + $0x2e0] ss:$16 sps:$4 sm:$0xff]   ;;  %1300 = vmatprep.mubr.msk.bf16.mxu1 %vm825_vm1, %v1643_v41  ;;  %v1396_v58 = vld [vmem:[%s2134_s1 + $0xec] ss:$16 sps:$4 sm:$0xff]  }
   0x3   :  { %922 = vmatprep.subr.bf16.mxu1 %v1314_v1  ;;  %v1318_v5 = vld [vmem:[%s2134_s1 + $0xc4] ss:$16 sps:$4 sm:$0xff]   ;;  %852 = vmatpush1.bf16.msra.mxu0 %v1316_v3  ;;  %v1322_v7 = vld [vmem:[%s2134_s1 + $0xc0] ss:$16 sps:$4 sm:$0xff]   ;;  %v1704_v59 = vld [vmem:[%s2135_s0 + $0x8] ss:$16 sps:$4 sm:$0xff]  }
   0x4   :  { %923 = vmatpush1.bf16.msra.mxu1 %v1317_v4  ;;  %v1320_v6 = vld [vmem:[%s2134_s1 + $0x2c4] ss:$16 sps:$4 sm:$0xff]   ;;  %853 = vmatprep.subr.bf16.mxu0 %v1318_v5  ;;  %v1323_v8 = vld [vmem:[%s2134_s1 + $0x2c0] ss:$16 sps:$4 sm:$0xff]   ;;  %v1394_v60 = vld [vmem:[%s2134_s1 + $0xe8] ss:$16 sps:$4 sm:$0xff]  }
   0x5   :  { %924 = vmatprep.subr.bf16.mxu1 %v1320_v6  ;;  %v1324_v9 = vld [vmem:[%s2134_s1 + $0xa4] ss:$16 sps:$4 sm:$0xff]   ;;  %v1328_v11 = vld [vmem:[%s2134_s1 + $0xa0] ss:$16 sps:$4 sm:$0xff]   ;;  %v1402_v63 = vld [vmem:[%s2134_s1 + $0xcc] ss:$16 sps:$4 sm:$0xff]  }
   0x6   :  { %v1326_v10 = vld [vmem:[%s2134_s1 + $0x2a4] ss:$16 sps:$4 sm:$0xff]   ;;  %v1329_v12 = vld [vmem:[%s2134_s1 + $0x2a0] ss:$16 sps:$4 sm:$0xff]   ;;  %v1400_v0 = vld [vmem:[%s2134_s1 + $0xc8] ss:$16 sps:$4 sm:$0xff]  }
   0x7   :  { %854 = vmatpush1.bf16.msra.mxu0 %v1322_v7  ;;  %v1330_v13 = vld [vmem:[%s2134_s1 + $0x84] ss:$16 sps:$4 sm:$0xff]   ;;  %v1334_v15 = vld [vmem:[%s2134_s1 + $0x80] ss:$16 sps:$4 sm:$0xff]   ;;  %v1408_v3 = vld [vmem:[%s2134_s1 + $0xac] ss:$16 sps:$4 sm:$0xff]  }
   0x8   :  { %925 = vmatpush1.bf16.msra.mxu1 %v1323_v8  ;;  %855 = vmatprep.subr.bf16.mxu0 %v1324_v9  ;;  %v1332_v14 = vld [vmem:[%s2134_s1 + $0x284] ss:$16 sps:$4 sm:$0xff]   ;;  %v1335_v16 = vld [vmem:[%s2134_s1 + $0x280] ss:$16 sps:$4 sm:$0xff]   ;;  %v1406_v4 = vld [vmem:[%s2134_s1 + $0xa8] ss:$16 sps:$4 sm:$0xff]  }
   0x9   :  { %926 = vmatprep.subr.bf16.mxu1 %v1326_v10  ;;  %v1336_v17 = vld [vmem:[%s2134_s1 + $0x64] ss:$16 sps:$4 sm:$0xff]   ;;  %v1340_v19 = vld [vmem:[%s2134_s1 + $0x60] ss:$16 sps:$4 sm:$0xff]   ;;  %v1415_v7 = vld [vmem:[%s2134_s1 + $0x8c] ss:$16 sps:$4 sm:$0xff]  }
   0xa   :  { %v1338_v18 = vld [vmem:[%s2134_s1 + $0x264] ss:$16 sps:$4 sm:$0xff]   ;;  %v1341_v20 = vld [vmem:[%s2134_s1 + $0x260] ss:$16 sps:$4 sm:$0xff]   ;;  %v1418_v8 = vld [vmem:[%s2134_s1 + $0x2ec] ss:$16 sps:$4 sm:$0xff]  }
   0xb   :  { %856 = vmatpush1.bf16.msra.mxu0 %v1328_v11  ;;  %v1342_v21 = vld [vmem:[%s2134_s1 + $0x44] ss:$16 sps:$4 sm:$0xff]   ;;  %v1346_v23 = vld [vmem:[%s2134_s1 + $0x40] ss:$16 sps:$4 sm:$0xff]   ;;  %v1413_v9 = vld [vmem:[%s2134_s1 + $0x88] ss:$16 sps:$4 sm:$0xff]  }
   0xc   :  { %927 = vmatpush1.bf16.msra.mxu1 %v1329_v12  ;;  %857 = vmatprep.subr.bf16.mxu0 %v1330_v13  ;;  %v1344_v22 = vld [vmem:[%s2134_s1 + $0x244] ss:$16 sps:$4 sm:$0xff]   ;;  %v1347_v24 = vld [vmem:[%s2134_s1 + $0x240] ss:$16 sps:$4 sm:$0xff]   ;;  %v1754_v10 = vld [vmem:[%s2135_s0 + $0x2c] ss:$16 sps:$4 sm:$0xff]  }
   0xd   :  { %928 = vmatprep.subr.bf16.mxu1 %v1332_v14  ;;  %v1348_v25 = vld [vmem:[%s2134_s1 + $0x24] ss:$16 sps:$4 sm:$0xff]   ;;  %v1352_v27 = vld [vmem:[%s2134_s1 + $0x20] ss:$16 sps:$4 sm:$0xff]   ;;  %v1759_v11 = vld [vmem:[%s2135_s0 + $0x28] ss:$16 sps:$4 sm:$0xff]  }
   0xe   :  { %v1350_v26 = vld [vmem:[%s2134_s1 + $0x224] ss:$16 sps:$4 sm:$0xff]   ;;  %v1353_v28 = vld [vmem:[%s2134_s1 + $0x220] ss:$16 sps:$4 sm:$0xff]   ;;  %v1416_v12 = vld [vmem:[%s2134_s1 + $0x2e8] ss:$16 sps:$4 sm:$0xff]  }
   0xf   :  { %858 = vmatpush1.bf16.msra.mxu0 %v1334_v15  ;;  %v1354_v29 = vld [vmem:[%s2134_s1 + $0x4] ss:$16 sps:$4 sm:$0xff]   ;;  %v1358_v32 = vld [vmem:[%s2134_s1] ss:$16 sps:$4 sm:$0xff]   ;;  %v1421_v13 = vld [vmem:[%s2134_s1 + $0x6c] ss:$16 sps:$4 sm:$0xff]  }
  0x10   :  { %929 = vmatpush1.bf16.msra.mxu1 %v1335_v16  ;;  %859 = vmatprep.subr.bf16.mxu0 %v1336_v17  ;;  %v1356_v30 = vld [vmem:[%s2134_s1 + $0x204] ss:$16 sps:$4 sm:$0xff]   ;;  %v1359_v33 = vld [vmem:[%s2134_s1 + $0x200] ss:$16 sps:$4 sm:$0xff]   ;;  %v1424_v14 = vld [vmem:[%s2134_s1 + $0x2cc] ss:$16 sps:$4 sm:$0xff]  }
  0x11   :  { %930 = vmatprep.subr.bf16.mxu1 %v1338_v18  ;;  %v141_v31 = vld [vmem:[%s2134_s1 + $0x380] sm:$0x11]  ;;  %v1419_v16 = vld [vmem:[%s2134_s1 + $0x68] ss:$16 sps:$4 sm:$0xff]   ;;  %v1427_v18 = vld [vmem:[%s2134_s1 + $0x4c] ss:$16 sps:$4 sm:$0xff]  }
  0x12   :  { %v1360_v34 = vld [vmem:[%s2134_s1 + $0x1e4] ss:$16 sps:$4 sm:$0xff]   ;;  %v1296_v35 = vcombine.high %v141_v31, %v141_v31  ;;  %v1295_v36 = vcombine.low %v141_v31, %v141_v31  ;;  %v1363_v37 = vld [vmem:[%s2134_s1 + $0x1e0] ss:$16 sps:$4 sm:$0xff]   ;;  %v1422_v17 = vld [vmem:[%s2134_s1 + $0x2c8] ss:$16 sps:$4 sm:$0xff]  }
  0x13   :  { %860 = vmatpush1.bf16.msra.mxu0 %v1340_v19  ;;  %v1365_v39 = vld [vmem:[%s2134_s1 + $0x1c4] ss:$16 sps:$4 sm:$0xff]   ;;  %v1369_v42 = vld [vmem:[%s2134_s1 + $0x1c0] ss:$16 sps:$4 sm:$0xff]   ;;  %v1430_v19 = vld [vmem:[%s2134_s1 + $0x2ac] ss:$16 sps:$4 sm:$0xff]  }
  0x14   :  { %931 = vmatpush1.bf16.msra.mxu1 %v1341_v20  ;;  %861 = vmatprep.subr.bf16.mxu0 %v1342_v21  ;;  %v840_v38 = vsel %vm838_vm0, %v1295_v36, 0  ;;  %v1367_v40 = vld [vmem:[%s2134_s1 + $0x364] ss:$16 sps:$4 sm:$0xff]   ;;  %v1370_v43 = vld [vmem:[%s2134_s1 + $0x360] ss:$16 sps:$4 sm:$0xff]  }
  0x15   :  { %932 = vmatprep.subr.bf16.mxu1 %v1344_v22  ;;  %v1371_v44 = vld [vmem:[%s2134_s1 + $0x1a4] ss:$16 sps:$4 sm:$0xff]   ;;  %v1375_v46 = vld [vmem:[%s2134_s1 + $0x1a0] ss:$16 sps:$4 sm:$0xff]   ;;  %v1800_v21 = vld [vmem:[%s2135_s0 + $0x4c] ss:$16 sps:$4 sm:$0xff]  }
  0x16   :  { %v1373_v45 = vld [vmem:[%s2134_s1 + $0x344] ss:$16 sps:$4 sm:$0xff]   ;;  %v1376_v47 = vld [vmem:[%s2134_s1 + $0x340] ss:$16 sps:$4 sm:$0xff]   ;;  %v1805_v22 = vld [vmem:[%s2135_s0 + $0x48] ss:$16 sps:$4 sm:$0xff]  }
  0x17   :  { %862 = vmatpush1.bf16.msra.mxu0 %v1346_v23  ;;  %v1377_v48 = vld [vmem:[%s2134_s1 + $0x184] ss:$16 sps:$4 sm:$0xff]   ;;  %v1381_v50 = vld [vmem:[%s2134_s1 + $0x180] ss:$16 sps:$4 sm:$0xff]   ;;  %v1425_v23 = vld [vmem:[%s2134_s1 + $0x48] ss:$16 sps:$4 sm:$0xff]  }
  0x18   :  { %933 = vmatpush1.bf16.msra.mxu1 %v1347_v24  ;;  %863 = vmatprep.subr.bf16.mxu0 %v1348_v25  ;;  %v1379_v49 = vld [vmem:[%s2134_s1 + $0x324] ss:$16 sps:$4 sm:$0xff]   ;;  %v1382_v51 = vld [vmem:[%s2134_s1 + $0x320] ss:$16 sps:$4 sm:$0xff]   ;;  %v1428_v24 = vld [vmem:[%s2134_s1 + $0x2a8] ss:$16 sps:$4 sm:$0xff]  }
  0x19   :  { %934 = vmatprep.subr.bf16.mxu1 %v1350_v26  ;;  %v1680_v52 = vld [vmem:[%s2135_s0 + $0x4] ss:$16 sps:$4 sm:$0xff]   ;;  %v1387_v55 = vld [vmem:[%s2134_s1 + $0x160] ss:$16 sps:$4 sm:$0xff]   ;;  %v1433_v25 = vld [vmem:[%s2134_s1 + $0x2c] ss:$16 sps:$4 sm:$0xff]  }
  0x1a   :  { %v1383_v53 = vld [vmem:[%s2134_s1 + $0x164] ss:$16 sps:$4 sm:$0xff]   ;;  %883 = vmatprep.mubr.bf16.mxu0 %v1680_v52  ;;  %v1388_v56 = vld [vmem:[%s2134_s1 + $0x300] ss:$16 sps:$4 sm:$0xff]   ;;  %v1436_v26 = vld [vmem:[%s2134_s1 + $0x28c] ss:$16 sps:$4 sm:$0xff]  }
  0x1b   :  { %864 = vmatpush1.bf16.msra.mxu0 %v1352_v27  ;;  %v1385_v54 = vld [vmem:[%s2134_s1 + $0x304] ss:$16 sps:$4 sm:$0xff]   ;;  %v1397_v61 = vld [vmem:[%s2134_s1 + $0x140] ss:$16 sps:$4 sm:$0xff]   ;;  %v1439_v31 = vld [vmem:[%s2134_s1 + $0xc] ss:$16 sps:$4 sm:$0xff]  }
  0x1c   :  { %935 = vmatpush1.bf16.msra.mxu1 %v1353_v28  ;;  %865 = vmatprep.subr.bf16.mxu0 %v1354_v29  ;;  %v1392_v57 = vld [vmem:[%s2134_s1 + $0x144] ss:$16 sps:$4 sm:$0xff]   ;;  %v1403_v1 = vld [vmem:[%s2134_s1 + $0x120] ss:$16 sps:$4 sm:$0xff]   ;;  %v1431_v28 = vld [vmem:[%s2134_s1 + $0x28] ss:$16 sps:$4 sm:$0xff]  }
  0x1d   :  { %936 = vmatprep.subr.bf16.mxu1 %v1356_v30  ;;  %v1398_v62 = vld [vmem:[%s2134_s1 + $0x124] ss:$16 sps:$4 sm:$0xff]   ;;  %v1409_v5 = vld [vmem:[%s2134_s1 + $0x100] ss:$16 sps:$4 sm:$0xff]   ;;  %v1434_v29 = vld [vmem:[%s2134_s1 + $0x288] ss:$16 sps:$4 sm:$0xff]  }
  0x1e   :  { %v1404_v2 = vld [vmem:[%s2134_s1 + $0x104] ss:$16 sps:$4 sm:$0xff]   ;;  %v1740_v6 = vld [vmem:[%s2135_s0] ss:$16 sps:$4 sm:$0xff]   ;;  %v28_v30 = vld [vmem:[%s2135_s0 + $0x68] sm:$0xff] }
  0x1f   :  { %866 = vmatpush1.bf16.msra.mxu0 %v1358_v32  ;;  %v1773_v15 = vld [vmem:[%s2135_s0 + $0x24] ss:$16 sps:$4 sm:$0xff]   ;;  %v1795_v20 = vld [vmem:[%s2135_s0 + $0x20] ss:$16 sps:$4 sm:$0xff]   ;;  %v1840_v32 = vcombine.high %v28_v30, %v28_v30 }
  0x20   :  { %937 = vmatpush1.bf16.msra.mxu1 %v1359_v33  ;;  %867 = vmatprep.subr.bf16.mxu0 %v1360_v34  ;;  %v1822_v27 = vld [vmem:[%s2135_s0 + $0x44] ss:$16 sps:$4 sm:$0xff]   ;;  %v1442_v33 = vld [vmem:[%s2134_s1 + $0x26c] ss:$16 sps:$4 sm:$0xff]   ;;  %v1437_v34 = vld [vmem:[%s2134_s1 + $0x8] ss:$16 sps:$4 sm:$0xff]  }
  0x21   :  { %1299 = vmatprep.subr.msk.bf16.mxu1 %vm838_vm0, %v1296_v35  ;;  %v1440_v35 = vld [vmem:[%s2134_s1 + $0x268] ss:$16 sps:$4 sm:$0xff]   ;;  %v1857_v36 = vld [vmem:[%s2135_s0 + $0x40] ss:$16 sps:$4 sm:$0xff]  }
  0x23   :  { %868 = vmatpush2.bf16.msra.mxu0 %v1363_v37  ;;  %v27_v37 = vld [vmem:[%s2135_s0 + $0x60] sm:$0xff] }
  0x24   :  { %945 = vmatpush2.bf16.msra.mxu1 %v840_v38  ;;  %869 = vmatprep.subr.bf16.mxu0 %v1365_v39  ;;  %v1862_v38 = vcombine.low %v28_v30, %v28_v30  ;;  %v1448_v39 = vld [vmem:[%s2134_s1 + $0x1ec] ss:$16 sps:$4 sm:$0xff]  }
  0x25   :  { %946 = vmatprep.subr.bf16.mxu1 %v1367_v40  ;;  %v1451_v40 = vld [vmem:[%s2134_s1 + $0x24c] ss:$16 sps:$4 sm:$0xff]  }
  0x27   :  { %870 = vmatpush2.bf16.msra.mxu0 %v1369_v42  ;;  %v1870_v42 = vcombine.high %v27_v37, %v27_v37 }
  0x28   :  { %947 = vmatpush2.bf16.msra.mxu1 %v1370_v43  ;;  %871 = vmatprep.subr.bf16.mxu0 %v1371_v44  ;;  %v1446_v43 = vld [vmem:[%s2134_s1 + $0x1e8] ss:$16 sps:$4 sm:$0xff]  }
  0x29   :  { %948 = vmatprep.subr.bf16.mxu1 %v1373_v45  ;;  %v1449_v44 = vld [vmem:[%s2134_s1 + $0x248] ss:$16 sps:$4 sm:$0xff]   ;;  %v143_v45 = vld [vmem:[%s2136_s2] sm:$0xff] }
  0x2a   :  { %152 = vperm.xlu0 %1310, %v143_v45  }
  0x2b   :  { %872 = vmatpush2.bf16.msra.mxu0 %v1375_v46  ;;  %v145_v46 = vld [vmem:[%s2136_s2 + $0x10] sm:$0xff] }
  0x2c   :  { %949 = vmatpush2.bf16.msra.mxu1 %v1376_v47  ;;  %873 = vmatprep.subr.bf16.mxu0 %v1377_v48  ;;  %v1457_v47 = vld [vmem:[%s2134_s1 + $0x1cc] ss:$16 sps:$4 sm:$0xff]  }
  0x2d   :  { %950 = vmatprep.subr.bf16.mxu1 %v1379_v49  ;;  %v1460_v48 = vld [vmem:[%s2134_s1 + $0x22c] ss:$16 sps:$4 sm:$0xff]   ;;  %v1894_v49 = vcombine.low %v27_v37, %v27_v37  ;;  %162 = vperm.xlu1 %1311, %v145_v46  }
  0x2f   :  { %874 = vmatpush2.bf16.msra.mxu0 %v1381_v50  ;;  %v1455_v50 = vld [vmem:[%s2134_s1 + $0x1c8] ss:$16 sps:$4 sm:$0xff]  }
  0x30   :  { %951 = vmatpush2.bf16.msra.mxu1 %v1382_v51  ;;  %875 = vmatprep.subr.bf16.mxu0 %v1383_v53  ;;  %v1458_v51 = vld [vmem:[%s2134_s1 + $0x228] ss:$16 sps:$4 sm:$0xff]  }
  0x31   :  { %952 = vmatprep.subr.bf16.mxu1 %v1385_v54  ;;  %v144_v53 = vld [vmem:[%s2136_s2 + $0x8] sm:$0xff] }
  0x32   :  { %v1469_v54 = vld [vmem:[%s2134_s1 + $0x20c] ss:$16 sps:$4 sm:$0xff]   ;;  %157 = vperm.xlu0 %1310, %v144_v53  }
  0x33   :  { %876 = vmatpush2.bf16.msra.mxu0 %v1387_v55  ;;  %v142_v55 = vld [vmem:[%s2134_s1 + $0x388] sm:$0x11] }
  0x34   :  { %953 = vmatpush2.bf16.msra.mxu1 %v1388_v56  ;;  %877 = vmatprep.subr.bf16.mxu0 %v1392_v57  ;;  %v146_v56 = vld [vmem:[%s2136_s2 + $0x18] sm:$0xff] }
  0x35   :  { %993 = vmatprep.subr.bf16.mxu1 %v1396_v58  ;;  %v1464_v57 = vld [vmem:[%s2134_s1 + $0x1a8] ss:$16 sps:$4 sm:$0xff]   ;;  %167 = vperm.xlu1 %1311, %v146_v56  }
  0x36   :  { %v1467_v58 = vld [vmem:[%s2134_s1 + $0x208] ss:$16 sps:$4 sm:$0xff]  }
  0x37   :  { %955 = vmatmul.mubr.bf16.vlgmr.msra.gmra.mxu1 %v1704_v59  ;;  %878 = vmatpush2.bf16.msra.mxu0 %v1397_v61  ;;  %v1475_v61 = vld [vmem:[%s2134_s1 + $0x18c] ss:$16 sps:$4 sm:$0xff]  }
  0x38   :  { %994 = vmatpush1.bf16.msra.mxu1 %v1394_v60  ;;  %879 = vmatprep.subr.bf16.mxu0 %v1398_v62  ;;  %v147_v60 = vld [vmem:[%s2136_s2 + $0x20] sm:$0xff]  ;;  %v1298_v62 = vcombine.high %v142_v55, %v142_v55 }
  0x39   :  { %995 = vmatprep.subr.bf16.mxu1 %v1402_v63  ;;  %1301 = vmatprep.mubr.msk.bf16.mxu1 %vm825_vm1, %v1754_v10  ;;  %v1297_v63 = vcombine.low %v142_v55, %v142_v55 }
  0x3a   :  { %172 = vperm.xlu0 %1310, %v147_v60  }
  0x3b   :  { %880 = vmatpush2.bf16.msra.mxu0 %v1403_v1  ;;  %v1473_v1 = vld [vmem:[%s2134_s1 + $0x188] ss:$16 sps:$4 sm:$0xff]  }
  0x3c   :  { %996 = vmatpush1.bf16.msra.mxu1 %v1400_v0  ;;  %881 = vmatprep.subr.bf16.mxu0 %v1404_v2  ;;  %v148_v0 = vld [vmem:[%s2136_s2 + $0x28] sm:$0xff]  ;;  %v149_v2 = vld [vmem:[%s2136_s2 + $0x30] sm:$0xff] }
  0x3d   :  { %997 = vmatprep.subr.bf16.mxu1 %v1408_v3  ;;  %v1480_v3 = vld [vmem:[%s2134_s1 + $0x16c] ss:$16 sps:$4 sm:$0xff]   ;;  %177 = vperm.xlu1 %1311, %v148_v0  }
  0x3e   :  { %182 = vperm.xlu0 %1310, %v149_v2  }
  0x3f   :  { %882 = vmatpush2.bf16.msra.mxu0 %v1409_v5  ;;  %965 = vmatmul.mubr.bf16.gmra.mxu1 %v1759_v11  ;;  %v1478_v5 = vld [vmem:[%s2134_s1 + $0x168] ss:$16 sps:$4 sm:$0xff]  }
  0x40   :  { %998 = vmatpush1.bf16.msra.mxu1 %v1406_v4  ;;  %1064 = vmatprep.subr.bf16.mxu0 %v1418_v8  ;;  %v1483_v4 = vld [vmem:[%s2134_s1 + $0x36c] ss:$16 sps:$4 sm:$0xff]  }
  0x41   :  { %999 = vmatprep.subr.bf16.mxu1 %v1415_v7  ;;  %1302 = vmatprep.mubr.msk.bf16.mxu1 %vm825_vm1, %v1800_v21  ;;  %v1481_v7 = vld [vmem:[%s2134_s1 + $0x368] ss:$16 sps:$4 sm:$0xff]   ;;  %v1490_v8 = vld [vmem:[%s2134_s1 + $0x14c] ss:$16 sps:$4 sm:$0xff]  }
  0x42   :  { %884 = vmatmul.mubr.bf16.vlgmr.msra.gmra.mxu0 %v1740_v6 }
  0x43   :  { %1065 = vmatpush1.bf16.msra.mxu0 %v1416_v12  ;;  %893 = vmatprep.mubr.bf16.mxu0 %v1773_v15  ;;  %v1488_v12 = vld [vmem:[%s2134_s1 + $0x148] ss:$16 sps:$4 sm:$0xff]  }
  0x44   :  { %1000 = vmatpush1.bf16.msra.mxu1 %v1413_v9  ;;  %1066 = vmatprep.subr.bf16.mxu0 %v1424_v14  ;;  %v1493_v9 = vld [vmem:[%s2134_s1 + $0x34c] ss:$16 sps:$4 sm:$0xff]  }
  0x45   :  { %1001 = vmatprep.subr.bf16.mxu1 %v1421_v13  ;;  %v1491_v13 = vld [vmem:[%s2134_s1 + $0x348] ss:$16 sps:$4 sm:$0xff]   ;;  %v1496_v14 = vld [vmem:[%s2134_s1 + $0x12c] ss:$16 sps:$4 sm:$0xff]  }
  0x47   :  { %1067 = vmatpush1.bf16.msra.mxu0 %v1422_v17  ;;  %975 = vmatmul.mubr.bf16.gmra.mxu1 %v1805_v22  ;;  %v1494_v17 = vld [vmem:[%s2134_s1 + $0x128] ss:$16 sps:$4 sm:$0xff]  }
  0x48   :  { %1002 = vmatpush1.bf16.msra.mxu1 %v1419_v16  ;;  %1068 = vmatprep.subr.bf16.mxu0 %v1430_v19  ;;  %v1499_v16 = vld [vmem:[%s2134_s1 + $0x32c] ss:$16 sps:$4 sm:$0xff]  }
  0x49   :  { %1003 = vmatprep.subr.bf16.mxu1 %v1427_v18  ;;  %1303 = vmatprep.mubr.msk.bf16.mxu1 %vm825_vm1, %v1840_v32  ;;  %v1497_v18 = vld [vmem:[%s2134_s1 + $0x328] ss:$16 sps:$4 sm:$0xff]   ;;  %v1502_v19 = vld [vmem:[%s2134_s1 + $0x10c] ss:$16 sps:$4 sm:$0xff]  }
  0x4a   :  { %894 = vmatmul.mubr.bf16.gmra.mxu0 %v1795_v20 }
  0x4b   :  { %1069 = vmatpush1.bf16.msra.mxu0 %v1428_v24  ;;  %903 = vmatprep.mubr.bf16.mxu0 %v1822_v27  ;;  %v1500_v24 = vld [vmem:[%s2134_s1 + $0x108] ss:$16 sps:$4 sm:$0xff]  }
  0x4c   :  { %1004 = vmatpush1.bf16.msra.mxu1 %v1425_v23  ;;  %1070 = vmatprep.subr.bf16.mxu0 %v1436_v26  ;;  %v1505_v23 = vld [vmem:[%s2134_s1 + $0x30c] ss:$16 sps:$4 sm:$0xff]  }
  0x4d   :  { %1005 = vmatprep.subr.bf16.mxu1 %v1433_v25  ;;  %v1503_v25 = vld [vmem:[%s2134_s1 + $0x308] ss:$16 sps:$4 sm:$0xff]  }
  0x4f   :  { %1071 = vmatpush1.bf16.msra.mxu0 %v1434_v29  ;;  %985 = vmatmul.mubr.bf16.gmra.mxu1 %v1862_v38 }
  0x50   :  { %1006 = vmatpush1.bf16.msra.mxu1 %v1431_v28  ;;  %1072 = vmatprep.subr.bf16.mxu0 %v1442_v33 }
  0x51   :  { %1007 = vmatprep.subr.bf16.mxu1 %v1439_v31  ;;  %1025 = vmatprep.mubr.bf16.mxu1 %v1680_v52  ;;  %v1466_v52 = vld [vmem:[%s2134_s1 + $0x1ac] ss:$16 sps:$4 sm:$0xff]  }
  0x52   :  { %904 = vmatmul.mubr.bf16.gmra.mxu0 %v1857_v36 }
  0x53   :  { %1073 = vmatpush1.bf16.msra.mxu0 %v1440_v35  ;;  %913 = vmatprep.mubr.bf16.mxu0 %v1870_v42 }
  0x54   :  { %1008 = vmatpush1.bf16.msra.mxu1 %v1437_v34  ;;  %1074 = vmatprep.subr.bf16.mxu0 %v1451_v40 }
  0x55   :  { %1009 = vmatprep.subr.bf16.mxu1 %v1448_v39 }
  0x57   :  { %1075 = vmatpush1.bf16.msra.mxu0 %v1449_v44 }
  0x58   :  { %1010 = vmatpush2.bf16.msra.mxu1 %v1446_v43  ;;  %1076 = vmatprep.subr.bf16.mxu0 %v1460_v48 }
  0x59   :  { %1011 = vmatprep.subr.bf16.mxu1 %v1457_v47 }
  0x5a   :  { %914 = vmatmul.mubr.bf16.gmra.mxu0 %v1894_v49 }
  0x5b   :  { %1077 = vmatpush1.bf16.msra.mxu0 %v1458_v51  ;;  %1305 = vmatprep.mubr.msk.bf16.mxu0 %vm825_vm1, %v1643_v41  ;;  %v846_v41 = vsel %vm838_vm0, %v1297_v63, 0 }
  0x5c   :  { %1012 = vmatpush2.bf16.msra.mxu1 %v1455_v50  ;;  %1078 = vmatprep.subr.bf16.mxu0 %v1469_v54 }
  0x5d   :  { %1013 = vmatprep.subr.bf16.mxu1 %v1466_v52 }
  0x5f   :  { %1079 = vmatpush1.bf16.msra.mxu0 %v1467_v58 }
  0x60   :  { %1014 = vmatpush2.bf16.msra.mxu1 %v1464_v57  ;;  %1304 = vmatprep.subr.msk.bf16.mxu0 %vm838_vm0, %v1298_v62 }
  0x61   :  { %1015 = vmatprep.subr.bf16.mxu1 %v1475_v61 }
  0x63   :  { %1087 = vmatpush2.bf16.msra.mxu0 %v846_v41 }
  0x64   :  { %1016 = vmatpush2.bf16.msra.mxu1 %v1473_v1  ;;  %1088 = vmatprep.subr.bf16.mxu0 %v1483_v4 }
  0x65   :  { %1017 = vmatprep.subr.bf16.mxu1 %v1480_v3 }
  0x67   :  { %1089 = vmatpush2.bf16.msra.mxu0 %v1481_v7 }
  0x68   :  { %1018 = vmatpush2.bf16.msra.mxu1 %v1478_v5  ;;  %1090 = vmatprep.subr.bf16.mxu0 %v1493_v9 }
  0x69   :  { %1019 = vmatprep.subr.bf16.mxu1 %v1490_v8 }
  0x6b   :  { %1091 = vmatpush2.bf16.msra.mxu0 %v1491_v13 }
  0x6c   :  { %1020 = vmatpush2.bf16.msra.mxu1 %v1488_v12  ;;  %1092 = vmatprep.subr.bf16.mxu0 %v1499_v16 }
  0x6d   :  { %1021 = vmatprep.subr.bf16.mxu1 %v1496_v14 }
  0x6f   :  { %1093 = vmatpush2.bf16.msra.mxu0 %v1497_v18 }
  0x70   :  { %1022 = vmatpush2.bf16.msra.mxu1 %v1494_v17  ;;  %1094 = vmatprep.subr.bf16.mxu0 %v1505_v23 }
  0x71   :  { %1023 = vmatprep.subr.bf16.mxu1 %v1502_v19 }
  0x73   :  { %1095 = vmatpush2.bf16.msra.mxu0 %v1503_v25 }
  0x74   :  { %1024 = vmatpush2.bf16.msra.mxu1 %v1500_v24 }
  0x76   :  { %1097 = vmatmul.mubr.bf16.vlgmr.msra.gmra.mxu0 %v1704_v59 }
  0x77   :  { %1026 = vmatmul.mubr.bf16.vlgmr.msra.gmra.mxu1 %v1740_v6  ;;  %1306 = vmatprep.mubr.msk.bf16.mxu0 %vm825_vm1, %v1754_v10 }
  0x78   :  { %1035 = vmatprep.mubr.bf16.mxu1 %v1773_v15 }
  0x7e   :  { %1107 = vmatmul.mubr.bf16.gmra.mxu0 %v1759_v11 }
  0x7f   :  { %1036 = vmatmul.mubr.bf16.gmra.mxu1 %v1795_v20  ;;  %1307 = vmatprep.mubr.msk.bf16.mxu0 %vm825_vm1, %v1800_v21 }
  0x80   :  { %1045 = vmatprep.mubr.bf16.mxu1 %v1822_v27 }
  0x86   :  { %1117 = vmatmul.mubr.bf16.gmra.mxu0 %v1805_v22 }
  0x87   :  { %1046 = vmatmul.mubr.bf16.gmra.mxu1 %v1857_v36  ;;  %1308 = vmatprep.mubr.msk.bf16.mxu0 %vm825_vm1, %v1840_v32 }
  0x88   :  { %1055 = vmatprep.mubr.bf16.mxu1 %v1870_v42 }
  0x8e   :  { %1127 = vmatmul.mubr.bf16.gmra.mxu0 %v1862_v38 }
  0x8f   :  { %1056 = vmatmul.mubr.bf16.gmra.mxu1 %v1894_v49 }
  0xa5   :  { %v2008_v11 = vpop.permute.xlu0 %152 }
  0xa8   :  { %v2014_v31 = vpop.permute.xlu1 %162 }
  0xad   :  { %v2011_v22 = vpop.permute.xlu0 %157 }
  0xb0   :  { %v2028_v45 = vpop.permute.xlu1 %167 }
  0xb5   :  { %v2038_v54 = vpop.permute.xlu0 %172 }
  0xb8   :  { %v2047_v63 = vpop.permute.xlu1 %177 }
  0xb9   :  { %v2058_v9 = vpop.permute.xlu0 %182 }
  0xf7   :  { %v956_v59 = vpop.f32.mrf.mxu1 }
  0xf9   :  { %v958_v6 = vpop.f32.mrf.mxu1 }
  0xfb   :  { %v960_v10 = vpop.f32.mrf.mxu1 }
  0xfd   :  { %v962_v15 = vpop.f32.mrf.mxu1 }
  0xff   :  { %v966_v21 = vpop.f32.mrf.mxu1 }
 0x101   :  { %v968_v28 = vpop.f32.mrf.mxu1 }
 0x102   :  { %v885_v20 = vpop.f32.mrf.mxu0 }
 0x103   :  { %v886_v26 = vadd.f32 %v885_v20, %v2008_v11  ;;  %v970_v33 = vpop.f32.mrf.mxu1 }
 0x104   :  { %v887_v27 = vpop.f32.mrf.mxu0 }
 0x105   :  { %v957_v29 = vadd.f32 %v956_v59, %v886_v26  ;;  %v888_v30 = vadd.f32 %v887_v27, %v2008_v11  ;;  %v972_v37 = vpop.f32.mrf.mxu1 }
 0x106   :  { %v889_v32 = vpop.f32.mrf.mxu0 }
 0x107   :  { %1135 = vst [vmem:[%s2137_s3] sm:$0xff] %v957_v29  ;;  %v959_v34 = vadd.f32 %v958_v6, %v888_v30  ;;  %v890_v35 = vadd.f32 %v889_v32, %v2011_v22  ;;  %v976_v42 = vpop.f32.mrf.mxu1 }
 0x108   :  { %v891_v36 = vpop.f32.mrf.mxu0 }
 0x109   :  { %1136 = vst [vmem:[%s2137_s3 + $0x8] sm:$0xff] %v959_v34  ;;  %v961_v38 = vadd.f32 %v960_v10, %v890_v35  ;;  %v892_v39 = vadd.f32 %v891_v36, %v2011_v22  ;;  %v978_v47 = vpop.f32.mrf.mxu1 }
 0x10a   :  { %v895_v40 = vpop.f32.mrf.mxu0 }
 0x10b   :  { %1139 = vst [vmem:[%s2137_s3 + $0x20] sm:$0xff] %v961_v38  ;;  %v963_v43 = vadd.f32 %v962_v15, %v892_v39  ;;  %v896_v44 = vadd.f32 %v895_v40, %v2014_v31  ;;  %v980_v51 = vpop.f32.mrf.mxu1 }
 0x10c   :  { %v897_v46 = vpop.f32.mrf.mxu0 }
 0x10d   :  { %1140 = vst [vmem:[%s2137_s3 + $0x28] sm:$0xff] %v963_v43  ;;  %v898_v48 = vadd.f32 %v897_v46, %v2014_v31  ;;  %v967_v49 = vadd.f32 %v966_v21, %v896_v44  ;;  %v982_v56 = vpop.f32.mrf.mxu1 }
 0x10e   :  { %v899_v50 = vpop.f32.mrf.mxu0 }
 0x10f   :  { %1143 = vst [vmem:[%s2137_s3 + $0x40] sm:$0xff] %v967_v49  ;;  %v969_v53 = vadd.f32 %v968_v28, %v898_v48  ;;  %v900_v52 = vadd.f32 %v899_v50, %v2028_v45  ;;  %v986_v61 = vpop.f32.mrf.mxu1 }
 0x110   :  { %v901_v55 = vpop.f32.mrf.mxu0 }
 0x111   :  { %1144 = vst [vmem:[%s2137_s3 + $0x48] sm:$0xff] %v969_v53  ;;  %v902_v57 = vadd.f32 %v901_v55, %v2028_v45  ;;  %v971_v58 = vadd.f32 %v970_v33, %v900_v52  ;;  %v988_v2 = vpop.f32.mrf.mxu1 }
 0x112   :  { %v905_v60 = vpop.f32.mrf.mxu0 }
 0x113   :  { %1147 = vst [vmem:[%s2137_s3 + $0x60] sm:$0xff] %v971_v58  ;;  %v973_v62 = vadd.f32 %v972_v37, %v902_v57  ;;  %v906_v0 = vadd.f32 %v905_v60, %v2038_v54  ;;  %v990_v5 = vpop.f32.mrf.mxu1 }
 0x114   :  { %v907_v1 = vpop.f32.mrf.mxu0 }
 0x115   :  { %1148 = vst [vmem:[%s2137_s3 + $0x68] sm:$0xff] %v973_v62  ;;  %v908_v41 = vadd.f32 %v907_v1, %v2038_v54  ;;  %v977_v3 = vadd.f32 %v976_v42, %v906_v0  ;;  %v991_v13 = vpop.f32.mrf.mxu1 }
 0x116   :  { %v909_v4 = vpop.f32.mrf.mxu0 }
 0x117   :  { %v979_v7 = vadd.f32 %v978_v47, %v908_v41  ;;  %1151 = vst [vmem:[%s2137_s3 + $0x80] sm:$0xff] %v977_v3  ;;  %v910_v8 = vadd.f32 %v909_v4, %v2047_v63 }
 0x118   :  { %v911_v12 = vpop.f32.mrf.mxu0 }
 0x119   :  { %1152 = vst [vmem:[%s2137_s3 + $0x88] sm:$0xff] %v979_v7  ;;  %v912_v14 = vadd.f32 %v911_v12, %v2047_v63  ;;  %v981_v16 = vadd.f32 %v980_v51, %v910_v8 }
 0x11a   :  { %v915_v17 = vpop.f32.mrf.mxu0 }
 0x11b   :  { %1155 = vst [vmem:[%s2137_s3 + $0xa0] sm:$0xff] %v981_v16  ;;  %v983_v18 = vadd.f32 %v982_v56, %v912_v14  ;;  %v916_v19 = vadd.f32 %v915_v17, %v2058_v9 }
 0x11c   :  { %v917_v23 = vpop.f32.mrf.mxu0 }
 0x11d   :  { %1156 = vst [vmem:[%s2137_s3 + $0xa8] sm:$0xff] %v983_v18  ;;  %v918_v24 = vadd.f32 %v917_v23, %v2058_v9  ;;  %v987_v25 = vadd.f32 %v986_v61, %v916_v19 }
 0x11e   :  { %v919_v59 = vpop.f32.mrf.mxu0 }
 0x11f   :  { %v989_v6 = vadd.f32 %v988_v2, %v918_v24  ;;  %1159 = vst [vmem:[%s2137_s3 + $0xc0] sm:$0xff] %v987_v25 }
 0x120   :  { %v920_v10 = vpop.f32.mrf.mxu0 }
 0x121   :  { %1160 = vst [vmem:[%s2137_s3 + $0xc8] sm:$0xff] %v989_v6 }
 0x136   :  { %v1098_v20 = vpop.f32.mrf.mxu0 }
 0x137   :  { %v1027_v15 = vpop.f32.mrf.mxu1 }
 0x138   :  { %v1028_v21 = vadd.f32 %v1027_v15, %v2008_v11  ;;  %v1100_v27 = vpop.f32.mrf.mxu0 }
 0x139   :  { %v1029_v26 = vpop.f32.mrf.mxu1 }
 0x13a   :  { %v1099_v28 = vadd.f32 %v1098_v20, %v1028_v21  ;;  %v1030_v29 = vadd.f32 %v1029_v26, %v2008_v11  ;;  %v1102_v32 = vpop.f32.mrf.mxu0 }
 0x13b   :  { %v1031_v30 = vpop.f32.mrf.mxu1 }
 0x13c   :  { %1137 = vst [vmem:[%s2137_s3 + $0x10] sm:$0xff] %v1099_v28  ;;  %v1101_v33 = vadd.f32 %v1100_v27, %v1030_v29  ;;  %v1032_v34 = vadd.f32 %v1031_v30, %v2011_v22  ;;  %v1104_v36 = vpop.f32.mrf.mxu0 }
 0x13d   :  { %v1033_v35 = vpop.f32.mrf.mxu1 }
 0x13e   :  { %1138 = vst [vmem:[%s2137_s3 + $0x18] sm:$0xff] %v1101_v33  ;;  %v1103_v37 = vadd.f32 %v1102_v32, %v1032_v34  ;;  %v1034_v38 = vadd.f32 %v1033_v35, %v2011_v22  ;;  %v1108_v11 = vpop.f32.mrf.mxu0 }
 0x13f   :  { %v1037_v39 = vpop.f32.mrf.mxu1 }
 0x140   :  { %1141 = vst [vmem:[%s2137_s3 + $0x30] sm:$0xff] %v1103_v37  ;;  %v1105_v40 = vadd.f32 %v1104_v36, %v1034_v38  ;;  %v1038_v42 = vadd.f32 %v1037_v39, %v2014_v31  ;;  %v1110_v44 = vpop.f32.mrf.mxu0 }
 0x141   :  { %v1039_v43 = vpop.f32.mrf.mxu1 }
 0x142   :  { %1142 = vst [vmem:[%s2137_s3 + $0x38] sm:$0xff] %v1105_v40  ;;  %v1109_v46 = vadd.f32 %v1108_v11, %v1038_v42  ;;  %v1040_v47 = vadd.f32 %v1039_v43, %v2014_v31  ;;  %v1112_v22 = vpop.f32.mrf.mxu0 }
 0x143   :  { %v1041_v48 = vpop.f32.mrf.mxu1 }
 0x144   :  { %1145 = vst [vmem:[%s2137_s3 + $0x50] sm:$0xff] %v1109_v46  ;;  %v1111_v49 = vadd.f32 %v1110_v44, %v1040_v47  ;;  %v1042_v50 = vadd.f32 %v1041_v48, %v2028_v45  ;;  %v1114_v53 = vpop.f32.mrf.mxu0 }
 0x145   :  { %v1043_v51 = vpop.f32.mrf.mxu1 }
 0x146   :  { %1146 = vst [vmem:[%s2137_s3 + $0x58] sm:$0xff] %v1111_v49  ;;  %v1113_v52 = vadd.f32 %v1112_v22, %v1042_v50  ;;  %v1044_v55 = vadd.f32 %v1043_v51, %v2028_v45  ;;  %v1118_v31 = vpop.f32.mrf.mxu0 }
 0x147   :  { %v1047_v56 = vpop.f32.mrf.mxu1 }
 0x148   :  { %1149 = vst [vmem:[%s2137_s3 + $0x70] sm:$0xff] %v1113_v52  ;;  %v1115_v57 = vadd.f32 %v1114_v53, %v1044_v55  ;;  %v1048_v58 = vadd.f32 %v1047_v56, %v2038_v54  ;;  %v1120_v61 = vpop.f32.mrf.mxu0 }
 0x149   :  { %v1049_v60 = vpop.f32.mrf.mxu1 }
 0x14a   :  { %1150 = vst [vmem:[%s2137_s3 + $0x78] sm:$0xff] %v1115_v57  ;;  %v1119_v62 = vadd.f32 %v1118_v31, %v1048_v58  ;;  %v1050_v0 = vadd.f32 %v1049_v60, %v2038_v54  ;;  %v1122_v45 = vpop.f32.mrf.mxu0 }
 0x14b   :  { %v1051_v1 = vpop.f32.mrf.mxu1 }
 0x14c   :  { %1153 = vst [vmem:[%s2137_s3 + $0x90] sm:$0xff] %v1119_v62  ;;  %v1121_v2 = vadd.f32 %v1120_v61, %v1050_v0  ;;  %v1052_v41 = vadd.f32 %v1051_v1, %v2047_v63  ;;  %v1124_v4 = vpop.f32.mrf.mxu0 }
 0x14d   :  { %v1053_v3 = vpop.f32.mrf.mxu1 }
 0x14e   :  { %1154 = vst [vmem:[%s2137_s3 + $0x98] sm:$0xff] %v1121_v2  ;;  %v1123_v5 = vadd.f32 %v1122_v45, %v1052_v41  ;;  %v1054_v7 = vadd.f32 %v1053_v3, %v2047_v63  ;;  %v1128_v54 = vpop.f32.mrf.mxu0 }
 0x14f   :  { %v1057_v8 = vpop.f32.mrf.mxu1 }
 0x150   :  { %1157 = vst [vmem:[%s2137_s3 + $0xb0] sm:$0xff] %v1123_v5  ;;  %v1125_v12 = vadd.f32 %v1124_v4, %v1054_v7  ;;  %v1058_v13 = vadd.f32 %v1057_v8, %v2058_v9  ;;  %v1130_v16 = vpop.f32.mrf.mxu0 }
 0x151   :  { %v1059_v14 = vpop.f32.mrf.mxu1 }
 0x152   :  { %1158 = vst [vmem:[%s2137_s3 + $0xb8] sm:$0xff] %v1125_v12  ;;  %v1129_v17 = vadd.f32 %v1128_v54, %v1058_v13  ;;  %v1060_v18 = vadd.f32 %v1059_v14, %v2058_v9  ;;  %v1132_v63 = vpop.f32.mrf.mxu0 }
 0x153   :  { %v1061_v19 = vpop.f32.mrf.mxu1 }
 0x154   :  { %1161 = vst [vmem:[%s2137_s3 + $0xd0] sm:$0xff] %v1129_v17  ;;  %v1131_v23 = vadd.f32 %v1130_v16, %v1060_v18  ;;  %v1133_v25 = vpop.f32.mrf.mxu0 }
 0x155   :  { %v1062_v24 = vpop.f32.mrf.mxu1 }
 0x156   :  { %1162 = vst [vmem:[%s2137_s3 + $0xd8] sm:$0xff] %v1131_v23 }

// kernel: forward_rnn.106
= control target key start
LH: loop header
LB: loop body
LE: loop exit
PB: predicated region body
PF: predicated region fallthrough
CT: control target
= control target key end

     0   :  { %vm95_vm0 = vcmask 1046528   ;;  %v295_v1 = vmov 0   ;;  %vm88_vm1 = vcmask 244736   ;;  %s391_s1 = inlined_call_operand.vmem [shape: bf16[30,512], index: 1, kind: input, shape index: {}]   ;;  %s392_s0 = inlined_call_operand.vmem [shape: bf16[24,30], index: 0, kind: input, shape index: {}]   ;;  %s393_s2 = inlined_call_operand.vmem [shape: f32[24,1], index: 2, kind: input, shape index: {}]   ;;  %s394_s3 = inlined_call_operand.vmem [shape: f32[24,512], index: 3, kind: output, shape index: {}]  }
   0x1   :  { %v281_v0 = vld [vmem:[%s391_s1 + $0x24] ss:$16 sps:$4 sm:$0x7f]   ;;  %140 = vmatprep.mubr.bf16.mxu0 %v295_v1  ;;  %191 = vmatprep.mubr.bf16.mxu1 %v295_v1  ;;  %v283_v2 = vld [vmem:[%s391_s1 + $0x2c] ss:$16 sps:$4 sm:$0x7f]  }
   0x2   :  { %279 = vset.pattern.permute.xlu0 %v295_v1  ;;  %280 = vset.pattern.permute.xlu1 %v295_v1  ;;  %v285_v3 = vld [vmem:[%s391_s1 + $0x20] ss:$16 sps:$4 sm:$0x7f]   ;;  %v286_v4 = vld [vmem:[%s391_s1 + $0x28] ss:$16 sps:$4 sm:$0x7f]  }
   0x3   :  { %272 = vmatprep.subr.msk.bf16.mxu0 %vm95_vm0, %v281_v0  ;;  %275 = vmatprep.subr.msk.bf16.mxu1 %vm95_vm0, %v283_v2  ;;  %v287_v5 = vld [vmem:[%s391_s1 + $0x4] ss:$16 sps:$4 sm:$0xff]   ;;  %v97_v6 = vsel %vm95_vm0, %v285_v3, 0  ;;  %v103_v7 = vsel %vm95_vm0, %v286_v4, 0  ;;  %v289_v8 = vld [vmem:[%s391_s1 + $0xc] ss:$16 sps:$4 sm:$0xff]  }
   0x4   :  { %121 = vmatpush1.bf16.msra.mxu0 %v97_v6  ;;  %172 = vmatpush1.bf16.msra.mxu1 %v103_v7  ;;  %v291_v9 = vld [vmem:[%s391_s1] ss:$16 sps:$4 sm:$0xff]   ;;  %v292_v10 = vld [vmem:[%s391_s1 + $0x8] ss:$16 sps:$4 sm:$0xff]  }
   0x5   :  { %122 = vmatprep.subr.bf16.mxu0 %v287_v5  ;;  %173 = vmatprep.subr.bf16.mxu1 %v289_v8  ;;  %v26_v11 = vld [vmem:[%s393_s2] sm:$0xff]  ;;  %v28_v13 = vld [vmem:[%s393_s2 + $0x10] sm:$0xff]  ;;  %v27_v14 = vld [vmem:[%s393_s2 + $0x8] sm:$0xff] }
   0x6   :  { %v293_v12 = vld [vmem:[%s392_s0] sm:$0xff]   ;;  %31 = vperm.xlu0 %279, %v26_v11   ;;  %41 = vperm.xlu1 %280, %v28_v13   ;;  %v294_v15 = vld [vmem:[%s392_s0 + $0x8] ss:$0 sps:$4 sm:$0xff]  }
   0x8   :  { %123 = vmatpush1.bf16.msra.mxu0 %v291_v9  ;;  %174 = vmatpush1.bf16.msra.mxu1 %v292_v10 }
   0xa   :  { %36 = vperm.xlu0 %279, %v27_v14  }
   0xb   :  { %273 = vmatmul.mubr.msk.bf16.vlgmr.msra.gmra.mxu0 %vm88_vm1, %v293_v12  ;;  %276 = vmatmul.mubr.msk.bf16.vlgmr.msra.gmra.mxu1 %vm88_vm1, %v293_v12 }
   0xc   :  { %150 = vmatprep.mubr.bf16.mxu0 %v295_v1  ;;  %201 = vmatprep.mubr.bf16.mxu1 %v295_v1 }
  0x13   :  { %274 = vmatmul.mubr.msk.bf16.gmra.mxu0 %vm88_vm1, %v294_v15  ;;  %277 = vmatmul.mubr.msk.bf16.gmra.mxu1 %vm88_vm1, %v294_v15 }
  0x81   :  { %v32_v16 = vpop.permute.xlu0 %31  ;;  %v42_v34 = vpop.permute.xlu1 %41 }
  0x85   :  { %v37_v21 = vpop.permute.xlu0 %36 }
  0xcb   :  { %v142_v17 = vpop.f32.mrf.mxu0  ;;  %v193_v18 = vpop.f32.mrf.mxu1 }
  0xcc   :  { %v143_v19 = vadd.f32 %v142_v17, %v32_v16  ;;  %v194_v20 = vadd.f32 %v193_v18, %v32_v16 }
  0xcd   :  { %v144_v22 = vpop.f32.mrf.mxu0  ;;  %v195_v23 = vpop.f32.mrf.mxu1 }
  0xce   :  { %vm210_vm2 = vcmp.gt.f32.partialorder %v143_v19, 0.0  ;;  %v222_v24 = vmul.f32 0.01, %v143_v19  ;;  %vm212_vm3 = vcmp.gt.f32.partialorder %v194_v20, 0.0  ;;  %v224_v25 = vmul.f32 0.01, %v194_v20 }
  0xcf   :  { %v145_v26 = vadd.f32 %v144_v22, %v32_v16  ;;  %v196_v27 = vadd.f32 %v195_v23, %v32_v16  ;;  %v146_v28 = vpop.f32.mrf.mxu0  ;;  %v197_v29 = vpop.f32.mrf.mxu1 }
  0xd0   :  { %v234_v30 = vsel %vm210_vm2, %v143_v19, %v222_v24  ;;  %v236_v31 = vsel %vm212_vm3, %v194_v20, %v224_v25  ;;  %v147_v32 = vadd.f32 %v146_v28, %v37_v21  ;;  %v198_v33 = vadd.f32 %v197_v29, %v37_v21 }
  0xd1   :  { %246 = vst [vmem:[%s394_s3] sm:$0xff] %v234_v30  ;;  %248 = vst [vmem:[%s394_s3 + $0x10] sm:$0xff] %v236_v31  ;;  %vm211_vm4 = vcmp.gt.f32.partialorder %v145_v26, 0.0  ;;  %v223_v35 = vmul.f32 0.01, %v145_v26  ;;  %vm213_vm5 = vcmp.gt.f32.partialorder %v196_v27, 0.0  ;;  %v148_v37 = vpop.f32.mrf.mxu0  ;;  %v199_v38 = vpop.f32.mrf.mxu1 }
  0xd2   :  { %v225_v36 = vmul.f32 0.01, %v196_v27  ;;  %vm214_vm6 = vcmp.gt.f32.partialorder %v147_v32, 0.0  ;;  %v226_v39 = vmul.f32 0.01, %v147_v32  ;;  %vm216_vm7 = vcmp.gt.f32.partialorder %v198_v33, 0.0 }
  0xd3   :  { %v228_v40 = vmul.f32 0.01, %v198_v33  ;;  %v235_v41 = vsel %vm211_vm4, %v145_v26, %v223_v35  ;;  %v149_v43 = vadd.f32 %v148_v37, %v37_v21  ;;  %v200_v44 = vadd.f32 %v199_v38, %v37_v21  ;;  %v152_v45 = vpop.f32.mrf.mxu0  ;;  %v203_v46 = vpop.f32.mrf.mxu1 }
  0xd4   :  { %v237_v42 = vsel %vm213_vm5, %v196_v27, %v225_v36  ;;  %247 = vst [vmem:[%s394_s3 + $0x8] sm:$0xff] %v235_v41  ;;  %v238_v47 = vsel %vm214_vm6, %v147_v32, %v226_v39  ;;  %v153_v49 = vadd.f32 %v152_v45, %v42_v34  ;;  %v204_v50 = vadd.f32 %v203_v46, %v42_v34 }
  0xd5   :  { %249 = vst [vmem:[%s394_s3 + $0x18] sm:$0xff] %v237_v42  ;;  %v240_v48 = vsel %vm216_vm7, %v198_v33, %v228_v40  ;;  %250 = vst [vmem:[%s394_s3 + $0x20] sm:$0xff] %v238_v47  ;;  %vm215_vm8 = vcmp.gt.f32.partialorder %v149_v43, 0.0  ;;  %v227_v51 = vmul.f32 0.01, %v149_v43  ;;  %vm217_vm9 = vcmp.gt.f32.partialorder %v200_v44, 0.0  ;;  %v154_v53 = vpop.f32.mrf.mxu0  ;;  %v205_v54 = vpop.f32.mrf.mxu1 }
  0xd6   :  { %252 = vst [vmem:[%s394_s3 + $0x30] sm:$0xff] %v240_v48  ;;  %v229_v52 = vmul.f32 0.01, %v200_v44  ;;  %vm218_vm10 = vcmp.gt.f32.partialorder %v153_v49, 0.0  ;;  %v230_v55 = vmul.f32 0.01, %v153_v49  ;;  %v155_v59 = vadd.f32 %v154_v53, %v42_v34 }
  0xd7   :  { %vm220_vm11 = vcmp.gt.f32.partialorder %v204_v50, 0.0  ;;  %v232_v56 = vmul.f32 0.01, %v204_v50  ;;  %v239_v57 = vsel %vm215_vm8, %v149_v43, %v227_v51  ;;  %v206_v60 = vadd.f32 %v205_v54, %v42_v34  ;;  %v156_v61 = vpop.f32.mrf.mxu0  ;;  %v207_v62 = vpop.f32.mrf.mxu1 }
  0xd8   :  { %v241_v58 = vsel %vm217_vm9, %v200_v44, %v229_v52  ;;  %251 = vst [vmem:[%s394_s3 + $0x28] sm:$0xff] %v239_v57  ;;  %v242_v63 = vsel %vm218_vm10, %v153_v49, %v230_v55  ;;  %vm219_vm12 = vcmp.gt.f32.partialorder %v155_v59, 0.0  ;;  %v231_v1 = vmul.f32 0.01, %v155_v59 }
  0xd9   :  { %253 = vst [vmem:[%s394_s3 + $0x38] sm:$0xff] %v241_v58  ;;  %v244_v0 = vsel %vm220_vm11, %v204_v50, %v232_v56  ;;  %254 = vst [vmem:[%s394_s3 + $0x40] sm:$0xff] %v242_v63  ;;  %vm221_vm13 = vcmp.gt.f32.partialorder %v206_v60, 0.0  ;;  %v233_v2 = vmul.f32 0.01, %v206_v60  ;;  %v157_v3 = vpop.f32.mrf.mxu0  ;;  %v208_v4 = vpop.f32.mrf.mxu1 }
  0xda   :  { %256 = vst [vmem:[%s394_s3 + $0x50] sm:$0xff] %v244_v0  ;;  %v243_v5 = vsel %vm219_vm12, %v155_v59, %v231_v1 }
  0xdb   :  { %v245_v6 = vsel %vm221_vm13, %v206_v60, %v233_v2  ;;  %255 = vst [vmem:[%s394_s3 + $0x48] sm:$0xff] %v243_v5 }
  0xdc   :  { %257 = vst [vmem:[%s394_s3 + $0x58] sm:$0xff] %v245_v6 }

// kernel: forward_rnn.105
= control target key start
LH: loop header
LB: loop body
LE: loop exit
PB: predicated region body
PF: predicated region fallthrough
CT: control target
= control target key end

     0   :  { %v1338_v1 = vmov 0   ;;  %vm776_vm0 = vcmask 1040384   ;;  %vm769_vm1 = vcmask 539648   ;;  %s1825_s1 = inlined_call_operand.vmem [shape: bf16[450,512], index: 1, kind: input, shape index: {}]   ;;  %s1826_s0 = inlined_call_operand.vmem [shape: bf16[32,450], index: 0, kind: input, shape index: {}]   ;;  %s1827_s2 = inlined_call_operand.vmem [shape: f32[32,1], index: 2, kind: input, shape index: {}]   ;;  %s1828_s3 = inlined_call_operand.vmem [shape: f32[32,512], index: 3, kind: output, shape index: {}]  }
   0x1   :  { %v1154_v0 = vld [vmem:[%s1825_s1 + $0xe4] ss:$16 sps:$4 sm:$0xff]   ;;  %1152 = vset.pattern.permute.xlu0 %v1338_v1  ;;  %1153 = vset.pattern.permute.xlu1 %v1338_v1  ;;  %v1158_v3 = vld [vmem:[%s1825_s1 + $0xe0] ss:$16 sps:$4 sm:$0xff]   ;;  %v1475_v41 = vld [vmem:[%s1826_s0 + $0xc] ss:$16 sps:$4 sm:$0xff]  }
   0x2   :  { %v1156_v2 = vld [vmem:[%s1825_s1 + $0x2e4] ss:$16 sps:$4 sm:$0xff]   ;;  %789 = vmatprep.subr.bf16.mxu0 %v1154_v0  ;;  %v1159_v4 = vld [vmem:[%s1825_s1 + $0x2e0] ss:$16 sps:$4 sm:$0xff]   ;;  %1146 = vmatprep.mubr.msk.bf16.mxu1 %vm769_vm1, %v1475_v41  ;;  %v1238_v58 = vld [vmem:[%s1825_s1 + $0xec] ss:$16 sps:$4 sm:$0xff]  }
   0x3   :  { %842 = vmatprep.subr.bf16.mxu1 %v1156_v2  ;;  %v1160_v5 = vld [vmem:[%s1825_s1 + $0xc4] ss:$16 sps:$4 sm:$0xff]   ;;  %790 = vmatpush1.bf16.msra.mxu0 %v1158_v3  ;;  %v1164_v7 = vld [vmem:[%s1825_s1 + $0xc0] ss:$16 sps:$4 sm:$0xff]   ;;  %v1536_v59 = vld [vmem:[%s1826_s0 + $0x8] ss:$16 sps:$4 sm:$0xff]  }
   0x4   :  { %843 = vmatpush1.bf16.msra.mxu1 %v1159_v4  ;;  %v1162_v6 = vld [vmem:[%s1825_s1 + $0x2c4] ss:$16 sps:$4 sm:$0xff]   ;;  %791 = vmatprep.subr.bf16.mxu0 %v1160_v5  ;;  %v1165_v8 = vld [vmem:[%s1825_s1 + $0x2c0] ss:$16 sps:$4 sm:$0xff]   ;;  %v1236_v60 = vld [vmem:[%s1825_s1 + $0xe8] ss:$16 sps:$4 sm:$0xff]  }
   0x5   :  { %844 = vmatprep.subr.bf16.mxu1 %v1162_v6  ;;  %v1166_v9 = vld [vmem:[%s1825_s1 + $0xa4] ss:$16 sps:$4 sm:$0xff]   ;;  %v1170_v11 = vld [vmem:[%s1825_s1 + $0xa0] ss:$16 sps:$4 sm:$0xff]   ;;  %v1244_v63 = vld [vmem:[%s1825_s1 + $0xcc] ss:$16 sps:$4 sm:$0xff]  }
   0x6   :  { %v1168_v10 = vld [vmem:[%s1825_s1 + $0x2a4] ss:$16 sps:$4 sm:$0xff]   ;;  %v1171_v12 = vld [vmem:[%s1825_s1 + $0x2a0] ss:$16 sps:$4 sm:$0xff]   ;;  %v1242_v0 = vld [vmem:[%s1825_s1 + $0xc8] ss:$16 sps:$4 sm:$0xff]  }
   0x7   :  { %792 = vmatpush1.bf16.msra.mxu0 %v1164_v7  ;;  %v1172_v13 = vld [vmem:[%s1825_s1 + $0x84] ss:$16 sps:$4 sm:$0xff]   ;;  %v1176_v15 = vld [vmem:[%s1825_s1 + $0x80] ss:$16 sps:$4 sm:$0xff]   ;;  %v1250_v3 = vld [vmem:[%s1825_s1 + $0xac] ss:$16 sps:$4 sm:$0xff]  }
   0x8   :  { %845 = vmatpush1.bf16.msra.mxu1 %v1165_v8  ;;  %793 = vmatprep.subr.bf16.mxu0 %v1166_v9  ;;  %v1174_v14 = vld [vmem:[%s1825_s1 + $0x284] ss:$16 sps:$4 sm:$0xff]   ;;  %v1177_v16 = vld [vmem:[%s1825_s1 + $0x280] ss:$16 sps:$4 sm:$0xff]   ;;  %v1248_v4 = vld [vmem:[%s1825_s1 + $0xa8] ss:$16 sps:$4 sm:$0xff]  }
   0x9   :  { %846 = vmatprep.subr.bf16.mxu1 %v1168_v10  ;;  %v1178_v17 = vld [vmem:[%s1825_s1 + $0x64] ss:$16 sps:$4 sm:$0xff]   ;;  %v1182_v19 = vld [vmem:[%s1825_s1 + $0x60] ss:$16 sps:$4 sm:$0xff]   ;;  %v1257_v6 = vld [vmem:[%s1825_s1 + $0x8c] ss:$16 sps:$4 sm:$0xff]  }
   0xa   :  { %v1180_v18 = vld [vmem:[%s1825_s1 + $0x264] ss:$16 sps:$4 sm:$0xff]   ;;  %v1183_v20 = vld [vmem:[%s1825_s1 + $0x260] ss:$16 sps:$4 sm:$0xff]   ;;  %v1260_v7 = vld [vmem:[%s1825_s1 + $0x2ec] ss:$16 sps:$4 sm:$0xff]  }
   0xb   :  { %794 = vmatpush1.bf16.msra.mxu0 %v1170_v11  ;;  %v1184_v21 = vld [vmem:[%s1825_s1 + $0x44] ss:$16 sps:$4 sm:$0xff]   ;;  %v1188_v23 = vld [vmem:[%s1825_s1 + $0x40] ss:$16 sps:$4 sm:$0xff]   ;;  %v1255_v9 = vld [vmem:[%s1825_s1 + $0x88] ss:$16 sps:$4 sm:$0xff]  }
   0xc   :  { %847 = vmatpush1.bf16.msra.mxu1 %v1171_v12  ;;  %795 = vmatprep.subr.bf16.mxu0 %v1172_v13  ;;  %v1186_v22 = vld [vmem:[%s1825_s1 + $0x244] ss:$16 sps:$4 sm:$0xff]   ;;  %v1189_v24 = vld [vmem:[%s1825_s1 + $0x240] ss:$16 sps:$4 sm:$0xff]   ;;  %v1258_v10 = vld [vmem:[%s1825_s1 + $0x2e8] ss:$16 sps:$4 sm:$0xff]  }
   0xd   :  { %848 = vmatprep.subr.bf16.mxu1 %v1174_v14  ;;  %v1190_v25 = vld [vmem:[%s1825_s1 + $0x24] ss:$16 sps:$4 sm:$0xff]   ;;  %v1194_v27 = vld [vmem:[%s1825_s1 + $0x20] ss:$16 sps:$4 sm:$0xff]   ;;  %v1263_v11 = vld [vmem:[%s1825_s1 + $0x6c] ss:$16 sps:$4 sm:$0xff]  }
   0xe   :  { %v1192_v26 = vld [vmem:[%s1825_s1 + $0x224] ss:$16 sps:$4 sm:$0xff]   ;;  %v1195_v28 = vld [vmem:[%s1825_s1 + $0x220] ss:$16 sps:$4 sm:$0xff]   ;;  %v1266_v12 = vld [vmem:[%s1825_s1 + $0x2cc] ss:$16 sps:$4 sm:$0xff]  }
   0xf   :  { %796 = vmatpush1.bf16.msra.mxu0 %v1176_v15  ;;  %v1196_v29 = vld [vmem:[%s1825_s1 + $0x4] ss:$16 sps:$4 sm:$0xff]   ;;  %v1200_v32 = vld [vmem:[%s1825_s1] ss:$16 sps:$4 sm:$0xff]   ;;  %v1261_v13 = vld [vmem:[%s1825_s1 + $0x68] ss:$16 sps:$4 sm:$0xff]  }
  0x10   :  { %849 = vmatpush1.bf16.msra.mxu1 %v1177_v16  ;;  %797 = vmatprep.subr.bf16.mxu0 %v1178_v17  ;;  %v1198_v30 = vld [vmem:[%s1825_s1 + $0x204] ss:$16 sps:$4 sm:$0xff]   ;;  %v1201_v33 = vld [vmem:[%s1825_s1 + $0x200] ss:$16 sps:$4 sm:$0xff]   ;;  %v1264_v14 = vld [vmem:[%s1825_s1 + $0x2c8] ss:$16 sps:$4 sm:$0xff]  }
  0x11   :  { %850 = vmatprep.subr.bf16.mxu1 %v1180_v18  ;;  %v135_v31 = vld [vmem:[%s1825_s1 + $0x380] sm:$0x11]  ;;  %v1269_v16 = vld [vmem:[%s1825_s1 + $0x4c] ss:$16 sps:$4 sm:$0xff]   ;;  %v1267_v18 = vld [vmem:[%s1825_s1 + $0x48] ss:$16 sps:$4 sm:$0xff]  }
  0x12   :  { %v1202_v34 = vld [vmem:[%s1825_s1 + $0x1e4] ss:$16 sps:$4 sm:$0xff]   ;;  %v1142_v35 = vcombine.high %v135_v31, %v135_v31  ;;  %v1141_v36 = vcombine.low %v135_v31, %v135_v31  ;;  %v1205_v37 = vld [vmem:[%s1825_s1 + $0x1e0] ss:$16 sps:$4 sm:$0xff]   ;;  %v1272_v17 = vld [vmem:[%s1825_s1 + $0x2ac] ss:$16 sps:$4 sm:$0xff]  }
  0x13   :  { %798 = vmatpush1.bf16.msra.mxu0 %v1182_v19  ;;  %v1207_v39 = vld [vmem:[%s1825_s1 + $0x1c4] ss:$16 sps:$4 sm:$0xff]   ;;  %v1211_v42 = vld [vmem:[%s1825_s1 + $0x1c0] ss:$16 sps:$4 sm:$0xff]   ;;  %v1270_v19 = vld [vmem:[%s1825_s1 + $0x2a8] ss:$16 sps:$4 sm:$0xff]  }
  0x14   :  { %851 = vmatpush1.bf16.msra.mxu1 %v1183_v20  ;;  %799 = vmatprep.subr.bf16.mxu0 %v1184_v21  ;;  %v778_v38 = vsel %vm776_vm0, %v1141_v36, 0  ;;  %v1209_v40 = vld [vmem:[%s1825_s1 + $0x364] ss:$16 sps:$4 sm:$0xff]   ;;  %v1212_v43 = vld [vmem:[%s1825_s1 + $0x360] ss:$16 sps:$4 sm:$0xff]   ;;  %v140_v36 = vld [vmem:[%s1827_s2 + $0x18] sm:$0xff] }
  0x15   :  { %852 = vmatprep.subr.bf16.mxu1 %v1186_v22  ;;  %v1213_v44 = vld [vmem:[%s1825_s1 + $0x1a4] ss:$16 sps:$4 sm:$0xff]   ;;  %v1217_v46 = vld [vmem:[%s1825_s1 + $0x1a0] ss:$16 sps:$4 sm:$0xff]   ;;  %v1625_v21 = vld [vmem:[%s1826_s0 + $0x2c] ss:$16 sps:$4 sm:$0xff]  }
  0x16   :  { %v1215_v45 = vld [vmem:[%s1825_s1 + $0x344] ss:$16 sps:$4 sm:$0xff]   ;;  %v1218_v47 = vld [vmem:[%s1825_s1 + $0x340] ss:$16 sps:$4 sm:$0xff]   ;;  %v1630_v22 = vld [vmem:[%s1826_s0 + $0x28] ss:$16 sps:$4 sm:$0xff]  }
  0x17   :  { %800 = vmatpush1.bf16.msra.mxu0 %v1188_v23  ;;  %v1219_v48 = vld [vmem:[%s1825_s1 + $0x184] ss:$16 sps:$4 sm:$0xff]   ;;  %v1223_v50 = vld [vmem:[%s1825_s1 + $0x180] ss:$16 sps:$4 sm:$0xff]   ;;  %v1275_v23 = vld [vmem:[%s1825_s1 + $0x2c] ss:$16 sps:$4 sm:$0xff]  }
  0x18   :  { %853 = vmatpush1.bf16.msra.mxu1 %v1189_v24  ;;  %801 = vmatprep.subr.bf16.mxu0 %v1190_v25  ;;  %v1221_v49 = vld [vmem:[%s1825_s1 + $0x324] ss:$16 sps:$4 sm:$0xff]   ;;  %v1224_v51 = vld [vmem:[%s1825_s1 + $0x320] ss:$16 sps:$4 sm:$0xff]   ;;  %v1278_v24 = vld [vmem:[%s1825_s1 + $0x28c] ss:$16 sps:$4 sm:$0xff]  }
  0x19   :  { %854 = vmatprep.subr.bf16.mxu1 %v1192_v26  ;;  %v1512_v52 = vld [vmem:[%s1826_s0 + $0x4] ss:$16 sps:$4 sm:$0xff]   ;;  %v1229_v55 = vld [vmem:[%s1825_s1 + $0x160] ss:$16 sps:$4 sm:$0xff]   ;;  %v1273_v25 = vld [vmem:[%s1825_s1 + $0x28] ss:$16 sps:$4 sm:$0xff]  }
  0x1a   :  { %v1225_v53 = vld [vmem:[%s1825_s1 + $0x164] ss:$16 sps:$4 sm:$0xff]   ;;  %821 = vmatprep.mubr.bf16.mxu0 %v1512_v52  ;;  %v1230_v56 = vld [vmem:[%s1825_s1 + $0x300] ss:$16 sps:$4 sm:$0xff]   ;;  %v1276_v26 = vld [vmem:[%s1825_s1 + $0x288] ss:$16 sps:$4 sm:$0xff]  }
  0x1b   :  { %802 = vmatpush1.bf16.msra.mxu0 %v1194_v27  ;;  %v1227_v54 = vld [vmem:[%s1825_s1 + $0x304] ss:$16 sps:$4 sm:$0xff]   ;;  %v1239_v61 = vld [vmem:[%s1825_s1 + $0x140] ss:$16 sps:$4 sm:$0xff]   ;;  %v1281_v27 = vld [vmem:[%s1825_s1 + $0xc] ss:$16 sps:$4 sm:$0xff]  }
  0x1c   :  { %855 = vmatpush1.bf16.msra.mxu1 %v1195_v28  ;;  %803 = vmatprep.subr.bf16.mxu0 %v1196_v29  ;;  %v1234_v57 = vld [vmem:[%s1825_s1 + $0x144] ss:$16 sps:$4 sm:$0xff]   ;;  %v1245_v1 = vld [vmem:[%s1825_s1 + $0x120] ss:$16 sps:$4 sm:$0xff]   ;;  %v1284_v28 = vld [vmem:[%s1825_s1 + $0x26c] ss:$16 sps:$4 sm:$0xff]  }
  0x1d   :  { %856 = vmatprep.subr.bf16.mxu1 %v1198_v30  ;;  %v1240_v62 = vld [vmem:[%s1825_s1 + $0x124] ss:$16 sps:$4 sm:$0xff]   ;;  %v1251_v5 = vld [vmem:[%s1825_s1 + $0x100] ss:$16 sps:$4 sm:$0xff]   ;;  %v1279_v29 = vld [vmem:[%s1825_s1 + $0x8] ss:$16 sps:$4 sm:$0xff]  }
  0x1e   :  { %v1246_v2 = vld [vmem:[%s1825_s1 + $0x104] ss:$16 sps:$4 sm:$0xff]   ;;  %v1578_v8 = vld [vmem:[%s1826_s0] ss:$16 sps:$4 sm:$0xff]   ;;  %v1282_v30 = vld [vmem:[%s1825_s1 + $0x268] ss:$16 sps:$4 sm:$0xff]  }
  0x1f   :  { %804 = vmatpush1.bf16.msra.mxu0 %v1200_v32  ;;  %v1602_v15 = vld [vmem:[%s1826_s0 + $0x24] ss:$16 sps:$4 sm:$0xff]   ;;  %v1620_v20 = vld [vmem:[%s1826_s0 + $0x20] ss:$16 sps:$4 sm:$0xff]   ;;  %v1287_v32 = vld [vmem:[%s1825_s1 + $0x1ec] ss:$16 sps:$4 sm:$0xff]  }
  0x20   :  { %857 = vmatpush1.bf16.msra.mxu1 %v1201_v33  ;;  %805 = vmatprep.subr.bf16.mxu0 %v1202_v34  ;;  %v137_v31 = vld [vmem:[%s1827_s2] sm:$0xff]  ;;  %v1290_v33 = vld [vmem:[%s1825_s1 + $0x24c] ss:$16 sps:$4 sm:$0xff]   ;;  %v139_v34 = vld [vmem:[%s1827_s2 + $0x10] sm:$0xff] }
  0x21   :  { %1145 = vmatprep.subr.msk.bf16.mxu1 %vm776_vm0, %v1142_v35  ;;  %143 = vperm.xlu0 %1152, %v137_v31   ;;  %v138_v35 = vld [vmem:[%s1827_s2 + $0x8] sm:$0xff] }
  0x22   :  { %153 = vperm.xlu1 %1153, %v139_v34  }
  0x23   :  { %806 = vmatpush2.bf16.msra.mxu0 %v1205_v37  ;;  %v1285_v37 = vld [vmem:[%s1825_s1 + $0x1e8] ss:$16 sps:$4 sm:$0xff]  }
  0x24   :  { %865 = vmatpush2.bf16.msra.mxu1 %v778_v38  ;;  %807 = vmatprep.subr.bf16.mxu0 %v1207_v39  ;;  %v1288_v38 = vld [vmem:[%s1825_s1 + $0x248] ss:$16 sps:$4 sm:$0xff]   ;;  %v1293_v39 = vld [vmem:[%s1825_s1 + $0x1cc] ss:$16 sps:$4 sm:$0xff]  }
  0x25   :  { %866 = vmatprep.subr.bf16.mxu1 %v1209_v40  ;;  %v1296_v40 = vld [vmem:[%s1825_s1 + $0x22c] ss:$16 sps:$4 sm:$0xff]   ;;  %148 = vperm.xlu0 %1152, %v138_v35  }
  0x26   :  { %158 = vperm.xlu1 %1153, %v140_v36  }
  0x27   :  { %808 = vmatpush2.bf16.msra.mxu0 %v1211_v42  ;;  %v1294_v42 = vld [vmem:[%s1825_s1 + $0x228] ss:$16 sps:$4 sm:$0xff]  }
  0x28   :  { %867 = vmatpush2.bf16.msra.mxu1 %v1212_v43  ;;  %809 = vmatprep.subr.bf16.mxu0 %v1213_v44  ;;  %v1299_v43 = vld [vmem:[%s1825_s1 + $0x1ac] ss:$16 sps:$4 sm:$0xff]  }
  0x29   :  { %868 = vmatprep.subr.bf16.mxu1 %v1215_v45  ;;  %v1302_v44 = vld [vmem:[%s1825_s1 + $0x20c] ss:$16 sps:$4 sm:$0xff]  }
  0x2a   :  { %v136_v45 = vld [vmem:[%s1825_s1 + $0x388] sm:$0x11] }
  0x2b   :  { %810 = vmatpush2.bf16.msra.mxu0 %v1217_v46  ;;  %v1297_v46 = vld [vmem:[%s1825_s1 + $0x1a8] ss:$16 sps:$4 sm:$0xff]  }
  0x2c   :  { %869 = vmatpush2.bf16.msra.mxu1 %v1218_v47  ;;  %811 = vmatprep.subr.bf16.mxu0 %v1219_v48  ;;  %v1300_v47 = vld [vmem:[%s1825_s1 + $0x208] ss:$16 sps:$4 sm:$0xff]   ;;  %v1305_v48 = vld [vmem:[%s1825_s1 + $0x18c] ss:$16 sps:$4 sm:$0xff]  }
  0x2d   :  { %870 = vmatprep.subr.bf16.mxu1 %v1221_v49  ;;  %v1144_v49 = vcombine.high %v136_v45, %v136_v45 }
  0x2f   :  { %812 = vmatpush2.bf16.msra.mxu0 %v1223_v50  ;;  %v1143_v50 = vcombine.low %v136_v45, %v136_v45 }
  0x30   :  { %871 = vmatpush2.bf16.msra.mxu1 %v1224_v51  ;;  %813 = vmatprep.subr.bf16.mxu0 %v1225_v53  ;;  %v1303_v51 = vld [vmem:[%s1825_s1 + $0x188] ss:$16 sps:$4 sm:$0xff]   ;;  %v1313_v53 = vld [vmem:[%s1825_s1 + $0x16c] ss:$16 sps:$4 sm:$0xff]  }
  0x31   :  { %872 = vmatprep.subr.bf16.mxu1 %v1227_v54  ;;  %v1316_v54 = vld [vmem:[%s1825_s1 + $0x36c] ss:$16 sps:$4 sm:$0xff]  }
  0x33   :  { %814 = vmatpush2.bf16.msra.mxu0 %v1229_v55  ;;  %v1311_v55 = vld [vmem:[%s1825_s1 + $0x168] ss:$16 sps:$4 sm:$0xff]  }
  0x34   :  { %873 = vmatpush2.bf16.msra.mxu1 %v1230_v56  ;;  %815 = vmatprep.subr.bf16.mxu0 %v1234_v57  ;;  %v1314_v56 = vld [vmem:[%s1825_s1 + $0x368] ss:$16 sps:$4 sm:$0xff]   ;;  %v1322_v57 = vld [vmem:[%s1825_s1 + $0x14c] ss:$16 sps:$4 sm:$0xff]  }
  0x35   :  { %895 = vmatprep.subr.bf16.mxu1 %v1238_v58  ;;  %v1325_v58 = vld [vmem:[%s1825_s1 + $0x34c] ss:$16 sps:$4 sm:$0xff]  }
  0x37   :  { %875 = vmatmul.mubr.bf16.vlgmr.msra.gmra.mxu1 %v1536_v59  ;;  %816 = vmatpush2.bf16.msra.mxu0 %v1239_v61  ;;  %v1323_v61 = vld [vmem:[%s1825_s1 + $0x348] ss:$16 sps:$4 sm:$0xff]  }
  0x38   :  { %896 = vmatpush1.bf16.msra.mxu1 %v1236_v60  ;;  %817 = vmatprep.subr.bf16.mxu0 %v1240_v62  ;;  %v1320_v60 = vld [vmem:[%s1825_s1 + $0x148] ss:$16 sps:$4 sm:$0xff]   ;;  %v1328_v62 = vld [vmem:[%s1825_s1 + $0x12c] ss:$16 sps:$4 sm:$0xff]  }
  0x39   :  { %897 = vmatprep.subr.bf16.mxu1 %v1244_v63  ;;  %1147 = vmatprep.mubr.msk.bf16.mxu1 %vm769_vm1, %v1625_v21  ;;  %v1331_v63 = vld [vmem:[%s1825_s1 + $0x32c] ss:$16 sps:$4 sm:$0xff]  }
  0x3b   :  { %818 = vmatpush2.bf16.msra.mxu0 %v1245_v1  ;;  %v1329_v1 = vld [vmem:[%s1825_s1 + $0x328] ss:$16 sps:$4 sm:$0xff]  }
  0x3c   :  { %898 = vmatpush1.bf16.msra.mxu1 %v1242_v0  ;;  %819 = vmatprep.subr.bf16.mxu0 %v1246_v2  ;;  %v1326_v0 = vld [vmem:[%s1825_s1 + $0x128] ss:$16 sps:$4 sm:$0xff]   ;;  %v1334_v2 = vld [vmem:[%s1825_s1 + $0x10c] ss:$16 sps:$4 sm:$0xff]  }
  0x3d   :  { %899 = vmatprep.subr.bf16.mxu1 %v1250_v3  ;;  %v1337_v3 = vld [vmem:[%s1825_s1 + $0x30c] ss:$16 sps:$4 sm:$0xff]  }
  0x3f   :  { %820 = vmatpush2.bf16.msra.mxu0 %v1251_v5  ;;  %885 = vmatmul.mubr.bf16.gmra.mxu1 %v1630_v22  ;;  %v1335_v5 = vld [vmem:[%s1825_s1 + $0x308] ss:$16 sps:$4 sm:$0xff]  }
  0x40   :  { %900 = vmatpush1.bf16.msra.mxu1 %v1248_v4  ;;  %948 = vmatprep.subr.bf16.mxu0 %v1260_v7  ;;  %v1332_v4 = vld [vmem:[%s1825_s1 + $0x108] ss:$16 sps:$4 sm:$0xff]  }
  0x41   :  { %901 = vmatprep.subr.bf16.mxu1 %v1257_v6  ;;  %927 = vmatprep.mubr.bf16.mxu1 %v1512_v52  ;;  %v784_v52 = vsel %vm776_vm0, %v1143_v50, 0 }
  0x42   :  { %822 = vmatmul.mubr.bf16.vlgmr.msra.gmra.mxu0 %v1578_v8 }
  0x43   :  { %949 = vmatpush1.bf16.msra.mxu0 %v1258_v10  ;;  %831 = vmatprep.mubr.bf16.mxu0 %v1602_v15 }
  0x44   :  { %902 = vmatpush1.bf16.msra.mxu1 %v1255_v9  ;;  %950 = vmatprep.subr.bf16.mxu0 %v1266_v12 }
  0x45   :  { %903 = vmatprep.subr.bf16.mxu1 %v1263_v11 }
  0x47   :  { %951 = vmatpush1.bf16.msra.mxu0 %v1264_v14 }
  0x48   :  { %904 = vmatpush1.bf16.msra.mxu1 %v1261_v13  ;;  %952 = vmatprep.subr.bf16.mxu0 %v1272_v17 }
  0x49   :  { %905 = vmatprep.subr.bf16.mxu1 %v1269_v16 }
  0x4a   :  { %832 = vmatmul.mubr.bf16.gmra.mxu0 %v1620_v20 }
  0x4b   :  { %953 = vmatpush1.bf16.msra.mxu0 %v1270_v19  ;;  %1149 = vmatprep.mubr.msk.bf16.mxu0 %vm769_vm1, %v1475_v41  ;;  %v1291_v41 = vld [vmem:[%s1825_s1 + $0x1c8] ss:$16 sps:$4 sm:$0xff]  }
  0x4c   :  { %906 = vmatpush1.bf16.msra.mxu1 %v1267_v18  ;;  %954 = vmatprep.subr.bf16.mxu0 %v1278_v24 }
  0x4d   :  { %907 = vmatprep.subr.bf16.mxu1 %v1275_v23 }
  0x4f   :  { %955 = vmatpush1.bf16.msra.mxu0 %v1276_v26 }
  0x50   :  { %908 = vmatpush1.bf16.msra.mxu1 %v1273_v25  ;;  %956 = vmatprep.subr.bf16.mxu0 %v1284_v28 }
  0x51   :  { %909 = vmatprep.subr.bf16.mxu1 %v1281_v27 }
  0x53   :  { %957 = vmatpush1.bf16.msra.mxu0 %v1282_v30 }
  0x54   :  { %910 = vmatpush1.bf16.msra.mxu1 %v1279_v29  ;;  %958 = vmatprep.subr.bf16.mxu0 %v1290_v33 }
  0x55   :  { %911 = vmatprep.subr.bf16.mxu1 %v1287_v32 }
  0x57   :  { %959 = vmatpush1.bf16.msra.mxu0 %v1288_v38 }
  0x58   :  { %912 = vmatpush2.bf16.msra.mxu1 %v1285_v37  ;;  %960 = vmatprep.subr.bf16.mxu0 %v1296_v40 }
  0x59   :  { %913 = vmatprep.subr.bf16.mxu1 %v1293_v39 }
  0x5b   :  { %961 = vmatpush1.bf16.msra.mxu0 %v1294_v42 }
  0x5c   :  { %914 = vmatpush2.bf16.msra.mxu1 %v1291_v41  ;;  %962 = vmatprep.subr.bf16.mxu0 %v1302_v44 }
  0x5d   :  { %915 = vmatprep.subr.bf16.mxu1 %v1299_v43 }
  0x5f   :  { %963 = vmatpush1.bf16.msra.mxu0 %v1300_v47 }
  0x60   :  { %916 = vmatpush2.bf16.msra.mxu1 %v1297_v46  ;;  %1148 = vmatprep.subr.msk.bf16.mxu0 %vm776_vm0, %v1144_v49 }
  0x61   :  { %917 = vmatprep.subr.bf16.mxu1 %v1305_v48 }
  0x63   :  { %971 = vmatpush2.bf16.msra.mxu0 %v784_v52 }
  0x64   :  { %918 = vmatpush2.bf16.msra.mxu1 %v1303_v51  ;;  %972 = vmatprep.subr.bf16.mxu0 %v1316_v54 }
  0x65   :  { %919 = vmatprep.subr.bf16.mxu1 %v1313_v53 }
  0x67   :  { %973 = vmatpush2.bf16.msra.mxu0 %v1314_v56 }
  0x68   :  { %920 = vmatpush2.bf16.msra.mxu1 %v1311_v55  ;;  %974 = vmatprep.subr.bf16.mxu0 %v1325_v58 }
  0x69   :  { %921 = vmatprep.subr.bf16.mxu1 %v1322_v57 }
  0x6b   :  { %975 = vmatpush2.bf16.msra.mxu0 %v1323_v61 }
  0x6c   :  { %922 = vmatpush2.bf16.msra.mxu1 %v1320_v60  ;;  %976 = vmatprep.subr.bf16.mxu0 %v1331_v63 }
  0x6d   :  { %923 = vmatprep.subr.bf16.mxu1 %v1328_v62 }
  0x6f   :  { %977 = vmatpush2.bf16.msra.mxu0 %v1329_v1 }
  0x70   :  { %924 = vmatpush2.bf16.msra.mxu1 %v1326_v0  ;;  %978 = vmatprep.subr.bf16.mxu0 %v1337_v3 }
  0x71   :  { %925 = vmatprep.subr.bf16.mxu1 %v1334_v2 }
  0x73   :  { %979 = vmatpush2.bf16.msra.mxu0 %v1335_v5 }
  0x74   :  { %926 = vmatpush2.bf16.msra.mxu1 %v1332_v4 }
  0x76   :  { %981 = vmatmul.mubr.bf16.vlgmr.msra.gmra.mxu0 %v1536_v59 }
  0x77   :  { %928 = vmatmul.mubr.bf16.vlgmr.msra.gmra.mxu1 %v1578_v8  ;;  %1150 = vmatprep.mubr.msk.bf16.mxu0 %vm769_vm1, %v1625_v21 }
  0x78   :  { %937 = vmatprep.mubr.bf16.mxu1 %v1602_v15 }
  0x7e   :  { %991 = vmatmul.mubr.bf16.gmra.mxu0 %v1630_v22 }
  0x7f   :  { %938 = vmatmul.mubr.bf16.gmra.mxu1 %v1620_v20 }
  0x9c   :  { %v144_v7 = vpop.permute.xlu0 %143 }
  0x9d   :  { %v154_v59 = vpop.permute.xlu1 %153 }
  0xa0   :  { %v149_v12 = vpop.permute.xlu0 %148 }
  0xa1   :  { %v159_v27 = vpop.permute.xlu1 %158 }
  0xf7   :  { %v876_v6 = vpop.f32.mrf.mxu1 }
  0xf9   :  { %v878_v9 = vpop.f32.mrf.mxu1 }
  0xfb   :  { %v880_v13 = vpop.f32.mrf.mxu1 }
  0xfd   :  { %v882_v19 = vpop.f32.mrf.mxu1 }
  0xff   :  { %v886_v24 = vpop.f32.mrf.mxu1 }
 0x101   :  { %v888_v29 = vpop.f32.mrf.mxu1 }
 0x102   :  { %v823_v10 = vpop.f32.mrf.mxu0 }
 0x103   :  { %v824_v11 = vadd.f32 %v823_v10, %v144_v7  ;;  %v890_v33 = vpop.f32.mrf.mxu1 }
 0x104   :  { %v825_v14 = vpop.f32.mrf.mxu0 }
 0x105   :  { %v877_v8 = vadd.f32 %v876_v6, %v824_v11  ;;  %v826_v16 = vadd.f32 %v825_v14, %v144_v7  ;;  %v892_v37 = vpop.f32.mrf.mxu1 }
 0x106   :  { %v827_v17 = vpop.f32.mrf.mxu0 }
 0x107   :  { %1001 = vst [vmem:[%s1828_s3] sm:$0xff] %v877_v8  ;;  %v879_v15 = vadd.f32 %v878_v9, %v826_v16  ;;  %v828_v18 = vadd.f32 %v827_v17, %v149_v12 }
 0x108   :  { %v829_v20 = vpop.f32.mrf.mxu0 }
 0x109   :  { %1002 = vst [vmem:[%s1828_s3 + $0x8] sm:$0xff] %v879_v15  ;;  %v881_v21 = vadd.f32 %v880_v13, %v828_v18  ;;  %v830_v22 = vadd.f32 %v829_v20, %v149_v12 }
 0x10a   :  { %v833_v23 = vpop.f32.mrf.mxu0 }
 0x10b   :  { %1005 = vst [vmem:[%s1828_s3 + $0x20] sm:$0xff] %v881_v21  ;;  %v883_v25 = vadd.f32 %v882_v19, %v830_v22  ;;  %v834_v26 = vadd.f32 %v833_v23, %v154_v59 }
 0x10c   :  { %v835_v28 = vpop.f32.mrf.mxu0 }
 0x10d   :  { %1006 = vst [vmem:[%s1828_s3 + $0x28] sm:$0xff] %v883_v25  ;;  %v836_v30 = vadd.f32 %v835_v28, %v154_v59  ;;  %v887_v31 = vadd.f32 %v886_v24, %v834_v26 }
 0x10e   :  { %v837_v32 = vpop.f32.mrf.mxu0 }
 0x10f   :  { %1009 = vst [vmem:[%s1828_s3 + $0x40] sm:$0xff] %v887_v31  ;;  %v889_v34 = vadd.f32 %v888_v29, %v836_v30  ;;  %v838_v35 = vadd.f32 %v837_v32, %v159_v27 }
 0x110   :  { %v839_v36 = vpop.f32.mrf.mxu0 }
 0x111   :  { %1010 = vst [vmem:[%s1828_s3 + $0x48] sm:$0xff] %v889_v34  ;;  %v840_v38 = vadd.f32 %v839_v36, %v159_v27  ;;  %v891_v39 = vadd.f32 %v890_v33, %v838_v35 }
 0x113   :  { %1013 = vst [vmem:[%s1828_s3 + $0x60] sm:$0xff] %v891_v39  ;;  %v893_v40 = vadd.f32 %v892_v37, %v840_v38 }
 0x115   :  { %1014 = vst [vmem:[%s1828_s3 + $0x68] sm:$0xff] %v893_v40 }
 0x136   :  { %v982_v42 = vpop.f32.mrf.mxu0 }
 0x137   :  { %v929_v41 = vpop.f32.mrf.mxu1 }
 0x138   :  { %v930_v43 = vadd.f32 %v929_v41, %v144_v7  ;;  %v984_v45 = vpop.f32.mrf.mxu0 }
 0x139   :  { %v931_v44 = vpop.f32.mrf.mxu1 }
 0x13a   :  { %v983_v46 = vadd.f32 %v982_v42, %v930_v43  ;;  %v932_v47 = vadd.f32 %v931_v44, %v144_v7  ;;  %v986_v49 = vpop.f32.mrf.mxu0 }
 0x13b   :  { %v933_v48 = vpop.f32.mrf.mxu1 }
 0x13c   :  { %1003 = vst [vmem:[%s1828_s3 + $0x10] sm:$0xff] %v983_v46  ;;  %v985_v50 = vadd.f32 %v984_v45, %v932_v47  ;;  %v934_v51 = vadd.f32 %v933_v48, %v149_v12  ;;  %v988_v53 = vpop.f32.mrf.mxu0 }
 0x13d   :  { %v935_v52 = vpop.f32.mrf.mxu1 }
 0x13e   :  { %1004 = vst [vmem:[%s1828_s3 + $0x18] sm:$0xff] %v985_v50  ;;  %v987_v54 = vadd.f32 %v986_v49, %v934_v51  ;;  %v936_v55 = vadd.f32 %v935_v52, %v149_v12  ;;  %v992_v57 = vpop.f32.mrf.mxu0 }
 0x13f   :  { %v939_v56 = vpop.f32.mrf.mxu1 }
 0x140   :  { %1007 = vst [vmem:[%s1828_s3 + $0x30] sm:$0xff] %v987_v54  ;;  %v989_v58 = vadd.f32 %v988_v53, %v936_v55  ;;  %v940_v60 = vadd.f32 %v939_v56, %v154_v59  ;;  %v994_v62 = vpop.f32.mrf.mxu0 }
 0x141   :  { %v941_v61 = vpop.f32.mrf.mxu1 }
 0x142   :  { %1008 = vst [vmem:[%s1828_s3 + $0x38] sm:$0xff] %v989_v58  ;;  %v993_v63 = vadd.f32 %v992_v57, %v940_v60  ;;  %v942_v0 = vadd.f32 %v941_v61, %v154_v59  ;;  %v996_v2 = vpop.f32.mrf.mxu0 }
 0x143   :  { %v943_v1 = vpop.f32.mrf.mxu1 }
 0x144   :  { %1011 = vst [vmem:[%s1828_s3 + $0x50] sm:$0xff] %v993_v63  ;;  %v995_v3 = vadd.f32 %v994_v62, %v942_v0  ;;  %v944_v4 = vadd.f32 %v943_v1, %v159_v27  ;;  %v998_v9 = vpop.f32.mrf.mxu0 }
 0x145   :  { %v945_v5 = vpop.f32.mrf.mxu1 }
 0x146   :  { %1012 = vst [vmem:[%s1828_s3 + $0x58] sm:$0xff] %v995_v3  ;;  %v997_v6 = vadd.f32 %v996_v2, %v944_v4  ;;  %v946_v7 = vadd.f32 %v945_v5, %v159_v27 }
 0x148   :  { %1015 = vst [vmem:[%s1828_s3 + $0x70] sm:$0xff] %v997_v6  ;;  %v999_v10 = vadd.f32 %v998_v9, %v946_v7 }
 0x14a   :  { %1016 = vst [vmem:[%s1828_s3 + $0x78] sm:$0xff] %v999_v10 }

// kernel: forward_rnn.109
= control target key start
LH: loop header
LB: loop body
LE: loop exit
PB: predicated region body
PF: predicated region fallthrough
CT: control target
= control target key end

     0   :  { %vm120_vm0 = vcmask 1043456   ;;  %v348_v2 = vmov 0   ;;  %vm113_vm1 = vcmask 326656   ;;  %s469_s1 = inlined_call_operand.vmem [shape: bf16[40,512], index: 1, kind: input, shape index: {}]   ;;  %s470_s0 = inlined_call_operand.vmem [shape: bf16[32,40], index: 0, kind: input, shape index: {}]   ;;  %s471_s2 = inlined_call_operand.vmem [shape: f32[32,1], index: 2, kind: input, shape index: {}]   ;;  %s472_s3 = inlined_call_operand.vmem [shape: f32[32,512], index: 3, kind: output, shape index: {}]  }
   0x1   :  { %v27_v0 = vld [vmem:[%s469_s1 + $0x40] sm:$0xff]  ;;  %v28_v1 = vld [vmem:[%s469_s1 + $0x48] sm:$0xff]  ;;  %165 = vmatprep.mubr.bf16.mxu0 %v348_v2  ;;  %218 = vmatprep.mubr.bf16.mxu1 %v348_v2  ;;  %v31_v18 = vld [vmem:[%s471_s2 + $0x10] sm:$0xff] }
   0x2   :  { %v318_v3 = vcombine.high %v27_v0, %v27_v0  ;;  %v320_v4 = vcombine.high %v28_v1, %v28_v1  ;;  %v317_v5 = vcombine.low %v27_v0, %v27_v0  ;;  %v319_v6 = vcombine.low %v28_v1, %v28_v1  ;;  %v334_v7 = vld [vmem:[%s469_s1 + $0x24] ss:$16 sps:$4 sm:$0xff]   ;;  %328 = vset.pattern.permute.xlu0 %v348_v2  ;;  %v336_v8 = vld [vmem:[%s469_s1 + $0x2c] ss:$16 sps:$4 sm:$0xff]   ;;  %v338_v11 = vld [vmem:[%s469_s1 + $0x20] ss:$16 sps:$4 sm:$0xff]  }
   0x3   :  { %329 = vset.pattern.permute.xlu1 %v348_v2  ;;  %v339_v12 = vld [vmem:[%s469_s1 + $0x28] ss:$16 sps:$4 sm:$0xff]   ;;  %v340_v13 = vld [vmem:[%s469_s1 + $0x4] ss:$16 sps:$4 sm:$0xff]   ;;  %v342_v14 = vld [vmem:[%s469_s1 + $0xc] ss:$16 sps:$4 sm:$0xff]  }
   0x4   :  { %321 = vmatprep.subr.msk.bf16.mxu0 %vm120_vm0, %v318_v3  ;;  %324 = vmatprep.subr.msk.bf16.mxu1 %vm120_vm0, %v320_v4  ;;  %v122_v9 = vsel %vm120_vm0, %v317_v5, 0  ;;  %v128_v10 = vsel %vm120_vm0, %v319_v6, 0  ;;  %v344_v15 = vld [vmem:[%s469_s1] ss:$16 sps:$4 sm:$0xff]   ;;  %v345_v16 = vld [vmem:[%s469_s1 + $0x8] ss:$16 sps:$4 sm:$0xff]  }
   0x5   :  { %144 = vmatpush1.bf16.msra.mxu0 %v122_v9  ;;  %197 = vmatpush1.bf16.msra.mxu1 %v128_v10  ;;  %v29_v17 = vld [vmem:[%s471_s2] sm:$0xff]  ;;  %v30_v20 = vld [vmem:[%s471_s2 + $0x8] sm:$0xff]  ;;  %v32_v21 = vld [vmem:[%s471_s2 + $0x18] sm:$0xff] }
   0x6   :  { %145 = vmatprep.subr.bf16.mxu0 %v334_v7  ;;  %198 = vmatprep.subr.bf16.mxu1 %v336_v8  ;;  %v346_v19 = vld [vmem:[%s470_s0] sm:$0xff]   ;;  %v347_v22 = vld [vmem:[%s470_s0 + $0x8] sm:$0xff]  }
   0x7   :  { %35 = vperm.xlu0 %328, %v29_v17   ;;  %45 = vperm.xlu1 %329, %v31_v18  }
   0x9   :  { %146 = vmatpush1.bf16.msra.mxu0 %v338_v11  ;;  %199 = vmatpush1.bf16.msra.mxu1 %v339_v12 }
   0xa   :  { %147 = vmatprep.subr.bf16.mxu0 %v340_v13  ;;  %200 = vmatprep.subr.bf16.mxu1 %v342_v14 }
   0xb   :  { %40 = vperm.xlu0 %328, %v30_v20   ;;  %50 = vperm.xlu1 %329, %v32_v21  }
   0xd   :  { %148 = vmatpush1.bf16.msra.mxu0 %v344_v15  ;;  %201 = vmatpush1.bf16.msra.mxu1 %v345_v16 }
  0x10   :  { %322 = vmatmul.mubr.msk.bf16.vlgmr.msra.gmra.mxu0 %vm113_vm1, %v346_v19  ;;  %325 = vmatmul.mubr.msk.bf16.vlgmr.msra.gmra.mxu1 %vm113_vm1, %v346_v19 }
  0x11   :  { %175 = vmatprep.mubr.bf16.mxu0 %v348_v2  ;;  %228 = vmatprep.mubr.bf16.mxu1 %v348_v2 }
  0x18   :  { %323 = vmatmul.mubr.msk.bf16.gmra.mxu0 %vm113_vm1, %v347_v22  ;;  %326 = vmatmul.mubr.msk.bf16.gmra.mxu1 %vm113_vm1, %v347_v22 }
  0x82   :  { %v36_v23 = vpop.permute.xlu0 %35  ;;  %v46_v41 = vpop.permute.xlu1 %45 }
  0x86   :  { %v41_v28 = vpop.permute.xlu0 %40  ;;  %v51_v0 = vpop.permute.xlu1 %50 }
  0xd0   :  { %v167_v24 = vpop.f32.mrf.mxu0  ;;  %v220_v25 = vpop.f32.mrf.mxu1 }
  0xd1   :  { %v168_v26 = vadd.f32 %v167_v24, %v36_v23  ;;  %v221_v27 = vadd.f32 %v220_v25, %v36_v23 }
  0xd2   :  { %v169_v29 = vpop.f32.mrf.mxu0  ;;  %v222_v30 = vpop.f32.mrf.mxu1 }
  0xd3   :  { %vm239_vm2 = vcmp.gt.f32.partialorder %v168_v26, 0.0  ;;  %v255_v31 = vmul.f32 0.01, %v168_v26  ;;  %vm241_vm3 = vcmp.gt.f32.partialorder %v221_v27, 0.0  ;;  %v257_v32 = vmul.f32 0.01, %v221_v27 }
  0xd4   :  { %v170_v33 = vadd.f32 %v169_v29, %v36_v23  ;;  %v223_v34 = vadd.f32 %v222_v30, %v36_v23  ;;  %v171_v35 = vpop.f32.mrf.mxu0  ;;  %v224_v36 = vpop.f32.mrf.mxu1 }
  0xd5   :  { %v271_v37 = vsel %vm239_vm2, %v168_v26, %v255_v31  ;;  %v273_v38 = vsel %vm241_vm3, %v221_v27, %v257_v32  ;;  %v172_v39 = vadd.f32 %v171_v35, %v41_v28  ;;  %v225_v40 = vadd.f32 %v224_v36, %v41_v28 }
  0xd6   :  { %287 = vst [vmem:[%s472_s3] sm:$0xff] %v271_v37  ;;  %289 = vst [vmem:[%s472_s3 + $0x10] sm:$0xff] %v273_v38  ;;  %vm240_vm4 = vcmp.gt.f32.partialorder %v170_v33, 0.0  ;;  %v256_v42 = vmul.f32 0.01, %v170_v33  ;;  %vm242_vm5 = vcmp.gt.f32.partialorder %v223_v34, 0.0  ;;  %v173_v44 = vpop.f32.mrf.mxu0  ;;  %v226_v45 = vpop.f32.mrf.mxu1 }
  0xd7   :  { %v258_v43 = vmul.f32 0.01, %v223_v34  ;;  %vm243_vm6 = vcmp.gt.f32.partialorder %v172_v39, 0.0  ;;  %v259_v46 = vmul.f32 0.01, %v172_v39  ;;  %vm245_vm7 = vcmp.gt.f32.partialorder %v225_v40, 0.0 }
  0xd8   :  { %v261_v47 = vmul.f32 0.01, %v225_v40  ;;  %v272_v48 = vsel %vm240_vm4, %v170_v33, %v256_v42  ;;  %v174_v50 = vadd.f32 %v173_v44, %v41_v28  ;;  %v227_v51 = vadd.f32 %v226_v45, %v41_v28  ;;  %v177_v52 = vpop.f32.mrf.mxu0  ;;  %v230_v53 = vpop.f32.mrf.mxu1 }
  0xd9   :  { %v274_v49 = vsel %vm242_vm5, %v223_v34, %v258_v43  ;;  %288 = vst [vmem:[%s472_s3 + $0x8] sm:$0xff] %v272_v48  ;;  %v275_v54 = vsel %vm243_vm6, %v172_v39, %v259_v46  ;;  %v178_v56 = vadd.f32 %v177_v52, %v46_v41  ;;  %v231_v57 = vadd.f32 %v230_v53, %v46_v41 }
  0xda   :  { %290 = vst [vmem:[%s472_s3 + $0x18] sm:$0xff] %v274_v49  ;;  %v277_v55 = vsel %vm245_vm7, %v225_v40, %v261_v47  ;;  %291 = vst [vmem:[%s472_s3 + $0x20] sm:$0xff] %v275_v54  ;;  %vm244_vm8 = vcmp.gt.f32.partialorder %v174_v50, 0.0  ;;  %v260_v58 = vmul.f32 0.01, %v174_v50  ;;  %vm246_vm9 = vcmp.gt.f32.partialorder %v227_v51, 0.0  ;;  %v179_v60 = vpop.f32.mrf.mxu0  ;;  %v232_v61 = vpop.f32.mrf.mxu1 }
  0xdb   :  { %293 = vst [vmem:[%s472_s3 + $0x30] sm:$0xff] %v277_v55  ;;  %v262_v59 = vmul.f32 0.01, %v227_v51  ;;  %vm247_vm10 = vcmp.gt.f32.partialorder %v178_v56, 0.0  ;;  %v263_v62 = vmul.f32 0.01, %v178_v56  ;;  %v180_v3 = vadd.f32 %v179_v60, %v46_v41 }
  0xdc   :  { %vm249_vm11 = vcmp.gt.f32.partialorder %v231_v57, 0.0  ;;  %v265_v63 = vmul.f32 0.01, %v231_v57  ;;  %v276_v1 = vsel %vm244_vm8, %v174_v50, %v260_v58  ;;  %v233_v4 = vadd.f32 %v232_v61, %v46_v41  ;;  %v181_v5 = vpop.f32.mrf.mxu0  ;;  %v234_v6 = vpop.f32.mrf.mxu1 }
  0xdd   :  { %v278_v2 = vsel %vm246_vm9, %v227_v51, %v262_v59  ;;  %292 = vst [vmem:[%s472_s3 + $0x28] sm:$0xff] %v276_v1  ;;  %v279_v7 = vsel %vm247_vm10, %v178_v56, %v263_v62  ;;  %v182_v9 = vadd.f32 %v181_v5, %v51_v0  ;;  %v235_v10 = vadd.f32 %v234_v6, %v51_v0 }
  0xde   :  { %294 = vst [vmem:[%s472_s3 + $0x38] sm:$0xff] %v278_v2  ;;  %v281_v8 = vsel %vm249_vm11, %v231_v57, %v265_v63  ;;  %295 = vst [vmem:[%s472_s3 + $0x40] sm:$0xff] %v279_v7  ;;  %vm248_vm12 = vcmp.gt.f32.partialorder %v180_v3, 0.0  ;;  %v264_v11 = vmul.f32 0.01, %v180_v3  ;;  %vm250_vm13 = vcmp.gt.f32.partialorder %v233_v4, 0.0  ;;  %v183_v13 = vpop.f32.mrf.mxu0  ;;  %v236_v14 = vpop.f32.mrf.mxu1 }
  0xdf   :  { %297 = vst [vmem:[%s472_s3 + $0x50] sm:$0xff] %v281_v8  ;;  %v266_v12 = vmul.f32 0.01, %v233_v4  ;;  %vm251_vm14 = vcmp.gt.f32.partialorder %v182_v9, 0.0  ;;  %v267_v15 = vmul.f32 0.01, %v182_v9  ;;  %v184_v19 = vadd.f32 %v183_v13, %v51_v0 }
  0xe0   :  { %vm253_vm15 = vcmp.gt.f32.partialorder %v235_v10, 0.0  ;;  %v269_v16 = vmul.f32 0.01, %v235_v10  ;;  %v280_v17 = vsel %vm248_vm12, %v180_v3, %v264_v11  ;;  %v237_v20 = vadd.f32 %v236_v14, %v51_v0 }
  0xe1   :  { %v282_v18 = vsel %vm250_vm13, %v233_v4, %v266_v12  ;;  %296 = vst [vmem:[%s472_s3 + $0x48] sm:$0xff] %v280_v17  ;;  %v283_v21 = vsel %vm251_vm14, %v182_v9, %v267_v15  ;;  %vm252_vm0 = vcmp.gt.f32.partialorder %v184_v19, 0.0  ;;  %v268_v23 = vmul.f32 0.01, %v184_v19 }
  0xe2   :  { %298 = vst [vmem:[%s472_s3 + $0x58] sm:$0xff] %v282_v18  ;;  %v285_v22 = vsel %vm253_vm15, %v235_v10, %v269_v16  ;;  %299 = vst [vmem:[%s472_s3 + $0x60] sm:$0xff] %v283_v21  ;;  %vm254_vm1 = vcmp.gt.f32.partialorder %v237_v20, 0.0  ;;  %v270_v24 = vmul.f32 0.01, %v237_v20 }
  0xe3   :  { %301 = vst [vmem:[%s472_s3 + $0x70] sm:$0xff] %v285_v22  ;;  %v284_v25 = vsel %vm252_vm0, %v184_v19, %v268_v23 }
  0xe4   :  { %v286_v26 = vsel %vm254_vm1, %v237_v20, %v270_v24  ;;  %300 = vst [vmem:[%s472_s3 + $0x68] sm:$0xff] %v284_v25 }
  0xe5   :  { %302 = vst [vmem:[%s472_s3 + $0x78] sm:$0xff] %v286_v26 }

// kernel: forward_rnn.108
= control target key start
LH: loop header
LB: loop body
LE: loop exit
PB: predicated region body
PF: predicated region fallthrough
CT: control target
= control target key end

     0   :  { %v1408_v2 = vmov 0   ;;  %vm800_vm0 = vcmask 1040384   ;;  %vm790_vm1 = vcmask 539648   ;;  %s1964_s1 = inlined_call_operand.vmem [shape: bf16[450,512], index: 1, kind: input, shape index: {}]   ;;  %s1965_s0 = inlined_call_operand.vmem [shape: bf16[40,450], index: 0, kind: input, shape index: {}]   ;;  %s1966_s2 = inlined_call_operand.vmem [shape: f32[40,1], index: 2, kind: input, shape index: {}]   ;;  %s1967_s3 = inlined_call_operand.vmem [shape: f32[40,512], index: 3, kind: output, shape index: {}]  }
   0x1   :  { %v1220_v0 = vld [vmem:[%s1964_s1 + $0xe4] ss:$16 sps:$4 sm:$0xff]   ;;  %1218 = vset.pattern.permute.xlu0 %v1408_v2  ;;  %1219 = vset.pattern.permute.xlu1 %v1408_v2  ;;  %v1224_v3 = vld [vmem:[%s1964_s1 + $0xe0] ss:$16 sps:$4 sm:$0xff]   ;;  %v1545_v41 = vld [vmem:[%s1965_s0 + $0xc] ss:$16 sps:$4 sm:$0xff]  }
   0x2   :  { %v1222_v1 = vld [vmem:[%s1964_s1 + $0x2e4] ss:$16 sps:$4 sm:$0xff]   ;;  %813 = vmatprep.subr.bf16.mxu0 %v1220_v0  ;;  %v1225_v4 = vld [vmem:[%s1964_s1 + $0x2e0] ss:$16 sps:$4 sm:$0xff]   ;;  %1210 = vmatprep.mubr.msk.bf16.mxu1 %vm790_vm1, %v1545_v41  ;;  %v1304_v58 = vld [vmem:[%s1964_s1 + $0xec] ss:$16 sps:$4 sm:$0xff]  }
   0x3   :  { %874 = vmatprep.subr.bf16.mxu1 %v1222_v1  ;;  %v1226_v5 = vld [vmem:[%s1964_s1 + $0xc4] ss:$16 sps:$4 sm:$0xff]   ;;  %814 = vmatpush1.bf16.msra.mxu0 %v1224_v3  ;;  %v1230_v7 = vld [vmem:[%s1964_s1 + $0xc0] ss:$16 sps:$4 sm:$0xff]   ;;  %v1606_v59 = vld [vmem:[%s1965_s0 + $0x8] ss:$16 sps:$4 sm:$0xff]  }
   0x4   :  { %875 = vmatpush1.bf16.msra.mxu1 %v1225_v4  ;;  %v1228_v6 = vld [vmem:[%s1964_s1 + $0x2c4] ss:$16 sps:$4 sm:$0xff]   ;;  %815 = vmatprep.subr.bf16.mxu0 %v1226_v5  ;;  %v1231_v8 = vld [vmem:[%s1964_s1 + $0x2c0] ss:$16 sps:$4 sm:$0xff]   ;;  %v1302_v60 = vld [vmem:[%s1964_s1 + $0xe8] ss:$16 sps:$4 sm:$0xff]  }
   0x5   :  { %876 = vmatprep.subr.bf16.mxu1 %v1228_v6  ;;  %v1232_v9 = vld [vmem:[%s1964_s1 + $0xa4] ss:$16 sps:$4 sm:$0xff]   ;;  %v1236_v11 = vld [vmem:[%s1964_s1 + $0xa0] ss:$16 sps:$4 sm:$0xff]   ;;  %v1310_v63 = vld [vmem:[%s1964_s1 + $0xcc] ss:$16 sps:$4 sm:$0xff]  }
   0x6   :  { %v1234_v10 = vld [vmem:[%s1964_s1 + $0x2a4] ss:$16 sps:$4 sm:$0xff]   ;;  %v1237_v12 = vld [vmem:[%s1964_s1 + $0x2a0] ss:$16 sps:$4 sm:$0xff]   ;;  %v1308_v0 = vld [vmem:[%s1964_s1 + $0xc8] ss:$16 sps:$4 sm:$0xff]  }
   0x7   :  { %816 = vmatpush1.bf16.msra.mxu0 %v1230_v7  ;;  %v1238_v13 = vld [vmem:[%s1964_s1 + $0x84] ss:$16 sps:$4 sm:$0xff]   ;;  %v1242_v15 = vld [vmem:[%s1964_s1 + $0x80] ss:$16 sps:$4 sm:$0xff]   ;;  %v1316_v3 = vld [vmem:[%s1964_s1 + $0xac] ss:$16 sps:$4 sm:$0xff]  }
   0x8   :  { %877 = vmatpush1.bf16.msra.mxu1 %v1231_v8  ;;  %817 = vmatprep.subr.bf16.mxu0 %v1232_v9  ;;  %v1240_v14 = vld [vmem:[%s1964_s1 + $0x284] ss:$16 sps:$4 sm:$0xff]   ;;  %v1243_v16 = vld [vmem:[%s1964_s1 + $0x280] ss:$16 sps:$4 sm:$0xff]   ;;  %v1314_v4 = vld [vmem:[%s1964_s1 + $0xa8] ss:$16 sps:$4 sm:$0xff]  }
   0x9   :  { %878 = vmatprep.subr.bf16.mxu1 %v1234_v10  ;;  %v1244_v17 = vld [vmem:[%s1964_s1 + $0x64] ss:$16 sps:$4 sm:$0xff]   ;;  %v1248_v19 = vld [vmem:[%s1964_s1 + $0x60] ss:$16 sps:$4 sm:$0xff]   ;;  %v1323_v6 = vld [vmem:[%s1964_s1 + $0x8c] ss:$16 sps:$4 sm:$0xff]  }
   0xa   :  { %v1246_v18 = vld [vmem:[%s1964_s1 + $0x264] ss:$16 sps:$4 sm:$0xff]   ;;  %v1249_v20 = vld [vmem:[%s1964_s1 + $0x260] ss:$16 sps:$4 sm:$0xff]   ;;  %v1326_v7 = vld [vmem:[%s1964_s1 + $0x2ec] ss:$16 sps:$4 sm:$0xff]  }
   0xb   :  { %818 = vmatpush1.bf16.msra.mxu0 %v1236_v11  ;;  %v1250_v21 = vld [vmem:[%s1964_s1 + $0x44] ss:$16 sps:$4 sm:$0xff]   ;;  %v1254_v23 = vld [vmem:[%s1964_s1 + $0x40] ss:$16 sps:$4 sm:$0xff]   ;;  %v1321_v9 = vld [vmem:[%s1964_s1 + $0x88] ss:$16 sps:$4 sm:$0xff]  }
   0xc   :  { %879 = vmatpush1.bf16.msra.mxu1 %v1237_v12  ;;  %819 = vmatprep.subr.bf16.mxu0 %v1238_v13  ;;  %v1252_v22 = vld [vmem:[%s1964_s1 + $0x244] ss:$16 sps:$4 sm:$0xff]   ;;  %v1255_v24 = vld [vmem:[%s1964_s1 + $0x240] ss:$16 sps:$4 sm:$0xff]   ;;  %v1324_v10 = vld [vmem:[%s1964_s1 + $0x2e8] ss:$16 sps:$4 sm:$0xff]  }
   0xd   :  { %880 = vmatprep.subr.bf16.mxu1 %v1240_v14  ;;  %v1256_v25 = vld [vmem:[%s1964_s1 + $0x24] ss:$16 sps:$4 sm:$0xff]   ;;  %v1260_v27 = vld [vmem:[%s1964_s1 + $0x20] ss:$16 sps:$4 sm:$0xff]   ;;  %v1329_v11 = vld [vmem:[%s1964_s1 + $0x6c] ss:$16 sps:$4 sm:$0xff]  }
   0xe   :  { %v1258_v26 = vld [vmem:[%s1964_s1 + $0x224] ss:$16 sps:$4 sm:$0xff]   ;;  %v1261_v28 = vld [vmem:[%s1964_s1 + $0x220] ss:$16 sps:$4 sm:$0xff]   ;;  %v1332_v12 = vld [vmem:[%s1964_s1 + $0x2cc] ss:$16 sps:$4 sm:$0xff]  }
   0xf   :  { %820 = vmatpush1.bf16.msra.mxu0 %v1242_v15  ;;  %v1262_v29 = vld [vmem:[%s1964_s1 + $0x4] ss:$16 sps:$4 sm:$0xff]   ;;  %v1266_v32 = vld [vmem:[%s1964_s1] ss:$16 sps:$4 sm:$0xff]   ;;  %v1327_v13 = vld [vmem:[%s1964_s1 + $0x68] ss:$16 sps:$4 sm:$0xff]  }
  0x10   :  { %881 = vmatpush1.bf16.msra.mxu1 %v1243_v16  ;;  %821 = vmatprep.subr.bf16.mxu0 %v1244_v17  ;;  %v1264_v30 = vld [vmem:[%s1964_s1 + $0x204] ss:$16 sps:$4 sm:$0xff]   ;;  %v1267_v33 = vld [vmem:[%s1964_s1 + $0x200] ss:$16 sps:$4 sm:$0xff]   ;;  %v1330_v14 = vld [vmem:[%s1964_s1 + $0x2c8] ss:$16 sps:$4 sm:$0xff]  }
  0x11   :  { %882 = vmatprep.subr.bf16.mxu1 %v1246_v18  ;;  %v137_v31 = vld [vmem:[%s1964_s1 + $0x380] sm:$0x11]  ;;  %v1677_v16 = vld [vmem:[%s1965_s0 + $0x2c] ss:$16 sps:$4 sm:$0xff]   ;;  %v1682_v17 = vld [vmem:[%s1965_s0 + $0x28] ss:$16 sps:$4 sm:$0xff]  }
  0x12   :  { %v1268_v34 = vld [vmem:[%s1964_s1 + $0x1e4] ss:$16 sps:$4 sm:$0xff]   ;;  %v1206_v35 = vcombine.high %v137_v31, %v137_v31  ;;  %v1205_v36 = vcombine.low %v137_v31, %v137_v31  ;;  %v1271_v37 = vld [vmem:[%s1964_s1 + $0x1e0] ss:$16 sps:$4 sm:$0xff]   ;;  %v1335_v18 = vld [vmem:[%s1964_s1 + $0x4c] ss:$16 sps:$4 sm:$0xff]  }
  0x13   :  { %822 = vmatpush1.bf16.msra.mxu0 %v1248_v19  ;;  %v1273_v39 = vld [vmem:[%s1964_s1 + $0x1c4] ss:$16 sps:$4 sm:$0xff]   ;;  %v1277_v42 = vld [vmem:[%s1964_s1 + $0x1c0] ss:$16 sps:$4 sm:$0xff]   ;;  %v1338_v19 = vld [vmem:[%s1964_s1 + $0x2ac] ss:$16 sps:$4 sm:$0xff]  }
  0x14   :  { %883 = vmatpush1.bf16.msra.mxu1 %v1249_v20  ;;  %823 = vmatprep.subr.bf16.mxu0 %v1250_v21  ;;  %v802_v38 = vsel %vm800_vm0, %v1205_v36, 0  ;;  %v1275_v40 = vld [vmem:[%s1964_s1 + $0x364] ss:$16 sps:$4 sm:$0xff]   ;;  %v1278_v43 = vld [vmem:[%s1964_s1 + $0x360] ss:$16 sps:$4 sm:$0xff]  }
  0x15   :  { %884 = vmatprep.subr.bf16.mxu1 %v1252_v22  ;;  %v1279_v44 = vld [vmem:[%s1964_s1 + $0x1a4] ss:$16 sps:$4 sm:$0xff]   ;;  %v1283_v46 = vld [vmem:[%s1964_s1 + $0x1a0] ss:$16 sps:$4 sm:$0xff]   ;;  %v1333_v20 = vld [vmem:[%s1964_s1 + $0x48] ss:$16 sps:$4 sm:$0xff]  }
  0x16   :  { %v1281_v45 = vld [vmem:[%s1964_s1 + $0x344] ss:$16 sps:$4 sm:$0xff]   ;;  %v1284_v47 = vld [vmem:[%s1964_s1 + $0x340] ss:$16 sps:$4 sm:$0xff]   ;;  %v1336_v21 = vld [vmem:[%s1964_s1 + $0x2a8] ss:$16 sps:$4 sm:$0xff]  }
  0x17   :  { %824 = vmatpush1.bf16.msra.mxu0 %v1254_v23  ;;  %v1285_v48 = vld [vmem:[%s1964_s1 + $0x184] ss:$16 sps:$4 sm:$0xff]   ;;  %v1289_v50 = vld [vmem:[%s1964_s1 + $0x180] ss:$16 sps:$4 sm:$0xff]   ;;  %v1341_v23 = vld [vmem:[%s1964_s1 + $0x2c] ss:$16 sps:$4 sm:$0xff]  }
  0x18   :  { %885 = vmatpush1.bf16.msra.mxu1 %v1255_v24  ;;  %825 = vmatprep.subr.bf16.mxu0 %v1256_v25  ;;  %v1287_v49 = vld [vmem:[%s1964_s1 + $0x324] ss:$16 sps:$4 sm:$0xff]   ;;  %v1290_v51 = vld [vmem:[%s1964_s1 + $0x320] ss:$16 sps:$4 sm:$0xff]   ;;  %v1344_v24 = vld [vmem:[%s1964_s1 + $0x28c] ss:$16 sps:$4 sm:$0xff]  }
  0x19   :  { %886 = vmatprep.subr.bf16.mxu1 %v1258_v26  ;;  %v1582_v52 = vld [vmem:[%s1965_s0 + $0x4] ss:$16 sps:$4 sm:$0xff]   ;;  %v1295_v55 = vld [vmem:[%s1964_s1 + $0x160] ss:$16 sps:$4 sm:$0xff]   ;;  %v24_v25 = vld [vmem:[%s1965_s0 + $0x48] sm:$0xff] }
  0x1a   :  { %v1291_v53 = vld [vmem:[%s1964_s1 + $0x164] ss:$16 sps:$4 sm:$0xff]   ;;  %845 = vmatprep.mubr.bf16.mxu0 %v1582_v52  ;;  %v1296_v56 = vld [vmem:[%s1964_s1 + $0x300] ss:$16 sps:$4 sm:$0xff]   ;;  %v1714_v26 = vcombine.high %v24_v25, %v24_v25  ;;  %v1730_v31 = vcombine.low %v24_v25, %v24_v25  ;;  %v1348_v36 = vld [vmem:[%s1964_s1 + $0x268] ss:$16 sps:$4 sm:$0xff]  }
  0x1b   :  { %826 = vmatpush1.bf16.msra.mxu0 %v1260_v27  ;;  %v1293_v54 = vld [vmem:[%s1964_s1 + $0x304] ss:$16 sps:$4 sm:$0xff]   ;;  %v1305_v61 = vld [vmem:[%s1964_s1 + $0x140] ss:$16 sps:$4 sm:$0xff]  }
  0x1c   :  { %887 = vmatpush1.bf16.msra.mxu1 %v1261_v28  ;;  %827 = vmatprep.subr.bf16.mxu0 %v1262_v29  ;;  %v1300_v57 = vld [vmem:[%s1964_s1 + $0x144] ss:$16 sps:$4 sm:$0xff]   ;;  %v1311_v1 = vld [vmem:[%s1964_s1 + $0x120] ss:$16 sps:$4 sm:$0xff]   ;;  %v1339_v29 = vld [vmem:[%s1964_s1 + $0x28] ss:$16 sps:$4 sm:$0xff]  }
  0x1d   :  { %888 = vmatprep.subr.bf16.mxu1 %v1264_v30  ;;  %v1306_v62 = vld [vmem:[%s1964_s1 + $0x124] ss:$16 sps:$4 sm:$0xff]   ;;  %v1317_v5 = vld [vmem:[%s1964_s1 + $0x100] ss:$16 sps:$4 sm:$0xff]   ;;  %v1342_v30 = vld [vmem:[%s1964_s1 + $0x288] ss:$16 sps:$4 sm:$0xff]  }
  0x1e   :  { %v1312_v2 = vld [vmem:[%s1964_s1 + $0x104] ss:$16 sps:$4 sm:$0xff]   ;;  %v1648_v8 = vld [vmem:[%s1965_s0] ss:$16 sps:$4 sm:$0xff]  }
  0x1f   :  { %828 = vmatpush1.bf16.msra.mxu0 %v1266_v32  ;;  %v1671_v15 = vld [vmem:[%s1965_s0 + $0x24] ss:$16 sps:$4 sm:$0xff]   ;;  %v1702_v22 = vld [vmem:[%s1965_s0 + $0x20] ss:$16 sps:$4 sm:$0xff]   ;;  %v1347_v32 = vld [vmem:[%s1964_s1 + $0xc] ss:$16 sps:$4 sm:$0xff]  }
  0x20   :  { %889 = vmatpush1.bf16.msra.mxu1 %v1267_v33  ;;  %829 = vmatprep.subr.bf16.mxu0 %v1268_v34  ;;  %v23_v27 = vld [vmem:[%s1965_s0 + $0x40] sm:$0xff]  ;;  %v1350_v33 = vld [vmem:[%s1964_s1 + $0x26c] ss:$16 sps:$4 sm:$0xff]   ;;  %v1345_v34 = vld [vmem:[%s1964_s1 + $0x8] ss:$16 sps:$4 sm:$0xff]  }
  0x21   :  { %1209 = vmatprep.subr.msk.bf16.mxu1 %vm800_vm0, %v1206_v35  ;;  %v1719_v28 = vcombine.high %v23_v27, %v23_v27  ;;  %v1743_v35 = vcombine.low %v23_v27, %v23_v27 }
  0x23   :  { %830 = vmatpush2.bf16.msra.mxu0 %v1271_v37  ;;  %v1353_v37 = vld [vmem:[%s1964_s1 + $0x1ec] ss:$16 sps:$4 sm:$0xff]  }
  0x24   :  { %897 = vmatpush2.bf16.msra.mxu1 %v802_v38  ;;  %831 = vmatprep.subr.bf16.mxu0 %v1273_v39  ;;  %v1356_v38 = vld [vmem:[%s1964_s1 + $0x24c] ss:$16 sps:$4 sm:$0xff]   ;;  %v139_v39 = vld [vmem:[%s1966_s2] sm:$0xff] }
  0x25   :  { %898 = vmatprep.subr.bf16.mxu1 %v1275_v40  ;;  %146 = vperm.xlu0 %1218, %v139_v39   ;;  %v141_v40 = vld [vmem:[%s1966_s2 + $0x10] sm:$0xff] }
  0x26   :  { %156 = vperm.xlu1 %1219, %v141_v40  }
  0x27   :  { %832 = vmatpush2.bf16.msra.mxu0 %v1277_v42  ;;  %v140_v42 = vld [vmem:[%s1966_s2 + $0x8] sm:$0xff] }
  0x28   :  { %899 = vmatpush2.bf16.msra.mxu1 %v1278_v43  ;;  %833 = vmatprep.subr.bf16.mxu0 %v1279_v44  ;;  %v1351_v43 = vld [vmem:[%s1964_s1 + $0x1e8] ss:$16 sps:$4 sm:$0xff]  }
  0x29   :  { %900 = vmatprep.subr.bf16.mxu1 %v1281_v45  ;;  %v1354_v44 = vld [vmem:[%s1964_s1 + $0x248] ss:$16 sps:$4 sm:$0xff]   ;;  %151 = vperm.xlu0 %1218, %v140_v42  }
  0x2a   :  { %v142_v45 = vld [vmem:[%s1966_s2 + $0x18] sm:$0xff] }
  0x2b   :  { %834 = vmatpush2.bf16.msra.mxu0 %v1283_v46  ;;  %v1359_v46 = vld [vmem:[%s1964_s1 + $0x1cc] ss:$16 sps:$4 sm:$0xff]   ;;  %161 = vperm.xlu1 %1219, %v142_v45  }
  0x2c   :  { %901 = vmatpush2.bf16.msra.mxu1 %v1284_v47  ;;  %835 = vmatprep.subr.bf16.mxu0 %v1285_v48  ;;  %v1362_v47 = vld [vmem:[%s1964_s1 + $0x22c] ss:$16 sps:$4 sm:$0xff]   ;;  %v143_v48 = vld [vmem:[%s1966_s2 + $0x20] sm:$0xff] }
  0x2d   :  { %902 = vmatprep.subr.bf16.mxu1 %v1287_v49  ;;  %v1357_v49 = vld [vmem:[%s1964_s1 + $0x1c8] ss:$16 sps:$4 sm:$0xff]   ;;  %166 = vperm.xlu0 %1218, %v143_v48  }
  0x2f   :  { %836 = vmatpush2.bf16.msra.mxu0 %v1289_v50  ;;  %v1360_v50 = vld [vmem:[%s1964_s1 + $0x228] ss:$16 sps:$4 sm:$0xff]  }
  0x30   :  { %903 = vmatpush2.bf16.msra.mxu1 %v1290_v51  ;;  %837 = vmatprep.subr.bf16.mxu0 %v1291_v53  ;;  %v1371_v51 = vld [vmem:[%s1964_s1 + $0x20c] ss:$16 sps:$4 sm:$0xff]   ;;  %v1366_v53 = vld [vmem:[%s1964_s1 + $0x1a8] ss:$16 sps:$4 sm:$0xff]  }
  0x31   :  { %904 = vmatprep.subr.bf16.mxu1 %v1293_v54  ;;  %v1369_v54 = vld [vmem:[%s1964_s1 + $0x208] ss:$16 sps:$4 sm:$0xff]  }
  0x33   :  { %838 = vmatpush2.bf16.msra.mxu0 %v1295_v55  ;;  %v1377_v55 = vld [vmem:[%s1964_s1 + $0x18c] ss:$16 sps:$4 sm:$0xff]  }
  0x34   :  { %905 = vmatpush2.bf16.msra.mxu1 %v1296_v56  ;;  %839 = vmatprep.subr.bf16.mxu0 %v1300_v57 }
  0x35   :  { %935 = vmatprep.subr.bf16.mxu1 %v1304_v58  ;;  %v1375_v58 = vld [vmem:[%s1964_s1 + $0x188] ss:$16 sps:$4 sm:$0xff]  }
  0x37   :  { %907 = vmatmul.mubr.bf16.vlgmr.msra.gmra.mxu1 %v1606_v59  ;;  %840 = vmatpush2.bf16.msra.mxu0 %v1305_v61  ;;  %v1382_v61 = vld [vmem:[%s1964_s1 + $0x16c] ss:$16 sps:$4 sm:$0xff]  }
  0x38   :  { %936 = vmatpush1.bf16.msra.mxu1 %v1302_v60  ;;  %841 = vmatprep.subr.bf16.mxu0 %v1306_v62  ;;  %v1385_v62 = vld [vmem:[%s1964_s1 + $0x36c] ss:$16 sps:$4 sm:$0xff]  }
  0x39   :  { %937 = vmatprep.subr.bf16.mxu1 %v1310_v63  ;;  %1211 = vmatprep.mubr.msk.bf16.mxu1 %vm790_vm1, %v1677_v16  ;;  %v1380_v63 = vld [vmem:[%s1964_s1 + $0x168] ss:$16 sps:$4 sm:$0xff]  }
  0x3b   :  { %842 = vmatpush2.bf16.msra.mxu0 %v1311_v1  ;;  %v1392_v1 = vld [vmem:[%s1964_s1 + $0x14c] ss:$16 sps:$4 sm:$0xff]  }
  0x3c   :  { %938 = vmatpush1.bf16.msra.mxu1 %v1308_v0  ;;  %843 = vmatprep.subr.bf16.mxu0 %v1312_v2  ;;  %v1383_v0 = vld [vmem:[%s1964_s1 + $0x368] ss:$16 sps:$4 sm:$0xff]   ;;  %v1395_v2 = vld [vmem:[%s1964_s1 + $0x34c] ss:$16 sps:$4 sm:$0xff]  }
  0x3d   :  { %939 = vmatprep.subr.bf16.mxu1 %v1316_v3  ;;  %v1390_v3 = vld [vmem:[%s1964_s1 + $0x148] ss:$16 sps:$4 sm:$0xff]  }
  0x3f   :  { %844 = vmatpush2.bf16.msra.mxu0 %v1317_v5  ;;  %917 = vmatmul.mubr.bf16.gmra.mxu1 %v1682_v17  ;;  %v1398_v5 = vld [vmem:[%s1964_s1 + $0x12c] ss:$16 sps:$4 sm:$0xff]  }
  0x40   :  { %940 = vmatpush1.bf16.msra.mxu1 %v1314_v4  ;;  %996 = vmatprep.subr.bf16.mxu0 %v1326_v7  ;;  %v1393_v4 = vld [vmem:[%s1964_s1 + $0x348] ss:$16 sps:$4 sm:$0xff]  }
  0x41   :  { %941 = vmatprep.subr.bf16.mxu1 %v1323_v6  ;;  %1212 = vmatprep.mubr.msk.bf16.mxu1 %vm790_vm1, %v1714_v26  ;;  %v1401_v6 = vld [vmem:[%s1964_s1 + $0x32c] ss:$16 sps:$4 sm:$0xff]   ;;  %v1396_v7 = vld [vmem:[%s1964_s1 + $0x128] ss:$16 sps:$4 sm:$0xff]  }
  0x42   :  { %846 = vmatmul.mubr.bf16.vlgmr.msra.gmra.mxu0 %v1648_v8 }
  0x43   :  { %997 = vmatpush1.bf16.msra.mxu0 %v1324_v10  ;;  %855 = vmatprep.mubr.bf16.mxu0 %v1671_v15  ;;  %v1404_v10 = vld [vmem:[%s1964_s1 + $0x10c] ss:$16 sps:$4 sm:$0xff]  }
  0x44   :  { %942 = vmatpush1.bf16.msra.mxu1 %v1321_v9  ;;  %998 = vmatprep.subr.bf16.mxu0 %v1332_v12  ;;  %v1399_v9 = vld [vmem:[%s1964_s1 + $0x328] ss:$16 sps:$4 sm:$0xff]  }
  0x45   :  { %943 = vmatprep.subr.bf16.mxu1 %v1329_v11  ;;  %v1407_v11 = vld [vmem:[%s1964_s1 + $0x30c] ss:$16 sps:$4 sm:$0xff]   ;;  %v1402_v12 = vld [vmem:[%s1964_s1 + $0x108] ss:$16 sps:$4 sm:$0xff]  }
  0x47   :  { %999 = vmatpush1.bf16.msra.mxu0 %v1330_v14  ;;  %927 = vmatmul.mubr.bf16.gmra.mxu1 %v1730_v31 }
  0x48   :  { %944 = vmatpush1.bf16.msra.mxu1 %v1327_v13  ;;  %1000 = vmatprep.subr.bf16.mxu0 %v1338_v19  ;;  %v1405_v13 = vld [vmem:[%s1964_s1 + $0x308] ss:$16 sps:$4 sm:$0xff]  }
  0x49   :  { %945 = vmatprep.subr.bf16.mxu1 %v1335_v18  ;;  %967 = vmatprep.mubr.bf16.mxu1 %v1582_v52  ;;  %v138_v52 = vld [vmem:[%s1964_s1 + $0x388] sm:$0x11] }
  0x4a   :  { %856 = vmatmul.mubr.bf16.gmra.mxu0 %v1702_v22  ;;  %v1208_v56 = vcombine.high %v138_v52, %v138_v52  ;;  %v1207_v57 = vcombine.low %v138_v52, %v138_v52 }
  0x4b   :  { %1001 = vmatpush1.bf16.msra.mxu0 %v1336_v21  ;;  %865 = vmatprep.mubr.bf16.mxu0 %v1719_v28 }
  0x4c   :  { %946 = vmatpush1.bf16.msra.mxu1 %v1333_v20  ;;  %1002 = vmatprep.subr.bf16.mxu0 %v1344_v24  ;;  %v808_v60 = vsel %vm800_vm0, %v1207_v57, 0 }
  0x4d   :  { %947 = vmatprep.subr.bf16.mxu1 %v1341_v23 }
  0x4f   :  { %1003 = vmatpush1.bf16.msra.mxu0 %v1342_v30 }
  0x50   :  { %948 = vmatpush1.bf16.msra.mxu1 %v1339_v29  ;;  %1004 = vmatprep.subr.bf16.mxu0 %v1350_v33 }
  0x51   :  { %949 = vmatprep.subr.bf16.mxu1 %v1347_v32 }
  0x52   :  { %866 = vmatmul.mubr.bf16.gmra.mxu0 %v1743_v35 }
  0x53   :  { %1005 = vmatpush1.bf16.msra.mxu0 %v1348_v36  ;;  %1214 = vmatprep.mubr.msk.bf16.mxu0 %vm790_vm1, %v1545_v41  ;;  %v1368_v41 = vld [vmem:[%s1964_s1 + $0x1ac] ss:$16 sps:$4 sm:$0xff]  }
  0x54   :  { %950 = vmatpush1.bf16.msra.mxu1 %v1345_v34  ;;  %1006 = vmatprep.subr.bf16.mxu0 %v1356_v38 }
  0x55   :  { %951 = vmatprep.subr.bf16.mxu1 %v1353_v37 }
  0x57   :  { %1007 = vmatpush1.bf16.msra.mxu0 %v1354_v44 }
  0x58   :  { %952 = vmatpush2.bf16.msra.mxu1 %v1351_v43  ;;  %1008 = vmatprep.subr.bf16.mxu0 %v1362_v47 }
  0x59   :  { %953 = vmatprep.subr.bf16.mxu1 %v1359_v46 }
  0x5b   :  { %1009 = vmatpush1.bf16.msra.mxu0 %v1360_v50 }
  0x5c   :  { %954 = vmatpush2.bf16.msra.mxu1 %v1357_v49  ;;  %1010 = vmatprep.subr.bf16.mxu0 %v1371_v51 }
  0x5d   :  { %955 = vmatprep.subr.bf16.mxu1 %v1368_v41 }
  0x5f   :  { %1011 = vmatpush1.bf16.msra.mxu0 %v1369_v54 }
  0x60   :  { %956 = vmatpush2.bf16.msra.mxu1 %v1366_v53  ;;  %1213 = vmatprep.subr.msk.bf16.mxu0 %vm800_vm0, %v1208_v56 }
  0x61   :  { %957 = vmatprep.subr.bf16.mxu1 %v1377_v55 }
  0x63   :  { %1019 = vmatpush2.bf16.msra.mxu0 %v808_v60 }
  0x64   :  { %958 = vmatpush2.bf16.msra.mxu1 %v1375_v58  ;;  %1020 = vmatprep.subr.bf16.mxu0 %v1385_v62 }
  0x65   :  { %959 = vmatprep.subr.bf16.mxu1 %v1382_v61 }
  0x67   :  { %1021 = vmatpush2.bf16.msra.mxu0 %v1383_v0 }
  0x68   :  { %960 = vmatpush2.bf16.msra.mxu1 %v1380_v63  ;;  %1022 = vmatprep.subr.bf16.mxu0 %v1395_v2 }
  0x69   :  { %961 = vmatprep.subr.bf16.mxu1 %v1392_v1 }
  0x6b   :  { %1023 = vmatpush2.bf16.msra.mxu0 %v1393_v4 }
  0x6c   :  { %962 = vmatpush2.bf16.msra.mxu1 %v1390_v3  ;;  %1024 = vmatprep.subr.bf16.mxu0 %v1401_v6 }
  0x6d   :  { %963 = vmatprep.subr.bf16.mxu1 %v1398_v5 }
  0x6f   :  { %1025 = vmatpush2.bf16.msra.mxu0 %v1399_v9 }
  0x70   :  { %964 = vmatpush2.bf16.msra.mxu1 %v1396_v7  ;;  %1026 = vmatprep.subr.bf16.mxu0 %v1407_v11 }
  0x71   :  { %965 = vmatprep.subr.bf16.mxu1 %v1404_v10 }
  0x73   :  { %1027 = vmatpush2.bf16.msra.mxu0 %v1405_v13 }
  0x74   :  { %966 = vmatpush2.bf16.msra.mxu1 %v1402_v12 }
  0x76   :  { %1029 = vmatmul.mubr.bf16.vlgmr.msra.gmra.mxu0 %v1606_v59 }
  0x77   :  { %968 = vmatmul.mubr.bf16.vlgmr.msra.gmra.mxu1 %v1648_v8  ;;  %1215 = vmatprep.mubr.msk.bf16.mxu0 %vm790_vm1, %v1677_v16 }
  0x78   :  { %977 = vmatprep.mubr.bf16.mxu1 %v1671_v15 }
  0x7e   :  { %1039 = vmatmul.mubr.bf16.gmra.mxu0 %v1682_v17 }
  0x7f   :  { %978 = vmatmul.mubr.bf16.gmra.mxu1 %v1702_v22  ;;  %1216 = vmatprep.mubr.msk.bf16.mxu0 %vm790_vm1, %v1714_v26 }
  0x80   :  { %987 = vmatprep.mubr.bf16.mxu1 %v1719_v28 }
  0x86   :  { %1049 = vmatmul.mubr.bf16.gmra.mxu0 %v1730_v31 }
  0x87   :  { %988 = vmatmul.mubr.bf16.gmra.mxu1 %v1743_v35 }
  0xa0   :  { %v1874_v14 = vpop.permute.xlu0 %146 }
  0xa1   :  { %v1880_v23 = vpop.permute.xlu1 %156 }
  0xa4   :  { %v1877_v19 = vpop.permute.xlu0 %151 }
  0xa6   :  { %v1894_v36 = vpop.permute.xlu1 %161 }
  0xa8   :  { %v1904_v46 = vpop.permute.xlu0 %166 }
  0xf7   :  { %v908_v8 = vpop.f32.mrf.mxu1 }
  0xf9   :  { %v910_v59 = vpop.f32.mrf.mxu1 }
  0xfb   :  { %v912_v15 = vpop.f32.mrf.mxu1 }
  0xfd   :  { %v914_v17 = vpop.f32.mrf.mxu1 }
  0xff   :  { %v918_v25 = vpop.f32.mrf.mxu1 }
 0x101   :  { %v920_v29 = vpop.f32.mrf.mxu1 }
 0x102   :  { %v847_v18 = vpop.f32.mrf.mxu0 }
 0x103   :  { %v848_v16 = vadd.f32 %v847_v18, %v1874_v14  ;;  %v922_v33 = vpop.f32.mrf.mxu1 }
 0x104   :  { %v849_v20 = vpop.f32.mrf.mxu0 }
 0x105   :  { %v909_v21 = vadd.f32 %v908_v8, %v848_v16  ;;  %v850_v22 = vadd.f32 %v849_v20, %v1874_v14  ;;  %v924_v38 = vpop.f32.mrf.mxu1 }
 0x106   :  { %v851_v24 = vpop.f32.mrf.mxu0 }
 0x107   :  { %1057 = vst [vmem:[%s1967_s3] sm:$0xff] %v909_v21  ;;  %v911_v26 = vadd.f32 %v910_v59, %v850_v22  ;;  %v852_v27 = vadd.f32 %v851_v24, %v1877_v19  ;;  %v928_v43 = vpop.f32.mrf.mxu1 }
 0x108   :  { %v853_v28 = vpop.f32.mrf.mxu0 }
 0x109   :  { %1058 = vst [vmem:[%s1967_s3 + $0x8] sm:$0xff] %v911_v26  ;;  %v913_v30 = vadd.f32 %v912_v15, %v852_v27  ;;  %v854_v31 = vadd.f32 %v853_v28, %v1877_v19  ;;  %v930_v48 = vpop.f32.mrf.mxu1 }
 0x10a   :  { %v857_v32 = vpop.f32.mrf.mxu0 }
 0x10b   :  { %1061 = vst [vmem:[%s1967_s3 + $0x20] sm:$0xff] %v913_v30  ;;  %v915_v34 = vadd.f32 %v914_v17, %v854_v31  ;;  %v858_v35 = vadd.f32 %v857_v32, %v1880_v23  ;;  %v932_v51 = vpop.f32.mrf.mxu1 }
 0x10c   :  { %v859_v37 = vpop.f32.mrf.mxu0 }
 0x10d   :  { %1062 = vst [vmem:[%s1967_s3 + $0x28] sm:$0xff] %v915_v34  ;;  %v860_v39 = vadd.f32 %v859_v37, %v1880_v23  ;;  %v919_v40 = vadd.f32 %v918_v25, %v858_v35  ;;  %v933_v55 = vpop.f32.mrf.mxu1 }
 0x10e   :  { %v861_v42 = vpop.f32.mrf.mxu0 }
 0x10f   :  { %1065 = vst [vmem:[%s1967_s3 + $0x40] sm:$0xff] %v919_v40  ;;  %v921_v44 = vadd.f32 %v920_v29, %v860_v39  ;;  %v862_v45 = vadd.f32 %v861_v42, %v1894_v36 }
 0x110   :  { %v863_v47 = vpop.f32.mrf.mxu0 }
 0x111   :  { %1066 = vst [vmem:[%s1967_s3 + $0x48] sm:$0xff] %v921_v44  ;;  %v864_v49 = vadd.f32 %v863_v47, %v1894_v36  ;;  %v923_v50 = vadd.f32 %v922_v33, %v862_v45 }
 0x112   :  { %v867_v41 = vpop.f32.mrf.mxu0 }
 0x113   :  { %1069 = vst [vmem:[%s1967_s3 + $0x60] sm:$0xff] %v923_v50  ;;  %v925_v52 = vadd.f32 %v924_v38, %v864_v49  ;;  %v868_v53 = vadd.f32 %v867_v41, %v1904_v46 }
 0x114   :  { %v869_v54 = vpop.f32.mrf.mxu0 }
 0x115   :  { %1070 = vst [vmem:[%s1967_s3 + $0x68] sm:$0xff] %v925_v52  ;;  %v870_v56 = vadd.f32 %v869_v54, %v1904_v46  ;;  %v929_v57 = vadd.f32 %v928_v43, %v868_v53 }
 0x116   :  { %v871_v58 = vpop.f32.mrf.mxu0 }
 0x117   :  { %v931_v60 = vadd.f32 %v930_v48, %v870_v56  ;;  %1073 = vst [vmem:[%s1967_s3 + $0x80] sm:$0xff] %v929_v57 }
 0x118   :  { %v872_v61 = vpop.f32.mrf.mxu0 }
 0x119   :  { %1074 = vst [vmem:[%s1967_s3 + $0x88] sm:$0xff] %v931_v60 }
 0x136   :  { %v1030_v63 = vpop.f32.mrf.mxu0 }
 0x137   :  { %v969_v62 = vpop.f32.mrf.mxu1 }
 0x138   :  { %v970_v0 = vadd.f32 %v969_v62, %v1874_v14  ;;  %v1032_v2 = vpop.f32.mrf.mxu0 }
 0x139   :  { %v971_v1 = vpop.f32.mrf.mxu1 }
 0x13a   :  { %v1031_v3 = vadd.f32 %v1030_v63, %v970_v0  ;;  %v972_v4 = vadd.f32 %v971_v1, %v1874_v14  ;;  %v1034_v6 = vpop.f32.mrf.mxu0 }
 0x13b   :  { %v973_v5 = vpop.f32.mrf.mxu1 }
 0x13c   :  { %1059 = vst [vmem:[%s1967_s3 + $0x10] sm:$0xff] %v1031_v3  ;;  %v1033_v7 = vadd.f32 %v1032_v2, %v972_v4  ;;  %v974_v9 = vadd.f32 %v973_v5, %v1877_v19  ;;  %v1036_v11 = vpop.f32.mrf.mxu0 }
 0x13d   :  { %v975_v10 = vpop.f32.mrf.mxu1 }
 0x13e   :  { %1060 = vst [vmem:[%s1967_s3 + $0x18] sm:$0xff] %v1033_v7  ;;  %v1035_v12 = vadd.f32 %v1034_v6, %v974_v9  ;;  %v976_v13 = vadd.f32 %v975_v10, %v1877_v19  ;;  %v1040_v59 = vpop.f32.mrf.mxu0 }
 0x13f   :  { %v979_v8 = vpop.f32.mrf.mxu1 }
 0x140   :  { %1063 = vst [vmem:[%s1967_s3 + $0x30] sm:$0xff] %v1035_v12  ;;  %v1037_v14 = vadd.f32 %v1036_v11, %v976_v13  ;;  %v980_v15 = vadd.f32 %v979_v8, %v1880_v23  ;;  %v1042_v16 = vpop.f32.mrf.mxu0 }
 0x141   :  { %v981_v18 = vpop.f32.mrf.mxu1 }
 0x142   :  { %1064 = vst [vmem:[%s1967_s3 + $0x38] sm:$0xff] %v1037_v14  ;;  %v1041_v17 = vadd.f32 %v1040_v59, %v980_v15  ;;  %v982_v20 = vadd.f32 %v981_v18, %v1880_v23  ;;  %v1044_v19 = vpop.f32.mrf.mxu0 }
 0x143   :  { %v983_v21 = vpop.f32.mrf.mxu1 }
 0x144   :  { %1067 = vst [vmem:[%s1967_s3 + $0x50] sm:$0xff] %v1041_v17  ;;  %v1043_v22 = vadd.f32 %v1042_v16, %v982_v20  ;;  %v984_v24 = vadd.f32 %v983_v21, %v1894_v36  ;;  %v1046_v26 = vpop.f32.mrf.mxu0 }
 0x145   :  { %v985_v25 = vpop.f32.mrf.mxu1 }
 0x146   :  { %1068 = vst [vmem:[%s1967_s3 + $0x58] sm:$0xff] %v1043_v22  ;;  %v1045_v27 = vadd.f32 %v1044_v19, %v984_v24  ;;  %v986_v28 = vadd.f32 %v985_v25, %v1894_v36  ;;  %v1050_v23 = vpop.f32.mrf.mxu0 }
 0x147   :  { %v989_v29 = vpop.f32.mrf.mxu1 }
 0x148   :  { %1071 = vst [vmem:[%s1967_s3 + $0x70] sm:$0xff] %v1045_v27  ;;  %v1047_v30 = vadd.f32 %v1046_v26, %v986_v28  ;;  %v990_v31 = vadd.f32 %v989_v29, %v1904_v46  ;;  %v1052_v33 = vpop.f32.mrf.mxu0 }
 0x149   :  { %v991_v32 = vpop.f32.mrf.mxu1 }
 0x14a   :  { %1072 = vst [vmem:[%s1967_s3 + $0x78] sm:$0xff] %v1047_v30  ;;  %v1051_v34 = vadd.f32 %v1050_v23, %v990_v31  ;;  %v992_v35 = vadd.f32 %v991_v32, %v1904_v46  ;;  %v1054_v36 = vpop.f32.mrf.mxu0 }
 0x14b   :  { %v993_v37 = vpop.f32.mrf.mxu1 }
 0x14c   :  { %1075 = vst [vmem:[%s1967_s3 + $0x90] sm:$0xff] %v1051_v34  ;;  %v1053_v38 = vadd.f32 %v1052_v33, %v992_v35  ;;  %v1055_v40 = vpop.f32.mrf.mxu0 }
 0x14d   :  { %v994_v39 = vpop.f32.mrf.mxu1 }
 0x14e   :  { %1076 = vst [vmem:[%s1967_s3 + $0x98] sm:$0xff] %v1053_v38 }

// kernel: forward_rnn.110
= control target key start
LH: loop header
LB: loop body
LE: loop exit
PB: predicated region body
PF: predicated region fallthrough
CT: control target
= control target key end

     0   :  { %vm475_vm0 = vcmask 1046528   ;;  %v902_v1 = vmov 0   ;;  %vm468_vm1 = vcmask 113664   ;;  %s1210_s1 = inlined_call_operand.vmem [shape: bf16[270,512], index: 1, kind: input, shape index: {}]   ;;  %s1211_s0 = inlined_call_operand.vmem [shape: bf16[24,270], index: 0, kind: input, shape index: {}]   ;;  %s1212_s2 = inlined_call_operand.vmem [shape: f32[24,1], index: 2, kind: input, shape index: {}]   ;;  %s1213_s3 = inlined_call_operand.vmem [shape: f32[24,512], index: 3, kind: output, shape index: {}]  }
   0x1   :  { %v793_v0 = vld [vmem:[%s1210_s1 + $0xe4] ss:$16 sps:$4 sm:$0xff]   ;;  %571 = vmatprep.mubr.bf16.mxu1 %v902_v1  ;;  %791 = vset.pattern.permute.xlu0 %v902_v1  ;;  %v797_v3 = vld [vmem:[%s1210_s1 + $0xe0] ss:$16 sps:$4 sm:$0xff]   ;;  %v802_v8 = vld [vmem:[%s1210_s1 + $0xe8] ss:$16 sps:$4 sm:$0xff]  }
   0x2   :  { %v795_v2 = vld [vmem:[%s1210_s1 + $0x204] ss:$16 sps:$4 sm:$0x7f]   ;;  %792 = vset.pattern.permute.xlu1 %v902_v1  ;;  %488 = vmatprep.subr.bf16.mxu0 %v793_v0  ;;  %v798_v4 = vld [vmem:[%s1210_s1 + $0x200] ss:$16 sps:$4 sm:$0x7f]  }
   0x3   :  { %782 = vmatprep.subr.msk.bf16.mxu1 %vm475_vm0, %v795_v2  ;;  %v799_v5 = vld [vmem:[%s1210_s1 + $0xc4] ss:$16 sps:$4 sm:$0xff]   ;;  %489 = vmatpush1.bf16.msra.mxu0 %v797_v3  ;;  %v477_v6 = vsel %vm475_vm0, %v798_v4, 0  ;;  %v804_v9 = vld [vmem:[%s1210_s1 + $0xec] ss:$16 sps:$4 sm:$0xff]  }
   0x4   :  { %v946_v7 = vld [vmem:[%s1211_s0 + $0x8] ss:$12 sps:$4 sm:$0xff]   ;;  %554 = vmatpush1.bf16.msra.mxu1 %v477_v6  ;;  %490 = vmatprep.subr.bf16.mxu0 %v799_v5  ;;  %v805_v10 = vld [vmem:[%s1210_s1 + $0xc0] ss:$16 sps:$4 sm:$0xff]   ;;  %v810_v13 = vld [vmem:[%s1210_s1 + $0xcc] ss:$16 sps:$4 sm:$0xff]  }
   0x5   :  { %590 = vmatprep.subr.bf16.mxu1 %v804_v9  ;;  %v806_v11 = vld [vmem:[%s1210_s1 + $0xa4] ss:$16 sps:$4 sm:$0xff]   ;;  %v808_v12 = vld [vmem:[%s1210_s1 + $0xc8] ss:$16 sps:$4 sm:$0xff]   ;;  %v811_v14 = vld [vmem:[%s1210_s1 + $0xa0] ss:$16 sps:$4 sm:$0xff]  }
   0x6   :  { %v812_v15 = vld [vmem:[%s1210_s1 + $0x84] ss:$16 sps:$4 sm:$0xff]   ;;  %v816_v16 = vld [vmem:[%s1210_s1 + $0xac] ss:$16 sps:$4 sm:$0xff]   ;;  %v817_v17 = vld [vmem:[%s1210_s1 + $0x80] ss:$16 sps:$4 sm:$0xff]  }
   0x7   :  { %783 = vmatmul.mubr.msk.bf16.vlgmr.msra.gmra.mxu1 %vm468_vm1, %v946_v7  ;;  %491 = vmatpush1.bf16.msra.mxu0 %v805_v10  ;;  %v814_v18 = vld [vmem:[%s1210_s1 + $0xa8] ss:$16 sps:$4 sm:$0xff]   ;;  %v818_v19 = vld [vmem:[%s1210_s1 + $0x64] ss:$16 sps:$4 sm:$0xff]   ;;  %v822_v20 = vld [vmem:[%s1210_s1 + $0x8c] ss:$16 sps:$4 sm:$0xff]  }
   0x8   :  { %591 = vmatpush1.bf16.msra.mxu1 %v802_v8  ;;  %492 = vmatprep.subr.bf16.mxu0 %v806_v11  ;;  %v820_v21 = vld [vmem:[%s1210_s1 + $0x88] ss:$16 sps:$4 sm:$0xff]   ;;  %v823_v22 = vld [vmem:[%s1210_s1 + $0x60] ss:$16 sps:$4 sm:$0xff]   ;;  %v824_v23 = vld [vmem:[%s1210_s1 + $0x44] ss:$16 sps:$4 sm:$0xff]  }
   0x9   :  { %592 = vmatprep.subr.bf16.mxu1 %v810_v13  ;;  %581 = vmatprep.mubr.bf16.mxu1 %v902_v1  ;;  %v828_v24 = vld [vmem:[%s1210_s1 + $0x6c] ss:$16 sps:$4 sm:$0xff]   ;;  %v829_v25 = vld [vmem:[%s1210_s1 + $0x40] ss:$16 sps:$4 sm:$0xff]   ;;  %v826_v26 = vld [vmem:[%s1210_s1 + $0x68] ss:$16 sps:$4 sm:$0xff]  }
   0xa   :  { %v830_v27 = vld [vmem:[%s1210_s1 + $0x24] ss:$16 sps:$4 sm:$0xff]   ;;  %v834_v28 = vld [vmem:[%s1210_s1 + $0x4c] ss:$16 sps:$4 sm:$0xff]   ;;  %v832_v29 = vld [vmem:[%s1210_s1 + $0x48] ss:$16 sps:$4 sm:$0xff]  }
   0xb   :  { %493 = vmatpush1.bf16.msra.mxu0 %v811_v14  ;;  %v835_v30 = vld [vmem:[%s1210_s1 + $0x20] ss:$16 sps:$4 sm:$0xff]   ;;  %v836_v31 = vld [vmem:[%s1210_s1 + $0x4] ss:$16 sps:$4 sm:$0xff]   ;;  %v840_v32 = vld [vmem:[%s1210_s1 + $0x2c] ss:$16 sps:$4 sm:$0xff]  }
   0xc   :  { %593 = vmatpush1.bf16.msra.mxu1 %v808_v12  ;;  %494 = vmatprep.subr.bf16.mxu0 %v812_v15  ;;  %v841_v33 = vld [vmem:[%s1210_s1] ss:$16 sps:$4 sm:$0xff]   ;;  %v838_v34 = vld [vmem:[%s1210_s1 + $0x28] ss:$16 sps:$4 sm:$0xff]   ;;  %v842_v35 = vld [vmem:[%s1210_s1 + $0x1e4] ss:$16 sps:$4 sm:$0xff]  }
   0xd   :  { %594 = vmatprep.subr.bf16.mxu1 %v816_v16  ;;  %v846_v36 = vld [vmem:[%s1210_s1 + $0xc] ss:$16 sps:$4 sm:$0xff]   ;;  %v844_v37 = vld [vmem:[%s1210_s1 + $0x8] ss:$16 sps:$4 sm:$0xff]   ;;  %v847_v38 = vld [vmem:[%s1210_s1 + $0x1e0] ss:$16 sps:$4 sm:$0xff]  }
   0xe   :  { %v848_v39 = vld [vmem:[%s1210_s1 + $0x1c4] ss:$16 sps:$4 sm:$0xff]   ;;  %v852_v40 = vld [vmem:[%s1210_s1 + $0x1ec] ss:$16 sps:$4 sm:$0xff]   ;;  %v853_v41 = vld [vmem:[%s1210_s1 + $0x1c0] ss:$16 sps:$4 sm:$0xff]  }
   0xf   :  { %495 = vmatpush1.bf16.msra.mxu0 %v817_v17  ;;  %v850_v42 = vld [vmem:[%s1210_s1 + $0x1e8] ss:$16 sps:$4 sm:$0xff]   ;;  %v854_v43 = vld [vmem:[%s1210_s1 + $0x1a4] ss:$16 sps:$4 sm:$0xff]   ;;  %v858_v44 = vld [vmem:[%s1210_s1 + $0x1cc] ss:$16 sps:$4 sm:$0xff]  }
  0x10   :  { %595 = vmatpush1.bf16.msra.mxu1 %v814_v18  ;;  %496 = vmatprep.subr.bf16.mxu0 %v818_v19  ;;  %v1065_v45 = vld [vmem:[%s1211_s0 + $0x20] ss:$0 sps:$4 sm:$0xff]   ;;  %v856_v47 = vld [vmem:[%s1210_s1 + $0x1c8] ss:$16 sps:$4 sm:$0xff]   ;;  %v860_v48 = vld [vmem:[%s1210_s1 + $0x184] ss:$16 sps:$4 sm:$0xff]  }
  0x11   :  { %596 = vmatprep.subr.bf16.mxu1 %v822_v20  ;;  %v859_v46 = vld [vmem:[%s1210_s1 + $0x1a0] ss:$16 sps:$4 sm:$0xff]   ;;  %784 = vmatmul.mubr.msk.bf16.gmra.mxu1 %vm468_vm1, %v1065_v45  ;;  %v864_v49 = vld [vmem:[%s1210_s1 + $0x1ac] ss:$16 sps:$4 sm:$0xff]   ;;  %v862_v50 = vld [vmem:[%s1210_s1 + $0x1a8] ss:$16 sps:$4 sm:$0xff]  }
  0x12   :  { %v865_v51 = vld [vmem:[%s1210_s1 + $0x180] ss:$16 sps:$4 sm:$0xff]   ;;  %v866_v52 = vld [vmem:[%s1210_s1 + $0x164] ss:$16 sps:$4 sm:$0xff]   ;;  %v870_v54 = vld [vmem:[%s1210_s1 + $0x18c] ss:$16 sps:$4 sm:$0xff]  }
  0x13   :  { %497 = vmatpush1.bf16.msra.mxu0 %v823_v22  ;;  %v893_v53 = vld [vmem:[%s1211_s0 + $0x4] ss:$12 sps:$4 sm:$0xff]   ;;  %v868_v57 = vld [vmem:[%s1210_s1 + $0x188] ss:$16 sps:$4 sm:$0xff]   ;;  %v876_v60 = vld [vmem:[%s1210_s1 + $0x16c] ss:$16 sps:$4 sm:$0xff]  }
  0x14   :  { %597 = vmatpush1.bf16.msra.mxu1 %v820_v21  ;;  %498 = vmatprep.subr.bf16.mxu0 %v824_v23  ;;  %v871_v55 = vld [vmem:[%s1210_s1 + $0x160] ss:$16 sps:$4 sm:$0xff]   ;;  %v872_v58 = vld [vmem:[%s1210_s1 + $0x144] ss:$16 sps:$4 sm:$0xff]   ;;  %v90_v61 = vld [vmem:[%s1212_s2 + $0x8] sm:$0xff] }
  0x15   :  { %598 = vmatprep.subr.bf16.mxu1 %v828_v24  ;;  %520 = vmatprep.mubr.bf16.mxu0 %v893_v53  ;;  %v89_v56 = vld [vmem:[%s1212_s2] sm:$0xff]  ;;  %v91_v59 = vld [vmem:[%s1212_s2 + $0x10] sm:$0xff]  ;;  %v874_v63 = vld [vmem:[%s1210_s1 + $0x168] ss:$16 sps:$4 sm:$0xff]  }
  0x16   :  { %622 = vmatprep.mubr.bf16.mxu1 %v893_v53  ;;  %94 = vperm.xlu0 %791, %v89_v56   ;;  %v877_v62 = vld [vmem:[%s1210_s1 + $0x140] ss:$16 sps:$4 sm:$0xff]   ;;  %v879_v0 = vld [vmem:[%s1210_s1 + $0x124] ss:$16 sps:$4 sm:$0xff]   ;;  %v883_v2 = vld [vmem:[%s1210_s1 + $0x14c] ss:$16 sps:$4 sm:$0xff]  }
  0x17   :  { %499 = vmatpush1.bf16.msra.mxu0 %v829_v25  ;;  %104 = vperm.xlu1 %792, %v91_v59   ;;  %v884_v3 = vld [vmem:[%s1210_s1 + $0x120] ss:$16 sps:$4 sm:$0xff]   ;;  %v881_v4 = vld [vmem:[%s1210_s1 + $0x148] ss:$16 sps:$4 sm:$0xff]   ;;  %v885_v5 = vld [vmem:[%s1210_s1 + $0x104] ss:$16 sps:$4 sm:$0xff]  }
  0x18   :  { %599 = vmatpush1.bf16.msra.mxu1 %v826_v26  ;;  %500 = vmatprep.subr.bf16.mxu0 %v830_v27  ;;  %v889_v6 = vld [vmem:[%s1210_s1 + $0x12c] ss:$16 sps:$4 sm:$0xff]   ;;  %v890_v8 = vld [vmem:[%s1210_s1 + $0x100] ss:$16 sps:$4 sm:$0xff]   ;;  %v887_v10 = vld [vmem:[%s1210_s1 + $0x128] ss:$16 sps:$4 sm:$0xff]  }
  0x19   :  { %600 = vmatprep.subr.bf16.mxu1 %v834_v28  ;;  %v897_v9 = vld [vmem:[%s1210_s1 + $0x20c] ss:$16 sps:$4 sm:$0x7f]   ;;  %v899_v11 = vld [vmem:[%s1210_s1 + $0x208] ss:$16 sps:$4 sm:$0x7f]  }
  0x1a   :  { %99 = vperm.xlu0 %791, %v90_v61   ;;  %v19_v12 = vld [vmem:[%s1211_s0 + $0x18] sm:$0xff]  ;;  %v891_v14 = vld [vmem:[%s1211_s0] ss:$12 sps:$4 sm:$0xff]   ;;  %v483_v17 = vsel %vm475_vm0, %v899_v11, 0 }
  0x1b   :  { %501 = vmatpush1.bf16.msra.mxu0 %v835_v30  ;;  %v896_v13 = vld [vmem:[%s1210_s1 + $0x10c] ss:$16 sps:$4 sm:$0xff]   ;;  %v712_v15 = vcombine.high %v19_v12, %v19_v12  ;;  %v894_v16 = vld [vmem:[%s1210_s1 + $0x108] ss:$16 sps:$4 sm:$0xff]   ;;  %v711_v18 = vcombine.low %v19_v12, %v19_v12 }
  0x1c   :  { %601 = vmatpush1.bf16.msra.mxu1 %v832_v29  ;;  %502 = vmatprep.subr.bf16.mxu0 %v836_v31 }
  0x1d   :  { %602 = vmatprep.subr.bf16.mxu1 %v840_v32 }
  0x1f   :  { %503 = vmatpush1.bf16.msra.mxu0 %v841_v33 }
  0x20   :  { %603 = vmatpush1.bf16.msra.mxu1 %v838_v34  ;;  %504 = vmatprep.subr.bf16.mxu0 %v842_v35 }
  0x21   :  { %604 = vmatprep.subr.bf16.mxu1 %v846_v36 }
  0x23   :  { %505 = vmatpush2.bf16.msra.mxu0 %v847_v38 }
  0x24   :  { %605 = vmatpush1.bf16.msra.mxu1 %v844_v37  ;;  %506 = vmatprep.subr.bf16.mxu0 %v848_v39 }
  0x25   :  { %606 = vmatprep.subr.bf16.mxu1 %v852_v40 }
  0x27   :  { %507 = vmatpush2.bf16.msra.mxu0 %v853_v41 }
  0x28   :  { %607 = vmatpush2.bf16.msra.mxu1 %v850_v42  ;;  %508 = vmatprep.subr.bf16.mxu0 %v854_v43 }
  0x29   :  { %608 = vmatprep.subr.bf16.mxu1 %v858_v44 }
  0x2b   :  { %509 = vmatpush2.bf16.msra.mxu0 %v859_v46 }
  0x2c   :  { %609 = vmatpush2.bf16.msra.mxu1 %v856_v47  ;;  %510 = vmatprep.subr.bf16.mxu0 %v860_v48 }
  0x2d   :  { %610 = vmatprep.subr.bf16.mxu1 %v864_v49 }
  0x2f   :  { %511 = vmatpush2.bf16.msra.mxu0 %v865_v51 }
  0x30   :  { %611 = vmatpush2.bf16.msra.mxu1 %v862_v50  ;;  %512 = vmatprep.subr.bf16.mxu0 %v866_v52 }
  0x31   :  { %612 = vmatprep.subr.bf16.mxu1 %v870_v54 }
  0x33   :  { %513 = vmatpush2.bf16.msra.mxu0 %v871_v55 }
  0x34   :  { %613 = vmatpush2.bf16.msra.mxu1 %v868_v57  ;;  %514 = vmatprep.subr.bf16.mxu0 %v872_v58 }
  0x35   :  { %614 = vmatprep.subr.bf16.mxu1 %v876_v60 }
  0x37   :  { %515 = vmatpush2.bf16.msra.mxu0 %v877_v62 }
  0x38   :  { %615 = vmatpush2.bf16.msra.mxu1 %v874_v63  ;;  %516 = vmatprep.subr.bf16.mxu0 %v879_v0 }
  0x39   :  { %616 = vmatprep.subr.bf16.mxu1 %v883_v2 }
  0x3b   :  { %517 = vmatpush2.bf16.msra.mxu0 %v884_v3 }
  0x3c   :  { %617 = vmatpush2.bf16.msra.mxu1 %v881_v4  ;;  %518 = vmatprep.subr.bf16.mxu0 %v885_v5 }
  0x3d   :  { %618 = vmatprep.subr.bf16.mxu1 %v889_v6 }
  0x3f   :  { %519 = vmatpush2.bf16.msra.mxu0 %v890_v8 }
  0x40   :  { %619 = vmatpush2.bf16.msra.mxu1 %v887_v10  ;;  %785 = vmatprep.subr.msk.bf16.mxu0 %vm475_vm0, %v897_v9 }
  0x41   :  { %620 = vmatprep.subr.bf16.mxu1 %v896_v13 }
  0x42   :  { %521 = vmatmul.mubr.bf16.vlgmr.msra.gmra.mxu0 %v891_v14 }
  0x43   :  { %656 = vmatpush1.bf16.msra.mxu0 %v483_v17  ;;  %530 = vmatprep.mubr.bf16.mxu0 %v712_v15 }
  0x44   :  { %621 = vmatpush2.bf16.msra.mxu1 %v894_v16 }
  0x45   :  { %788 = vmatprep.subr.msk.bf16.mxu1 %vm475_vm0, %v897_v9 }
  0x47   :  { %623 = vmatmul.mubr.bf16.vlgmr.msra.gmra.mxu1 %v891_v14 }
  0x48   :  { %789 = vmatpush1.bf16.msra.mxu1 %v483_v17  ;;  %632 = vmatprep.mubr.bf16.mxu1 %v712_v15 }
  0x4a   :  { %531 = vmatmul.mubr.bf16.gmra.mxu0 %v711_v18 }
  0x4b   :  { %673 = vmatprep.mubr.bf16.mxu0 %v902_v1 }
  0x4f   :  { %633 = vmatmul.mubr.bf16.gmra.mxu1 %v711_v18 }
  0x50   :  { %683 = vmatprep.mubr.bf16.mxu1 %v902_v1 }
  0x52   :  { %786 = vmatmul.mubr.msk.bf16.vlgmr.msra.gmra.mxu0 %vm468_vm1, %v946_v7 }
  0x57   :  { %787 = vmatmul.mubr.msk.bf16.vlgmr.msra.gmra.mxu1 %vm468_vm1, %v1065_v45 }
  0x91   :  { %v95_v27 = vpop.permute.xlu0 %94 }
  0x92   :  { %v105_v37 = vpop.permute.xlu1 %104 }
  0x95   :  { %v100_v31 = vpop.permute.xlu0 %99 }
  0xc7   :  { %v573_v19 = vpop.f32.mrf.mxu1 }
  0xc9   :  { %v575_v20 = vpop.f32.mrf.mxu1 }
  0xcb   :  { %v577_v21 = vpop.f32.mrf.mxu1 }
  0xcd   :  { %v579_v22 = vpop.f32.mrf.mxu1 }
  0xd1   :  { %v583_v23 = vpop.f32.mrf.mxu1 }
  0xd3   :  { %v585_v24 = vpop.f32.mrf.mxu1 }
  0xd5   :  { %v587_v25 = vpop.f32.mrf.mxu1 }
  0xd7   :  { %v588_v26 = vpop.f32.mrf.mxu1 }
 0x102   :  { %v522_v28 = vpop.f32.mrf.mxu0 }
 0x103   :  { %v523_v29 = vadd.f32 %v522_v28, %v95_v27 }
 0x104   :  { %v524_v30 = vpop.f32.mrf.mxu0 }
 0x105   :  { %v574_v1 = vadd.f32 %v573_v19, %v523_v29  ;;  %v525_v32 = vadd.f32 %v524_v30, %v95_v27 }
 0x106   :  { %v526_v33 = vpop.f32.mrf.mxu0 }
 0x107   :  { %692 = vst [vmem:[%s1213_s3] sm:$0xff] %v574_v1  ;;  %v576_v7 = vadd.f32 %v575_v20, %v525_v32  ;;  %v527_v34 = vadd.f32 %v526_v33, %v100_v31  ;;  %v624_v35 = vpop.f32.mrf.mxu1 }
 0x108   :  { %v528_v36 = vpop.f32.mrf.mxu0  ;;  %v625_v53 = vadd.f32 %v624_v35, %v95_v27 }
 0x109   :  { %693 = vst [vmem:[%s1213_s3 + $0x8] sm:$0xff] %v576_v7  ;;  %v578_v38 = vadd.f32 %v577_v21, %v527_v34  ;;  %v529_v39 = vadd.f32 %v528_v36, %v100_v31  ;;  %v626_v40 = vpop.f32.mrf.mxu1 }
 0x10a   :  { %v532_v41 = vpop.f32.mrf.mxu0  ;;  %v627_v56 = vadd.f32 %v626_v40, %v95_v27 }
 0x10b   :  { %696 = vst [vmem:[%s1213_s3 + $0x20] sm:$0xff] %v578_v38  ;;  %v580_v42 = vadd.f32 %v579_v22, %v529_v39  ;;  %v533_v43 = vadd.f32 %v532_v41, %v105_v37  ;;  %v628_v44 = vpop.f32.mrf.mxu1 }
 0x10c   :  { %v534_v45 = vpop.f32.mrf.mxu0  ;;  %v629_v60 = vadd.f32 %v628_v44, %v100_v31 }
 0x10d   :  { %697 = vst [vmem:[%s1213_s3 + $0x28] sm:$0xff] %v580_v42  ;;  %v584_v46 = vadd.f32 %v583_v23, %v533_v43  ;;  %v535_v47 = vadd.f32 %v534_v45, %v105_v37  ;;  %v630_v48 = vpop.f32.mrf.mxu1 }
 0x10e   :  { %v536_v49 = vpop.f32.mrf.mxu0  ;;  %v631_v2 = vadd.f32 %v630_v48, %v100_v31 }
 0x10f   :  { %700 = vst [vmem:[%s1213_s3 + $0x40] sm:$0xff] %v584_v46  ;;  %v586_v50 = vadd.f32 %v585_v24, %v535_v47  ;;  %v634_v51 = vpop.f32.mrf.mxu1 }
 0x110   :  { %v537_v52 = vpop.f32.mrf.mxu0  ;;  %v635_v63 = vadd.f32 %v634_v51, %v105_v37 }
 0x111   :  { %701 = vst [vmem:[%s1213_s3 + $0x48] sm:$0xff] %v586_v50  ;;  %v636_v54 = vpop.f32.mrf.mxu1 }
 0x112   :  { %v675_v55 = vpop.f32.mrf.mxu0  ;;  %v637_v5 = vadd.f32 %v636_v54, %v105_v37 }
 0x113   :  { %v638_v57 = vpop.f32.mrf.mxu1  ;;  %v676_v58 = vadd.f32 %v675_v55, %v625_v53 }
 0x114   :  { %v677_v59 = vpop.f32.mrf.mxu0 }
 0x115   :  { %694 = vst [vmem:[%s1213_s3 + $0x10] sm:$0xff] %v676_v58  ;;  %v639_v61 = vpop.f32.mrf.mxu1  ;;  %v678_v62 = vadd.f32 %v677_v59, %v627_v56 }
 0x116   :  { %v679_v0 = vpop.f32.mrf.mxu0 }
 0x117   :  { %695 = vst [vmem:[%s1213_s3 + $0x18] sm:$0xff] %v678_v62  ;;  %v680_v3 = vadd.f32 %v679_v0, %v629_v60  ;;  %v685_v4 = vpop.f32.mrf.mxu1 }
 0x118   :  { %v686_v6 = vadd.f32 %v685_v4, %v635_v63  ;;  %v681_v8 = vpop.f32.mrf.mxu0 }
 0x119   :  { %698 = vst [vmem:[%s1213_s3 + $0x30] sm:$0xff] %v680_v3  ;;  %v682_v9 = vadd.f32 %v681_v8, %v631_v2  ;;  %v687_v10 = vpop.f32.mrf.mxu1 }
 0x11a   :  { %702 = vst [vmem:[%s1213_s3 + $0x50] sm:$0xff] %v686_v6  ;;  %v688_v11 = vadd.f32 %v687_v10, %v637_v5 }
 0x11b   :  { %699 = vst [vmem:[%s1213_s3 + $0x38] sm:$0xff] %v682_v9  ;;  %v689_v12 = vpop.f32.mrf.mxu1 }
 0x11c   :  { %703 = vst [vmem:[%s1213_s3 + $0x58] sm:$0xff] %v688_v11 }
 0x11d   :  { %v690_v13 = vpop.f32.mrf.mxu1 }

// kernel: forward_rnn.113
= control target key start
LH: loop header
LB: loop body
LE: loop exit
PB: predicated region body
PF: predicated region fallthrough
CT: control target
= control target key end

     0   :  { %vm62_vm0 = vcmask 1041408   ;;  %v189_v2 = vmov 0   ;;  %vm58_vm1 = vcmask 162816   ;;  %s250_s1 = inlined_call_operand.vmem [shape: bf16[20,512], index: 1, kind: input, shape index: {}]   ;;  %s251_s2 = inlined_call_operand.vmem [shape: f32[8,1], index: 2, kind: input, shape index: {}]   ;;  %s252_s0 = inlined_call_operand.vmem [shape: bf16[8,20], index: 0, kind: input, shape index: {}]   ;;  %s253_s3 = inlined_call_operand.vmem [shape: f32[8,512], index: 3, kind: output, shape index: {}]  }
   0x1   :  { %v20_v0 = vld [vmem:[%s250_s1 + $0x20] sm:$0x33]  ;;  %v21_v1 = vld [vmem:[%s250_s1 + $0x28] sm:$0x33]  ;;  %107 = vmatprep.mubr.bf16.mxu0 %v189_v2  ;;  %148 = vmatprep.mubr.bf16.mxu1 %v189_v2 }
   0x2   :  { %v170_v3 = vcombine.high %v20_v0, %v20_v0  ;;  %v172_v4 = vcombine.high %v21_v1, %v21_v1  ;;  %v169_v5 = vcombine.low %v20_v0, %v20_v0  ;;  %v171_v6 = vcombine.low %v21_v1, %v21_v1  ;;  %v183_v7 = vld [vmem:[%s250_s1 + $0x4] ss:$16 sps:$4 sm:$0xff]   ;;  %178 = vset.pattern.permute.xlu0 %v189_v2  ;;  %v185_v8 = vld [vmem:[%s250_s1 + $0xc] ss:$16 sps:$4 sm:$0xff]   ;;  %v187_v11 = vld [vmem:[%s250_s1] ss:$16 sps:$4 sm:$0xff]  }
   0x3   :  { %v188_v12 = vld [vmem:[%s250_s1 + $0x8] ss:$16 sps:$4 sm:$0xff]   ;;  %v22_v13 = vld [vmem:[%s251_s2] sm:$0xff] }
   0x4   :  { %173 = vmatprep.subr.msk.bf16.mxu0 %vm62_vm0, %v170_v3  ;;  %175 = vmatprep.subr.msk.bf16.mxu1 %vm62_vm0, %v172_v4  ;;  %v64_v9 = vsel %vm62_vm0, %v169_v5, 0  ;;  %v70_v10 = vsel %vm62_vm0, %v171_v6, 0  ;;  %v15_v14 = vld [vmem:[%s252_s0] sm:$0xf] }
   0x5   :  { %88 = vmatpush1.bf16.msra.mxu0 %v64_v9  ;;  %129 = vmatpush1.bf16.msra.mxu1 %v70_v10 }
   0x6   :  { %89 = vmatprep.subr.bf16.mxu0 %v183_v7  ;;  %130 = vmatprep.subr.bf16.mxu1 %v185_v8 }
   0x7   :  { %25 = vperm.xlu0 %178, %v22_v13  }
   0x9   :  { %90 = vmatpush1.bf16.msra.mxu0 %v187_v11  ;;  %131 = vmatpush1.bf16.msra.mxu1 %v188_v12 }
   0xc   :  { %174 = vmatmul.mubr.msk.bf16.vlgmr.msra.gmra.mxu0 %vm58_vm1, %v15_v14  ;;  %176 = vmatmul.mubr.msk.bf16.vlgmr.msra.gmra.mxu1 %vm58_vm1, %v15_v14 }
  0x82   :  { %v26_v15 = vpop.permute.xlu0 %25 }
  0xcc   :  { %v109_v16 = vpop.f32.mrf.mxu0  ;;  %v150_v17 = vpop.f32.mrf.mxu1 }
  0xcd   :  { %v110_v18 = vadd.f32 %v109_v16, %v26_v15  ;;  %v151_v19 = vadd.f32 %v150_v17, %v26_v15 }
  0xce   :  { %v111_v20 = vpop.f32.mrf.mxu0  ;;  %v152_v21 = vpop.f32.mrf.mxu1 }
  0xcf   :  { %157 = vst [vmem:[%s253_s3] sm:$0xff] %v110_v18  ;;  %159 = vst [vmem:[%s253_s3 + $0x10] sm:$0xff] %v151_v19  ;;  %v112_v22 = vadd.f32 %v111_v20, %v26_v15  ;;  %v153_v23 = vadd.f32 %v152_v21, %v26_v15 }
  0xd0   :  { %v113_v24 = vpop.f32.mrf.mxu0  ;;  %v154_v25 = vpop.f32.mrf.mxu1 }
  0xd1   :  { %158 = vst [vmem:[%s253_s3 + $0x8] sm:$0xff] %v112_v22  ;;  %160 = vst [vmem:[%s253_s3 + $0x18] sm:$0xff] %v153_v23 }
  0xd2   :  { %v114_v26 = vpop.f32.mrf.mxu0  ;;  %v155_v27 = vpop.f32.mrf.mxu1 }

</bundles_post_ra>
